<compile_context>
chip_gen: v7x
topology: tpu7x:2x2x1
jax: 0.10.0
libtpu: 0.0.40
codegen_flags: <defaults>
</compile_context>

<pallas_src>
import jax
import jax.numpy as jnp
from jax.experimental import pallas as pl
from jax.experimental.pallas import tpu as pltpu

# ---------------- problem sizes (small, synthetic) ----------------
NUM_MODELS = 10
VOCAB = 64
EMBED_DIM = 32          # D
SEQ_TITLE = 16          # Sx
SEQ_CONTENT = 20        # Sy
NUM_FILTERS = 8         # C  (per kernel size, per branch)
KERNEL_SIZES = (2, 3)
NUM_CLASSES = 16
BATCH = 2
FEAT_DIM = NUM_FILTERS * len(KERNEL_SIZES) * 2   # per-model: title + content branches

BATCH_PAD = 8           # pad batch to a full sublane group
NCLS_PAD = 128          # pad logits to a full lane group (lane-dense store)


# ---------------- Pallas kernel (single invocation, no grid) ----------------
def ensemble_textcnn_kernel(xe_ref, ye_ref,
                            wt2_ref, wt3_ref, wc2_ref, wc3_ref,
                            bconv_ref, wfc_ref, bfc_ref,
                            out_ref):
    """All 10 models fused.

    xe_ref:  [BP, Sx, D]      ye_ref:  [BP, Sy, D]
    w*_ref:  [k*D, M*C]       (im2col conv weights, models stacked on filter axis)
    bconv_ref: [4, M*C]       (rows: title_k2, title_k3, content_k2, content_k3)
    wfc_ref: [4*M*C, NCLS_PAD] (FC weights row-stacked branch-major/model-major)
    bfc_ref: [1, NCLS_PAD]    (sum of the 10 FC biases)
    out_ref: [BP, NCLS_PAD]
    """

    def conv_relu_maxpool(e, w, bias, k):
        # e: [BP, S, D] f32, w: [k*D, M*C], bias: [M*C]  ->  [BP, M*C]
        S = e.shape[1]
        L = S - k + 1
        # im2col: window the sequence into [BP, L, k*D] (static slices, one per tap)
        win = jnp.concatenate([e[:, t:t + L, :] for t in range(k)], axis=-1)
        acc = jax.lax.dot_general(
            win, w,
            dimension_numbers=(((2,), (0,)), ((), ())),
            preferred_element_type=jnp.float32)          # [BP, L, M*C]
        acc = jnp.maximum(acc + bias[None, None, :], 0.0)
        return jnp.max(acc, axis=1)                       # [BP, M*C]

    xe = xe_ref[...]
    ye = ye_ref[...]
    bconv = bconv_ref[...]

    feats = jnp.concatenate([
        conv_relu_maxpool(xe, wt2_ref[...], bconv[0], 2),
        conv_relu_maxpool(xe, wt3_ref[...], bconv[1], 3),
        conv_relu_maxpool(ye, wc2_ref[...], bconv[2], 2),
        conv_relu_maxpool(ye, wc3_ref[...], bconv[3], 3),
    ], axis=-1)                                           # [BP, 4*M*C] = [8, 320]

    # One K=320 contraction: ensemble sum over the 10 models falls out for free.
    out_ref[...] = jnp.dot(feats, wfc_ref[...],
                           preferred_element_type=jnp.float32) + bfc_ref[...]


# ---------------- wrapper: weight stacking (layout plumbing) + pallas_call ----------------
def _stack_conv_w(w):
    """[M, k, D, C] -> im2col weight [k*D, M*C] (models fused on the filter axis)."""
    M, k, D, C = w.shape
    return jnp.transpose(w, (1, 2, 0, 3)).reshape(k * D, M * C)


def _stack_conv_b(b):
    """[M, 1, C] -> [M*C]."""
    return b[:, 0, :].reshape(-1)


def boost_cnn10_forward(x_ids, y_ids, params):
    """x_ids: [B, Sx] int32, y_ids: [B, Sy] int32 -> logits [B, NUM_CLASSES] f32."""
    # Embedding gather is glue (plain JAX); the embedding matrix (pretrained
    # embed_mat) is shared across the 10 models.
    xe = params["embed"][x_ids].astype(jnp.float32)   # [B, Sx, D]
    ye = params["embed"][y_ids].astype(jnp.float32)   # [B, Sy, D]
    B = x_ids.shape[0]

    # Pad batch to 8 sublanes (padded rows compute garbage that is sliced away).
    xe_p = jnp.zeros((BATCH_PAD,) + xe.shape[1:], jnp.float32).at[:B].set(xe)
    ye_p = jnp.zeros((BATCH_PAD,) + ye.shape[1:], jnp.float32).at[:B].set(ye)

    # Conv weights/biases: stack the 10 models along the filter (N) axis.
    wt2 = _stack_conv_w(params["wt2"])   # [2*D, M*C]
    wt3 = _stack_conv_w(params["wt3"])   # [3*D, M*C]
    wc2 = _stack_conv_w(params["wc2"])
    wc3 = _stack_conv_w(params["wc3"])
    bconv = jnp.stack([_stack_conv_b(params["bt2"]),
                       _stack_conv_b(params["bt3"]),
                       _stack_conv_b(params["bc2"]),
                       _stack_conv_b(params["bc3"])], axis=0)   # [4, M*C]

    # FC weights: reorder rows to branch-major, then model, then filter so they
    # line up with concat([f_t2, f_t3, f_c2, f_c3]) where each f_* is [B, M*C].
    M, FD, NC = params["wfc"].shape
    C = NUM_FILTERS
    wfc = (params["wfc"].reshape(M, 4, C, NC)
           .transpose(1, 0, 2, 3)
           .reshape(4 * M * C, NC))                              # [320, NC]
    wfc_p = jnp.zeros((4 * M * C, NCLS_PAD), jnp.float32).at[:, :NC].set(wfc)
    bfc_sum = jnp.sum(params["bfc"][:, 0, :], axis=0)            # [NC]
    bfc_p = jnp.zeros((1, NCLS_PAD), jnp.float32).at[0, :NC].set(bfc_sum)

    out = pl.pallas_call(
        ensemble_textcnn_kernel,
        out_shape=jax.ShapeDtypeStruct((BATCH_PAD, NCLS_PAD), jnp.float32),
    )(xe_p, ye_p, wt2, wt3, wc2, wc3, bconv, wfc_p, bfc_p)

    return out[:B, :NUM_CLASSES]


# ---------------- deterministic synthetic parameters ----------------
def init_params(key):
    ks = jax.random.split(key, 12)
    scale = 0.1
    p = {
        "embed": scale * jax.random.normal(ks[0], (VOCAB, EMBED_DIM), jnp.float32),
        # conv weights laid out [M, k, D, C] (per tap, input-dim x filters)
        "wt2": scale * jax.random.normal(ks[1], (NUM_MODELS, 2, EMBED_DIM, NUM_FILTERS), jnp.float32),
        "wt3": scale * jax.random.normal(ks[2], (NUM_MODELS, 3, EMBED_DIM, NUM_FILTERS), jnp.float32),
        "wc2": scale * jax.random.normal(ks[3], (NUM_MODELS, 2, EMBED_DIM, NUM_FILTERS), jnp.float32),
        "wc3": scale * jax.random.normal(ks[4], (NUM_MODELS, 3, EMBED_DIM, NUM_FILTERS), jnp.float32),
        "bt2": scale * jax.random.normal(ks[5], (NUM_MODELS, 1, NUM_FILTERS), jnp.float32),
        "bt3": scale * jax.random.normal(ks[6], (NUM_MODELS, 1, NUM_FILTERS), jnp.float32),
        "bc2": scale * jax.random.normal(ks[7], (NUM_MODELS, 1, NUM_FILTERS), jnp.float32),
        "bc3": scale * jax.random.normal(ks[8], (NUM_MODELS, 1, NUM_FILTERS), jnp.float32),
        "wfc": scale * jax.random.normal(ks[9], (NUM_MODELS, FEAT_DIM, NUM_CLASSES), jnp.float32),
        "bfc": scale * jax.random.normal(ks[10], (NUM_MODELS, 1, NUM_CLASSES), jnp.float32),
    }
    return p
    # TODO(synk): original code loads 10 finetuned TextCNN checkpoints; here each
    # model gets its own deterministic random conv/fc params instead.


# ---------------- pure-JAX reference for verification ----------------
def reference_forward(x_ids, y_ids, p):
    xe = p["embed"][x_ids]
    ye = p["embed"][y_ids]

    def conv_pool(e, w, b, k):
        L = e.shape[1] - k + 1
        acc = jnp.zeros((e.shape[0], L, w.shape[-1]), jnp.float32)
        for t in range(k):
            acc = acc + jnp.einsum("bld,dc->blc", e[:, t:t + L, :], w[t])
        return jnp.max(jnp.maximum(acc + b[None, None, :], 0.0), axis=1)

    total = jnp.zeros((x_ids.shape[0], NUM_CLASSES), jnp.float32)
    for m in range(NUM_MODELS):
        feats = jnp.concatenate([
            conv_pool(xe, p["wt2"][m], p["bt2"][m, 0], 2),
            conv_pool(xe, p["wt3"][m], p["bt3"][m, 0], 3),
            conv_pool(ye, p["wc2"][m], p["bc2"][m, 0], 2),
            conv_pool(ye, p["wc3"][m], p["bc3"][m, 0], 3),
        ], axis=-1)
        total = total + feats @ p["wfc"][m] + p["bfc"][m, 0][None, :]
    return total


if __name__ == "__main__":
    key = jax.random.PRNGKey(0)
    kx, ky, kp = jax.random.split(key, 3)
    x_ids = jax.random.randint(kx, (BATCH, SEQ_TITLE), 0, VOCAB, dtype=jnp.int32)
    y_ids = jax.random.randint(ky, (BATCH, SEQ_CONTENT), 0, VOCAB, dtype=jnp.int32)
    params = init_params(kp)

    out = boost_cnn10_forward(x_ids, y_ids, params)
    out = jax.block_until_ready(out)

    ref = reference_forward(x_ids, y_ids, params)
    assert out.shape == (BATCH, NUM_CLASSES)
    assert jnp.allclose(out, ref, atol=1e-4, rtol=1e-4), (out, ref)
    print("KERNEL_OK")
</pallas_src>

<mosaic_0001>
module attributes {stable_mosaic.version = 11 : i64} {
  func.func @ensemble_textcnn_kernel(%arg0: memref<8x16x32xf32, #tpu.memory_space<vmem>>, %arg1: memref<8x20x32xf32, #tpu.memory_space<vmem>>, %arg2: memref<64x80xf32, #tpu.memory_space<vmem>>, %arg3: memref<96x80xf32, #tpu.memory_space<vmem>>, %arg4: memref<64x80xf32, #tpu.memory_space<vmem>>, %arg5: memref<96x80xf32, #tpu.memory_space<vmem>>, %arg6: memref<4x80xf32, #tpu.memory_space<vmem>>, %arg7: memref<320x128xf32, #tpu.memory_space<vmem>>, %arg8: memref<1x128xf32, #tpu.memory_space<vmem>>, %arg9: memref<8x128xf32, #tpu.memory_space<vmem>>) attributes {dimension_semantics = [], scalar_prefetch = 0 : i64, scratch_operands = 0 : i64, tpu.core_type = #tpu.core_type<tc>} {
    %c0 = arith.constant 0 : index
    %c0_0 = arith.constant 0 : index
    %c0_1 = arith.constant 0 : index
    %0 = vector.load %arg0[%c0, %c0_0, %c0_1] : memref<8x16x32xf32, #tpu.memory_space<vmem>>, vector<8x16x32xf32>
    %c0_2 = arith.constant 0 : index
    %c0_3 = arith.constant 0 : index
    %c0_4 = arith.constant 0 : index
    %1 = vector.load %arg1[%c0_2, %c0_3, %c0_4] : memref<8x20x32xf32, #tpu.memory_space<vmem>>, vector<8x20x32xf32>
    %c0_5 = arith.constant 0 : index
    %c0_6 = arith.constant 0 : index
    %2 = vector.load %arg6[%c0_5, %c0_6] : memref<4x80xf32, #tpu.memory_space<vmem>>, vector<4x80xf32>
    %c0_7 = arith.constant 0 : index
    %c0_8 = arith.constant 0 : index
    %3 = vector.load %arg2[%c0_7, %c0_8] : memref<64x80xf32, #tpu.memory_space<vmem>>, vector<64x80xf32>
    %4 = vector.extract_strided_slice %2 {offsets = [0, 0], sizes = [1, 80], strides = [1, 1]} : vector<4x80xf32> to vector<1x80xf32>
    %5 = vector.shape_cast %4 : vector<1x80xf32> to vector<80xf32>
    %6 = vector.extract_strided_slice %0 {offsets = [0, 0, 0], sizes = [8, 15, 32], strides = [1, 1, 1]} : vector<8x16x32xf32> to vector<8x15x32xf32>
    %7 = vector.extract_strided_slice %0 {offsets = [0, 1, 0], sizes = [8, 15, 32], strides = [1, 1, 1]} : vector<8x16x32xf32> to vector<8x15x32xf32>
    %8 = tpu.concatenate %6, %7 in 2 : vector<8x15x32xf32>, vector<8x15x32xf32> -> vector<8x15x64xf32>
    %cst = arith.constant dense<0.000000e+00> : vector<8x15x80xf32>
    %9 = tpu.matmul %8, %3, %cst {dimension_numbers = #tpu.dot_dimension_numbers<[2], [0], [0, 1], [1], [0, 0, 0, 1, 1, 1], [], []>} : vector<8x15x64xf32>, vector<64x80xf32>, vector<8x15x80xf32> -> vector<8x15x80xf32>
    %10 = vector.shape_cast %5 : vector<80xf32> to vector<1x1x80xf32>
    %11 = vector.broadcast %10 : vector<1x1x80xf32> to vector<8x15x80xf32>
    %12 = arith.addf %9, %11 : vector<8x15x80xf32>
    %cst_9 = arith.constant 0.000000e+00 : f32
    %13 = vector.broadcast %cst_9 : f32 to vector<8x15x80xf32>
    %14 = arith.maximumf %12, %13 : vector<8x15x80xf32>
    %cst_10 = arith.constant dense<0xFF800000> : vector<8x80xf32>
    %15 = vector.multi_reduction <maximumf>, %14, %cst_10 [1] : vector<8x15x80xf32> to vector<8x80xf32>
    %c0_11 = arith.constant 0 : index
    %c0_12 = arith.constant 0 : index
    %16 = vector.load %arg3[%c0_11, %c0_12] : memref<96x80xf32, #tpu.memory_space<vmem>>, vector<96x80xf32>
    %17 = vector.extract_strided_slice %2 {offsets = [1, 0], sizes = [1, 80], strides = [1, 1]} : vector<4x80xf32> to vector<1x80xf32>
    %18 = vector.shape_cast %17 : vector<1x80xf32> to vector<80xf32>
    %19 = vector.extract_strided_slice %0 {offsets = [0, 0, 0], sizes = [8, 14, 32], strides = [1, 1, 1]} : vector<8x16x32xf32> to vector<8x14x32xf32>
    %20 = vector.extract_strided_slice %0 {offsets = [0, 1, 0], sizes = [8, 14, 32], strides = [1, 1, 1]} : vector<8x16x32xf32> to vector<8x14x32xf32>
    %21 = vector.extract_strided_slice %0 {offsets = [0, 2, 0], sizes = [8, 14, 32], strides = [1, 1, 1]} : vector<8x16x32xf32> to vector<8x14x32xf32>
    %22 = tpu.concatenate %19, %20, %21 in 2 : vector<8x14x32xf32>, vector<8x14x32xf32>, vector<8x14x32xf32> -> vector<8x14x96xf32>
    %cst_13 = arith.constant dense<0.000000e+00> : vector<8x14x80xf32>
    %23 = tpu.matmul %22, %16, %cst_13 {dimension_numbers = #tpu.dot_dimension_numbers<[2], [0], [0, 1], [1], [0, 0, 0, 1, 1, 1], [], []>} : vector<8x14x96xf32>, vector<96x80xf32>, vector<8x14x80xf32> -> vector<8x14x80xf32>
    %24 = vector.shape_cast %18 : vector<80xf32> to vector<1x1x80xf32>
    %25 = vector.broadcast %24 : vector<1x1x80xf32> to vector<8x14x80xf32>
    %26 = arith.addf %23, %25 : vector<8x14x80xf32>
    %cst_14 = arith.constant 0.000000e+00 : f32
    %27 = vector.broadcast %cst_14 : f32 to vector<8x14x80xf32>
    %28 = arith.maximumf %26, %27 : vector<8x14x80xf32>
    %cst_15 = arith.constant dense<0xFF800000> : vector<8x80xf32>
    %29 = vector.multi_reduction <maximumf>, %28, %cst_15 [1] : vector<8x14x80xf32> to vector<8x80xf32>
    %c0_16 = arith.constant 0 : index
    %c0_17 = arith.constant 0 : index
    %30 = vector.load %arg4[%c0_16, %c0_17] : memref<64x80xf32, #tpu.memory_space<vmem>>, vector<64x80xf32>
    %31 = vector.extract_strided_slice %2 {offsets = [2, 0], sizes = [1, 80], strides = [1, 1]} : vector<4x80xf32> to vector<1x80xf32>
    %32 = vector.shape_cast %31 : vector<1x80xf32> to vector<80xf32>
    %33 = vector.extract_strided_slice %1 {offsets = [0, 0, 0], sizes = [8, 19, 32], strides = [1, 1, 1]} : vector<8x20x32xf32> to vector<8x19x32xf32>
    %34 = vector.extract_strided_slice %1 {offsets = [0, 1, 0], sizes = [8, 19, 32], strides = [1, 1, 1]} : vector<8x20x32xf32> to vector<8x19x32xf32>
    %35 = tpu.concatenate %33, %34 in 2 : vector<8x19x32xf32>, vector<8x19x32xf32> -> vector<8x19x64xf32>
    %cst_18 = arith.constant dense<0.000000e+00> : vector<8x19x80xf32>
    %36 = tpu.matmul %35, %30, %cst_18 {dimension_numbers = #tpu.dot_dimension_numbers<[2], [0], [0, 1], [1], [0, 0, 0, 1, 1, 1], [], []>} : vector<8x19x64xf32>, vector<64x80xf32>, vector<8x19x80xf32> -> vector<8x19x80xf32>
    %37 = vector.shape_cast %32 : vector<80xf32> to vector<1x1x80xf32>
    %38 = vector.broadcast %37 : vector<1x1x80xf32> to vector<8x19x80xf32>
    %39 = arith.addf %36, %38 : vector<8x19x80xf32>
    %cst_19 = arith.constant 0.000000e+00 : f32
    %40 = vector.broadcast %cst_19 : f32 to vector<8x19x80xf32>
    %41 = arith.maximumf %39, %40 : vector<8x19x80xf32>
    %cst_20 = arith.constant dense<0xFF800000> : vector<8x80xf32>
    %42 = vector.multi_reduction <maximumf>, %41, %cst_20 [1] : vector<8x19x80xf32> to vector<8x80xf32>
    %c0_21 = arith.constant 0 : index
    %c0_22 = arith.constant 0 : index
    %43 = vector.load %arg5[%c0_21, %c0_22] : memref<96x80xf32, #tpu.memory_space<vmem>>, vector<96x80xf32>
    %44 = vector.extract_strided_slice %2 {offsets = [3, 0], sizes = [1, 80], strides = [1, 1]} : vector<4x80xf32> to vector<1x80xf32>
    %45 = vector.shape_cast %44 : vector<1x80xf32> to vector<80xf32>
    %46 = vector.extract_strided_slice %1 {offsets = [0, 0, 0], sizes = [8, 18, 32], strides = [1, 1, 1]} : vector<8x20x32xf32> to vector<8x18x32xf32>
    %47 = vector.extract_strided_slice %1 {offsets = [0, 1, 0], sizes = [8, 18, 32], strides = [1, 1, 1]} : vector<8x20x32xf32> to vector<8x18x32xf32>
    %48 = vector.extract_strided_slice %1 {offsets = [0, 2, 0], sizes = [8, 18, 32], strides = [1, 1, 1]} : vector<8x20x32xf32> to vector<8x18x32xf32>
    %49 = tpu.concatenate %46, %47, %48 in 2 : vector<8x18x32xf32>, vector<8x18x32xf32>, vector<8x18x32xf32> -> vector<8x18x96xf32>
    %cst_23 = arith.constant dense<0.000000e+00> : vector<8x18x80xf32>
    %50 = tpu.matmul %49, %43, %cst_23 {dimension_numbers = #tpu.dot_dimension_numbers<[2], [0], [0, 1], [1], [0, 0, 0, 1, 1, 1], [], []>} : vector<8x18x96xf32>, vector<96x80xf32>, vector<8x18x80xf32> -> vector<8x18x80xf32>
    %51 = vector.shape_cast %45 : vector<80xf32> to vector<1x1x80xf32>
    %52 = vector.broadcast %51 : vector<1x1x80xf32> to vector<8x18x80xf32>
    %53 = arith.addf %50, %52 : vector<8x18x80xf32>
    %cst_24 = arith.constant 0.000000e+00 : f32
    %54 = vector.broadcast %cst_24 : f32 to vector<8x18x80xf32>
    %55 = arith.maximumf %53, %54 : vector<8x18x80xf32>
    %cst_25 = arith.constant dense<0xFF800000> : vector<8x80xf32>
    %56 = vector.multi_reduction <maximumf>, %55, %cst_25 [1] : vector<8x18x80xf32> to vector<8x80xf32>
    %57 = tpu.concatenate %15, %29, %42, %56 in 1 : vector<8x80xf32>, vector<8x80xf32>, vector<8x80xf32>, vector<8x80xf32> -> vector<8x320xf32>
    %c0_26 = arith.constant 0 : index
    %c0_27 = arith.constant 0 : index
    %58 = vector.load %arg7[%c0_26, %c0_27] : memref<320x128xf32, #tpu.memory_space<vmem>>, vector<320x128xf32>
    %cst_28 = arith.constant dense<0.000000e+00> : vector<8x128xf32>
    %59 = tpu.matmul %57, %58, %cst_28 {dimension_numbers = #tpu.dot_dimension_numbers<[1], [0], [0], [1], [0, 0, 1, 1], [], []>} : vector<8x320xf32>, vector<320x128xf32>, vector<8x128xf32> -> vector<8x128xf32>
    %c0_29 = arith.constant 0 : index
    %c0_30 = arith.constant 0 : index
    %60 = vector.load %arg8[%c0_29, %c0_30] : memref<1x128xf32, #tpu.memory_space<vmem>>, vector<1x128xf32>
    %61 = vector.broadcast %60 : vector<1x128xf32> to vector<8x128xf32>
    %62 = arith.addf %59, %61 : vector<8x128xf32>
    %c0_31 = arith.constant 0 : index
    %c0_32 = arith.constant 0 : index
    %63 = vector.load %arg9[%c0_31, %c0_32] : memref<8x128xf32, #tpu.memory_space<vmem>>, vector<8x128xf32>
    tpu.vector_store %arg9[%c0_31, %c0_32], %62 {strides = array<i32>} : memref<8x128xf32, #tpu.memory_space<vmem>>, vector<8x128xf32>,
    return
  }
}

</mosaic_0001>

<bundles_post_ra>
// kernel: tpu_custom_call.1
= control target key start
LH: loop header
LB: loop body
LE: loop exit
PB: predicated region body
PF: predicated region fallthrough
CT: control target
= control target key end

     0   :  { %14 = vsyncpa [#allocation3], 0  ;;  %s18310_s0 = inlined_call_operand.vmem [shape: f32[8,16,32], index: 0, kind: input, shape index: {}]   ;;  %s18311_s1 = inlined_call_operand.vmem [shape: f32[8,20,32], index: 1, kind: input, shape index: {}]   ;;  %s18312_s2 = inlined_call_operand.hbm [shape: f32[64,80], index: 2, kind: input, shape index: {}]   ;;  %s18313_s3 = inlined_call_operand.vmem [shape: f32[96,80], index: 3, kind: input, shape index: {}]   ;;  %s18314_s4 = inlined_call_operand.hbm [shape: f32[64,80], index: 4, kind: input, shape index: {}]   ;;  %s18315_s5 = inlined_call_operand.vmem [shape: f32[96,80], index: 5, kind: input, shape index: {}]   ;;  %s18316_s6 = inlined_call_operand.vmem [shape: f32[4,80], index: 6, kind: input, shape index: {}]   ;;  %s18317_s7 = inlined_call_operand.vmem [shape: f32[320,128], index: 7, kind: input, shape index: {}]   ;;  %s18318_s8 = inlined_call_operand.vmem [shape: f32[1,128], index: 8, kind: input, shape index: {}]   ;;  %s18319_s9 = inlined_call_operand.hbm [shape: f32[8,128], index: 9, kind: output, shape index: {}]  }
   0x1   :  { %15 = vsyncpa [#allocation6], 0 }
   0x2   :  { %16 = vsyncpa [#allocation4], 0  ;;  %s13861_s30 = smov [#allocation2]   ;;  %s13789_s13 = scalar_lea.hbm %s18312_s2, 1024 }
   0x3   :  { %s26_s10 = sshll.u32 %s13861_s30, 4  ;;  %p13790_p0 = scmp.ne.s32.totalorder %s18312_s2, %s13789_s13  ;;  %s27_s10 = int_to_ptr.vmem [resolvable:$true] %s26_s10 }
   0x4   :  { %p13793_p1 = scmp.lt.u32.totalorder %s13789_s13, %s18312_s2 }
   0x6   :  { %p13795_p2 = pnand %p13793_p1, %p13790_p0 }
   0x8   :  { %13798 = shalt.err (!%p13795_p2)
}
   0x9   :  { %s13799_s18 = scalar_lea.vmem %s27_s10, 1024  ;;  %p13804_p4 = scmp.lt.s32.totalorder %s27_s10, %s27_s10 }
   0xa   :  { %p13800_p3 = scmp.ne.s32.totalorder %s27_s10, %s13799_s18  ;;  %p13805_p5 = scmp.lt.s32.totalorder %s13799_s18, %s13799_s18 }
   0xc   :  { %p13806_p6 = por %p13805_p5, %p13804_p4 }
   0xe   :  { %p13807_p7 = pnand %p13806_p6, %p13800_p3 }
  0x10   :  { %13810 = shalt.err (!%p13807_p7)
}
  0x11   :  { %s13862_s19 = smov 128   ;;  %s13863_s20 = smov 8  }
  0x12   :  { %32 = dma.hbm_to_vmem [thread:$0]  %s18312_s2, 1024, %s27_s10, [#allocation3], %s13862_s19, %s13862_s19, %s13863_s20  }
  0x13   :  { %s13864_s23 = smov [#allocation5]   ;;  %s13811_s27 = scalar_lea.hbm %s18314_s4, 1024 }
  0x14   :  { %s40_s24 = sshll.u32 %s13864_s23, 4  ;;  %p13812_p8 = scmp.ne.s32.totalorder %s18314_s4, %s13811_s27  ;;  %s41_s24 = int_to_ptr.vmem [resolvable:$true] %s40_s24 }
  0x15   :  { %p13815_p9 = scmp.lt.u32.totalorder %s13811_s27, %s18314_s4 }
  0x17   :  { %p13817_p10 = pnand %p13815_p9, %p13812_p8 }
  0x19   :  { %13820 = shalt.err (!%p13817_p10)
}
  0x1a   :  { %s13821_s12 = scalar_lea.vmem %s41_s24, 1024  ;;  %p13826_p12 = scmp.lt.s32.totalorder %s41_s24, %s41_s24 }
  0x1b   :  { %p13822_p11 = scmp.ne.s32.totalorder %s41_s24, %s13821_s12  ;;  %p13827_p13 = scmp.lt.s32.totalorder %s13821_s12, %s13821_s12 }
  0x1d   :  { %p13828_p0 = por %p13827_p13, %p13826_p12 }
  0x1f   :  { %p13829_p1 = pnand %p13828_p0, %p13822_p11 }
  0x21   :  { %13832 = shalt.err (!%p13829_p1)
}
  0x22   :  { %46 = dma.hbm_to_vmem [thread:$0]  %s18314_s4, 1024, %s41_s24, [#allocation6], %s13862_s19, %s13862_s19, %s13863_s20  }
  0x23   :  { %13855 = dma.done.wait [#allocation3], 1024  }
  0x24   :  { %13856 = vsyncadd [#allocation3], 4294966272 }
  0x25   :  { %13857 = dma.done.wait [#allocation6], 1024  }
  0x26   :  { %13858 = vsyncadd [#allocation6], 4294966272  ;;  %v13952_v0 = vld [vmem:[%s18310_s0 + $0x8] sm:$0xff]  ;;  %v13957_v1 = vld [vmem:[%s18310_s0 + $0x10] sm:$0xff]  ;;  %vm126_vm0 = vcmask 1046528   ;;  %s13865_s20 = smov 64  }
  0x27   :  { %v13962_v2 = vld [vmem:[%s18310_s0 + $0x18] sm:$0xff]  ;;  %v4148_v3 = vrot.slane %v13952_v0, 2  ;;  %v128_v4 = vrot.slane %v13952_v0, 1  ;;  %v130_v5 = vrot.slane %v13957_v1, 1  ;;  %v13971_v7 = vld [vmem:[%s18310_s0] sm:$0xff]  ;;  %s13866_s21 = smov 32  }
  0x28   :  { %v131_v6 = vrot.slane %v13962_v2, 1  ;;  %v127_v8 = vrot.slane %v13971_v7, 1  ;;  %v4150_v9 = vrot.slane %v13957_v1, 2  ;;  %v4151_v12 = vrot.slane %v13962_v2, 2  ;;  %v13984_v14 = vld [vmem:[%s18310_s0 + $0x20] sm:$0xff]  ;;  %v13989_v15 = vld [vmem:[%s18310_s0 + $0x28] sm:$0xff] }
  0x29   :  { %4173 = vrot.lane.b32.xlu0 %v4148_v3, %s13865_s20  ;;  %153 = vrot.lane.b32.xlu1 %v128_v4, %s13866_s21  ;;  %v4147_v13 = vrot.slane %v13971_v7, 2  ;;  %vm4146_vm1 = vcmask 1045504   ;;  %v133_v18 = vrot.slane %v13984_v14, 1  ;;  %v134_v19 = vrot.slane %v13989_v15, 1  ;;  %v14005_v23 = vld [vmem:[%s18310_s0 + $0x30] sm:$0xff]  ;;  %v14010_v24 = vld [vmem:[%s18310_s0 + $0x38] sm:$0xff] }
  0x2a   :  { %v132_v10 = vsel %vm126_vm0, %v130_v5, %v131_v6  ;;  %v129_v11 = vsel %vm126_vm0, %v127_v8, %v128_v4  ;;  %v4152_v16 = vsel %vm4146_vm1, %v4150_v9, %v4151_v12  ;;  %v4153_v21 = vrot.slane %v13984_v14, 2  ;;  %v69_v31 = vld [vmem:[%s18310_s0 + $0x40] sm:$0xff]  ;;  %v14028_v32 = vld [vmem:[%s18310_s0 + $0x48] sm:$0xff]  ;;  %v4136_v35 = vld [vmem:[%s18313_s3 + $0x10] sm:$0xff]  ;;  %s13873_s11 = smov 112  }
  0x2b   :  { %v4149_v17 = vsel %vm4146_vm1, %v4147_v13, %v4148_v3  ;;  %v135_v20 = vsel %vm126_vm0, %v133_v18, %v134_v19  ;;  %v4154_v22 = vrot.slane %v13989_v15, 2  ;;  %v136_v26 = vrot.slane %v14005_v23, 1  ;;  %v4134_v33 = vld [vmem:[%s18313_s3] sm:$0xff]  ;;  %v4135_v34 = vld [vmem:[%s18313_s3 + $0x8] sm:$0xff]  ;;  %v4137_v36 = vld [vmem:[%s18313_s3 + $0x18] sm:$0xff] }
  0x2c   :  { %v137_v27 = vrot.slane %v14010_v24, 1  ;;  %v4156_v29 = vrot.slane %v14005_v23, 2  ;;  %v4157_v30 = vrot.slane %v14010_v24, 2  ;;  %v139_v38 = vrot.slane %v69_v31, 1  ;;  %v102_v41 = vld [vmem:[#allocation2] sm:$0xff]  ;;  %v103_v42 = vld [vmem:[#allocation2 + $0x8] sm:$0xff] }
  0x2d   :  { %155 = vrot.lane.b32.xlu1 %v132_v10, %s13866_s21  ;;  %151 = vrot.lane.b32.xlu0 %v129_v11, %s13866_s21  ;;  %v4155_v25 = vsel %vm4146_vm1, %v4153_v21, %v4154_v22  ;;  %v140_v39 = vrot.slane %v14028_v32, 1  ;;  %v13638_v40 = vpack.c.bf16 %v4135_v34, %v4134_v33  ;;  %v13642_v43 = vpack.c.bf16 %v4137_v36, %v4136_v35  ;;  %v4138_v44 = vld [vmem:[%s18313_s3 + $0x20] sm:$0xff]  ;;  %v4139_v45 = vld [vmem:[%s18313_s3 + $0x28] sm:$0xff]  ;;  %v104_v46 = vld [vmem:[#allocation2 + $0x10] sm:$0xff] }
  0x2e   :  { %v138_v28 = vsel %vm126_vm0, %v136_v26, %v137_v27  ;;  %v4158_v37 = vsel %vm4146_vm1, %v4156_v29, %v4157_v30  ;;  %v105_v47 = vld [vmem:[#allocation2 + $0x18] sm:$0xff]  ;;  %v13627_v48 = vpack.c.bf16 %v103_v42, %v102_v41  ;;  %v4159_v50 = vrot.slane %v69_v31, 2  ;;  %v71_v53 = vld [vmem:[%s18310_s0 + $0x50] sm:$0xff]  ;;  %v106_v59 = vld [vmem:[#allocation2 + $0x20] sm:$0xff] }
  0x2f   :  { %13639 = vmatprep.subr.bf16.mxu1 %v13638_v40  ;;  %v141_v49 = vsel %vm126_vm0, %v139_v38, %v140_v39  ;;  %v4160_v51 = vrot.slane %v14028_v32, 2  ;;  %v18320_v52 = vmov 0.0|0.0   ;;  %v14063_v54 = vld [vmem:[%s18310_s0 + $0x58] sm:$0xff]  ;;  %v13646_v55 = vpack.c.bf16 %v4139_v45, %v4138_v44  ;;  %v4140_v56 = vld [vmem:[%s18313_s3 + $0x30] sm:$0xff]  ;;  %v107_v60 = vld [vmem:[#allocation2 + $0x28] sm:$0xff] }
  0x30   :  { %13641 = vmatpush3.bf16.msra.mxu1 %v13638_v40  ;;  %13626 = vmatprep.subr.bf16.mxu0 %v18320_v52  ;;  %v13630_v57 = vpack.c.bf16 %v105_v47, %v104_v46  ;;  %v4141_v58 = vld [vmem:[%s18313_s3 + $0x38] sm:$0xff]  ;;  %v142_v62 = vrot.slane %v71_v53, 1  ;;  %v143_v63 = vrot.slane %v14063_v54, 1  ;;  %v4142_v4 = vld [vmem:[%s18313_s3 + $0x40] sm:$0xff]  ;;  %v13633_v5 = vpack.c.bf16 %v107_v60, %v106_v59  ;;  %v108_v8 = vld [vmem:[#allocation2 + $0x30] sm:$0xff] }
  0x31   :  { %4175 = vrot.lane.b32.xlu1 %v4152_v16, %s13865_s20  ;;  %4171 = vrot.lane.b32.xlu0 %v4149_v17, %s13865_s20  ;;  %v4161_v61 = vsel %vm4146_vm1, %v4159_v50, %v4160_v51  ;;  %v13650_v3 = vpack.c.bf16 %v4141_v58, %v4140_v56  ;;  %v109_v9 = vld [vmem:[#allocation2 + $0x38] sm:$0xff]  ;;  %vm13868_vm2 = vmmov 0   ;;  %v18322_v10 = vmov 0.0   ;;  %v73_v16 = vld [vmem:[%s18310_s0 + $0x60] sm:$0xff]  ;;  %v74_v17 = vld [vmem:[%s18310_s0 + $0x68] sm:$0xff] }
  0x32   :  { %13643 = vmatprep.subr.bf16.mxu1 %v13642_v43  ;;  %13628 = vmatpush3.bf16.msra.mxu0 %v13627_v48  ;;  %v144_v11 = vsel %vm126_vm0, %v142_v62, %v143_v63  ;;  %v4163_v13 = vrot.slane %v14063_v54, 2  ;;  %v4145_v21 = vld [vmem:[%s18313_s3 + $0x58] sm:$0xff]  ;;  %v146_v26 = vrot.slane %v74_v17, 1  ;;  %v4165_v29 = vrot.slane %v73_v16, 2  ;;  %v75_v32 = vld [vmem:[%s18310_s0 + $0x70] sm:$0xff]  ;;  %v14120_v34 = vld [vmem:[%s18311_s1] sm:$0xff] }
  0x33   :  { %13629 = vmatprep.subr.bf16.mxu0 %v18320_v52  ;;  %13393 = vmatprep.mubr.msk.f32.mxu0 %vm13868_vm2, %v18322_v10  ;;  %v76_v33 = vld [vmem:[%s18310_s0 + $0x78] sm:$0xff]  ;;  %v14125_v35 = vld [vmem:[%s18311_s1 + $0x8] sm:$0xff]  ;;  %v148_v36 = vrot.slane %v75_v32, 1  ;;  %v5798_v38 = vrot.slane %v14120_v34, 1  ;;  %v4168_v42 = vrot.slane %v75_v32, 2  ;;  %v14153_v48 = vld [vmem:[%s18311_s1 + $0x20] sm:$0xff] }
  0x34   :  { %13645 = vmatpush3.bf16.msra.mxu1 %v13642_v43  ;;  %v4169_v43 = vrot.slane %v76_v33, 2  ;;  %v14139_v44 = vld [vmem:[%s18311_s1 + $0x10] sm:$0xf]  ;;  %v14148_v47 = vld [vmem:[%s18311_s1 + $0x18] sm:$0xff]  ;;  %v10798_v32 = vrot.slane %v14120_v34, 2  ;;  %vm199_vm3 = vcmask 261120  }
  0x35   :  { %159 = vrot.lane.b32.xlu1 %v135_v20, %s13866_s21  ;;  %157 = vrot.lane.b32.xlu0 %v131_v6, %s13866_s21  ;;  %v4143_v6 = vld [vmem:[%s18313_s3 + $0x48] sm:$0xff]  ;;  %v4144_v20 = vld [vmem:[%s18313_s3 + $0x50] sm:$0xff]  ;;  %v5801_v46 = vrot.slane %v14139_v44, 1  ;;  %v5803_v50 = vrot.slane %v14148_v47, 1  ;;  %vm1987_vm4 = vcmask 523264   ;;  %vm4829_vm5 = vcmask 785408  }
  0x36   :  { %13647 = vmatprep.subr.bf16.mxu1 %v13646_v55  ;;  %13631 = vmatpush3.bf16.msra.mxu0 %v13630_v57  ;;  %v13654_v18 = vpack.c.bf16 %v4143_v6, %v4142_v4  ;;  %v4170_v45 = vsel %vm4146_vm1, %v4168_v42, %v4169_v43  ;;  %v14172_v56 = vld [vmem:[%s18311_s1 + $0x38] sm:$0xff]  ;;  %v14177_v57 = vld [vmem:[%s18311_s1 + $0x40] sm:$0xf]  ;;  %v14182_v58 = vld [vmem:[%s18311_s1 + $0x30] sm:$0xff]  ;;  %v10804_v42 = vrot.slane %v14153_v48, 2  ;;  %vm5694_vm6 = vcmask 652288  }
  0x37   :  { %13632 = vmatprep.subr.bf16.mxu0 %v18320_v52  ;;  %v5809_v60 = vrot.slane %v14172_v56, 1  ;;  %v5808_v62 = vrot.slane %v14182_v58, 1  ;;  %v14276_v34 = vld [vmem:[%s18311_s1 + $0x98] sm:$0xff]  ;;  %vm4060_vm7 = vcmask 654336   ;;  %vm4062_vm8 = vcmask 653312  }
  0x38   :  { %13649 = vmatpush3.bf16.msra.mxu1 %v13646_v55  ;;  %vm10700_vm9 = vcmask 649216   ;;  %vm12848_vm10 = vcmask 1041409   ;;  %vm12850_vm11 = vcmask 1042434   ;;  %vm12852_vm12 = vcmask 1043459  }
  0x39   :  { %4179 = vrot.lane.b32.xlu1 %v4155_v25, %s13865_s20  ;;  %4177 = vrot.lane.b32.xlu0 %v4151_v12, %s13865_s20  ;;  %v4162_v12 = vrot.slane %v71_v53, 2  ;;  %v145_v25 = vrot.slane %v73_v16, 1  ;;  %v14163_v53 = vld [vmem:[%s18311_s1 + $0x28] sm:$0xf]  ;;  %v14223_v16 = vld [vmem:[%s18311_s1 + $0x70] sm:$0xf] }
  0x3a   :  { %13651 = vmatprep.subr.bf16.mxu1 %v13650_v3  ;;  %13634 = vmatpush3.bf16.msra.mxu0 %v13633_v5  ;;  %v5806_v55 = vrot.slane %v14163_v53, 1  ;;  %v5810_v5 = vsel %vm126_vm0, %v5808_v62, %v5809_v60  ;;  %vm12854_vm13 = vcmask 1044484   ;;  %vm12856_vm14 = vcmask 1045509  }
  0x3b   :  { %13635 = vmatprep.subr.bf16.mxu0 %v18320_v52  ;;  %vm12858_vm15 = vcmask 1046534  }
  0x3c   :  { %13653 = vmatpush3.bf16.msra.mxu1 %v13650_v3  ;;  %v14198_v3 = vld [vmem:[%s18311_s1 + $0x50] sm:$0xff] }
  0x3d   :  { %163 = vrot.lane.b32.xlu1 %v138_v28, %s13866_s21  ;;  %161 = vrot.lane.b32.xlu0 %v134_v19, %s13866_s21  ;;  %v13636_v19 = vpack.c.bf16 %v109_v9, %v108_v8  ;;  %v147_v28 = vsel %vm126_vm0, %v145_v25, %v146_v26  ;;  %v5814_v8 = vrot.slane %v14198_v3, 1  ;;  %v14209_v9 = vld [vmem:[%s18311_s1 + $0x58] sm:$0xf]  ;;  %v14244_v25 = vld [vmem:[%s18311_s1 + $0x80] sm:$0xff] }
  0x3e   :  { %13655 = vmatprep.subr.bf16.mxu1 %v13654_v18 }
  0x3f   :  { %13637 = vmatpush3.bf16.msra.mxu0 %v13636_v19 }
  0x40   :  { %13657 = vmatpush3.bf16.msra.mxu1 %v13654_v18 }
  0x41   :  { %4183 = vrot.lane.b32.xlu1 %v4158_v37, %s13865_s20  ;;  %4181 = vrot.lane.b32.xlu0 %v4154_v22, %s13865_s20  ;;  %v4164_v22 = vsel %vm4146_vm1, %v4162_v12, %v4163_v13  ;;  %v149_v37 = vrot.slane %v76_v33, 1  ;;  %v5816_v12 = vrot.slane %v14209_v9, 1  ;;  %v10799_v33 = vrot.slane %v14125_v35, 2 }
  0x43   :  { %v150_v40 = vsel %vm126_vm0, %v148_v36, %v149_v37  ;;  %v5817_v18 = vsel %vm126_vm0, %v5814_v8, %v5816_v12 }
  0x45   :  { %165 = vrot.lane.b32.xlu1 %v137_v27, %s13866_s21  ;;  %167 = vrot.lane.b32.xlu0 %v141_v49, %s13866_s21  ;;  %v13658_v27 = vpack.c.bf16 %v4145_v21, %v4144_v20  ;;  %v5821_v20 = vrot.slane %v14223_v16, 1 }
  0x47   :  { %13659 = vmatprep.subr.bf16.mxu1 %v13658_v27 }
  0x48   :  { %13661 = vmatpush3.bf16.msra.mxu1 %v13658_v27 }
  0x49   :  { %4185 = vrot.lane.b32.xlu1 %v4157_v30, %s13865_s20  ;;  %4187 = vrot.lane.b32.xlu0 %v4161_v61, %s13865_s20  ;;  %v4166_v30 = vrot.slane %v74_v17, 2  ;;  %v5811_v61 = vrot.slane %v14177_v57, 1  ;;  %v14228_v17 = vld [vmem:[%s18311_s1 + $0x60] sm:$0xff] }
  0x4a   :  { %13662 = vmatprep.subr.bf16.mxu1 %v18320_v52  ;;  %v5818_v21 = vrot.slane %v14228_v17, 1 }
  0x4b   :  { %v4167_v31 = vsel %vm4146_vm1, %v4165_v29, %v4166_v30  ;;  %v5812_v4 = vsel %vm126_vm0, %v5809_v60, %v5811_v61  ;;  %v5824_v29 = vrot.slane %v14244_v25, 1 }
  0x4d   :  { %169 = vrot.lane.b32.xlu1 %v140_v39, %s13866_s21  ;;  %171 = vrot.lane.b32.xlu0 %v144_v11, %s13866_s21  ;;  %v5799_v39 = vrot.slane %v14125_v35, 1  ;;  %v10803_v35 = vrot.slane %v14148_v47, 2 }
  0x4f   :  { %v5800_v41 = vsel %vm126_vm0, %v5798_v38, %v5799_v39  ;;  %v5802_v49 = vsel %vm126_vm0, %v5799_v39, %v5801_v46  ;;  %v10801_v39 = vrot.slane %v14139_v44, 2  ;;  %v5829_v44 = vrot.slane %v14276_v34, 1 }
  0x51   :  { %4189 = vrot.lane.b32.xlu1 %v4160_v51, %s13865_s20  ;;  %4191 = vrot.lane.b32.xlu0 %v4164_v22, %s13865_s20  ;;  %v5804_v51 = vrot.slane %v14153_v48, 1  ;;  %v14239_v22 = vld [vmem:[%s18311_s1 + $0x78] sm:$0xff]  ;;  %v14293_v48 = vld [vmem:[%s18311_s1 + $0xa0] sm:$0xf] }
  0x53   :  { %v5805_v54 = vsel %vm126_vm0, %v5803_v50, %v5804_v51  ;;  %v5807_v59 = vsel %vm126_vm0, %v5804_v51, %v5806_v55  ;;  %v13871_v50 = vmov 1983009808  }
  0x54   :  { %v4257_v51 = vunpack.c.l.s4 %v13871_v50 }
  0x55   :  { %175 = vrot.lane.b32.xlu1 %v147_v28, %s13866_s21  ;;  %173 = vrot.lane.b32.xlu0 %v143_v63, %s13866_s21  ;;  %v14193_v63 = vld [vmem:[%s18311_s1 + $0x48] sm:$0xff]  ;;  %v5823_v28 = vrot.slane %v14239_v22, 1 }
  0x56   :  { %v5813_v6 = vrot.slane %v14193_v63, 1 }
  0x58   :  { %v5815_v11 = vsel %vm126_vm0, %v5813_v6, %v5814_v8  ;;  %v98_v6 = vld [vmem:[%s18311_s1 + $0xa8] sm:$0xff]  ;;  %v99_v8 = vld [vmem:[%s18311_s1 + $0xb0] sm:$0xff] }
  0x59   :  { %4195 = vrot.lane.b32.xlu1 %v4167_v31, %s13865_s20  ;;  %4193 = vrot.lane.b32.xlu0 %v4163_v13, %s13865_s20  ;;  %v14218_v13 = vld [vmem:[%s18311_s1 + $0x68] sm:$0xff]  ;;  %v5825_v31 = vsel %vm126_vm0, %v5823_v28, %v5824_v29  ;;  %v10818_v28 = vrot.slane %v14228_v17, 2 }
  0x5a   :  { %v5819_v19 = vrot.slane %v14218_v13, 1 }
  0x5c   :  { %v5820_v27 = vsel %vm126_vm0, %v5818_v21, %v5819_v19 }
  0x5d   :  { %4197 = vrot.lane.b32.xlu1 %v4166_v30, %s13865_s20  ;;  %177 = vrot.lane.b32.xlu0 %v146_v26, %s13866_s21  ;;  %v5822_v26 = vsel %vm126_vm0, %v5819_v19, %v5821_v20  ;;  %v14255_v30 = vld [vmem:[%s18311_s1 + $0x88] sm:$0xf]  ;;  %v5833_v19 = vrot.slane %v98_v6, 1 }
  0x5e   :  { %v5826_v36 = vrot.slane %v14255_v30, 1 }
  0x60   :  { %v5827_v38 = vsel %vm126_vm0, %v5824_v29, %v5826_v36  ;;  %v10819_v29 = vrot.slane %v14218_v13, 2 }
  0x61   :  { %179 = vrot.lane.b32.xlu1 %v150_v40, %s13866_s21  ;;  %5838 = vrot.lane.b32.xlu0 %v5800_v41, %s13866_s21  ;;  %v14271_v40 = vld [vmem:[%s18311_s1 + $0x90] sm:$0xff]  ;;  %v10802_v41 = vsel %vm4146_vm1, %v10799_v33, %v10801_v39 }
  0x65   :  { %181 = vrot.lane.b32.xlu1 %v149_v37, %s13866_s21  ;;  %4199 = vrot.lane.b32.xlu0 %v4170_v45, %s13865_s20  ;;  %v10800_v37 = vsel %vm4146_vm1, %v10798_v32, %v10799_v33  ;;  %v216_v45 = vlaneseq  ;;  %v10823_v32 = vrot.slane %v14239_v22, 2  ;;  %v10824_v33 = vrot.slane %v14244_v25, 2 }
  0x66   :  { %v10826_v22 = vrot.slane %v14255_v30, 2  ;;  %v10831_v25 = vrot.slane %v14293_v48, 2 }
  0x69   :  { %5840 = vrot.lane.b32.xlu1 %v5802_v49, %s13866_s21  ;;  %4201 = vrot.lane.b32.xlu0 %v4169_v43, %s13865_s20  ;;  %v5828_v43 = vrot.slane %v14271_v40, 1 }
  0x6b   :  { %v5830_v47 = vsel %vm126_vm0, %v5828_v43, %v5829_v44 }
  0x6d   :  { %5842 = vrot.lane.b32.xlu1 %v5801_v46, %s13866_s21  ;;  %5844 = vrot.lane.b32.xlu0 %v5805_v54, %s13866_s21  ;;  %v13870_v46 = vmov 1966171168   ;;  %v10805_v54 = vsel %vm4146_vm1, %v10803_v35, %v10804_v42 }
  0x6e   :  { %v238_v49 = vunpack.c.l.s4 %v13870_v46 }
  0x70   :  { %v239_v60 = vunpack.c.0.s8 %v238_v49  ;;  %v14369_v49 = vsel %vm4146_vm1, %v10823_v32, %v10824_v33 }
  0x71   :  { %5848 = vrot.lane.b32.xlu1 %v5806_v55, %s13866_s21  ;;  %5846 = vrot.lane.b32.xlu0 %v5807_v59, %s13866_s21  ;;  %v10806_v55 = vrot.slane %v14163_v53, 2  ;;  %v14295_v59 = vshrl.u32 %v216_v45, 7  ;;  %v5831_v53 = vrot.slane %v14293_v48, 1 }
  0x73   :  { %18365 = vst [vmem:[#allocation11_spill] sm:$0xff] %v14295_v59  ;;  %v10807_v62 = vsel %vm4146_vm1, %v10804_v42, %v10806_v55 }
  0x75   :  { %5852 = vrot.lane.b32.xlu1 %v5812_v4, %s13866_s21  ;;  %5850 = vrot.lane.b32.xlu0 %v5810_v5, %s13866_s21  ;;  %v10808_v4 = vrot.slane %v14182_v58, 2  ;;  %v10809_v5 = vrot.slane %v14172_v56, 2  ;;  %v14316_v56 = vld [vmem:[%s18311_s1 + $0xb8] sm:$0xf]  ;;  %v10813_v58 = vrot.slane %v14193_v63, 2 }
  0x76   :  { %v5836_v63 = vrot.slane %v14316_v56, 1 }
  0x77   :  { %v10810_v21 = vsel %vm4146_vm1, %v10808_v4, %v10809_v5 }
  0x79   :  { %5856 = vrot.lane.b32.xlu1 %v5815_v11, %s13866_s21  ;;  %5854 = vrot.lane.b32.xlu0 %v5811_v61, %s13866_s21  ;;  %v4258_v61 = vunpack.c.0.s8 %v4257_v51  ;;  %v14310_v11 = vsub.s32 %v239_v60, %v14295_v59  ;;  %v14382_v60 = vsel %vm4146_vm1, %v10824_v33, %v10826_v22 }
  0x7d   :  { %5860 = vrot.lane.b32.xlu1 %v5816_v12, %s13866_s21  ;;  %5858 = vrot.lane.b32.xlu0 %v5817_v18, %s13866_s21  ;;  %v10811_v12 = vrot.slane %v14177_v57, 2  ;;  %v10814_v18 = vrot.slane %v14198_v3, 2  ;;  %v10821_v3 = vrot.slane %v14223_v16, 2 }
  0x7f   :  { %v10812_v13 = vsel %vm4146_vm1, %v10809_v5, %v10811_v12  ;;  %v10815_v17 = vsel %vm4146_vm1, %v10813_v58, %v10814_v18  ;;  %v14366_v46 = vsel %vm4146_vm1, %v10819_v29, %v10821_v3 }
  0x81   :  { %5864 = vrot.lane.b32.xlu1 %v5822_v26, %s13866_s21  ;;  %5862 = vrot.lane.b32.xlu0 %v5820_v27, %s13866_s21  ;;  %v5832_v26 = vsel %vm126_vm0, %v5829_v44, %v5831_v53  ;;  %v14327_v27 = vsub.s32 %v4258_v61, %v14295_v59  ;;  %v10836_v44 = vrot.slane %v14316_v56, 2 }
  0x85   :  { %5868 = vrot.lane.b32.xlu1 %v5825_v31, %s13866_s21  ;;  %5866 = vrot.lane.b32.xlu0 %v5821_v20, %s13866_s21  ;;  %v5834_v20 = vrot.slane %v99_v8, 1  ;;  %v10816_v31 = vrot.slane %v14209_v9, 2 }
  0x87   :  { %v14353_v42 = vsel %vm4146_vm1, %v10814_v18, %v10816_v31  ;;  %v14358_v43 = vsel %vm126_vm0, %v5834_v20, %v5836_v63 }
  0x89   :  { %10838 = vrot.lane.b32.xlu1 %v10800_v37, %s13865_s20  ;;  %5870 = vrot.lane.b32.xlu0 %v5827_v38, %s13866_s21  ;;  %v10829_v37 = vrot.slane %v14276_v34, 2  ;;  %v5835_v38 = vsel %vm126_vm0, %v5833_v19, %v5834_v20  ;;  %vm12860_vm0 = vcmask 1047559  }
  0x8b   :  { %v14387_v61 = vsel %vm4146_vm1, %v10829_v37, %v10831_v25 }
  0x8d   :  { %5872 = vrot.lane.b32.xlu1 %v5826_v36, %s13866_s21  ;;  %10840 = vrot.lane.b32.xlu0 %v10802_v41, %s13865_s20  ;;  %v10828_v36 = vrot.slane %v14271_v40, 2  ;;  %v10834_v40 = vrot.slane %v99_v8, 2  ;;  %v14348_v41 = vsel %vm4146_vm1, %v10818_v28, %v10819_v29 }
  0x8f   :  { %v14372_v50 = vsel %vm4146_vm1, %v10828_v36, %v10829_v37  ;;  %v14397_v58 = vsel %vm4146_vm1, %v10834_v40, %v10836_v44 }
  0x91   :  { %10844 = vrot.lane.b32.xlu1 %v10805_v54, %s13865_s20  ;;  %5874 = vrot.lane.b32.xlu0 %v5830_v47, %s13866_s21 }
  0x95   :  { %10842 = vrot.lane.b32.xlu1 %v10801_v39, %s13865_s20  ;;  %10846 = vrot.lane.b32.xlu0 %v10807_v62, %s13865_s20  ;;  %v10833_v39 = vrot.slane %v98_v6, 2 }
  0x97   :  { %v14390_v62 = vsel %vm4146_vm1, %v10833_v39, %v10834_v40  ;;  %vm12754_vm1 = vcmask 648192  }
  0x99   :  { %10850 = vrot.lane.b32.xlu1 %v10810_v21, %s13865_s20  ;;  %5876 = vrot.lane.b32.xlu0 %v5832_v26, %s13866_s21 }
  0x9b   :  { %v4174_v34 = vpop.permute.xlu0 %4173  ;;  %v154_v35 = vpop.permute.xlu1 %153 }
  0x9c   :  { %v201_v45 = vsel %vm199_vm3, %v13952_v0, %v154_v35 }
  0x9d   :  { %v285_v51 = vcombine.high %v201_v45, %v201_v45  ;;  %v292_v54 = vrot.slane %v201_v45, %v14310_v11  ;;  %v4220_v47 = vsel %vm1987_vm4, %v201_v45, %v4174_v34  ;;  %10848 = vrot.lane.b32.xlu1 %v10806_v55, %s13865_s20  ;;  %10852 = vrot.lane.b32.xlu0 %v10812_v13, %s13865_s20 }
  0x9e   :  { %v4279_v0 = vrot.slane %v4220_v47, %v14327_v27  ;;  %v4272_v18 = vcombine.high %v4220_v47, %v4220_v47 }
  0x9f   :  { %v299_v4 = vrot.slane %v285_v51, %v14310_v11  ;;  %v300_v55 = vcombine.high %v292_v54, %v292_v54  ;;  %v308_v5 = vrot.slane %v292_v54, %v14310_v11  ;;  %v156_v6 = vpop.permute.xlu1 %155  ;;  %v152_v8 = vpop.permute.xlu0 %151 }
  0xa0   :  { %v4287_v19 = vcombine.high %v4279_v0, %v4279_v0  ;;  %v202_v20 = vsel %vm199_vm3, %v13957_v1, %v156_v6  ;;  %v200_v21 = vsel %vm199_vm3, %v13971_v7, %v152_v8 }
  0xa1   :  { %v301_v26 = vcombine.high %v299_v4, %v299_v4  ;;  %v315_v28 = vrot.slane %v299_v4, %v14310_v11  ;;  %v322_v29 = vrot.slane %v300_v55, %v14310_v11  ;;  %v333_v32 = vcombine.high %v202_v20, %v202_v20  ;;  %5878 = vrot.lane.b32.xlu1 %v5831_v53, %s13866_s21 }
  0xa2   :  { %v14408_v33 = vcombine.low %v4279_v0, %v4287_v19  ;;  %v340_v36 = vrot.slane %v202_v20, %v14310_v11  ;;  %v236_v37 = vcombine.high %v200_v21, %v200_v21  ;;  %v243_v1 = vrot.slane %v200_v21, %v14310_v11  ;;  %10856 = vrot.lane.b32.xlu0 %v10815_v17, %s13865_s20 }
  0xa3   :  { %v329_v7 = vrot.slane %v301_v26, %v14310_v11  ;;  %v1111_v13 = vcombine.low %v308_v5, %v322_v29  ;;  %v13129_v39 = vcombine.high %v308_v5, %v322_v29  ;;  %v331_v40 = vcombine.high %v315_v28, %v315_v28  ;;  %v4176_v51 = vpop.permute.xlu1 %4175 }
  0xa4   :  { %v347_v34 = vrot.slane %v333_v32, %v14310_v11  ;;  %v348_v35 = vcombine.high %v340_v36, %v340_v36  ;;  %v356_v45 = vrot.slane %v340_v36, %v14310_v11  ;;  %v4286_v53 = vrot.slane %v4272_v18, %v14327_v27  ;;  %v4172_v32 = vpop.permute.xlu0 %4171 }
  0xa5   :  { %v1113_v54 = vcombine.low %v315_v28, %v329_v7  ;;  %v14418_v47 = vrot.slane %v1111_v13, %v14310_v11  ;;  %v4562_v17 = vrot.slane %v14408_v33, %v14327_v27  ;;  %v250_v0 = vrot.slane %v236_v37, %v14310_v11  ;;  %10854 = vrot.lane.b32.xlu1 %v10811_v12, %s13865_s20 }
  0xa6   :  { %v349_v4 = vcombine.high %v347_v34, %v347_v34  ;;  %v363_v55 = vrot.slane %v347_v34, %v14310_v11  ;;  %v370_v5 = vrot.slane %v348_v35, %v14310_v11  ;;  %v378_v6 = vcombine.high %v356_v45, %v356_v45  ;;  %5880 = vrot.lane.b32.xlu0 %v5835_v38, %s13866_s21 }
  0xa7   :  { %v14430_v8 = vrot.slane %v13129_v39, %v14310_v11  ;;  %v14432_v18 = vcombine.low %v331_v40, %v356_v45  ;;  %v251_v19 = vcombine.high %v243_v1, %v243_v1  ;;  %v252_v26 = vcombine.high %v250_v0, %v250_v0  ;;  %v160_v35 = vpop.permute.xlu1 %159 }
  0xa8   :  { %v14435_v28 = vrot.slane %v349_v4, %v14310_v11  ;;  %v379_v57 = vcombine.high %v363_v55, %v363_v55  ;;  %v380_v12 = vcombine.high %v370_v5, %v370_v5  ;;  %v14437_v29 = vcombine.low %v370_v5, %v378_v6 }
  0xa9   :  { %v14440_v36 = vrot.slane %v1113_v54, %v14310_v11  ;;  %v1142_v38 = vrot.slane %v14432_v18, %v14310_v11  ;;  %v259_v37 = vrot.slane %v243_v1, %v14310_v11  ;;  %v273_v7 = vrot.slane %v251_v19, %v14310_v11  ;;  %10862 = vrot.lane.b32.xlu1 %v14348_v41, %s13865_s20 }
  0xaa   :  { %v14448_v13 = vcombine.low %v380_v12, %v363_v55  ;;  %v14451_v39 = vcombine.low %v14435_v28, %v379_v57  ;;  %v266_v40 = vrot.slane %v250_v0, %v14310_v11  ;;  %v280_v34 = vrot.slane %v252_v26, %v14310_v11  ;;  %10858 = vrot.lane.b32.xlu0 %v14353_v42, %s13865_s20  ;;  %v158_v12 = vpop.permute.xlu0 %157 }
  0xab   :  { %v1062_v45 = vcombine.low %v259_v37, %v273_v7  ;;  %v13127_v1 = vcombine.high %v259_v37, %v273_v7  ;;  %v4221_v54 = vsel %vm1987_vm4, %v202_v20, %v4176_v51  ;;  %v4219_v4 = vsel %vm1987_vm4, %v200_v21, %v4172_v32 }
  0xac   :  { %v1064_v55 = vcombine.low %v266_v40, %v280_v34  ;;  %v13128_v5 = vcombine.high %v266_v40, %v280_v34  ;;  %v4288_v6 = vcombine.high %v4221_v54, %v4221_v54  ;;  %v1177_v0 = vrot.slane %v14448_v13, %v14310_v11 }
  0xad   :  { %v14464_v19 = vrot.slane %v1062_v45, %v14310_v11  ;;  %v4295_v42 = vrot.slane %v4221_v54, %v14327_v27  ;;  %v4255_v26 = vcombine.high %v4219_v4, %v4219_v4  ;;  %10860 = vrot.lane.b32.xlu1 %v10816_v31, %s13865_s20  ;;  %v14471_v20 = vrot.slane %v13127_v1, %v14310_v11  ;;  %v4180_v1 = vpop.permute.xlu1 %4179 }
  0xae   :  { %v14474_v21 = vrot.slane %v1064_v55, %v14310_v11  ;;  %v14477_v51 = vrot.slane %v4288_v6, %v14327_v27  ;;  %v4262_v57 = vrot.slane %v4219_v4, %v14327_v27  ;;  %5882 = vrot.lane.b32.xlu0 %v14358_v43, %s13866_s21  ;;  %v204_v31 = vsel %vm199_vm3, %v13984_v14, %v160_v35 }
  0xaf   :  { %v4303_v32 = vcombine.high %v4295_v42, %v4295_v42  ;;  %v4555_v37 = vcombine.low %v4286_v53, %v4295_v42  ;;  %v14483_v9 = vrot.slane %v4255_v26, %v14327_v27  ;;  %v14488_v7 = vrot.slane %v13128_v5, %v14310_v11 }
  0xb0   :  { %v4270_v40 = vcombine.high %v4262_v57, %v4262_v57  ;;  %v430_v34 = vcombine.high %v204_v31, %v204_v31  ;;  %v437_v45 = vrot.slane %v204_v31, %v14310_v11  ;;  %v381_v53 = vcombine.high %v14435_v28, %v14435_v28 }
  0xb1   :  { %v14492_v54 = vrot.slane %v4555_v37, %v14327_v27  ;;  %v14495_v43 = vcombine.low %v4303_v32, %v14477_v51  ;;  %v203_v14 = vsel %vm199_vm3, %v13962_v2, %v158_v12  ;;  %5884 = vrot.lane.b32.xlu1 %v5836_v63, %s13866_s21  ;;  %v4271_v35 = vcombine.high %v14483_v9, %v14483_v9 }
  0xb2   :  { %v444_v4 = vrot.slane %v430_v34, %v14310_v11  ;;  %v445_v55 = vcombine.high %v437_v45, %v437_v45  ;;  %v453_v5 = vrot.slane %v437_v45, %v14310_v11  ;;  %10864 = vrot.lane.b32.xlu0 %v14366_v46, %s13865_s20  ;;  %v14510_v6 = vcombine.low %v4262_v57, %v4270_v40  ;;  %v4178_v57 = vpop.permute.xlu0 %4177 }
  0xb3   :  { %v382_v28 = vcombine.high %v203_v14, %v203_v14  ;;  %v389_v2 = vrot.slane %v203_v14, %v14310_v11  ;;  %v4223_v42 = vsel %vm1987_vm4, %v204_v31, %v4180_v1  ;;  %v4579_v52 = vrot.slane %v14495_v43, %v14327_v27 }
  0xb4   :  { %v446_v26 = vcombine.high %v444_v4, %v444_v4  ;;  %v460_v63 = vrot.slane %v444_v4, %v14310_v11  ;;  %v467_v12 = vrot.slane %v445_v55, %v14310_v11  ;;  %v4321_v32 = vcombine.high %v4223_v42, %v4223_v42 }
  0xb5   :  { %v396_v37 = vrot.slane %v382_v28, %v14310_v11  ;;  %v397_v34 = vcombine.high %v389_v2, %v389_v2  ;;  %v405_v45 = vrot.slane %v389_v2, %v14310_v11  ;;  %v4328_v46 = vrot.slane %v4223_v42, %v14327_v27  ;;  %10866 = vrot.lane.b32.xlu1 %v10821_v3, %s13865_s20 }
  0xb6   :  { %v474_v31 = vrot.slane %v446_v26, %v14310_v11  ;;  %v1212_v40 = vcombine.low %v453_v5, %v467_v12  ;;  %v13130_v1 = vcombine.high %v453_v5, %v467_v12  ;;  %v4335_v4 = vrot.slane %v4321_v32, %v14327_v27  ;;  %10868 = vrot.lane.b32.xlu0 %v14369_v49, %s13865_s20 }
  0xb7   :  { %v398_v55 = vcombine.high %v396_v37, %v396_v37  ;;  %v412_v28 = vrot.slane %v396_v37, %v14310_v11  ;;  %v419_v2 = vrot.slane %v397_v34, %v14310_v11  ;;  %v427_v42 = vcombine.high %v405_v45, %v405_v45 }
  0xb8   :  { %v14531_v16 = vrot.slane %v1212_v40, %v14310_v11  ;;  %v1259_v3 = vcombine.low %v460_v63, %v474_v31  ;;  %v13131_v26 = vcombine.high %v460_v63, %v474_v31  ;;  %v14534_v41 = vcombine.low %v381_v53, %v405_v45  ;;  %v162_v31 = vpop.permute.xlu0 %161 }
  0xb9   :  { %v426_v5 = vrot.slane %v398_v55, %v14310_v11  ;;  %v428_v12 = vcombine.high %v412_v28, %v412_v28  ;;  %v429_v32 = vcombine.high %v419_v2, %v419_v2  ;;  %10874 = vrot.lane.b32.xlu1 %v14372_v50, %s13865_s20  ;;  %v14539_v49 = vrot.slane %v13130_v1, %v14310_v11 }
  0xba   :  { %v14542_v37 = vrot.slane %v1259_v3, %v14310_v11  ;;  %v14544_v34 = vcombine.low %v419_v2, %v427_v42  ;;  %v4336_v40 = vcombine.high %v4328_v46, %v4328_v46  ;;  %10870 = vrot.lane.b32.xlu0 %v14382_v60, %s13865_s20  ;;  %v14549_v63 = vrot.slane %v13131_v26, %v14310_v11 }
  0xbb   :  { %v1191_v53 = vrot.slane %v14534_v41, %v14310_v11  ;;  %v14553_v50 = vcombine.low %v429_v32, %v412_v28  ;;  %v4337_v45 = vcombine.high %v4335_v4, %v4335_v4  ;;  %v14555_v1 = vcombine.low %v426_v5, %v428_v12  ;;  %v164_v32 = vpop.permute.xlu1 %163 }
  0xbc   :  { %v14559_v2 = vcombine.low %v4328_v46, %v4336_v40  ;;  %v4222_v42 = vsel %vm1987_vm4, %v203_v14, %v4178_v57  ;;  %v4304_v3 = vcombine.high %v14477_v51, %v14477_v51  ;;  %v206_v46 = vsel %vm199_vm3, %v14005_v23, %v164_v32 }
  0xbd   :  { %v14562_v60 = vcombine.low %v4335_v4, %v4337_v45  ;;  %v4305_v26 = vcombine.high %v4222_v42, %v4222_v42  ;;  %v4312_v28 = vrot.slane %v4222_v42, %v14327_v27  ;;  %10876 = vrot.lane.b32.xlu1 %v14387_v61, %s13865_s20  ;;  %v1226_v5 = vrot.slane %v14553_v50, %v14310_v11 }
  0xbe   :  { %v14575_v14 = vsel %vm199_vm3, %v13989_v15, %v162_v31  ;;  %v4538_v57 = vcombine.low %v14483_v9, %v4271_v35  ;;  %10872 = vrot.lane.b32.xlu0 %v10826_v22, %s13865_s20  ;;  %v4603_v51 = vrot.slane %v14559_v2, %v14327_v27  ;;  %v527_v40 = vcombine.high %v206_v46, %v206_v46 }
  0xbf   :  { %v4319_v61 = vrot.slane %v4305_v26, %v14327_v27  ;;  %v4320_v4 = vcombine.high %v4312_v28, %v4312_v28  ;;  %v4572_v12 = vcombine.low %v4304_v3, %v4312_v28  ;;  %v534_v23 = vrot.slane %v206_v46, %v14310_v11  ;;  %v4184_v30 = vpop.permute.xlu1 %4183 }
  0xc0   :  { %v479_v15 = vcombine.high %v14575_v14, %v14575_v14  ;;  %v486_v9 = vrot.slane %v14575_v14, %v14310_v11  ;;  %v4545_v35 = vrot.slane %v14510_v6, %v14327_v27  ;;  %v4552_v45 = vrot.slane %v4538_v57, %v14327_v27 }
  0xc1   :  { %v4586_v22 = vrot.slane %v4572_v12, %v14327_v27  ;;  %10878 = vrot.lane.b32.xlu1 %v10831_v25, %s13865_s20  ;;  %v541_v31 = vrot.slane %v527_v40, %v14310_v11  ;;  %v542_v42 = vcombine.high %v534_v23, %v534_v23  ;;  %v550_v3 = vrot.slane %v534_v23, %v14310_v11 }
  0xc2   :  { %v493_v26 = vrot.slane %v479_v15, %v14310_v11  ;;  %10880 = vrot.lane.b32.xlu0 %v14390_v62, %s13865_s20  ;;  %v14603_v28 = vcombine.low %v4320_v4, %v4319_v61  ;;  %v494_v32 = vcombine.high %v486_v9, %v486_v9  ;;  %v502_v6 = vrot.slane %v486_v9, %v14310_v11 }
  0xc3   :  { %v4553_v57 = vcombine.low %v4545_v35, %v4552_v45  ;;  %v543_v12 = vcombine.high %v541_v31, %v541_v31  ;;  %v557_v48 = vrot.slane %v541_v31, %v14310_v11  ;;  %v564_v25 = vrot.slane %v542_v42, %v14310_v11 }
  0xc4   :  { %v572_v40 = vcombine.high %v550_v3, %v550_v3  ;;  %v495_v55 = vcombine.high %v493_v26, %v493_v26  ;;  %v509_v23 = vrot.slane %v493_v26, %v14310_v11  ;;  %v516_v15 = vrot.slane %v494_v32, %v14310_v11 }
  0xc5   :  { %13462 = vmatprep.mubr.msk.f32.mxu1 %vm4829_vm5, %v4553_v57  ;;  %v4570_v62 = vcombine.low %v4562_v17, %v14492_v54  ;;  %v14616_v61 = vrot.slane %v543_v12, %v14310_v11  ;;  %v573_v4 = vcombine.high %v557_v48, %v557_v48  ;;  %v574_v9 = vcombine.high %v564_v25, %v564_v25  ;;  %v4182_v57 = vpop.permute.xlu0 %4181 }
  0xc6   :  { %v14618_v35 = vcombine.low %v564_v25, %v572_v40  ;;  %10884 = vrot.lane.b32.xlu1 %v10836_v44, %s13865_s20  ;;  %v523_v45 = vrot.slane %v495_v55, %v14310_v11  ;;  %v525_v31 = vcombine.high %v509_v23, %v509_v23  ;;  %v1261_v42 = vcombine.low %v502_v6, %v516_v15 }
  0xc7   :  { %v13132_v26 = vcombine.high %v502_v6, %v516_v15  ;;  %13463 = vmatmul.mubr.msk.f32.vlgmr.msra.gmra.mrb[0].mxu1 %vm4829_vm5, %v4570_v62  ;;  %v4596_v33 = vrot.slane %v14603_v28, %v14327_v27  ;;  %v14629_v54 = vcombine.low %v574_v9, %v557_v48  ;;  %v4225_v32 = vsel %vm1987_vm4, %v206_v46, %v4184_v30  ;;  %v166_v30 = vpop.permute.xlu1 %165 }
  0xc8   :  { %v1338_v17 = vrot.slane %v14618_v35, %v14310_v11  ;;  %10882 = vrot.lane.b32.xlu0 %v14397_v58, %s13865_s20  ;;  %v14635_v56 = vcombine.low %v14616_v61, %v573_v4  ;;  %v14638_v44 = vrot.slane %v1261_v42, %v14310_v11  ;;  %v1308_v55 = vcombine.low %v509_v23, %v523_v45 }
  0xc9   :  { %v14640_v6 = vcombine.low %v525_v31, %v550_v3  ;;  %v14643_v28 = vrot.slane %v13132_v26, %v14310_v11  ;;  %v4354_v12 = vcombine.high %v4225_v32, %v4225_v32  ;;  %v4361_v48 = vrot.slane %v4225_v32, %v14327_v27  ;;  %v168_v18 = vpop.permute.xlu0 %167 }
  0xca   :  { %v1094_v46 = vcombine.low %v14464_v19, %v14471_v20  ;;  %v1366_v58 = vrot.slane %v14629_v54, %v14310_v11  ;;  %v1095_v25 = vcombine.low %v14474_v21, %v14488_v7  ;;  %v4224_v3 = vsel %vm1987_vm4, %v14575_v14, %v4182_v57 }
  0xcb   :  { %v4587_v40 = vcombine.low %v4579_v52, %v4586_v22  ;;  %v14658_v23 = vrot.slane %v4354_v12, %v14327_v27  ;;  %v4369_v15 = vcombine.high %v4361_v48, %v4361_v48  ;;  %v4338_v20 = vcombine.high %v4224_v3, %v4224_v3 }
  0xcc   :  { %v1102_v19 = vrot.slane %v1094_v46, %v14310_v11  ;;  %v1109_v62 = vrot.slane %v1095_v25, %v14310_v11  ;;  %v4345_v4 = vrot.slane %v4224_v3, %v14327_v27  ;;  %v575_v21 = vcombine.high %v14616_v61, %v14616_v61 }
  0xcd   :  { %13465 = vmatprep.mubr.msk.f32.mxu1 %vm4829_vm5, %v4587_v40  ;;  %v207_v7 = vsel %vm199_vm3, %v14010_v24, %v166_v30  ;;  %v14669_v52 = vcombine.low %v4369_v15, %v14658_v23  ;;  %v4352_v43 = vrot.slane %v4338_v20, %v14327_v27  ;;  %v1143_v31 = vcombine.low %v14418_v47, %v14430_v8 }
  0xce   :  { %v576_v14 = vcombine.high %v207_v7, %v207_v7  ;;  %v583_v22 = vrot.slane %v207_v7, %v14310_v11  ;;  %v1110_v9 = vcombine.low %v1102_v19, %v1109_v62  ;;  %v4353_v45 = vcombine.high %v4345_v4, %v4345_v4  ;;  %v4186_v62 = vpop.permute.xlu1 %4185 }
  0xcf   :  { %v1144_v61 = vcombine.low %v14440_v36, %v1142_v38  ;;  %v14680_v24 = vrot.slane %v1308_v55, %v14310_v11  ;;  %v4622_v42 = vcombine.low %v4352_v43, %v4361_v48  ;;  %v1151_v47 = vrot.slane %v1143_v31, %v14310_v11 }
  0xd0   :  { %v590_v26 = vrot.slane %v576_v14, %v14310_v11  ;;  %v591_v32 = vcombine.high %v583_v22, %v583_v22  ;;  %13394 = vmatmul.mubr.msk.f32.vlgmr.msra.gmra.mrb[0].mxu0 %vm1987_vm4, %v1110_v9  ;;  %v14684_v57 = vcombine.low %v4345_v4, %v4353_v45  ;;  %v599_v12 = vrot.slane %v583_v22, %v14310_v11 }
  0xd1   :  { %v1158_v8 = vrot.slane %v1144_v61, %v14310_v11  ;;  %v4637_v36 = vrot.slane %v14669_v52, %v14327_v27  ;;  %13396 = vmatprep.mubr.msk.f32.mxu0 %vm13868_vm2, %v18322_v10  ;;  %v14696_v46 = vrot.slane %v4622_v42, %v14327_v27  ;;  %v4604_v20 = vcombine.low %v4596_v33, %v4603_v51 }
  0xd2   :  { %v592_v38 = vcombine.high %v590_v26, %v590_v26  ;;  %v606_v55 = vrot.slane %v590_v26, %v14310_v11  ;;  %v613_v48 = vrot.slane %v591_v32, %v14310_v11  ;;  %v621_v30 = vcombine.high %v599_v12, %v599_v12  ;;  %v4188_v32 = vpop.permute.xlu0 %4187 }
  0xd3   :  { %v14698_v25 = vcombine.low %v575_v21, %v599_v12  ;;  %v1159_v3 = vcombine.low %v1151_v47, %v1158_v8  ;;  %v4620_v4 = vrot.slane %v14684_v57, %v14327_v27  ;;  %v13756_v21 = vld [vmem:[%s18310_s0 + $0x40] sm:$0xff]  ;;  %13466 = vmatmul.mubr.msk.f32.gmra.mrb[2].mxu1 %vm4829_vm5, %v4604_v20  ;;  %v4370_v33 = vcombine.high %v14658_v23, %v14658_v23  ;;  %v170_v20 = vpop.permute.xlu1 %169 }
  0xd4   :  { %v620_v40 = vrot.slane %v592_v38, %v14310_v11  ;;  %v622_v15 = vcombine.high %v606_v55, %v606_v55  ;;  %v623_v19 = vcombine.high %v613_v48, %v613_v48  ;;  %v14706_v43 = vcombine.low %v613_v48, %v621_v30 }
  0xd5   :  { %v1380_v14 = vrot.slane %v14698_v25, %v14310_v11  ;;  %13397 = vmatmul.mubr.msk.f32.gmra.mrb[2].mxu0 %vm1987_vm4, %v1159_v3  ;;  %v208_v22 = vsel %vm199_vm3, %v13756_v21, %v168_v18  ;;  %v4226_v31 = vsel %vm1987_vm4, %v207_v7, %v4186_v62  ;;  %v1184_v61 = vrot.slane %v14451_v39, %v14310_v11 }
  0xd6   :  { %v14715_v9 = vcombine.low %v623_v19, %v606_v55  ;;  %v624_v2 = vcombine.high %v208_v22, %v208_v22  ;;  %v631_v51 = vrot.slane %v208_v22, %v14310_v11  ;;  %v14721_v45 = vcombine.low %v620_v40, %v622_v15  ;;  %13399 = vmatprep.mubr.msk.f32.mxu0 %vm13868_vm2, %v18322_v10 }
  0xd7   :  { %v18366_v42 = vrot.slane %v14437_v29, %v14310_v11  ;;  %v1387_v23 = vrot.slane %v14706_v43, %v14310_v11  ;;  %v4371_v7 = vcombine.high %v4226_v31, %v4226_v31  ;;  %v4378_v18 = vrot.slane %v4226_v31, %v14327_v27 }
  0xd8   :  { %v638_v12 = vrot.slane %v624_v2, %v14310_v11  ;;  %v639_v47 = vcombine.high %v631_v51, %v631_v51  ;;  %v647_v8 = vrot.slane %v631_v51, %v14310_v11  ;;  %v1193_v13 = vcombine.low %v1184_v61, %v1191_v53 }
  0xd9   :  { %v1192_v26 = vcombine.low %v18366_v42, %v1177_v0  ;;  %v4227_v55 = vsel %vm1987_vm4, %v208_v22, %v4188_v32  ;;  %v4385_v48 = vrot.slane %v4371_v7, %v14327_v27  ;;  %v4386_v30 = vcombine.high %v4378_v18, %v4378_v18 }
  0xda   :  { %v640_v29 = vcombine.high %v638_v12, %v638_v12  ;;  %v654_v0 = vrot.slane %v638_v12, %v14310_v11  ;;  %v661_v38 = vrot.slane %v639_v47, %v14310_v11  ;;  %v14747_v3 = vcombine.low %v4370_v33, %v4378_v18  ;;  %v13757_v12 = vld [vmem:[%s18310_s0 + $0x48] sm:$0xff] }
  0xdb   :  { %v1200_v39 = vrot.slane %v1192_v26, %v14310_v11  ;;  %v1207_v40 = vrot.slane %v1193_v13, %v14310_v11  ;;  %v4387_v19 = vcombine.high %v4227_v55, %v4227_v55  ;;  %v1415_v62 = vrot.slane %v14715_v9, %v14310_v11 }
  0xdc   :  { %v668_v15 = vrot.slane %v640_v29, %v14310_v11  ;;  %v1407_v41 = vcombine.low %v647_v8, %v661_v38  ;;  %v13133_v53 = vcombine.high %v647_v8, %v661_v38  ;;  %v14753_v21 = vcombine.low %v4386_v30, %v4385_v48  ;;  %v172_v48 = vpop.permute.xlu0 %171 }
  0xdd   :  { %v1208_v2 = vcombine.low %v1200_v39, %v1207_v40  ;;  %v4394_v22 = vrot.slane %v4227_v55, %v14327_v27  ;;  %v4647_v61 = vrot.slane %v14747_v3, %v14327_v27  ;;  %v4401_v26 = vrot.slane %v4387_v19, %v14327_v27  ;;  %v13760_v3 = vld [vmem:[%s18310_s0 + $0x58] sm:$0xff] }
  0xde   :  { %v14757_v51 = vrot.slane %v1407_v41, %v14310_v11  ;;  %v14760_v33 = vrot.slane %v13133_v53, %v14310_v11  ;;  %v1454_v31 = vcombine.low %v654_v0, %v668_v15  ;;  %v13134_v42 = vcombine.high %v654_v0, %v668_v15 }
  0xdf   :  { %13400 = vmatmul.mubr.msk.f32.gmra.mrb[4].mxu0 %vm1987_vm4, %v1208_v2  ;;  %v4402_v32 = vcombine.high %v4394_v22, %v4394_v22  ;;  %v209_v47 = vsel %vm199_vm3, %v13757_v12, %v170_v20  ;;  %v4654_v7 = vrot.slane %v14753_v21, %v14327_v27  ;;  %v4403_v39 = vcombine.high %v4401_v26, %v4401_v26 }
  0xe0   :  { %v14771_v8 = vrot.slane %v1454_v31, %v14310_v11  ;;  %13402 = vmatprep.mubr.msk.f32.mxu0 %vm13868_vm2, %v18322_v10  ;;  %v673_v18 = vcombine.high %v209_v47, %v209_v47  ;;  %v680_v13 = vrot.slane %v209_v47, %v14310_v11  ;;  %v1233_v0 = vrot.slane %v14555_v1, %v14310_v11 }
  0xe1   :  { %v14778_v29 = vcombine.low %v4394_v22, %v4402_v32  ;;  %v18367_v38 = vrot.slane %v14544_v34, %v14310_v11  ;;  %v18368_v41 = vrot.slane %v14562_v60, %v14327_v27  ;;  %v14797_v53 = vrot.slane %v13134_v42, %v14310_v11  ;;  %v13758_v60 = vld [vmem:[%s18310_s0 + $0x50] sm:$0xff] }
  0xe2   :  { %v687_v30 = vrot.slane %v673_v18, %v14310_v11  ;;  %v688_v40 = vcombine.high %v680_v13, %v680_v13  ;;  %v696_v15 = vrot.slane %v680_v13, %v14310_v11  ;;  %v14799_v50 = vcombine.low %v4401_v26, %v4403_v39 }
  0xe3   :  { %v1241_v55 = vcombine.low %v18367_v38, %v1226_v5  ;;  %v4621_v1 = vcombine.low %v18368_v41, %v4620_v4  ;;  %v1242_v34 = vcombine.low %v1233_v0, %v14531_v16  ;;  %v210_v57 = vsel %vm199_vm3, %v13758_v60, %v172_v48  ;;  %v4190_v38 = vpop.permute.xlu1 %4189  ;;  %v4192_v60 = vpop.permute.xlu0 %4191 }
  0xe4   :  { %v689_v19 = vcombine.high %v687_v30, %v687_v30  ;;  %v703_v20 = vrot.slane %v687_v30, %v14310_v11  ;;  %v710_v2 = vrot.slane %v688_v40, %v14310_v11  ;;  %v4664_v4 = vrot.slane %v14778_v29, %v14327_v27 }
  0xe5   :  { %v1249_v5 = vrot.slane %v1241_v55, %v14310_v11  ;;  %13468 = vmatprep.mubr.msk.f32.mxu1 %vm4829_vm5, %v4621_v1  ;;  %v1256_v16 = vrot.slane %v1242_v34, %v14310_v11  ;;  %v721_v22 = vcombine.high %v210_v57, %v210_v57  ;;  %v728_v31 = vrot.slane %v210_v57, %v14310_v11 }
  0xe6   :  { %v717_v42 = vrot.slane %v689_v19, %v14310_v11  ;;  %v1456_v26 = vcombine.low %v696_v15, %v710_v2  ;;  %v13135_v32 = vcombine.high %v696_v15, %v710_v2  ;;  %v719_v12 = vcombine.high %v703_v20, %v703_v20 }
  0xe7   :  { %v1257_v18 = vcombine.low %v1249_v5, %v1256_v16  ;;  %v735_v13 = vrot.slane %v721_v22, %v14310_v11  ;;  %v736_v39 = vcombine.high %v728_v31, %v728_v31  ;;  %v744_v0 = vrot.slane %v728_v31, %v14310_v11 }
  0xe8   :  { %v4671_v55 = vrot.slane %v14799_v50, %v14327_v27  ;;  %v14820_v48 = vrot.slane %v1456_v26, %v14310_v11  ;;  %v1503_v30 = vcombine.low %v703_v20, %v717_v42  ;;  %v4638_v40 = vcombine.low %v14696_v46, %v4637_v36 }
  0xe9   :  { %13403 = vmatmul.mubr.msk.f32.gmra.mrb[6].mxu0 %vm1987_vm4, %v1257_v18  ;;  %v737_v15 = vcombine.high %v735_v13, %v735_v13  ;;  %v751_v41 = vrot.slane %v735_v13, %v14310_v11  ;;  %v758_v1 = vrot.slane %v736_v39, %v14310_v11  ;;  %v766_v34 = vcombine.high %v744_v0, %v744_v0  ;;  %v176_v18 = vpop.permute.xlu1 %175 }
  0xea   :  { %v14830_v5 = vrot.slane %v13135_v32, %v14310_v11  ;;  %v14832_v19 = vcombine.low %v719_v12, %v744_v0  ;;  %13469 = vmatmul.mubr.msk.f32.gmra.mrb[4].mxu1 %vm4829_vm5, %v4638_v40  ;;  %13405 = vmatprep.mubr.msk.f32.mxu0 %vm13868_vm2, %v18322_v10  ;;  %v4228_v52 = vsel %vm1987_vm4, %v209_v47, %v4190_v38 }
  0xeb   :  { %v14839_v36 = vrot.slane %v737_v15, %v14310_v11  ;;  %v767_v46 = vcombine.high %v751_v41, %v751_v41  ;;  %v768_v20 = vcombine.high %v758_v1, %v758_v1  ;;  %v14841_v2 = vcombine.low %v758_v1, %v766_v34 }
  0xec   :  { %v14844_v16 = vrot.slane %v1503_v30, %v14310_v11  ;;  %v4404_v22 = vcombine.high %v4228_v52, %v4228_v52  ;;  %v4411_v31 = vrot.slane %v4228_v52, %v14327_v27  ;;  %v1290_v42 = vcombine.low %v14539_v49, %v14542_v37 }
  0xed   :  { %v14849_v26 = vcombine.low %v768_v20, %v751_v41  ;;  %v1520_v47 = vrot.slane %v14832_v19, %v14310_v11  ;;  %v1527_v32 = vrot.slane %v14841_v2, %v14310_v11  ;;  %v1291_v12 = vcombine.low %v14549_v63, %v14638_v44  ;;  %v13759_v63 = vld [vmem:[%s18310_s0 + $0x60] sm:$0xff] }
  0xee   :  { %v14858_v13 = vcombine.low %v14839_v36, %v767_v46  ;;  %v4418_v39 = vrot.slane %v4404_v22, %v14327_v27  ;;  %v4419_v0 = vcombine.high %v4411_v31, %v4411_v31  ;;  %v4229_v49 = vsel %vm1987_vm4, %v210_v57, %v4192_v60 }
  0xef   :  { %v1298_v37 = vrot.slane %v1290_v42, %v14310_v11  ;;  %v1305_v38 = vrot.slane %v1291_v12, %v14310_v11  ;;  %v4420_v30 = vcombine.high %v4229_v49, %v4229_v49  ;;  %v4427_v40 = vrot.slane %v4229_v49, %v14327_v27 }
  0xf0   :  { %v14865_v15 = vcombine.low %v4411_v31, %v4419_v0  ;;  %v212_v44 = vsel %vm199_vm3, %v13759_v63, %v176_v18  ;;  %v1331_v41 = vrot.slane %v14640_v6, %v14310_v11  ;;  %v1339_v57 = vcombine.low %v14643_v28, %v14680_v24  ;;  %v174_v6 = vpop.permute.xlu0 %173  ;;  %v4196_v0 = vpop.permute.xlu1 %4195 }
  0xf1   :  { %v1306_v1 = vcombine.low %v1298_v37, %v1305_v38  ;;  %v14876_v34 = vrot.slane %v4420_v30, %v14327_v27  ;;  %v4435_v52 = vcombine.high %v4427_v40, %v4427_v40  ;;  %v4674_v46 = vcombine.low %v4418_v39, %v4427_v40 }
  0xf2   :  { %v1534_v20 = vrot.slane %v14849_v26, %v14310_v11  ;;  %v818_v60 = vcombine.high %v212_v44, %v212_v44  ;;  %v825_v22 = vrot.slane %v212_v44, %v14310_v11  ;;  %v1340_v31 = vcombine.low %v1331_v41, %v1338_v17 }
  0xf3   :  { %v4681_v28 = vrot.slane %v14865_v15, %v14327_v27  ;;  %13406 = vmatmul.mubr.msk.f32.gmra.mrb[8].mxu0 %vm1987_vm4, %v1306_v1  ;;  %v14888_v24 = vcombine.low %v4435_v52, %v14876_v34  ;;  %v1347_v42 = vrot.slane %v1339_v57, %v14310_v11  ;;  %v4655_v12 = vcombine.low %v4647_v61, %v4654_v7 }
  0xf4   :  { %13408 = vmatprep.mubr.msk.f32.mxu0 %vm13868_vm2, %v18322_v10  ;;  %v832_v35 = vrot.slane %v818_v60, %v14310_v11  ;;  %v833_v17 = vcombine.high %v825_v22, %v825_v22  ;;  %v841_v18 = vrot.slane %v825_v22, %v14310_v11  ;;  %v1354_v39 = vrot.slane %v1340_v31, %v14310_v11 }
  0xf5   :  { %v14903_v49 = vrot.slane %v4674_v46, %v14327_v27  ;;  %v4698_v21 = vrot.slane %v14888_v24, %v14327_v27  ;;  %13471 = vmatprep.mubr.msk.f32.mxu1 %vm4829_vm5, %v4655_v12  ;;  %v211_v61 = vsel %vm199_vm3, %v13760_v3, %v174_v6  ;;  %v4672_v7 = vcombine.low %v4664_v4, %v4671_v55  ;;  %v13764_v24 = vld [vmem:[%s18310_s0 + $0x78] sm:$0xff] }
  0xf6   :  { %v834_v37 = vcombine.high %v832_v35, %v832_v35  ;;  %v848_v38 = vrot.slane %v832_v35, %v14310_v11  ;;  %v855_v30 = vrot.slane %v833_v17, %v14310_v11  ;;  %v1355_v40 = vcombine.low %v1347_v42, %v1354_v39 }
  0xf7   :  { %v769_v63 = vcombine.high %v14839_v36, %v14839_v36  ;;  %v770_v41 = vcombine.high %v211_v61, %v211_v61  ;;  %v777_v57 = vrot.slane %v211_v61, %v14310_v11  ;;  %13472 = vmatmul.mubr.msk.f32.gmra.mrb[6].mxu1 %vm4829_vm5, %v4672_v7  ;;  %v4231_v50 = vsel %vm1987_vm4, %v212_v44, %v4196_v0 }
  0xf8   :  { %v862_v1 = vrot.slane %v834_v37, %v14310_v11  ;;  %v1602_v29 = vcombine.low %v841_v18, %v855_v30  ;;  %v13136_v4 = vcombine.high %v841_v18, %v855_v30  ;;  %13409 = vmatmul.mubr.msk.f32.gmra.mrb[10].mxu0 %vm1987_vm4, %v1355_v40  ;;  %v4453_v55 = vcombine.high %v4231_v50, %v4231_v50  ;;  %v4194_v18 = vpop.permute.xlu0 %4193 }
  0xf9   :  { %v784_v52 = vrot.slane %v770_v41, %v14310_v11  ;;  %v785_v46 = vcombine.high %v777_v57, %v777_v57  ;;  %v793_v60 = vrot.slane %v777_v57, %v14310_v11  ;;  %13411 = vmatprep.mubr.msk.f32.mxu0 %vm13868_vm2, %v18322_v10  ;;  %v1373_v36 = vrot.slane %v14635_v56, %v14310_v11 }
  0xfa   :  { %v1604_v22 = vcombine.low %v848_v38, %v862_v1  ;;  %v14934_v44 = vrot.slane %v1602_v29, %v14310_v11  ;;  %v13137_v31 = vcombine.high %v848_v38, %v862_v1  ;;  %v4460_v6 = vrot.slane %v4231_v50, %v14327_v27 }
  0xfb   :  { %v786_v42 = vcombine.high %v784_v52, %v784_v52  ;;  %v800_v12 = vrot.slane %v784_v52, %v14310_v11  ;;  %v807_v35 = vrot.slane %v785_v46, %v14310_v11  ;;  %v815_v17 = vcombine.high %v793_v60, %v793_v60 }
  0xfc   :  { %v14940_v39 = vrot.slane %v13136_v4, %v14310_v11  ;;  %v14943_v0 = vrot.slane %v1604_v22, %v14310_v11  ;;  %v14945_v56 = vcombine.low %v769_v63, %v793_v60  ;;  %v4467_v3 = vrot.slane %v4453_v55, %v14327_v27  ;;  %v4198_v55 = vpop.permute.xlu1 %4197 }
  0xfd   :  { %v814_v7 = vrot.slane %v786_v42, %v14310_v11  ;;  %v816_v37 = vcombine.high %v800_v12, %v800_v12  ;;  %v817_v38 = vcombine.high %v807_v35, %v807_v35  ;;  %v14949_v30 = vcombine.low %v807_v35, %v815_v17 }
  0xfe   :  { %v14952_v40 = vrot.slane %v13137_v31, %v14310_v11  ;;  %v4468_v41 = vcombine.high %v4460_v6, %v4460_v6  ;;  %v4469_v57 = vcombine.high %v4467_v3, %v4467_v3  ;;  %v1388_v50 = vcombine.low %v1366_v58, %v1373_v36 }
  0xff   :  { %v14957_v1 = vcombine.low %v817_v38, %v800_v12  ;;  %v1569_v63 = vrot.slane %v14945_v56, %v14310_v11  ;;  %v1576_v29 = vrot.slane %v14949_v30, %v14310_v11  ;;  %v1389_v4 = vcombine.low %v1380_v14, %v1387_v23  ;;  %v178_v14 = vpop.permute.xlu0 %177 }
 0x100   :  { %v14969_v52 = vcombine.low %v814_v7, %v816_v37  ;;  %v14971_v54 = vcombine.low %v4460_v6, %v4468_v41  ;;  %v14973_v58 = vcombine.low %v4467_v3, %v4469_v57  ;;  %v1396_v46 = vrot.slane %v1388_v50, %v14310_v11  ;;  %v180_v15 = vpop.permute.xlu1 %179 }
 0x101   :  { %v1403_v60 = vrot.slane %v1389_v4, %v14310_v11  ;;  %v4436_v36 = vcombine.high %v14876_v34, %v14876_v34  ;;  %v4230_v43 = vsel %vm1987_vm4, %v211_v61, %v4194_v18  ;;  %v1422_v25 = vrot.slane %v14721_v45, %v14310_v11  ;;  %v13761_v18 = vld [vmem:[%s18310_s0 + $0x68] sm:$0xff] }
 0x102   :  { %v1583_v23 = vrot.slane %v14957_v1, %v14310_v11  ;;  %v4722_v22 = vrot.slane %v14971_v54, %v14327_v27  ;;  %v4437_v31 = vcombine.high %v4230_v43, %v4230_v43  ;;  %v4444_v6 = vrot.slane %v4230_v43, %v14327_v27 }
 0x103   :  { %v1404_v42 = vcombine.low %v1396_v46, %v1403_v60  ;;  %v1437_v34 = vcombine.low %v1415_v62, %v1422_v25  ;;  %v1438_v61 = vcombine.low %v14757_v51, %v14760_v33  ;;  %v4689_v45 = vcombine.low %v4681_v28, %v14903_v49  ;;  %v13762_v60 = vld [vmem:[%s18310_s0 + $0x70] sm:$0xff] }
 0x104   :  { %v4451_v12 = vrot.slane %v4437_v31, %v14327_v27  ;;  %v4452_v35 = vcombine.high %v4444_v6, %v4444_v6  ;;  %v14997_v17 = vcombine.low %v4436_v36, %v4444_v6  ;;  %v213_v9 = vsel %vm199_vm3, %v13761_v18, %v178_v14 }
 0x105   :  { %13412 = vmatmul.mubr.msk.f32.gmra.mrb[12].mxu0 %vm1987_vm4, %v1404_v42  ;;  %v1445_v62 = vrot.slane %v1437_v34, %v14310_v11  ;;  %v1452_v51 = vrot.slane %v1438_v61, %v14310_v11  ;;  %13474 = vmatprep.mubr.msk.f32.mxu1 %vm4829_vm5, %v4689_v45  ;;  %v867_v33 = vcombine.high %v213_v9, %v213_v9 }
 0x106   :  { %v4732_v28 = vrot.slane %v14973_v58, %v14327_v27  ;;  %v4705_v49 = vrot.slane %v14997_v17, %v14327_v27  ;;  %13414 = vmatprep.mubr.msk.f32.mxu0 %vm13868_vm2, %v18322_v10  ;;  %v874_v3 = vrot.slane %v213_v9, %v14310_v11  ;;  %v15015_v7 = vsel %vm1987_vm4, %v213_v9, %v4198_v55 }
 0x107   :  { %v15017_v37 = vcombine.low %v4452_v35, %v4451_v12  ;;  %v1453_v38 = vcombine.low %v1445_v62, %v1452_v51  ;;  %v881_v41 = vrot.slane %v867_v33, %v14310_v11  ;;  %v4477_v57 = vrot.slane %v15015_v7, %v14327_v27 }
 0x108   :  { %v882_v50 = vcombine.high %v874_v3, %v874_v3  ;;  %v890_v4 = vrot.slane %v874_v3, %v14310_v11  ;;  %v4470_v46 = vcombine.high %v15015_v7, %v15015_v7  ;;  %v15029_v55 = vsel %vm199_vm3, %v13762_v60, %v180_v15 }
 0x109   :  { %13415 = vmatmul.mubr.msk.f32.gmra.mrb[14].mxu0 %vm1987_vm4, %v1453_v38  ;;  %v883_v36 = vcombine.high %v881_v41, %v881_v41  ;;  %v897_v43 = vrot.slane %v881_v41, %v14310_v11  ;;  %v4485_v25 = vcombine.high %v4477_v57, %v4477_v57  ;;  %v915_v14 = vcombine.high %v15029_v55, %v15029_v55  ;;  %v5839_v38 = vpop.permute.xlu0 %5838 }
 0x10a   :  { %v904_v31 = vrot.slane %v882_v50, %v14310_v11  ;;  %13417 = vmatprep.mubr.msk.f32.mxu0 %vm13868_vm2, %v18322_v10  ;;  %v922_v6 = vrot.slane %v15029_v55, %v14310_v11  ;;  %v1486_v42 = vcombine.low %v14771_v8, %v14797_v53  ;;  %v1487_v34 = vcombine.low %v14820_v48, %v14830_v5 }
 0x10b   :  { %v911_v61 = vrot.slane %v883_v36, %v14310_v11  ;;  %v15045_v45 = vcombine.low %v4477_v57, %v4485_v25  ;;  %v913_v12 = vcombine.high %v897_v43, %v897_v43  ;;  %v929_v35 = vrot.slane %v915_v14, %v14310_v11  ;;  %v182_v25 = vpop.permute.xlu1 %181 }
 0x10c   :  { %v1651_v17 = vcombine.low %v890_v4, %v904_v31  ;;  %v13138_v18 = vcombine.high %v890_v4, %v904_v31  ;;  %v930_v9 = vcombine.high %v922_v6, %v922_v6  ;;  %v938_v62 = vrot.slane %v922_v6, %v14310_v11  ;;  %v13763_v6 = vld [vmem:[%s18311_s1] sm:$0xff] }
 0x10d   :  { %v4715_v51 = vrot.slane %v15017_v37, %v14327_v27  ;;  %v1653_v33 = vcombine.low %v897_v43, %v911_v61  ;;  %v931_v8 = vcombine.high %v929_v35, %v929_v35  ;;  %v945_v53 = vrot.slane %v929_v35, %v14310_v11 }
 0x10e   :  { %v15053_v48 = vrot.slane %v1651_v17, %v14310_v11  ;;  %v4739_v5 = vrot.slane %v15045_v45, %v14327_v27  ;;  %v952_v15 = vrot.slane %v930_v9, %v14310_v11  ;;  %v960_v3 = vcombine.high %v938_v62, %v938_v62 }
 0x10f   :  { %v15059_v41 = vrot.slane %v13138_v18, %v14310_v11  ;;  %v959_v57 = vrot.slane %v931_v8, %v14310_v11  ;;  %v961_v37 = vcombine.high %v945_v53, %v945_v53  ;;  %v15062_v50 = vcombine.low %v913_v12, %v938_v62 }
 0x110   :  { %v962_v4 = vcombine.high %v952_v15, %v952_v15  ;;  %v15064_v60 = vcombine.low %v952_v15, %v960_v3  ;;  %v1494_v36 = vrot.slane %v1486_v42, %v14310_v11  ;;  %v1501_v43 = vrot.slane %v1487_v34, %v14310_v11 }
 0x111   :  { %v15069_v14 = vrot.slane %v1653_v33, %v14310_v11  ;;  %v15071_v31 = vcombine.low %v959_v57, %v961_v37  ;;  %v15077_v61 = vsel %vm199_vm3, %v13763_v6, %v5839_v38  ;;  %v4706_v12 = vcombine.low %v4698_v21, %v4705_v49 }
 0x112   :  { %v15082_v42 = vcombine.low %v962_v4, %v945_v53  ;;  %v1709_v34 = vrot.slane %v15062_v50, %v14310_v11  ;;  %v1502_v35 = vcombine.low %v1494_v36, %v1501_v43  ;;  %v5962_v17 = vcombine.high %v15077_v61, %v15077_v61 }
 0x113   :  { %v1716_v18 = vrot.slane %v15064_v60, %v14310_v11  ;;  %v5969_v9 = vrot.slane %v15077_v61, %v14310_v11  ;;  %13475 = vmatmul.mubr.msk.f32.gmra.mrb[8].mxu1 %vm4829_vm5, %v4706_v12  ;;  %v15097_v21 = vsel %vm199_vm3, %v13764_v24, %v182_v25  ;;  %v1535_v49 = vcombine.low %v14844_v16, %v1520_v47 }
 0x114   :  { %13418 = vmatmul.mubr.msk.f32.gmra.mrb[16].mxu0 %vm1987_vm4, %v1502_v35  ;;  %v5976_v62 = vrot.slane %v5962_v17, %v14310_v11  ;;  %v963_v33 = vcombine.high %v959_v57, %v959_v57  ;;  %v964_v8 = vcombine.high %v15097_v21, %v15097_v21  ;;  %v971_v53 = vrot.slane %v15097_v21, %v14310_v11 }
 0x115   :  { %v5977_v15 = vcombine.high %v5969_v9, %v5969_v9  ;;  %v5985_v3 = vrot.slane %v5969_v9, %v14310_v11  ;;  %13420 = vmatprep.mubr.msk.f32.mxu0 %vm13868_vm2, %v18322_v10  ;;  %v1536_v19 = vcombine.low %v1527_v32, %v1534_v20  ;;  %v1543_v16 = vrot.slane %v1535_v49, %v14310_v11 }
 0x116   :  { %v5978_v47 = vcombine.high %v5976_v62, %v5976_v62  ;;  %v5992_v38 = vrot.slane %v5976_v62, %v14310_v11  ;;  %v978_v57 = vrot.slane %v964_v8, %v14310_v11  ;;  %v979_v37 = vcombine.high %v971_v53, %v971_v53 }
 0x117   :  { %v5999_v4 = vrot.slane %v5977_v15, %v14310_v11  ;;  %v987_v36 = vrot.slane %v971_v53, %v14310_v11  ;;  %v1550_v43 = vrot.slane %v1536_v19, %v14310_v11  ;;  %v4723_v26 = vcombine.low %v4715_v51, %v4722_v22  ;;  %v4200_v53 = vpop.permute.xlu0 %4199  ;;  %v5841_v15 = vpop.permute.xlu1 %5840 }
 0x118   :  { %v6006_v2 = vrot.slane %v5978_v47, %v14310_v11  ;;  %v980_v32 = vcombine.high %v978_v57, %v978_v57  ;;  %v994_v20 = vrot.slane %v978_v57, %v14310_v11  ;;  %v1001_v25 = vrot.slane %v979_v37, %v14310_v11 }
 0x119   :  { %v6980_v6 = vcombine.low %v5985_v3, %v5999_v4  ;;  %v13170_v12 = vcombine.high %v5985_v3, %v5999_v4  ;;  %v1009_v35 = vcombine.high %v987_v36, %v987_v36  ;;  %v15130_v17 = vcombine.low %v963_v33, %v987_v36  ;;  %13477 = vmatprep.mubr.msk.f32.mxu1 %vm4829_vm5, %v4723_v26 }
 0x11a   :  { %v6982_v9 = vcombine.low %v5992_v38, %v6006_v2  ;;  %v13171_v24 = vcombine.high %v5992_v38, %v6006_v2  ;;  %v1008_v49 = vrot.slane %v980_v32, %v14310_v11  ;;  %v1010_v54 = vcombine.high %v994_v20, %v994_v20  ;;  %v13765_v32 = vld [vmem:[%s18311_s1 + $0x8] sm:$0xff] }
 0x11b   :  { %v6990_v22 = vrot.slane %v6980_v6, %v14310_v11  ;;  %v6997_v51 = vrot.slane %v13170_v12, %v14310_v11  ;;  %v1011_v62 = vcombine.high %v1001_v25, %v1001_v25  ;;  %v15136_v8 = vcombine.low %v1001_v25, %v1009_v35 }
 0x11c   :  { %v1723_v33 = vrot.slane %v15082_v42, %v14310_v11  ;;  %v7004_v3 = vrot.slane %v6982_v9, %v14310_v11  ;;  %v7011_v19 = vrot.slane %v13171_v24, %v14310_v11  ;;  %v15142_v47 = vcombine.low %v1008_v49, %v1010_v54  ;;  %v5766_v54 = vld [vmem:[#allocation5] sm:$0xff] }
 0x11d   :  { %v7012_v38 = vcombine.low %v6990_v22, %v6997_v51  ;;  %v15144_v57 = vcombine.low %v1011_v62, %v994_v20  ;;  %v1758_v37 = vrot.slane %v15130_v17, %v14310_v11  ;;  %v1551_v4 = vcombine.low %v1543_v16, %v1550_v43  ;;  %v5767_v22 = vld [vmem:[#allocation5 + $0x8] sm:$0xff] }
 0x11e   :  { %v7013_v36 = vcombine.low %v7004_v3, %v7011_v19  ;;  %v1765_v26 = vrot.slane %v15136_v8, %v14310_v11  ;;  %v4233_v2 = vsel %vm1987_vm4, %v15029_v55, %v4200_v53  ;;  %v15156_v25 = vsel %vm199_vm3, %v13765_v32, %v5841_v15  ;;  %v4202_v15 = vpop.permute.xlu0 %4201 }
 0x11f   :  { %v15159_v20 = vrot.slane %v7012_v38, %v14310_v11  ;;  %13421 = vmatmul.mubr.msk.f32.gmra.mrb[18].mxu0 %vm1987_vm4, %v1551_v4  ;;  %v4484_v16 = vrot.slane %v4470_v46, %v14327_v27  ;;  %v4486_v43 = vcombine.high %v4233_v2, %v4233_v2  ;;  %v4493_v55 = vrot.slane %v4233_v2, %v14327_v27 }
 0x120   :  { %v15168_v6 = vrot.slane %v7013_v36, %v14310_v11  ;;  %13423 = vmatprep.mubr.msk.f32.mxu0 %vm13868_vm2, %v18322_v10  ;;  %v6011_v12 = vcombine.high %v15156_v25, %v15156_v25  ;;  %v6018_v35 = vrot.slane %v15156_v25, %v14310_v11  ;;  %v1562_v9 = vrot.slane %v14858_v13, %v14310_v11  ;;  %v5843_v36 = vpop.permute.xlu1 %5842 }
 0x121   :  { %v4500_v7 = vrot.slane %v4486_v43, %v14327_v27  ;;  %v4501_v46 = vcombine.high %v4493_v55, %v4493_v55  ;;  %v4741_v24 = vcombine.low %v4484_v16, %v4493_v55  ;;  %v1585_v49 = vcombine.low %v1576_v29, %v1583_v23 }
 0x122   :  { %v1772_v51 = vrot.slane %v15144_v57, %v14310_v11  ;;  %v6025_v62 = vrot.slane %v6011_v12, %v14310_v11  ;;  %v6026_v53 = vcombine.high %v6018_v35, %v6018_v35  ;;  %v6034_v13 = vrot.slane %v6018_v35, %v14310_v11 }
 0x123   :  { %v7028_v3 = vcombine.low %v15159_v20, %v15168_v6  ;;  %v15191_v19 = vcombine.low %v4501_v46, %v4500_v7  ;;  %v1584_v30 = vcombine.low %v1562_v9, %v1569_v63  ;;  %v1599_v1 = vrot.slane %v1585_v49, %v14310_v11 }
 0x124   :  { %v6027_v29 = vcombine.high %v6025_v62, %v6025_v62  ;;  %v6041_v23 = vrot.slane %v6025_v62, %v14310_v11  ;;  %v6048_v38 = vrot.slane %v6026_v53, %v14310_v11  ;;  %v13663_v4 = vpack.c.bf16 %v5767_v22, %v5766_v54  ;;  %v5845_v62 = vpop.permute.xlu0 %5844 }
 0x125   :  { %v15200_v2 = vrot.slane %v4741_v24, %v14327_v27  ;;  %v1592_v32 = vrot.slane %v1584_v30, %v14310_v11  ;;  %v4502_v16 = vcombine.high %v4500_v7, %v4500_v7  ;;  %v4234_v43 = vsel %vm1987_vm4, %v15097_v21, %v4202_v15  ;;  %v13766_v21 = vld [vmem:[%s18311_s1 + $0x10] sm:$0xf] }
 0x126   :  { %v6055_v56 = vrot.slane %v6027_v29, %v14310_v11  ;;  %v7029_v63 = vcombine.low %v6034_v13, %v6048_v38  ;;  %v13172_v55 = vcombine.high %v6034_v13, %v6048_v38  ;;  %13664 = vmatpush3.bf16.msra.mxu1 %v13663_v4  ;;  %v4503_v12 = vcombine.high %v4234_v43, %v4234_v43  ;;  %v5769_v29 = vld [vmem:[#allocation5 + $0x18] sm:$0xff] }
 0x127   :  { %v1600_v35 = vcombine.low %v1592_v32, %v1599_v1  ;;  %v4510_v9 = vrot.slane %v4234_v43, %v14327_v27  ;;  %v4740_v46 = vcombine.low %v4732_v28, %v4739_v5  ;;  %v15217_v7 = vsel %vm199_vm3, %v13766_v21, %v5843_v36  ;;  %v5768_v1 = vld [vmem:[#allocation5 + $0x10] sm:$0xff]  ;;  %v13767_v36 = vld [vmem:[%s18311_s1 + $0x18] sm:$0xff] }
 0x128   :  { %v18369_v24 = vmov 0.0|0.0   ;;  %v4756_v49 = vrot.slane %v15191_v19, %v14327_v27  ;;  %v7031_v54 = vcombine.low %v6041_v23, %v6055_v56  ;;  %v13173_v22 = vcombine.high %v6041_v23, %v6055_v56 }
 0x129   :  { %13665 = vmatprep.subr.bf16.mxu1 %v18369_v24  ;;  %v15223_v45 = vrot.slane %v7029_v63, %v14310_v11  ;;  %13424 = vmatmul.mubr.msk.f32.gmra.mrb[20].mxu0 %vm1987_vm4, %v1600_v35  ;;  %v4517_v58 = vrot.slane %v4503_v12, %v14327_v27  ;;  %v4518_v28 = vcombine.high %v4510_v9, %v4510_v9 }
 0x12a   :  { %v15227_v5 = vcombine.low %v4502_v16, %v4510_v9  ;;  %13478 = vmatmul.mubr.msk.f32.gmra.mrb[10].mxu1 %vm4829_vm5, %v4740_v46  ;;  %v15231_v53 = vrot.slane %v13172_v55, %v14310_v11  ;;  %v15234_v13 = vrot.slane %v7031_v54, %v14310_v11  ;;  %13426 = vmatprep.mubr.msk.f32.mxu0 %vm13868_vm2, %v18322_v10 }
 0x12b   :  { %v6066_v15 = vrot.slane %v15217_v7, %v14310_v11  ;;  %v1611_v30 = vrot.slane %v14969_v52, %v14310_v11  ;;  %v15243_v23 = vrot.slane %v13173_v22, %v14310_v11  ;;  %v15245_v38 = vcombine.low %v4518_v28, %v4517_v58  ;;  %v13768_v22 = vld [vmem:[%s18311_s1 + $0x28] sm:$0xf] }
 0x12c   :  { %v1634_v4 = vcombine.low %v14940_v39, %v14943_v0  ;;  %v15253_v32 = vsel %vm199_vm3, %v13767_v36, %v5845_v62  ;;  %v4766_v63 = vrot.slane %v15227_v5, %v14327_v27  ;;  %v13666_v55 = vpack.c.bf16 %v5769_v29, %v5768_v1  ;;  %v13771_v5 = vld [vmem:[%s18311_s1 + $0x30] sm:$0xff] }
 0x12d   :  { %v6067_v16 = vcombine.high %v6066_v15, %v6066_v15  ;;  %v6074_v52 = vrot.slane %v6066_v15, %v14310_v11  ;;  %v1633_v43 = vcombine.low %v1611_v30, %v14934_v44  ;;  %v6083_v56 = vcombine.high %v15253_v32, %v15253_v32  ;;  %v5849_v44 = vpop.permute.xlu1 %5848 }
 0x12e   :  { %v1648_v39 = vrot.slane %v1634_v4, %v14310_v11  ;;  %v6090_v0 = vrot.slane %v15253_v32, %v14310_v11  ;;  %13667 = vmatpush3.bf16.msra.mxu1 %v13666_v55  ;;  %v15272_v62 = vsel %vm199_vm3, %v13768_v22, %v5849_v44  ;;  %v1682_v58 = vcombine.low %v14952_v40, %v15053_v48  ;;  %v5771_v44 = vld [vmem:[#allocation5 + $0x28] sm:$0xff] }
 0x12f   :  { %v6081_v12 = vrot.slane %v6067_v16, %v14310_v11  ;;  %v6082_v35 = vcombine.high %v6074_v52, %v6074_v52  ;;  %v1641_v9 = vrot.slane %v1633_v43, %v14310_v11  ;;  %v6097_v46 = vrot.slane %v6083_v56, %v14310_v11  ;;  %13668 = vmatprep.subr.bf16.mxu1 %v18369_v24 }
 0x130   :  { %v6098_v21 = vcombine.high %v6090_v0, %v6090_v0  ;;  %v6106_v54 = vrot.slane %v6090_v0, %v14310_v11  ;;  %v6187_v16 = vrot.slane %v15272_v62, %v14310_v11  ;;  %v4773_v43 = vrot.slane %v15245_v38, %v14327_v27 }
 0x131   :  { %v7078_v28 = vcombine.low %v6074_v52, %v6081_v12  ;;  %v1649_v15 = vcombine.low %v1641_v9, %v1648_v39  ;;  %v6099_v30 = vcombine.high %v6097_v46, %v6097_v46  ;;  %v6113_v1 = vrot.slane %v6097_v46, %v14310_v11  ;;  %v5847_v12 = vpop.permute.xlu0 %5846 }
 0x132   :  { %v6120_v29 = vrot.slane %v6098_v21, %v14310_v11  ;;  %v6128_v4 = vcombine.high %v6106_v54, %v6106_v54  ;;  %v15279_v36 = vcombine.low %v6082_v35, %v6106_v54  ;;  %v1683_v52 = vcombine.low %v15059_v41, %v15069_v14  ;;  %v5770_v14 = vld [vmem:[#allocation5 + $0x20] sm:$0xff] }
 0x133   :  { %13427 = vmatmul.mubr.msk.f32.gmra.mrb[22].mxu0 %vm1987_vm4, %v1649_v15  ;;  %v6127_v40 = vrot.slane %v6099_v30, %v14310_v11  ;;  %v6129_v48 = vcombine.high %v6113_v1, %v6113_v1  ;;  %v15290_v56 = vrot.slane %v7078_v28, %v14310_v11  ;;  %v6188_v55 = vcombine.high %v6187_v16, %v6187_v16  ;;  %v5853_v15 = vpop.permute.xlu1 %5852 }
 0x134   :  { %v6130_v39 = vcombine.high %v6120_v29, %v6120_v29  ;;  %v15292_v0 = vcombine.low %v6120_v29, %v6128_v4  ;;  %13429 = vmatprep.mubr.msk.f32.mxu0 %vm13868_vm2, %v18322_v10  ;;  %v15299_v9 = vrot.slane %v6187_v16, %v14310_v11  ;;  %v1690_v46 = vrot.slane %v1682_v58, %v14310_v11 }
 0x135   :  { %v1697_v41 = vrot.slane %v1683_v52, %v14310_v11  ;;  %v15305_v54 = vcombine.low %v6127_v40, %v6129_v48  ;;  %v6202_v22 = vrot.slane %v6188_v55, %v14310_v11  ;;  %v4757_v28 = vcombine.low %v15200_v2, %v4756_v49 }
 0x136   :  { %v15303_v21 = vcombine.low %v6130_v39, %v6113_v1  ;;  %v6203_v58 = vcombine.high %v15299_v9, %v15299_v9  ;;  %v13769_v1 = vld [vmem:[%s18311_s1 + $0x20] sm:$0xff]  ;;  %v6131_v19 = vcombine.high %v6127_v40, %v6127_v40  ;;  %v13669_v16 = vpack.c.bf16 %v5771_v44, %v5770_v14  ;;  %v13770_v39 = vld [vmem:[%s18311_s1 + $0x38] sm:$0xff] }
 0x137   :  { %v1698_v29 = vcombine.low %v1690_v46, %v1697_v41  ;;  %v15320_v4 = vsel %vm199_vm3, %v13769_v1, %v5847_v12  ;;  %13480 = vmatprep.mubr.msk.f32.mxu1 %vm4829_vm5, %v4757_v28  ;;  %v15336_v40 = vsel %vm199_vm3, %v13770_v39, %v5853_v15  ;;  %v1730_v55 = vrot.slane %v15071_v31, %v14310_v11 }
 0x138   :  { %v6132_v2 = vcombine.high %v15320_v4, %v15320_v4  ;;  %v6139_v49 = vrot.slane %v15320_v4, %v14310_v11  ;;  %v15329_v52 = vcombine.low %v6202_v22, %v6203_v58  ;;  %13670 = vmatpush3.bf16.msra.mxu1 %v13669_v16  ;;  %v6253_v14 = vcombine.high %v15336_v40, %v15336_v40 }
 0x139   :  { %13430 = vmatmul.mubr.msk.f32.gmra.mrb[24].mxu0 %vm1987_vm4, %v1698_v29  ;;  %v6260_v44 = vrot.slane %v15336_v40, %v14310_v11  ;;  %v1731_v31 = vcombine.low %v1709_v34, %v1716_v18  ;;  %v1732_v22 = vcombine.low %v1723_v33, %v1730_v55  ;;  %13671 = vmatprep.subr.bf16.mxu1 %v18369_v24 }
 0x13a   :  { %v6146_v12 = vrot.slane %v6132_v2, %v14310_v11  ;;  %v6147_v46 = vcombine.high %v6139_v49, %v6139_v49  ;;  %v6155_v41 = vrot.slane %v6139_v49, %v14310_v11  ;;  %13432 = vmatprep.mubr.msk.f32.mxu0 %vm13868_vm2, %v18322_v10  ;;  %v6267_v60 = vrot.slane %v6253_v14, %v14310_v11  ;;  %v5851_v14 = vpop.permute.xlu0 %5850  ;;  %v5773_v49 = vld [vmem:[#allocation5 + $0x38] sm:$0xff] }
 0x13b   :  { %v6268_v2 = vcombine.high %v6260_v44, %v6260_v44  ;;  %v6276_v50 = vrot.slane %v6260_v44, %v14310_v11  ;;  %v5772_v44 = vld [vmem:[#allocation5 + $0x30] sm:$0xff]  ;;  %v15415_v38 = vsel %vm199_vm3, %v13771_v5, %v5851_v14 }
 0x13c   :  { %v6148_v28 = vcombine.high %v6146_v12, %v6146_v12  ;;  %v6162_v15 = vrot.slane %v6146_v12, %v14310_v11  ;;  %v6169_v58 = vrot.slane %v6147_v46, %v14310_v11  ;;  %v6177_v29 = vcombine.high %v6155_v41, %v6155_v41 }
 0x13d   :  { %v15360_v1 = vcombine.low %v6131_v19, %v6155_v41  ;;  %v6269_v16 = vcombine.high %v6267_v60, %v6267_v60  ;;  %v15370_v39 = vrot.slane %v6267_v60, %v14310_v11  ;;  %v6290_v19 = vrot.slane %v6268_v2, %v14310_v11  ;;  %v10787_v2 = vld [vmem:[%s18315_s5 + $0x8] sm:$0xff] }
 0x13e   :  { %v6176_v34 = vrot.slane %v6148_v28, %v14310_v11  ;;  %v6178_v18 = vcombine.high %v6162_v15, %v6162_v15  ;;  %v6179_v42 = vcombine.high %v6169_v58, %v6169_v58  ;;  %v15365_v33 = vcombine.low %v6169_v58, %v6177_v29 }
 0x13f   :  { %v15382_v58 = vrot.slane %v6269_v16, %v14310_v11  ;;  %v7228_v29 = vcombine.low %v6276_v50, %v6290_v19  ;;  %v13176_v60 = vcombine.high %v6276_v50, %v6290_v19  ;;  %v4774_v50 = vcombine.low %v4766_v63, %v4773_v43 }
 0x140   :  { %v6180_v55 = vcombine.high %v6176_v34, %v6176_v34  ;;  %v15373_v12 = vcombine.low %v6179_v42, %v6162_v15  ;;  %v15379_v28 = vcombine.low %v6176_v34, %v6178_v18  ;;  %v10786_v15 = vld [vmem:[%s18315_s5] sm:$0xff]  ;;  %v1739_v34 = vrot.slane %v1731_v31, %v14310_v11 }
 0x141   :  { %v1746_v18 = vrot.slane %v1732_v22, %v14310_v11  ;;  %v15404_v19 = vrot.slane %v7228_v29, %v14310_v11  ;;  %v7275_v46 = vcombine.low %v15370_v39, %v15382_v58  ;;  %v13177_v31 = vcombine.high %v15370_v39, %v15382_v58  ;;  %v5857_v22 = vpop.permute.xlu1 %5856  ;;  %13481 = vmatmul.mubr.msk.f32.gmra.mrb[12].mxu1 %vm4829_vm5, %v4774_v50  ;;  %v5855_v29 = vpop.permute.xlu0 %5854 }
 0x142   :  { %v15401_v16 = vcombine.low %v6180_v55, %v15299_v9  ;;  %v13672_v63 = vpack.c.bf16 %v5773_v49, %v5772_v44  ;;  %v13674_v43 = vpack.c.bf16 %v10787_v2, %v10786_v15  ;;  %v15418_v9 = vrot.slane %v13176_v60, %v14310_v11  ;;  %13499 = vmatprep.mubr.msk.f32.mxu1 %vm13868_vm2, %v18322_v10  ;;  %v13772_v49 = vld [vmem:[%s18311_s1 + $0x48] sm:$0xff] }
 0x143   :  { %v1747_v41 = vcombine.low %v1739_v34, %v1746_v18  ;;  %v15421_v55 = vrot.slane %v7275_v46, %v14310_v11  ;;  %v6204_v39 = vcombine.high %v15415_v38, %v15415_v38  ;;  %v6211_v58 = vrot.slane %v15415_v38, %v14310_v11  ;;  %v13773_v18 = vld [vmem:[%s18311_s1 + $0x40] sm:$0xf] }
 0x144   :  { %13673 = vmatpush3.bf16.msra.mxu1 %v13672_v63  ;;  %v15434_v14 = vsel %vm199_vm3, %v13772_v49, %v5857_v22  ;;  %v1779_v46 = vrot.slane %v15142_v47, %v14310_v11  ;;  %v1780_v44 = vcombine.low %v1758_v37, %v1765_v26  ;;  %13675 = vmatprep.subr.bf16.mxu0 %v13674_v43 }
 0x145   :  { %13433 = vmatmul.mubr.msk.f32.gmra.mrb[26].mxu0 %vm1987_vm4, %v1747_v41  ;;  %v6218_v41 = vrot.slane %v6204_v39, %v14310_v11  ;;  %v6219_v60 = vcombine.high %v6211_v58, %v6211_v58  ;;  %v6227_v15 = vrot.slane %v6211_v58, %v14310_v11  ;;  %v6325_v47 = vcombine.high %v15434_v14, %v15434_v14 }
 0x146   :  { %13435 = vmatprep.mubr.msk.f32.mxu0 %vm13868_vm2, %v18322_v10  ;;  %13677 = vmatpush3.bf16.msra.mxu0 %v13674_v43  ;;  %v6332_v8 = vrot.slane %v15434_v14, %v14310_v11  ;;  %v1781_v17 = vcombine.low %v1772_v51, %v1779_v46  ;;  %v1788_v37 = vrot.slane %v1780_v44, %v14310_v11 }
 0x147   :  { %v6220_v26 = vcombine.high %v6218_v41, %v6218_v41  ;;  %v6234_v2 = vrot.slane %v6218_v41, %v14310_v11  ;;  %v6241_v34 = vrot.slane %v6219_v60, %v14310_v11  ;;  %13500 = vmatmul.mubr.msk.f32.vlgmr.msra.gmra.mrb[14].mxu1 %vm1987_vm4, %v7028_v3  ;;  %v15466_v50 = vsel %vm199_vm3, %v13773_v18, %v5855_v29 }
 0x148   :  { %v6339_v57 = vrot.slane %v6325_v47, %v14310_v11  ;;  %v6340_v51 = vcombine.high %v6332_v8, %v6332_v8  ;;  %v6348_v22 = vrot.slane %v6332_v8, %v14310_v11  ;;  %v1795_v5 = vrot.slane %v1781_v17, %v14310_v11  ;;  %13502 = vmatprep.mubr.msk.f32.mxu1 %vm13868_vm2, %v18322_v10 }
 0x149   :  { %v6248_v20 = vrot.slane %v6220_v26, %v14310_v11  ;;  %v7179_v6 = vcombine.low %v6227_v15, %v6241_v34  ;;  %v13174_v3 = vcombine.high %v6227_v15, %v6241_v34  ;;  %v6308_v63 = vrot.slane %v15466_v50, %v14310_v11 }
 0x14a   :  { %v6341_v43 = vcombine.high %v6339_v57, %v6339_v57  ;;  %v6355_v39 = vrot.slane %v6339_v57, %v14310_v11  ;;  %v6362_v58 = vrot.slane %v6340_v51, %v14310_v11  ;;  %v6370_v49 = vcombine.high %v6348_v22, %v6348_v22 }
 0x14b   :  { %v15479_v46 = vrot.slane %v13177_v31, %v14310_v11  ;;  %v15482_v44 = vrot.slane %v7179_v6, %v14310_v11  ;;  %v7226_v29 = vcombine.low %v6234_v2, %v6248_v20  ;;  %v13175_v41 = vcombine.high %v6234_v2, %v6248_v20  ;;  %v5861_v20 = vpop.permute.xlu1 %5860  ;;  %v5859_v6 = vpop.permute.xlu0 %5858 }
 0x14c   :  { %v6369_v60 = vrot.slane %v6341_v43, %v14310_v11  ;;  %v6371_v15 = vcombine.high %v6355_v39, %v6355_v39  ;;  %v6372_v47 = vcombine.high %v6362_v58, %v6362_v58  ;;  %v15485_v8 = vcombine.low %v6362_v58, %v6370_v49 }
 0x14d   :  { %v15488_v17 = vrot.slane %v13174_v3, %v14310_v11  ;;  %v15491_v26 = vrot.slane %v7226_v29, %v14310_v11  ;;  %v1796_v34 = vcombine.low %v1788_v37, %v1795_v5  ;;  %v6309_v31 = vcombine.high %v6308_v63, %v6308_v63  ;;  %v13774_v37 = vld [vmem:[%s18311_s1 + $0x58] sm:$0xf] }
 0x14e   :  { %v15494_v18 = vrot.slane %v13175_v41, %v14310_v11  ;;  %v15496_v57 = vcombine.low %v6372_v47, %v6355_v39  ;;  %v15498_v2 = vcombine.low %v6369_v60, %v6371_v15  ;;  %v6316_v51 = vrot.slane %v6308_v63, %v14310_v11  ;;  %v10788_v41 = vld [vmem:[%s18315_s5 + $0x10] sm:$0xff] }
 0x14f   :  { %13436 = vmatmul.mubr.msk.f32.gmra.mrb[28].mxu0 %vm1987_vm4, %v1796_v34  ;;  %v6323_v3 = vrot.slane %v6309_v31, %v14310_v11  ;;  %v15507_v5 = vsel %vm199_vm3, %v13774_v37, %v5861_v20  ;;  %v7061_v43 = vcombine.low %v15223_v45, %v15231_v53  ;;  %v7062_v39 = vcombine.low %v15234_v13, %v15243_v23  ;;  %v10789_v45 = vld [vmem:[%s18315_s5 + $0x18] sm:$0xff]  ;;  %v13775_v15 = vld [vmem:[%s18311_s1 + $0x50] sm:$0xff] }
 0x150   :  { %18370 = vst [vmem:[#allocation12_spill] sm:$0xff] %v15507_v5  ;;  %v6324_v49 = vcombine.high %v6316_v51, %v6316_v51  ;;  %v6429_v29 = vrot.slane %v15507_v5, %v14310_v11  ;;  %v15531_v47 = vsel %vm199_vm3, %v13775_v15, %v5859_v6 }
 0x151   :  { %v7277_v53 = vcombine.low %v6316_v51, %v6323_v3  ;;  %v7069_v13 = vrot.slane %v7061_v43, %v14310_v11  ;;  %v7076_v23 = vrot.slane %v7062_v39, %v14310_v11  ;;  %18371 = vst [vmem:[#allocation13_spill] sm:$0xff] %v15531_v47  ;;  %v6374_v37 = vcombine.high %v15531_v47, %v15531_v47 }
 0x152   :  { %v15533_v34 = vcombine.low %v6324_v49, %v6348_v22  ;;  %v6430_v31 = vcombine.high %v6429_v29, %v6429_v29  ;;  %v6437_v20 = vrot.slane %v6429_v29, %v14310_v11  ;;  %v6373_v3 = vcombine.high %v6369_v60, %v6369_v60  ;;  %v5865_v49 = vpop.permute.xlu1 %5864 }
 0x153   :  { %v7077_v51 = vcombine.low %v7069_v13, %v7076_v23  ;;  %v6381_v43 = vrot.slane %v15531_v47, %v14310_v11  ;;  %v13678_v39 = vpack.c.bf16 %v10789_v45, %v10788_v41  ;;  %v15541_v58 = vrot.slane %v7277_v53, %v14310_v11  ;;  %v13776_v53 = vld [vmem:[%s18311_s1 + $0x68] sm:$0xff] }
 0x154   :  { %v6444_v6 = vrot.slane %v6430_v31, %v14310_v11  ;;  %v6445_v15 = vcombine.high %v6437_v20, %v6437_v20  ;;  %v6388_v22 = vrot.slane %v6374_v37, %v14310_v11  ;;  %v15558_v31 = vsel %vm199_vm3, %v13776_v53, %v5865_v49 }
 0x155   :  { %13503 = vmatmul.mubr.msk.f32.gmra.mrb[16].mxu1 %vm1987_vm4, %v7077_v51  ;;  %v6389_v13 = vcombine.high %v6381_v43, %v6381_v43  ;;  %v6397_v60 = vrot.slane %v6381_v43, %v14310_v11  ;;  %13679 = vmatprep.subr.bf16.mxu0 %v13678_v39  ;;  %18372 = vst [vmem:[#allocation14_spill] sm:$0xff] %v15558_v31 }
 0x156   :  { %v15549_v23 = vcombine.low %v6444_v6, %v6445_v15  ;;  %v6390_v41 = vcombine.high %v6388_v22, %v6388_v22  ;;  %v6404_v45 = vrot.slane %v6388_v22, %v14310_v11  ;;  %13505 = vmatprep.mubr.msk.f32.mxu1 %vm13868_vm2, %v18322_v10  ;;  %v6495_v6 = vcombine.high %v15558_v31, %v15558_v31  ;;  %v5869_v10 = vpop.permute.xlu1 %5868 }
 0x157   :  { %v6411_v37 = vrot.slane %v6389_v13, %v14310_v11  ;;  %v6419_v51 = vcombine.high %v6397_v60, %v6397_v60  ;;  %v15561_v43 = vcombine.low %v6373_v3, %v6397_v60  ;;  %13681 = vmatpush3.bf16.msra.mxu0 %v13678_v39  ;;  %v6502_v63 = vrot.slane %v15558_v31, %v14310_v11 }
 0x158   :  { %v6418_v22 = vrot.slane %v6390_v41, %v14310_v11  ;;  %v6420_v29 = vcombine.high %v6404_v45, %v6404_v45  ;;  %v6509_v3 = vrot.slane %v6495_v6, %v14310_v11  ;;  %v5863_v41 = vpop.permute.xlu0 %5862  ;;  %v18373_v6 = vrot.slane %v15279_v36, %v14310_v11  ;;  %v13778_v36 = vld [vmem:[%s18311_s1 + $0x78] sm:$0xff] }
 0x159   :  { %v6421_v13 = vcombine.high %v6411_v37, %v6411_v37  ;;  %v15572_v53 = vcombine.low %v6411_v37, %v6419_v51  ;;  %v6510_v42 = vcombine.high %v6502_v63, %v6502_v63  ;;  %v6518_v15 = vrot.slane %v6502_v63, %v14310_v11 }
 0x15a   :  { %v6422_v60 = vcombine.high %v6418_v22, %v6418_v22  ;;  %v15580_v48 = vcombine.low %v6418_v22, %v6420_v29  ;;  %v6511_v35 = vcombine.high %v6509_v3, %v6509_v3  ;;  %v6525_v49 = vrot.slane %v6509_v3, %v14310_v11 }
 0x15b   :  { %v15578_v30 = vcombine.low %v6421_v13, %v6404_v45  ;;  %v6532_v51 = vrot.slane %v6510_v42, %v14310_v11  ;;  %v7110_v39 = vcombine.low %v15290_v56, %v18373_v6  ;;  %v18374_v63 = vrot.slane %v15303_v21, %v14310_v11  ;;  %v13777_v42 = vld [vmem:[%s18311_s1 + $0x60] sm:$0xff] }
 0x15c   :  { %v18375_v29 = vrot.slane %v15292_v0, %v14310_v11  ;;  %v15596_v22 = vcombine.low %v6422_v60, %v6437_v20  ;;  %v6539_v13 = vrot.slane %v6511_v35, %v14310_v11  ;;  %v15603_v3 = vsel %vm199_vm3, %v13777_v42, %v5863_v41  ;;  %v5867_v5 = vpop.permute.xlu0 %5866 }
 0x15d   :  { %v15609_v56 = vsel %vm199_vm3, %v13778_v36, %v5869_v10  ;;  %v7472_v0 = vcombine.low %v6518_v15, %v6532_v51  ;;  %v13180_v21 = vcombine.high %v6518_v15, %v6532_v51  ;;  %v7118_v20 = vrot.slane %v7110_v39, %v14310_v11 }
 0x15e   :  { %v7111_v45 = vcombine.low %v18375_v29, %v18374_v63  ;;  %18376 = vst [vmem:[#allocation15_spill] sm:$0xff] %v15609_v56  ;;  %v7519_v6 = vcombine.low %v6525_v49, %v6539_v13  ;;  %v6446_v41 = vcombine.high %v15603_v3, %v15603_v3  ;;  %v6453_v63 = vrot.slane %v15603_v3, %v14310_v11 }
 0x15f   :  { %v15620_v29 = vrot.slane %v7472_v0, %v14310_v11  ;;  %v13181_v10 = vcombine.high %v6525_v49, %v6539_v13  ;;  %v6567_v15 = vcombine.high %v15609_v56, %v15609_v56  ;;  %v15625_v39 = vrot.slane %v13180_v21, %v14310_v11 }
 0x160   :  { %v7125_v35 = vrot.slane %v7111_v45, %v14310_v11  ;;  %v15628_v51 = vrot.slane %v7519_v6, %v14310_v11  ;;  %v6460_v45 = vrot.slane %v6446_v41, %v14310_v11  ;;  %v6461_v36 = vcombine.high %v6453_v63, %v6453_v63 }
 0x161   :  { %v6469_v60 = vrot.slane %v6453_v63, %v14310_v11  ;;  %v6574_v49 = vrot.slane %v15609_v56, %v14310_v11  ;;  %v6581_v13 = vrot.slane %v6567_v15, %v14310_v11  ;;  %v7137_v0 = vrot.slane %v15305_v54, %v14310_v11 }
 0x162   :  { %v7126_v42 = vcombine.low %v7118_v20, %v7125_v35  ;;  %v6462_v21 = vcombine.high %v6460_v45, %v6460_v45  ;;  %v6476_v20 = vrot.slane %v6460_v45, %v14310_v11  ;;  %v6483_v35 = vrot.slane %v6461_v36, %v14310_v11 }
 0x163   :  { %v18377_v6 = vmov 0.0   ;;  %v18378_v41 = vrot.slane %v15373_v12, %v14310_v11  ;;  %v18379_v63 = vrot.slane %v15365_v33, %v14310_v11  ;;  %v6582_v37 = vcombine.high %v6574_v49, %v6574_v49 }
 0x164   :  { %13506 = vmatmul.mubr.msk.f32.gmra.mrb[18].mxu1 %vm1987_vm4, %v7126_v42  ;;  %v6583_v15 = vcombine.high %v6581_v13, %v6581_v13  ;;  %v6590_v24 = vrot.slane %v6574_v49, %v14310_v11  ;;  %v6597_v54 = vrot.slane %v6581_v13, %v14310_v11  ;;  %v6490_v45 = vrot.slane %v6462_v21, %v14310_v11 }
 0x165   :  { %13508 = vmatprep.mubr.msk.f32.mxu1 %vm13868_vm2, %v18377_v6  ;;  %v7160_v42 = vcombine.low %v18379_v63, %v18378_v41  ;;  %v7423_v59 = vcombine.low %v6469_v60, %v6483_v35  ;;  %v13178_v36 = vcombine.high %v6469_v60, %v6483_v35  ;;  %v18380_v56 = vrot.slane %v15360_v1, %v14310_v11  ;;  %v10839_v35 = vpop.permute.xlu1 %10838 }
 0x166   :  { %v6604_v12 = vrot.slane %v6582_v37, %v14310_v11  ;;  %v15656_v33 = vrot.slane %v6583_v15, %v14310_v11  ;;  %v6612_v41 = vcombine.high %v6590_v24, %v6590_v24  ;;  %v6613_v63 = vcombine.high %v6597_v54, %v6597_v54 }
 0x167   :  { %v7159_v31 = vcombine.low %v7137_v0, %v18380_v56  ;;  %v15659_v49 = vrot.slane %v13181_v10, %v14310_v11  ;;  %v15662_v13 = vrot.slane %v7423_v59, %v14310_v11  ;;  %v7470_v21 = vcombine.low %v6476_v20, %v6490_v45 }
 0x168   :  { %v13179_v60 = vcombine.high %v6476_v20, %v6490_v45  ;;  %v15665_v1 = vrot.slane %v13178_v36, %v14310_v11  ;;  %v6614_v56 = vcombine.high %v6604_v12, %v6604_v12  ;;  %v15667_v0 = vcombine.low %v6604_v12, %v6612_v41  ;;  %v13779_v20 = vld [vmem:[%s18311_s1 + $0x70] sm:$0xf] }
 0x169   :  { %v15670_v37 = vcombine.low %v15656_v33, %v6613_v63  ;;  %v15673_v15 = vrot.slane %v7470_v21, %v14310_v11  ;;  %v7167_v10 = vrot.slane %v7159_v31, %v14310_v11  ;;  %v7174_v59 = vrot.slane %v7160_v42, %v14310_v11 }
 0x16a   :  { %18381 = vst [vmem:[#allocation16_spill] sm:$0xff] %v15667_v0  ;;  %v15681_v45 = vsel %vm199_vm3, %v13779_v20, %v5867_v5  ;;  %v15684_v36 = vrot.slane %v13179_v60, %v14310_v11  ;;  %v15686_v12 = vcombine.low %v6614_v56, %v6597_v54  ;;  %v10910_v31 = vsel %vm1987_vm4, %v15077_v61, %v10839_v35  ;;  %v5871_v5 = vpop.permute.xlu0 %5870 }
 0x16b   :  { %18382 = vst [vmem:[#allocation17_spill] sm:$0xff] %v15681_v45  ;;  %v6550_v41 = vrot.slane %v15681_v45, %v14310_v11  ;;  %v7175_v63 = vcombine.low %v7167_v10, %v7174_v59  ;;  %v10962_v21 = vcombine.high %v10910_v31, %v10910_v31  ;;  %v10969_v47 = vrot.slane %v10910_v31, %v14327_v27 }
 0x16c   :  { %18383 = vst [vmem:[#allocation18_spill] sm:$0xff] %v15686_v12  ;;  %v7186_v54 = vrot.slane %v15379_v28, %v14310_v11  ;;  %v7193_v56 = vrot.slane %v15401_v16, %v14310_v11  ;;  %v18384_v59 = vrot.slane %v15329_v52, %v14310_v11  ;;  %v13780_v16 = vld [vmem:[%s18311_s1 + $0x80] sm:$0xff]  ;;  %v10791_v52 = vld [vmem:[%s18315_s5 + $0x28] sm:$0xff]  ;;  %v6615_v0 = vcombine.high %v15656_v33, %v15656_v33 }
 0x16d   :  { %v6551_v20 = vcombine.high %v6550_v41, %v6550_v41  ;;  %v6558_v60 = vrot.slane %v6550_v41, %v14310_v11  ;;  %13509 = vmatmul.mubr.msk.f32.gmra.mrb[20].mxu1 %vm1987_vm4, %v7175_v63  ;;  %v10976_v35 = vrot.slane %v10962_v21, %v14327_v27  ;;  %v10977_v10 = vcombine.high %v10969_v47, %v10969_v47  ;;  %v10790_v21 = vld [vmem:[%s18315_s5 + $0x20] sm:$0xff] }
 0x16e   :  { %v7209_v31 = vcombine.low %v18384_v59, %v15482_v44  ;;  %13511 = vmatprep.mubr.msk.f32.mxu1 %vm13868_vm2, %v18377_v6  ;;  %v7208_v28 = vcombine.low %v7186_v54, %v7193_v56  ;;  %v15715_v63 = vsel %vm199_vm3, %v13780_v16, %v5871_v5 }
 0x16f   :  { %v6565_v41 = vrot.slane %v6551_v20, %v14310_v11  ;;  %v6566_v42 = vcombine.high %v6558_v60, %v6558_v60  ;;  %18385 = vst [vmem:[#allocation19_spill] sm:$0xff] %v15715_v63  ;;  %v10978_v44 = vcombine.high %v10976_v35, %v10976_v35  ;;  %v15723_v20 = vcombine.low %v10969_v47, %v10977_v10 }
 0x170   :  { %v7223_v54 = vrot.slane %v7209_v31, %v14310_v11  ;;  %v6616_v56 = vcombine.high %v15715_v63, %v15715_v63  ;;  %v7216_v5 = vrot.slane %v7208_v28, %v14310_v11  ;;  %v6623_v16 = vrot.slane %v15715_v63, %v14310_v11 }
 0x171   :  { %v7521_v59 = vcombine.low %v6558_v60, %v6565_v41  ;;  %v7522_v61 = vcombine.low %v6566_v42, %v6590_v24  ;;  %v15731_v45 = vcombine.low %v10976_v35, %v10978_v44  ;;  %v13682_v10 = vpack.c.bf16 %v10791_v52, %v10790_v21  ;;  %v5873_v44 = vpop.permute.xlu1 %5872  ;;  %v13781_v52 = vld [vmem:[%s18311_s1 + $0x88] sm:$0xf] }
 0x172   :  { %v6630_v47 = vrot.slane %v6616_v56, %v14310_v11  ;;  %v7224_v60 = vcombine.low %v7216_v5, %v7223_v54  ;;  %v6631_v24 = vcombine.high %v6623_v16, %v6623_v16  ;;  %v6639_v28 = vrot.slane %v6623_v16, %v14310_v11 }
 0x173   :  { %v7543_v31 = vrot.slane %v7521_v59, %v14310_v11  ;;  %v7550_v42 = vrot.slane %v7522_v61, %v14310_v11  ;;  %13683 = vmatprep.subr.bf16.mxu0 %v13682_v10  ;;  %v15750_v61 = vsel %vm199_vm3, %v13781_v52, %v5873_v44 }
 0x174   :  { %v6632_v41 = vcombine.high %v6630_v47, %v6630_v47  ;;  %v6646_v35 = vrot.slane %v6630_v47, %v14310_v11  ;;  %13512 = vmatmul.mubr.msk.f32.gmra.mrb[22].mxu1 %vm1987_vm4, %v7224_v60  ;;  %v6653_v21 = vrot.slane %v6631_v24, %v14310_v11  ;;  %13685 = vmatpush3.bf16.msra.mxu0 %v13682_v10  ;;  %v10841_v24 = vpop.permute.xlu0 %10840 }
 0x175   :  { %18386 = vst [vmem:[#allocation20_spill] sm:$0xff] %v15750_v61  ;;  %v6661_v56 = vcombine.high %v6639_v28, %v6639_v28  ;;  %v15753_v5 = vcombine.low %v6615_v0, %v6639_v28  ;;  %13514 = vmatprep.mubr.msk.f32.mxu1 %vm13868_vm2, %v18377_v6  ;;  %v6671_v47 = vrot.slane %v15750_v61, %v14310_v11 }
 0x176   :  { %v6660_v54 = vrot.slane %v6632_v41, %v14310_v11  ;;  %v6662_v59 = vcombine.high %v6646_v35, %v6646_v35  ;;  %v6663_v16 = vcombine.high %v6653_v21, %v6653_v21  ;;  %v7257_v10 = vcombine.low %v15488_v17, %v15491_v26  ;;  %v10792_v17 = vld [vmem:[%s18315_s5 + $0x30] sm:$0xff] }
 0x177   :  { %v7258_v60 = vcombine.low %v15494_v18, %v15404_v19  ;;  %v15763_v44 = vcombine.low %v7543_v31, %v7550_v42  ;;  %v15765_v41 = vcombine.low %v6653_v21, %v6661_v56  ;;  %v6672_v12 = vcombine.high %v6671_v47, %v6671_v47  ;;  %v10793_v19 = vld [vmem:[%s18315_s5 + $0x38] sm:$0xff]  ;;  %v10845_v21 = vpop.permute.xlu1 %10844 }
 0x178   :  { %v7619_v0 = vcombine.low %v6660_v54, %v6662_v59  ;;  %v6664_v28 = vcombine.high %v6660_v54, %v6660_v54  ;;  %v6679_v33 = vrot.slane %v6671_v47, %v14310_v11  ;;  %v7265_v61 = vrot.slane %v7257_v10, %v14310_v11 }
 0x179   :  { %v15777_v26 = vcombine.low %v6663_v16, %v6646_v35  ;;  %v7272_v31 = vrot.slane %v7258_v60, %v14310_v11  ;;  %v10911_v42 = vsel %vm1987_vm4, %v15156_v25, %v10841_v24  ;;  %v6686_v54 = vrot.slane %v6672_v12, %v14310_v11  ;;  %v5875_v24 = vpop.permute.xlu0 %5874 }
 0x17a   :  { %v6687_v56 = vcombine.high %v6679_v33, %v6679_v33  ;;  %v7620_v59 = vcombine.low %v6664_v28, %v6679_v33  ;;  %v7641_v47 = vrot.slane %v7619_v0, %v14310_v11  ;;  %v10979_v52 = vcombine.high %v10911_v42, %v10911_v42  ;;  %v10794_v0 = vld [vmem:[%s18315_s5 + $0x40] sm:$0xff]  ;;  %v10795_v28 = vld [vmem:[%s18315_s5 + $0x48] sm:$0xff] }
 0x17b   :  { %v7273_v10 = vcombine.low %v7265_v61, %v7272_v31  ;;  %v10986_v35 = vrot.slane %v10911_v42, %v14327_v27  ;;  %v13686_v16 = vpack.c.bf16 %v10793_v19, %v10792_v17  ;;  %v10913_v60 = vsel %vm1987_vm4, %v15253_v32, %v10845_v21  ;;  %v10843_v42 = vpop.permute.xlu1 %10842 }
 0x17c   :  { %v7648_v63 = vrot.slane %v7620_v59, %v14310_v11  ;;  %v15788_v18 = vcombine.low %v6686_v54, %v6687_v56  ;;  %v7306_v25 = vcombine.low %v15418_v9, %v15421_v55  ;;  %v10993_v12 = vrot.slane %v10979_v52, %v14327_v27  ;;  %v13782_v56 = vld [vmem:[%s18311_s1 + $0x90] sm:$0xff] }
 0x17d   :  { %13515 = vmatmul.mubr.msk.f32.gmra.mrb[24].mxu1 %vm1987_vm4, %v7273_v10  ;;  %v10994_v33 = vcombine.high %v10986_v35, %v10986_v35  ;;  %13687 = vmatprep.subr.bf16.mxu0 %v13686_v16  ;;  %v11003_v61 = vcombine.high %v10913_v60, %v10913_v60  ;;  %v7634_v32 = vrot.slane %v15777_v26, %v14310_v11 }
 0x17e   :  { %v15804_v9 = vcombine.low %v7641_v47, %v7648_v63  ;;  %13517 = vmatprep.mubr.msk.f32.mxu1 %vm13868_vm2, %v18377_v6  ;;  %13689 = vmatpush3.bf16.msra.mxu0 %v13686_v16  ;;  %v11010_v55 = vrot.slane %v10913_v60, %v14327_v27  ;;  %v10995_v52 = vcombine.high %v10993_v12, %v10993_v12 }
 0x17f   :  { %v11325_v17 = vcombine.low %v10986_v35, %v10994_v33  ;;  %v11017_v19 = vrot.slane %v11003_v61, %v14327_v27  ;;  %v7314_v31 = vrot.slane %v7306_v25, %v14310_v11  ;;  %v18387_v54 = vcombine.low %v15479_v46, %v15541_v58 }
 0x180   :  { %v11018_v21 = vcombine.high %v11010_v55, %v11010_v55  ;;  %v15819_v59 = vsel %vm199_vm3, %v13782_v56, %v5875_v24  ;;  %v13690_v47 = vpack.c.bf16 %v10795_v28, %v10794_v0  ;;  %v7676_v10 = vrot.slane %v15788_v18, %v14310_v11  ;;  %v10847_v28 = vpop.permute.xlu0 %10846 }
 0x181   :  { %v7321_v63 = vrot.slane %v18387_v54, %v14310_v11  ;;  %v11326_v35 = vcombine.low %v10993_v12, %v10995_v52  ;;  %v6688_v16 = vcombine.high %v15819_v59, %v15819_v59  ;;  %v6695_v60 = vrot.slane %v15819_v59, %v14310_v11 }
 0x182   :  { %v15827_v46 = vcombine.low %v11018_v21, %v11017_v19  ;;  %13691 = vmatprep.subr.bf16.mxu0 %v13690_v47  ;;  %v10912_v25 = vsel %vm1987_vm4, %v15217_v7, %v10843_v42  ;;  %v7354_v33 = vrot.slane %v15498_v2, %v14310_v11  ;;  %v11333_v61 = vrot.slane %v11325_v17, %v14327_v27 }
 0x183   :  { %v7322_v58 = vcombine.low %v7314_v31, %v7321_v63  ;;  %v11340_v12 = vrot.slane %v11326_v35, %v14327_v27  ;;  %v6702_v24 = vrot.slane %v6688_v16, %v14310_v11  ;;  %v6703_v0 = vcombine.high %v6695_v60, %v6695_v60  ;;  %13693 = vmatpush3.bf16.msra.mxu0 %v13690_v47 }
 0x184   :  { %v6711_v52 = vrot.slane %v6695_v60, %v14310_v11  ;;  %v11002_v31 = vrot.slane %v10912_v25, %v14327_v27  ;;  %v18388_v7 = vrot.slane %v15485_v8, %v14310_v11  ;;  %v18389_v2 = vrot.slane %v15533_v34, %v14310_v11 }
 0x185   :  { %13518 = vmatmul.mubr.msk.f32.gmra.mrb[26].mxu1 %vm1987_vm4, %v7322_v58  ;;  %v18390_v42 = vrot.slane %v15496_v57, %v14310_v11  ;;  %v11357_v54 = vrot.slane %v15827_v46, %v14327_v27  ;;  %v6704_v63 = vcombine.high %v6702_v24, %v6702_v24  ;;  %v6718_v56 = vrot.slane %v6702_v24, %v14310_v11  ;;  %v10851_v57 = vpop.permute.xlu1 %10850  ;;  %v10796_v24 = vld [vmem:[%s18315_s5 + $0x50] sm:$0xff] }
 0x186   :  { %v7355_v17 = vcombine.low %v18389_v2, %v18388_v7  ;;  %v6725_v47 = vrot.slane %v6703_v0, %v14310_v11  ;;  %13520 = vmatprep.mubr.msk.f32.mxu1 %vm13868_vm2, %v18377_v6  ;;  %v15854_v8 = vcombine.low %v11002_v31, %v11010_v55  ;;  %v11019_v16 = vcombine.high %v11017_v19, %v11017_v19  ;;  %v10797_v55 = vld [vmem:[%s18315_s5 + $0x58] sm:$0xff] }
 0x187   :  { %v7356_v21 = vcombine.low %v18390_v42, %v7354_v33  ;;  %v6732_v60 = vrot.slane %v6704_v63, %v14310_v11  ;;  %v10914_v33 = vsel %vm1987_vm4, %v15320_v4, %v10847_v28  ;;  %v11341_v0 = vcombine.low %v11333_v61, %v11340_v12  ;;  %v5877_v28 = vpop.permute.xlu0 %5876 }
 0x188   :  { %v7363_v34 = vrot.slane %v7355_v17, %v14310_v11  ;;  %v7667_v58 = vcombine.low %v6711_v52, %v6725_v47  ;;  %v13182_v25 = vcombine.high %v6711_v52, %v6725_v47  ;;  %v11020_v7 = vcombine.high %v10914_v33, %v10914_v33 }
 0x189   :  { %v7370_v35 = vrot.slane %v7356_v21, %v14310_v11  ;;  %v11027_v19 = vrot.slane %v10914_v33, %v14327_v27  ;;  %v7669_v2 = vcombine.low %v6718_v56, %v6732_v60  ;;  %v13183_v52 = vcombine.high %v6718_v56, %v6732_v60 }
 0x18a   :  { %v15869_v17 = vrot.slane %v7667_v58, %v14310_v11  ;;  %v11350_v4 = vrot.slane %v15854_v8, %v14327_v27  ;;  %v11034_v42 = vrot.slane %v11020_v7, %v14327_v27  ;;  %v13694_v61 = vpack.c.bf16 %v10797_v55, %v10796_v24  ;;  %v13783_v55 = vld [vmem:[%s18311_s1 + $0x98] sm:$0xff] }
 0x18b   :  { %v7371_v31 = vcombine.low %v7363_v34, %v7370_v35  ;;  %v11035_v21 = vcombine.high %v11027_v19, %v11027_v19  ;;  %v15875_v63 = vcombine.low %v11019_v16, %v11027_v19  ;;  %v15878_v12 = vrot.slane %v13182_v25, %v14310_v11 }
 0x18c   :  { %v15881_v47 = vrot.slane %v7669_v2, %v14310_v11  ;;  %v18391_v56 = vrot.slane %v15731_v45, %v14327_v27  ;;  %v18392_v34 = vrot.slane %v15723_v20, %v14327_v27  ;;  %v10916_v16 = vsel %vm1987_vm4, %v15415_v38, %v10851_v57  ;;  %13695 = vmatprep.subr.bf16.mxu0 %v13694_v61  ;;  %v10849_v45 = vpop.permute.xlu1 %10848 }
 0x18d   :  { %13521 = vmatmul.mubr.msk.f32.gmra.mrb[28].mxu1 %vm1987_vm4, %v7371_v31  ;;  %v15894_v60 = vrot.slane %v13183_v52, %v14310_v11  ;;  %v15896_v58 = vcombine.low %v11035_v21, %v11034_v42  ;;  %v11044_v25 = vcombine.high %v10916_v16, %v10916_v16  ;;  %v11051_v33 = vrot.slane %v10916_v16, %v14327_v27 }
 0x18e   :  { %v11324_v35 = vcombine.low %v18392_v34, %v18391_v56  ;;  %13523 = vmatprep.mubr.msk.f32.mxu1 %vm13868_vm2, %v18377_v6  ;;  %13697 = vmatpush3.bf16.msra.mxu0 %v13694_v61  ;;  %v7403_v20 = vrot.slane %v15580_v48, %v14310_v11  ;;  %v18393_v24 = vrot.slane %v15572_v53, %v14310_v11 }
 0x18f   :  { %v18394_v38 = vrot.slane %v15561_v43, %v14310_v11  ;;  %v15912_v31 = vsel %vm199_vm3, %v13783_v55, %v5877_v28  ;;  %v11367_v7 = vrot.slane %v15875_v63, %v14327_v27  ;;  %v11058_v19 = vrot.slane %v11044_v25, %v14327_v27  ;;  %v10853_v63 = vpop.permute.xlu0 %10852 }
 0x190   :  { %13580 = vmatprep.mubr.msk.f32.mxu0 %vm4829_vm5, %v11324_v35  ;;  %v11059_v48 = vcombine.high %v11051_v33, %v11051_v33  ;;  %v6737_v53 = vcombine.high %v15912_v31, %v15912_v31  ;;  %v11374_v43 = vrot.slane %v15896_v58, %v14327_v27  ;;  %v18395_v2 = vrot.slane %v15578_v30, %v14310_v11 }
 0x191   :  { %v7404_v57 = vcombine.low %v18394_v38, %v18393_v24  ;;  %v6744_v28 = vrot.slane %v15912_v31, %v14310_v11  ;;  %v10915_v21 = vsel %vm1987_vm4, %v15272_v62, %v10849_v45  ;;  %v11060_v61 = vcombine.high %v11058_v19, %v11058_v19  ;;  %13581 = vmatmul.mubr.msk.f32.vlgmr.msra.gmra.mrb[30].mxu0 %vm4829_vm5, %v11341_v0  ;;  %v5879_v24 = vpop.permute.xlu1 %5878 }
 0x192   :  { %v7405_v52 = vcombine.low %v18395_v2, %v7403_v20  ;;  %v15928_v56 = vcombine.low %v11051_v33, %v11059_v48  ;;  %v6751_v35 = vrot.slane %v6737_v53, %v14310_v11  ;;  %v11036_v58 = vcombine.high %v11034_v42, %v11034_v42 }
 0x193   :  { %v7412_v34 = vrot.slane %v7404_v57, %v14310_v11  ;;  %v6752_v30 = vcombine.high %v6744_v28, %v6744_v28  ;;  %v11043_v25 = vrot.slane %v10915_v21, %v14327_v27  ;;  %v15937_v62 = vcombine.low %v11058_v19, %v11060_v61  ;;  %v10857_v61 = vpop.permute.xlu0 %10856 }
 0x194   :  { %v7419_v16 = vrot.slane %v7405_v52, %v14310_v11  ;;  %v11391_v20 = vrot.slane %v15928_v56, %v14327_v27  ;;  %v6753_v45 = vcombine.high %v6751_v35, %v6751_v35  ;;  %v6760_v33 = vrot.slane %v6744_v28, %v14310_v11 }
 0x195   :  { %v6774_v57 = vrot.slane %v6752_v30, %v14310_v11  ;;  %v15941_v55 = vcombine.low %v11036_v58, %v11043_v25  ;;  %v7431_v0 = vrot.slane %v15596_v22, %v14310_v11  ;;  %v6767_v42 = vrot.slane %v6751_v35, %v14310_v11 }
 0x196   :  { %v7420_v38 = vcombine.low %v7412_v34, %v7419_v16  ;;  %v6781_v48 = vrot.slane %v6753_v45, %v14310_v11  ;;  %v7454_v19 = vcombine.low %v15662_v13, %v15665_v1  ;;  %v10917_v53 = vsel %vm1987_vm4, %v15336_v40, %v10853_v63 }
 0x197   :  { %v11401_v2 = vrot.slane %v15937_v62, %v14327_v27  ;;  %v7716_v52 = vcombine.low %v6760_v33, %v6774_v57  ;;  %v13184_v28 = vcombine.high %v6760_v33, %v6774_v57  ;;  %v18396_v22 = vrot.slane %v15549_v23, %v14310_v11  ;;  %v10855_v33 = vpop.permute.xlu1 %10854  ;;  %v18403_v62 = vld [vmem:[#allocation12_spill] sm:$0xff] }
 0x198   :  { %13524 = vmatmul.mubr.msk.f32.gmra.mrb[30].mxu1 %vm1987_vm4, %v7420_v38  ;;  %v7718_v34 = vcombine.low %v6767_v42, %v6781_v48  ;;  %v11384_v13 = vrot.slane %v15941_v55, %v14327_v27  ;;  %v7468_v40 = vrot.slane %v7454_v19, %v14310_v11  ;;  %v11061_v1 = vcombine.high %v10917_v53, %v10917_v53  ;;  %v13784_v55 = vld [vmem:[%s18311_s1 + $0xa0] sm:$0xf] }
 0x199   :  { %v7453_v21 = vcombine.low %v7431_v0, %v18396_v22  ;;  %13526 = vmatprep.mubr.msk.f32.mxu1 %vm13868_vm2, %v18377_v6  ;;  %v15963_v63 = vrot.slane %v7716_v52, %v14310_v11  ;;  %v13185_v35 = vcombine.high %v6767_v42, %v6781_v48  ;;  %v11068_v23 = vrot.slane %v10917_v53, %v14327_v27  ;;  %v5881_v52 = vpop.permute.xlu0 %5880 }
 0x19a   :  { %v15968_v30 = vrot.slane %v13184_v28, %v14310_v11  ;;  %v15971_v58 = vrot.slane %v7718_v34, %v14310_v11  ;;  %v11075_v25 = vrot.slane %v11061_v1, %v14327_v27  ;;  %v11358_v45 = vcombine.low %v11350_v4, %v11357_v54  ;;  %v15988_v48 = vpop.f32.mrb[0].mxu1 }
 0x19b   :  { %v7461_v16 = vrot.slane %v7453_v21, %v14310_v11  ;;  %v11076_v57 = vcombine.high %v11068_v23, %v11068_v23  ;;  %v15984_v0 = vsel %vm199_vm3, %v13784_v55, %v5879_v24  ;;  %v7502_v42 = vcombine.low %v15673_v15, %v15684_v36  ;;  %v15995_v19 = vpop.f32.mrb[1].mxu1 }
 0x19c   :  { %v11077_v46 = vcombine.high %v11075_v25, %v11075_v25  ;;  %13583 = vmatprep.mubr.msk.f32.mxu0 %vm4829_vm5, %v11358_v45  ;;  %v6792_v54 = vrot.slane %v15984_v0, %v14310_v11  ;;  %v7503_v8 = vcombine.low %v15620_v29, %v15625_v39  ;;  %v11375_v4 = vcombine.low %v11367_v7, %v11374_v43 }
 0x19d   :  { %v7469_v38 = vcombine.low %v7461_v16, %v7468_v40  ;;  %v15998_v24 = vcombine.low %v11068_v23, %v11076_v57  ;;  %v7510_v15 = vrot.slane %v7502_v42, %v14310_v11  ;;  %v10919_v36 = vsel %vm1987_vm4, %v15434_v14, %v10857_v61 }
 0x19e   :  { %v10918_v53 = vsel %vm1987_vm4, %v15466_v50, %v10855_v33  ;;  %v16005_v28 = vcombine.low %v11075_v25, %v11077_v46  ;;  %v6793_v29 = vcombine.high %v6792_v54, %v6792_v54  ;;  %v6800_v39 = vrot.slane %v6792_v54, %v14310_v11  ;;  %13584 = vmatmul.mubr.msk.f32.gmra.mrb[32].mxu0 %vm4829_vm5, %v11375_v4  ;;  %v10863_v25 = vpop.permute.xlu1 %10862  ;;  %v10859_v46 = vpop.permute.xlu0 %10858 }
 0x19f   :  { %13527 = vmatmul.mubr.msk.f32.gmra.mrb[32].mxu1 %vm1987_vm4, %v7469_v38  ;;  %v7517_v7 = vrot.slane %v7503_v8, %v14310_v11  ;;  %v16012_v43 = vrot.slane %v13185_v35, %v14310_v11  ;;  %v11085_v14 = vcombine.high %v10919_v36, %v10919_v36  ;;  %v11092_v22 = vrot.slane %v10919_v36, %v14327_v27  ;;  %v13785_v38 = vld [vmem:[%s18311_s1 + $0xa8] sm:$0xff] }
 0x1a0   :  { %13529 = vmatprep.mubr.msk.f32.mxu1 %vm13868_vm2, %v18377_v6  ;;  %v11084_v50 = vrot.slane %v10918_v53, %v14327_v27  ;;  %v11408_v21 = vrot.slane %v15998_v24, %v14327_v27  ;;  %v11418_v61 = vrot.slane %v16005_v28, %v14327_v27  ;;  %v6807_v34 = vrot.slane %v6793_v29, %v14310_v11 }
 0x1a1   :  { %v7518_v40 = vcombine.low %v7510_v15, %v7517_v7  ;;  %v16023_v1 = vrot.slane %v11085_v14, %v14327_v27  ;;  %v11100_v35 = vcombine.high %v11092_v22, %v11092_v22  ;;  %v7551_v23 = vcombine.low %v15628_v51, %v15659_v49 }
 0x1a2   :  { %v16025_v16 = vcombine.low %v11084_v50, %v11092_v22  ;;  %v7765_v45 = vcombine.low %v6800_v39, %v6807_v34  ;;  %v7566_v33 = vrot.slane %v15763_v44, %v14310_v11  ;;  %v16036_v57 = vsel %vm199_vm3, %v13785_v38, %v5881_v52  ;;  %v18397_v34 = vld [vmem:[#allocation18_spill] sm:$0xff] }
 0x1a3   :  { %13530 = vmatmul.mubr.msk.f32.gmra.mrb[34].mxu1 %vm1987_vm4, %v7518_v40  ;;  %v11392_v55 = vcombine.low %v11384_v13, %v11391_v20  ;;  %v6808_v42 = vcombine.high %v6800_v39, %v6800_v39  ;;  %v16042_v51 = vcombine.low %v11100_v35, %v16023_v1  ;;  %v7559_v49 = vrot.slane %v7551_v23, %v14310_v11  ;;  %v16062_v53 = vpop.f32.mrb[0].mxu0  ;;  %v18399_v40 = vld [vmem:[#allocation16_spill] sm:$0xff] }
 0x1a4   :  { %13532 = vmatprep.mubr.msk.f32.mxu1 %vm13868_vm2, %v18377_v6  ;;  %v6809_v44 = vcombine.high %v16036_v57, %v16036_v57  ;;  %v16050_v54 = vrot.slane %v7765_v45, %v14310_v11  ;;  %v11425_v56 = vrot.slane %v16025_v16, %v14327_v27  ;;  %v6816_v20 = vrot.slane %v16036_v57, %v14310_v11  ;;  %v13395_v14 = vpop.f32.mrb[1].mxu0 }
 0x1a5   :  { %13586 = vmatprep.mubr.msk.f32.mxu0 %vm4829_vm5, %v11392_v55  ;;  %v10922_v13 = vsel %vm1987_vm4, %v15603_v3, %v10863_v25  ;;  %v7567_v8 = vcombine.low %v7559_v49, %v7566_v33  ;;  %v7592_v36 = vrot.slane %v15670_v37, %v14310_v11  ;;  %v11435_v52 = vrot.slane %v16042_v51, %v14327_v27  ;;  %v10861_v55 = vpop.permute.xlu1 %10860 }
 0x1a6   :  { %v6823_v4 = vrot.slane %v6809_v44, %v14310_v11  ;;  %v11126_v15 = vcombine.high %v10922_v13, %v10922_v13  ;;  %v6824_v29 = vcombine.high %v6816_v20, %v6816_v20  ;;  %v6832_v39 = vrot.slane %v6816_v20, %v14310_v11 }
 0x1a7   :  { %v11133_v7 = vrot.slane %v10922_v13, %v14327_v27  ;;  %13533 = vmatmul.mubr.msk.f32.gmra.mrb[36].mxu1 %vm1987_vm4, %v7567_v8  ;;  %v18398_v37 = vrot.slane %v18397_v34, %v14310_v11  ;;  %v18400_v35 = vrot.slane %v18399_v40, %v14310_v11  ;;  %v18401_v13 = vrot.slane %v15753_v5, %v14310_v11  ;;  %v16096_v34 = vpop.f32.mrb[2].mxu1 }
 0x1a8   :  { %v6825_v3 = vcombine.high %v6823_v4, %v6823_v4  ;;  %v6839_v22 = vrot.slane %v6823_v4, %v14310_v11  ;;  %v11140_v50 = vrot.slane %v11126_v15, %v14327_v27  ;;  %v6846_v25 = vrot.slane %v6824_v29, %v14310_v11  ;;  %13535 = vmatprep.mubr.msk.f32.mxu1 %vm13868_vm2, %v18377_v6  ;;  %v5883_v4 = vpop.permute.xlu0 %5882  ;;  %v16088_v15 = vpop.f32.mrb[2].mxu0 }
 0x1a9   :  { %v7600_v23 = vcombine.low %v18400_v35, %v18398_v37  ;;  %v6854_v45 = vcombine.high %v6832_v39, %v6832_v39  ;;  %v16078_v33 = vcombine.low %v6808_v42, %v6832_v39  ;;  %v11141_v38 = vcombine.high %v11133_v7, %v11133_v7  ;;  %v16104_v35 = vpop.f32.mrb[3].mxu1 }
 0x1aa   :  { %v16083_v49 = vrot.slane %v6825_v3, %v14310_v11  ;;  %v6855_v44 = vcombine.high %v6839_v22, %v6839_v22  ;;  %v11142_v20 = vcombine.high %v11140_v50, %v11140_v50  ;;  %v7601_v8 = vcombine.low %v7592_v36, %v18401_v13  ;;  %v13398_v3 = vpop.f32.mrb[3].mxu0  ;;  %v18402_v13 = vld [vmem:[#allocation13_spill] sm:$0xff] }
 0x1ab   :  { %v6856_v29 = vcombine.high %v6846_v25, %v6846_v25  ;;  %v16092_v39 = vcombine.low %v6846_v25, %v6854_v45  ;;  %v16094_v14 = vcombine.low %v11133_v7, %v11141_v38  ;;  %v7608_v5 = vrot.slane %v7600_v23, %v14310_v11 }
 0x1ac   :  { %v16100_v40 = vcombine.low %v11140_v50, %v11142_v20  ;;  %v7615_v36 = vrot.slane %v7601_v8, %v14310_v11  ;;  %v16111_v7 = vcombine.low %v16083_v49, %v6855_v44  ;;  %v11409_v50 = vcombine.low %v11401_v2, %v11408_v21  ;;  %v18405_v21 = vld [vmem:[#allocation14_spill] sm:$0xff] }
 0x1ad   :  { %v7795_v25 = vrot.slane %v16092_v39, %v14310_v11  ;;  %v16108_v45 = vcombine.low %v6856_v29, %v6839_v22  ;;  %v11469_v23 = vrot.slane %v16094_v14, %v14327_v27  ;;  %v10920_v22 = vsel %vm1987_vm4, %v18402_v13, %v10859_v46 }
 0x1ae   :  { %v11476_v38 = vrot.slane %v16100_v40, %v14327_v27  ;;  %v7616_v20 = vcombine.low %v7608_v5, %v7615_v36  ;;  %13587 = vmatmul.mubr.msk.f32.gmra.mrb[34].mxu0 %vm4829_vm5, %v11409_v50  ;;  %v11101_v44 = vcombine.high %v16023_v1, %v16023_v1  ;;  %v11102_v24 = vcombine.high %v10920_v22, %v10920_v22  ;;  %v5885_v5 = vpop.permute.xlu1 %5884 }
 0x1af   :  { %v11109_v8 = vrot.slane %v10920_v22, %v14327_v27  ;;  %v10921_v2 = vsel %vm1987_vm4, %v18403_v62, %v10861_v55  ;;  %v18404_v46 = vrot.slane %v15765_v41, %v14310_v11  ;;  %v7664_v3 = vrot.slane %v15804_v9, %v14310_v11  ;;  %v10865_v41 = vpop.permute.xlu0 %10864 }
 0x1b0   :  { %13536 = vmatmul.mubr.msk.f32.gmra.mrb[38].mxu1 %vm1987_vm4, %v7616_v20  ;;  %v11125_v29 = vrot.slane %v10921_v2, %v14327_v27  ;;  %v11116_v55 = vrot.slane %v11102_v24, %v14327_v27  ;;  %v13786_v20 = vld [vmem:[%s18311_s1 + $0xb0] sm:$0xff]  ;;  %v11426_v22 = vcombine.low %v11418_v61, %v11425_v56  ;;  %v6857_v24 = vcombine.high %v16083_v49, %v16083_v49 }
 0x1b1   :  { %v7649_v1 = vcombine.low %v18404_v46, %v7634_v32  ;;  %v11117_v36 = vcombine.high %v11109_v8, %v11109_v8  ;;  %v11428_v50 = vcombine.low %v11101_v44, %v11109_v8  ;;  %13538 = vmatprep.mubr.msk.f32.mxu1 %vm13868_vm2, %v18377_v6  ;;  %v16150_v26 = vsel %vm199_vm3, %v13786_v20, %v5883_v4  ;;  %v13787_v8 = vld [vmem:[%s18311_s1 + $0xb8] sm:$0xf] }
 0x1b2   :  { %v6858_v9 = vcombine.high %v16150_v26, %v16150_v26  ;;  %v6865_v13 = vrot.slane %v16150_v26, %v14310_v11  ;;  %v11118_v4 = vcombine.high %v11116_v55, %v11116_v55  ;;  %v16171_v62 = vsel %vm199_vm3, %v13787_v8, %v5885_v5  ;;  %13589 = vmatprep.mubr.msk.f32.mxu0 %vm4829_vm5, %v11426_v22  ;;  %v16176_v61 = vpop.f32.mrb[4].mxu0 }
 0x1b3   :  { %v7657_v32 = vrot.slane %v7649_v1, %v14310_v11  ;;  %v16163_v44 = vcombine.low %v11117_v36, %v11116_v55  ;;  %v11442_v56 = vrot.slane %v11428_v50, %v14327_v27  ;;  %v6913_v5 = vrot.slane %v16171_v62, %v14310_v11  ;;  %v10869_v22 = vpop.permute.xlu0 %10868 }
 0x1b4   :  { %v6872_v16 = vrot.slane %v6858_v9, %v14310_v11  ;;  %v6873_v46 = vcombine.high %v6865_v13, %v6865_v13  ;;  %v6881_v28 = vrot.slane %v6865_v13, %v14310_v11  ;;  %v16181_v1 = vcombine.low %v11118_v4, %v11125_v29 }
 0x1b5   :  { %v7665_v2 = vcombine.low %v7657_v32, %v7664_v3  ;;  %v11452_v49 = vrot.slane %v16163_v44, %v14327_v27  ;;  %v13401_v3 = vpop.f32.mrb[5].mxu0  ;;  %v6914_v50 = vcombine.high %v6913_v5, %v6913_v5  ;;  %v6921_v29 = vrot.slane %v6913_v5, %v14310_v11 }
 0x1b6   :  { %v6874_v55 = vcombine.high %v6872_v16, %v6872_v16  ;;  %v6888_v36 = vrot.slane %v6872_v16, %v14310_v11  ;;  %v6895_v20 = vrot.slane %v6873_v46, %v14310_v11  ;;  %v6903_v32 = vcombine.high %v6881_v28, %v6881_v28 }
 0x1b7   :  { %13539 = vmatmul.mubr.msk.f32.gmra.mrb[40].mxu1 %vm1987_vm4, %v7665_v2  ;;  %v16188_v9 = vcombine.low %v6857_v24, %v6881_v28  ;;  %v7698_v13 = vcombine.low %v7676_v10, %v15869_v17  ;;  %v10867_v24 = vpop.permute.xlu1 %10866  ;;  %v11459_v46 = vrot.slane %v16181_v1, %v14327_v27  ;;  %v6928_v28 = vrot.slane %v6914_v50, %v14310_v11 }
 0x1b8   :  { %13541 = vmatprep.mubr.msk.f32.mxu1 %vm13868_vm2, %v18377_v6  ;;  %v6902_v4 = vrot.slane %v6874_v55, %v14310_v11  ;;  %v6904_v8 = vcombine.high %v6888_v36, %v6888_v36  ;;  %v6905_v2 = vcombine.high %v6895_v20, %v6895_v20  ;;  %v16198_v16 = vcombine.low %v6895_v20, %v6903_v32 }
 0x1b9   :  { %v6929_v3 = vcombine.high %v6921_v29, %v6921_v29  ;;  %v7699_v5 = vcombine.low %v15878_v12, %v15881_v47  ;;  %v7706_v32 = vrot.slane %v7698_v13, %v14310_v11  ;;  %v10923_v50 = vsel %vm1987_vm4, %v18405_v21, %v10865_v41 }
 0x1ba   :  { %v16209_v17 = vcombine.low %v6905_v2, %v6888_v36  ;;  %v6906_v55 = vcombine.high %v6902_v4, %v6902_v4  ;;  %v16215_v42 = vcombine.low %v6902_v4, %v6904_v8  ;;  %v11143_v47 = vcombine.high %v10923_v50, %v10923_v50  ;;  %v18406_v2 = vld [vmem:[#allocation17_spill] sm:$0xff] }
 0x1bb   :  { %v7865_v20 = vcombine.low %v6928_v28, %v6929_v3  ;;  %v7713_v1 = vrot.slane %v7699_v5, %v14310_v11  ;;  %v11150_v18 = vrot.slane %v10923_v50, %v14327_v27  ;;  %v11443_v36 = vcombine.low %v11435_v52, %v11442_v56  ;;  %v10871_v28 = vpop.permute.xlu0 %10870  ;;  %v10875_v4 = vpop.permute.xlu1 %10874  ;;  %v18407_v56 = vld [vmem:[#allocation15_spill] sm:$0xff] }
 0x1bc   :  { %v7864_v12 = vcombine.low %v6906_v55, %v6921_v29  ;;  %v10924_v13 = vsel %vm1987_vm4, %v18406_v2, %v10867_v24  ;;  %v11157_v21 = vrot.slane %v11143_v47, %v14327_v27  ;;  %v16227_v8 = vpop.f32.mrb[6].mxu0  ;;  %v7747_v51 = vcombine.low %v15894_v60, %v15963_v63  ;;  %v18408_v5 = vld [vmem:[#allocation11_spill] sm:$0xff] }
 0x1bd   :  { %v7893_v37 = vrot.slane %v7865_v20, %v14310_v11  ;;  %v7714_v10 = vcombine.low %v7706_v32, %v7713_v1  ;;  %v11158_v41 = vcombine.high %v11150_v18, %v11150_v18  ;;  %v11166_v29 = vrot.slane %v10924_v13, %v14327_v27  ;;  %13590 = vmatmul.mubr.msk.f32.gmra.mrb[36].mxu0 %vm4829_vm5, %v11443_v36  ;;  %v13404_v20 = vpop.f32.mrb[7].mxu0  ;;  %v16238_v32 = vpop.f32.mrb[4].mxu1 }
 0x1be   :  { %v7886_v3 = vrot.slane %v7864_v12, %v14310_v11  ;;  %v7748_v52 = vcombine.low %v15968_v30, %v15971_v58  ;;  %v10925_v24 = vsel %vm1987_vm4, %v18407_v56, %v10869_v22  ;;  %v4237_v55 = vsub.s32 1, %v18408_v5  ;;  %v16246_v63 = vpop.f32.mrb[5].mxu1 }
 0x1bf   :  { %13542 = vmatmul.mubr.msk.f32.gmra.mrb[42].mxu1 %vm1987_vm4, %v7714_v10  ;;  %v7872_v1 = vrot.slane %v16209_v17, %v14310_v11  ;;  %v11159_v10 = vcombine.high %v11157_v21, %v11157_v21  ;;  %v16242_v50 = vcombine.low %v11150_v18, %v11158_v41  ;;  %v11167_v60 = vcombine.high %v10925_v24, %v10925_v24  ;;  %v10873_v44 = vpop.permute.xlu0 %10872 }
 0x1c0   :  { %13544 = vmatprep.mubr.msk.f32.mxu1 %vm13868_vm2, %v18377_v6  ;;  %v7755_v30 = vrot.slane %v7747_v51, %v14310_v11  ;;  %v7762_v58 = vrot.slane %v7748_v52, %v14310_v11  ;;  %v11174_v22 = vrot.slane %v10925_v24, %v14327_v27  ;;  %v11460_v12 = vcombine.low %v11452_v49, %v11459_v46 }
 0x1c1   :  { %v16254_v47 = vcombine.low %v7886_v3, %v7893_v37  ;;  %v11479_v18 = vcombine.low %v11157_v21, %v11159_v10  ;;  %v11181_v36 = vrot.slane %v11167_v60, %v14327_v27  ;;  %v11477_v2 = vcombine.low %v11469_v23, %v11476_v38  ;;  %v10877_v38 = vpop.permute.xlu1 %10876 }
 0x1c2   :  { %v7763_v13 = vcombine.low %v7755_v30, %v7762_v58  ;;  %v11182_v41 = vcombine.high %v11174_v22, %v11174_v22  ;;  %v16263_v51 = vcombine.low %v11166_v29, %v11174_v22  ;;  %13592 = vmatprep.mubr.msk.f32.mxu0 %vm4829_vm5, %v11460_v12  ;;  %v10928_v37 = vsel %vm1987_vm4, %v15819_v59, %v10875_v4 }
 0x1c3   :  { %v11486_v49 = vrot.slane %v16242_v50, %v14327_v27  ;;  %13593 = vmatmul.mubr.msk.f32.gmra.mrb[38].mxu0 %vm4829_vm5, %v11477_v2  ;;  %v11208_v40 = vcombine.high %v10928_v37, %v10928_v37  ;;  %v11215_v46 = vrot.slane %v10928_v37, %v14327_v27  ;;  %v18409_v14 = vrot.slane %v16078_v33, %v14310_v11 }
 0x1c4   :  { %v11493_v3 = vrot.slane %v11479_v18, %v14327_v27  ;;  %13545 = vmatmul.mubr.msk.f32.gmra.mrb[44].mxu1 %vm1987_vm4, %v7763_v13  ;;  %v11496_v59 = vcombine.low %v11182_v41, %v11181_v36  ;;  %v18410_v21 = vcombine.low %v16012_v43, %v16050_v54  ;;  %v11183_v4 = vcombine.high %v11181_v36, %v11181_v36  ;;  %v10881_v36 = vpop.permute.xlu0 %10880 }
 0x1c5   :  { %v7797_v23 = vcombine.low %v18409_v14, %v7795_v25  ;;  %13547 = vmatprep.mubr.msk.f32.mxu1 %vm13868_vm2, %v18377_v6  ;;  %v11222_v39 = vrot.slane %v11208_v40, %v14327_v27  ;;  %v11223_v52 = vcombine.high %v11215_v46, %v11215_v46  ;;  %v18411_v25 = vld [vmem:[#allocation19_spill] sm:$0xff]  ;;  %v11503_v24 = vrot.slane %v16263_v51, %v14327_v27  ;;  %v18412_v51 = vld [vmem:[#allocation20_spill] sm:$0xff] }
 0x1c6   :  { %v7804_v29 = vrot.slane %v18410_v21, %v14310_v11  ;;  %v10926_v56 = vsel %vm1987_vm4, %v18411_v25, %v10871_v28  ;;  %v10929_v43 = vsel %vm1987_vm4, %v15912_v31, %v10877_v38  ;;  %v16297_v58 = vpop.f32.mrb[8].mxu0  ;;  %v11510_v13 = vrot.slane %v11496_v59, %v14327_v27  ;;  %v10879_v38 = vpop.permute.xlu1 %10878 }
 0x1c7   :  { %v7811_v33 = vrot.slane %v7797_v23, %v14310_v11  ;;  %v11184_v20 = vcombine.high %v10926_v56, %v10926_v56  ;;  %v11191_v10 = vrot.slane %v10926_v56, %v14327_v27  ;;  %v11224_v54 = vcombine.high %v11222_v39, %v11222_v39  ;;  %v13407_v2 = vpop.f32.mrb[9].mxu0 }
 0x1c8   :  { %v16295_v50 = vcombine.low %v11215_v46, %v11223_v52  ;;  %v11225_v30 = vcombine.high %v10929_v43, %v10929_v43  ;;  %v11232_v18 = vrot.slane %v10929_v43, %v14327_v27  ;;  %v10927_v37 = vsel %vm1987_vm4, %v18412_v51, %v10873_v44 }
 0x1c9   :  { %v7812_v60 = vcombine.low %v7804_v29, %v7811_v33  ;;  %v11198_v22 = vrot.slane %v11184_v20, %v14327_v27  ;;  %v11199_v12 = vcombine.high %v11191_v10, %v11191_v10  ;;  %v11512_v28 = vcombine.low %v11183_v4, %v11191_v10 }
 0x1ca   :  { %v11544_v31 = vrot.slane %v16295_v50, %v14327_v27  ;;  %v11239_v41 = vrot.slane %v11225_v30, %v14327_v27  ;;  %v11546_v40 = vcombine.low %v11222_v39, %v11224_v54  ;;  %v11240_v14 = vcombine.high %v11232_v18, %v11232_v18  ;;  %v16314_v52 = vpop.f32.mrb[6].mxu1 }
 0x1cb   :  { %13548 = vmatmul.mubr.msk.f32.gmra.mrb[46].mxu1 %vm1987_vm4, %v7812_v60  ;;  %v11513_v46 = vcombine.low %v11199_v12, %v11198_v22  ;;  %v11200_v23 = vcombine.high %v11198_v22, %v11198_v22  ;;  %v11520_v59 = vrot.slane %v11512_v28, %v14327_v27  ;;  %v11207_v29 = vrot.slane %v10927_v37, %v14327_v27  ;;  %v16323_v10 = vpop.f32.mrb[10].mxu0  ;;  %v16325_v43 = vpop.f32.mrb[7].mxu1 }
 0x1cc   :  { %13550 = vmatprep.mubr.msk.f32.mxu1 %vm13868_vm2, %v18377_v6  ;;  %v11241_v21 = vcombine.high %v11239_v41, %v11239_v41  ;;  %v7830_v4 = vrot.slane %v16111_v7, %v14310_v11  ;;  %v11547_v39 = vcombine.low %v11232_v18, %v11240_v14  ;;  %v18413_v33 = vrot.slane %v16198_v16, %v14310_v11  ;;  %v13410_v12 = vpop.f32.mrb[11].mxu0  ;;  %v10883_v28 = vpop.permute.xlu0 %10882 }
 0x1cd   :  { %v11527_v44 = vrot.slane %v11513_v46, %v14327_v27  ;;  %v18414_v25 = vrot.slane %v16188_v9, %v14310_v11  ;;  %v11494_v20 = vcombine.low %v11486_v49, %v11493_v3  ;;  %v11529_v60 = vcombine.low %v11200_v23, %v11207_v29 }
 0x1ce   :  { %v11563_v54 = vcombine.low %v11239_v41, %v11241_v21  ;;  %v18415_v7 = vrot.slane %v16108_v45, %v14310_v11  ;;  %v10930_v22 = vsel %vm1987_vm4, %v15984_v0, %v10879_v38  ;;  %v11554_v16 = vrot.slane %v11546_v40, %v14327_v27 }
 0x1cf   :  { %v7846_v56 = vcombine.low %v18414_v25, %v18413_v33  ;;  %13595 = vmatprep.mubr.msk.f32.mxu0 %vm4829_vm5, %v11494_v20  ;;  %v11248_v49 = vrot.slane %v10930_v22, %v14327_v27  ;;  %v11511_v3 = vcombine.low %v11503_v24, %v11510_v13  ;;  %v11561_v18 = vrot.slane %v11547_v39, %v14327_v27  ;;  %v10885_v13 = vpop.permute.xlu1 %10884 }
 0x1d0   :  { %v7845_v30 = vcombine.low %v18415_v7, %v7830_v4  ;;  %v11571_v2 = vrot.slane %v11563_v54, %v14327_v27  ;;  %v10931_v0 = vsel %vm1987_vm4, %v16036_v57, %v10881_v36  ;;  %v11537_v41 = vrot.slane %v11529_v60, %v14327_v27 }
 0x1d1   :  { %v7860_v9 = vrot.slane %v7846_v56, %v14310_v11  ;;  %13596 = vmatmul.mubr.msk.f32.gmra.mrb[40].mxu0 %vm4829_vm5, %v11511_v3  ;;  %v11249_v51 = vcombine.high %v10931_v0, %v10931_v0  ;;  %v11256_v37 = vrot.slane %v10931_v0, %v14327_v27  ;;  %v7879_v24 = vrot.slane %v16215_v42, %v14310_v11 }
 0x1d2   :  { %v7853_v45 = vrot.slane %v7845_v30, %v14310_v11  ;;  %v7909_v46 = vrot.slane %v16254_v47, %v14310_v11  ;;  %v11528_v14 = vcombine.low %v11520_v59, %v11527_v44  ;;  %v10932_v23 = vsel %vm1987_vm4, %v16150_v26, %v10883_v28 }
 0x1d3   :  { %v11263_v57 = vrot.slane %v11249_v51, %v14327_v27  ;;  %v11264_v36 = vcombine.high %v11256_v37, %v11256_v37  ;;  %v11564_v38 = vcombine.low %v11248_v49, %v11256_v37  ;;  %v7894_v21 = vcombine.low %v7872_v1, %v7879_v24 }
 0x1d4   :  { %v7861_v40 = vcombine.low %v7853_v45, %v7860_v9  ;;  %v10933_v42 = vsel %vm1987_vm4, %v16171_v62, %v10885_v13  ;;  %13598 = vmatprep.mubr.msk.f32.mxu0 %vm4829_vm5, %v11528_v14  ;;  %v11266_v47 = vcombine.high %v10932_v23, %v10932_v23  ;;  %v11273_v59 = vrot.slane %v10932_v23, %v14327_v27  ;;  %v101_v62 = vld [vmem:[%s18316_s6] sm:$0xf] }
 0x1d5   :  { %v218_v26 = vsub.s32 0, %v18408_v5  ;;  %v11578_v29 = vrot.slane %v11564_v38, %v14327_v27  ;;  %v11580_v4 = vcombine.low %v11264_v36, %v11263_v57  ;;  %v7902_v17 = vrot.slane %v7894_v21, %v14310_v11 }
 0x1d6   :  { %13551 = vmatmul.mubr.msk.f32.gmra.mrb[48].mxu1 %vm1987_vm4, %v7861_v40  ;;  %v11265_v1 = vcombine.high %v11263_v57, %v11263_v57  ;;  %v11280_v44 = vrot.slane %v11266_v47, %v14327_v27  ;;  %v11281_v39 = vcombine.high %v11273_v59, %v11273_v59  ;;  %v11545_v33 = vcombine.low %v11537_v41, %v11544_v31 }
 0x1d7   :  { %13553 = vmatprep.mubr.msk.f32.mxu1 %vm13868_vm2, %v18377_v6  ;;  %v11562_v25 = vcombine.low %v11554_v16, %v11561_v18  ;;  %v7910_v56 = vcombine.low %v7902_v17, %v7909_v46  ;;  %v11289_v20 = vrot.slane %v10933_v42, %v14327_v27  ;;  %v11579_v60 = vcombine.low %v11571_v2, %v11578_v29 }
 0x1d8   :  { %v11581_v54 = vcombine.low %v11265_v1, %v11273_v59  ;;  %v11282_v7 = vcombine.high %v11280_v44, %v11280_v44  ;;  %v11597_v30 = vcombine.low %v11281_v39, %v11280_v44  ;;  %13599 = vmatmul.mubr.msk.f32.gmra.mrb[42].mxu0 %vm4829_vm5, %v11545_v33  ;;  %v4238_v22 = vrot.slane %v101_v62, %v4237_v55  ;;  %v16380_v3 = vpop.f32.mrb[12].mxu0 }
 0x1d9   :  { %v219_v12 = vrot.slane %v101_v62, %v218_v26  ;;  %v11588_v9 = vrot.slane %v11580_v4, %v14327_v27  ;;  %13601 = vmatprep.mubr.msk.f32.mxu0 %vm4829_vm5, %v11562_v25  ;;  %v13413_v55 = vpop.f32.mrb[13].mxu0 }
 0x1da   :  { %13554 = vmatmul.mubr.msk.f32.gmra.mrb[50].mxu1 %vm1987_vm4, %v7910_v56  ;;  %v11595_v50 = vrot.slane %v11581_v54, %v14327_v27  ;;  %v11598_v31 = vcombine.low %v11282_v7, %v11289_v20  ;;  %v4520_v16 = vcombine.high %v4238_v22, %v4238_v22  ;;  %v4527_v49 = vrot.slane %v4238_v22, %v14327_v27 }
 0x1db   :  { %v1013_v18 = vcombine.high %v219_v12, %v219_v12  ;;  %v1020_v2 = vrot.slane %v219_v12, %v14310_v11  ;;  %v11605_v45 = vrot.slane %v11597_v30, %v14327_v27 }
 0x1dc   :  { %v11596_v28 = vcombine.low %v11588_v9, %v11595_v50  ;;  %13602 = vmatmul.mubr.msk.f32.gmra.mrb[44].mxu0 %vm4829_vm5, %v11579_v60  ;;  %v11612_v0 = vrot.slane %v11598_v31, %v14327_v27  ;;  %v4534_v41 = vrot.slane %v4520_v16, %v14327_v27  ;;  %v4535_v51 = vcombine.high %v4527_v49, %v4527_v49  ;;  %v16392_v57 = vpop.f32.mrb[14].mxu0 }
 0x1dd   :  { %v1027_v37 = vrot.slane %v1013_v18, %v14310_v11  ;;  %v1028_v24 = vcombine.high %v1020_v2, %v1020_v2  ;;  %v16390_v13 = vrot.slane %v1020_v2, %v14310_v11  ;;  %v13416_v47 = vpop.f32.mrb[15].mxu0 }
 0x1de   :  { %13604 = vmatprep.mubr.msk.f32.mxu0 %vm4829_vm5, %v11596_v28  ;;  %v11613_v40 = vcombine.low %v11605_v45, %v11612_v0  ;;  %v4775_v46 = vcombine.low %v4527_v49, %v4535_v51  ;;  %v4792_v14 = vcombine.low %v4534_v41, %v4527_v49  ;;  %v4536_v23 = vcombine.high %v4534_v41, %v4534_v41 }
 0x1df   :  { %v1029_v36 = vcombine.high %v1027_v37, %v1027_v37  ;;  %v16395_v38 = vrot.slane %v1027_v37, %v14310_v11  ;;  %v16398_v21 = vrot.slane %v1028_v24, %v14310_v11  ;;  %v4801_v42 = vcombine.low %v4535_v51, %v4534_v41 }
 0x1e0   :  { %13605 = vmatmul.mubr.msk.f32.gmra.mrb[46].mxu0 %vm4829_vm5, %v11613_v40  ;;  %v16402_v59 = vrot.slane %v4775_v46, %v14327_v27  ;;  %v16405_v26 = vrot.slane %v4792_v14, %v14327_v27  ;;  %v4776_v29 = vcombine.low %v4534_v41, %v4536_v23  ;;  %v4802_v4 = vcombine.low %v4536_v23, %v4527_v49 }
 0x1e1   :  { %v16408_v17 = vrot.slane %v1029_v36, %v14310_v11  ;;  %v1797_v1 = vcombine.low %v16390_v13, %v16398_v21  ;;  %v13139_v62 = vcombine.high %v16390_v13, %v16398_v21  ;;  %v16416_v44 = vcombine.high %v16395_v38, %v16395_v38 }
 0x1e2   :  { %v16420_v39 = vcombine.low %v16402_v59, %v16405_v26  ;;  %v16423_v33 = vrot.slane %v4776_v29, %v14327_v27  ;;  %v16426_v25 = vrot.slane %v4801_v42, %v14327_v27  ;;  %v16429_v56 = vrot.slane %v4802_v4, %v14327_v27 }
 0x1e3   :  { %v1799_v20 = vcombine.low %v16395_v38, %v16408_v17  ;;  %v13140_v54 = vcombine.high %v16395_v38, %v16408_v17  ;;  %v16436_v60 = vrot.slane %v1797_v1, %v14310_v11  ;;  %v16439_v7 = vrot.slane %v13139_v62, %v14310_v11 }
 0x1e4   :  { %18416 = vst [vmem:[#allocation18_spill] sm:$0xff] %v16420_v39  ;;  %v4930_v30 = vadd.f32 %v15988_v48, %v16420_v39  ;;  %v16445_v22 = vcombine.low %v16402_v59, %v16423_v33  ;;  %v1846_v12 = vcombine.low %v16416_v44, %v16390_v13  ;;  %v16451_v9 = vcombine.low %v16426_v25, %v16402_v59 }
 0x1e5   :  { %v16454_v50 = vrot.slane %v1799_v20, %v14310_v11  ;;  %v16457_v31 = vrot.slane %v13140_v54, %v14310_v11  ;;  %v1829_v48 = vcombine.low %v16436_v60, %v16439_v7  ;;  %v16474_v45 = vcombine.low %v16426_v25, %v16429_v56 }
 0x1e6   :  { %18417 = vst [vmem:[#allocation16_spill] sm:$0xff] %v16451_v9  ;;  %v5024_v16 = vcombine.high %v4930_v30, %v4930_v30  ;;  %v5031_v49 = vrot.slane %v4930_v30, %v14327_v27  ;;  %v4925_v28 = vadd.f32 %v15995_v19, %v16445_v22  ;;  %v16465_v18 = vrot.slane %v1846_v12, %v14310_v11  ;;  %v16479_v37 = vpop.f32.mrb[8].mxu1 }
 0x1e7   :  { %v1830_v2 = vcombine.low %v16454_v50, %v16457_v31  ;;  %v16470_v55 = vrot.slane %v1829_v48, %v14310_v11  ;;  %18418 = vst [vmem:[#allocation13_spill] sm:$0xff] %v16474_v45  ;;  %v4940_v19 = vadd.f32 %v16096_v34, %v16451_v9  ;;  %18419 = vst [vmem:[#allocation12_spill] sm:$0xff] %v16479_v37  ;;  %v16487_v23 = vpop.f32.mrb[16].mxu0  ;;  %v16489_v36 = vpop.f32.mrb[9].mxu1  ;;  %vm12919_vm5 = vcmask 916480  }
 0x1e8   :  { %v5038_v0 = vrot.slane %v5024_v16, %v14327_v27  ;;  %v5039_v41 = vcombine.high %v5031_v49, %v5031_v49  ;;  %v5007_v51 = vcombine.high %v4925_v28, %v4925_v28  ;;  %v5305_v24 = vmax.f32 %v5031_v49, 0.0  ;;  %18420 = vst [vmem:[#allocation14_spill] sm:$0xff] %v16489_v36  ;;  %v13419_v4 = vpop.f32.mrb[17].mxu0 }
 0x1e9   :  { %v16482_v40 = vrot.slane %v1830_v2, %v14310_v11  ;;  %v5014_v46 = vrot.slane %v4925_v28, %v14327_v27  ;;  %v1854_v14 = vcombine.low %v16454_v50, %v16465_v18  ;;  %v16499_v54 = vadd.f32 %v16104_v35, %v16474_v45 }
 0x1ea   :  { %v5040_v42 = vcombine.high %v5038_v0, %v5038_v0  ;;  %v5306_v47 = vmax.f32 %v5039_v41, 0.0  ;;  %v5307_v29 = vmax.f32 %v5038_v0, 0.0  ;;  %v5021_v34 = vrot.slane %v5007_v51, %v14327_v27 }
 0x1eb   :  { %v1845_v1 = vcombine.low %v16470_v55, %v16482_v40  ;;  %v5022_v62 = vcombine.high %v5014_v46, %v5014_v46  ;;  %v16495_v20 = vrot.slane %v1854_v14, %v14310_v11  ;;  %v5301_v48 = vmax.f32 %v5014_v46, 0.0 }
 0x1ec   :  { %v5430_v30 = vcombine.low %v5305_v24, %v5306_v47  ;;  %v5023_v12 = vcombine.high %v5021_v34, %v5021_v34  ;;  %v5058_v16 = vcombine.high %v4940_v19, %v4940_v19  ;;  %v16501_v49 = vmax.f32 %v5040_v42, 0.0 }
 0x1ed   :  { %18421 = vst [vmem:[#allocation17_spill] sm:$0xff] %v16495_v20  ;;  %v2085_v28 = vadd.f32 %v16062_v53, %v1845_v1  ;;  %v5302_v2 = vmax.f32 %v5022_v62, 0.0  ;;  %v1862_v0 = vcombine.low %v16470_v55, %v16495_v20  ;;  %v5444_v51 = vrot.slane %v5307_v29, %v14327_v27 }
 0x1ee   :  { %v5437_v41 = vrot.slane %v5430_v30, %v14327_v27  ;;  %v5303_v14 = vmax.f32 %v5021_v34, 0.0  ;;  %v5304_v4 = vmax.f32 %v5023_v12, 0.0  ;;  %v16511_v53 = vrot.slane %v4940_v19, %v14327_v27 }
 0x1ef   :  { %v2173_v35 = vcombine.high %v2085_v28, %v2085_v28  ;;  %v2180_v24 = vrot.slane %v2085_v28, %v14310_v11  ;;  %v5413_v47 = vcombine.low %v5301_v48, %v5302_v2  ;;  %v2090_v46 = vadd.f32 %v16088_v15, %v1862_v0 }
 0x1f0   :  { %v5445_v42 = vcombine.low %v5437_v41, %v5444_v51  ;;  %v5414_v6 = vcombine.low %v5303_v14, %v5304_v4  ;;  %v16514_v1 = vrot.slane %v5058_v16, %v14327_v27 }
 0x1f1   :  { %v2187_v62 = vrot.slane %v2173_v35, %v14310_v11  ;;  %v2188_v30 = vcombine.high %v2180_v24, %v2180_v24  ;;  %v2196_v29 = vrot.slane %v2180_v24, %v14310_v11  ;;  %v5421_v34 = vrot.slane %v5413_v47, %v14327_v27 }
 0x1f2   :  { %v5695_v12 = vsel %vm5694_vm6, %v5445_v42, -inf  ;;  %v5428_v48 = vrot.slane %v5414_v6, %v14327_v27  ;;  %v2222_v15 = vcombine.high %v2090_v46, %v2090_v46  ;;  %v2229_v28 = vrot.slane %v2090_v46, %v14310_v11  ;;  %v16525_v35 = vpop.f32.mrb[18].mxu0 }
 0x1f3   :  { %v2189_v2 = vcombine.high %v2187_v62, %v2187_v62  ;;  %v2203_v19 = vrot.slane %v2187_v62, %v14310_v11  ;;  %v2210_v16 = vrot.slane %v2188_v30, %v14310_v11  ;;  %v2218_v0 = vcombine.high %v2196_v29, %v2196_v29  ;;  %18422 = vst [vmem:[#allocation15_spill] sm:$0xff] %v16525_v35  ;;  %v13422_v5 = vpop.f32.mrb[19].mxu0 }
 0x1f4   :  { %v3028_v41 = vmax.f32 %v2196_v29, 0.0  ;;  %v5429_v51 = vcombine.low %v5421_v34, %v5428_v48  ;;  %v2236_v14 = vrot.slane %v2222_v15, %v14310_v11  ;;  %v2237_v4 = vcombine.high %v2229_v28, %v2229_v28 }
 0x1f5   :  { %v2217_v24 = vrot.slane %v2189_v2, %v14310_v11  ;;  %v2219_v47 = vcombine.high %v2203_v19, %v2203_v19  ;;  %v2220_v6 = vcombine.high %v2210_v16, %v2210_v16  ;;  %v3029_v42 = vmax.f32 %v2210_v16, 0.0 }
 0x1f6   :  { %v3030_v46 = vmax.f32 %v2218_v0, 0.0  ;;  %v3032_v9 = vmax.f32 %v2203_v19, 0.0  ;;  %v5693_v62 = vsel %vm4060_vm7, %v5429_v51, -inf  ;;  %v2238_v20 = vcombine.high %v2236_v14, %v2236_v14 }
 0x1f7   :  { %v2221_v30 = vcombine.high %v2217_v24, %v2217_v24  ;;  %v3031_v36 = vmax.f32 %v2220_v6, 0.0  ;;  %v3033_v29 = vmax.f32 %v2217_v24, 0.0  ;;  %v3034_v34 = vmax.f32 %v2219_v47, 0.0 }
 0x1f8   :  { %v3268_v48 = vcombine.low %v3028_v41, %v3029_v42  ;;  %v5696_v15 = vmax.f32 %v5693_v62, %v5695_v12  ;;  %v2245_v39 = vrot.slane %v2229_v28, %v14310_v11  ;;  %v2252_v35 = vrot.slane %v2236_v14, %v14310_v11 }
 0x1f9   :  { %v3035_v2 = vmax.f32 %v2221_v30, 0.0  ;;  %v3269_v37 = vcombine.low %v3030_v46, %v3031_v36  ;;  %v3270_v45 = vcombine.low %v3032_v9, %v3033_v29  ;;  %v2259_v5 = vrot.slane %v2237_v4, %v14310_v11 }
 0x1fa   :  { %v5697_v16 = vrot.slane %v5696_v15, 4  ;;  %v16533_v19 = vrot.slane %v2238_v20, %v14310_v11  ;;  %v2267_v0 = vcombine.high %v2245_v39, %v2245_v39  ;;  %v5073_v51 = vcombine.high %v16511_v53, %v16511_v53 }
 0x1fb   :  { %v3271_v24 = vcombine.low %v3034_v34, %v3035_v2  ;;  %v3278_v12 = vrot.slane %v3268_v48, %v14310_v11  ;;  %v3285_v28 = vrot.slane %v3269_v37, %v14310_v11  ;;  %v2268_v41 = vcombine.high %v2252_v35, %v2252_v35 }
 0x1fc   :  { %v3292_v14 = vrot.slane %v3270_v45, %v14310_v11  ;;  %v5698_v36 = vmax.f32 %v5696_v15, %v5697_v16  ;;  %v2269_v9 = vcombine.high %v2259_v5, %v2259_v5  ;;  %v3036_v47 = vmax.f32 %v2245_v39, 0.0  ;;  %v16542_v34 = vpop.f32.mrb[20].mxu0 }
 0x1fd   :  { %v3299_v4 = vrot.slane %v3271_v24, %v14310_v11  ;;  %v3300_v6 = vcombine.low %v3278_v12, %v3285_v28  ;;  %v3037_v20 = vmax.f32 %v2259_v5, 0.0  ;;  %v3038_v42 = vmax.f32 %v2267_v0, 0.0  ;;  %v16544_v48 = vpop.f32.mrb[10].mxu1  ;;  %v13425_v15 = vpop.f32.mrb[21].mxu0 }
 0x1fe   :  { %v5699_v46 = vrot.slane %v5698_v36, 2  ;;  %v3039_v62 = vmax.f32 %v2269_v9, 0.0  ;;  %v3040_v30 = vmax.f32 %v2252_v35, 0.0  ;;  %v3041_v29 = vmax.f32 %v16533_v19, 0.0  ;;  %18423 = vst [vmem:[#allocation19_spill] sm:$0xff] %v16544_v48 }
 0x1ff   :  { %v3301_v37 = vcombine.low %v3292_v14, %v3299_v4  ;;  %v3042_v2 = vmax.f32 %v2268_v41, 0.0  ;;  %v3317_v45 = vcombine.low %v3036_v47, %v3037_v20  ;;  %v5074_v39 = vcombine.high %v16514_v1, %v16514_v1 }
 0x200   :  { %v5700_v16 = vmax.f32 %v5698_v36, %v5699_v46  ;;  %v2270_v5 = vcombine.high %v16533_v19, %v16533_v19  ;;  %v3318_v0 = vcombine.low %v3038_v42, %v3039_v62  ;;  %v3319_v35 = vcombine.low %v3040_v30, %v3041_v29  ;;  %v16556_v36 = vpop.f32.mrb[11].mxu1 }
 0x201   :  { %v3308_v24 = vrot.slane %v3300_v6, %v14310_v11  ;;  %v3315_v12 = vrot.slane %v3301_v37, %v14310_v11  ;;  %v3326_v28 = vrot.slane %v3317_v45, %v14310_v11  ;;  %v5314_v14 = vmax.f32 %v5073_v51, 0.0  ;;  %18424 = vst [vmem:[#allocation20_spill] sm:$0xff] %v16556_v36 }
 0x202   :  { %v5701_v41 = vrot.slane %v5700_v16, 1  ;;  %v3333_v9 = vrot.slane %v3318_v0, %v14310_v11  ;;  %v3340_v47 = vrot.slane %v3319_v35, %v14310_v11  ;;  %v3347_v4 = vrot.slane %v3042_v2, %v14310_v11 }
 0x203   :  { %v3316_v20 = vcombine.low %v3308_v24, %v3315_v12  ;;  %v5313_v42 = vmax.f32 %v16511_v53, 0.0  ;;  %v5315_v46 = vmax.f32 %v16514_v1, 0.0  ;;  %v5041_v6 = vcombine.high %v16499_v54, %v16499_v54 }
 0x204   :  { %v3348_v62 = vcombine.low %v3326_v28, %v3333_v9  ;;  %v3349_v30 = vcombine.low %v3340_v47, %v3347_v4  ;;  %v5316_v51 = vmax.f32 %v5074_v39, 0.0  ;;  %v5048_v29 = vrot.slane %v16499_v54, %v14327_v27 }
 0x205   :  { %v16564_v37 = vmax.f32 %v5700_v16, %v5701_v41  ;;  %v5477_v2 = vrot.slane %v5314_v14, %v14327_v27  ;;  %v5055_v45 = vrot.slane %v5041_v6, %v14327_v27  ;;  %v1058_v53 = vcombine.high %v16390_v13, %v16390_v13 }
 0x206   :  { %v3356_v1 = vrot.slane %v3348_v62, %v14310_v11  ;;  %v3363_v15 = vrot.slane %v3349_v30, %v14310_v11  ;;  %v5056_v0 = vcombine.high %v5048_v29, %v5048_v29  ;;  %v5309_v35 = vmax.f32 %v5048_v29, 0.0 }
 0x207   :  { %18425 = vst [vmem:[#allocation21_spill] sm:$0xff] %v16564_v37  ;;  %v4061_v39 = vsel %vm4060_vm7, %v3316_v20, -inf  ;;  %v5057_v24 = vcombine.high %v5055_v45, %v5055_v45  ;;  %v5311_v12 = vmax.f32 %v5055_v45, 0.0  ;;  %v1060_v54 = vcombine.high %v16398_v21, %v16398_v21  ;;  %v16586_v45 = vpop.f32.mrb[22].mxu0 }
 0x208   :  { %v3364_v16 = vcombine.low %v3356_v1, %v3363_v15  ;;  %v5310_v28 = vmax.f32 %v5056_v0, 0.0  ;;  %v5446_v14 = vcombine.low %v16501_v49, %v5309_v35  ;;  %v1061_v41 = vcombine.high %v16408_v17, %v16408_v17  ;;  %18426 = vst [vmem:[#allocation22_spill] sm:$0xff] %v16586_v45 }
 0x209   :  { %v5312_v9 = vmax.f32 %v5057_v24, 0.0  ;;  %v1863_v47 = vcombine.low %v16398_v21, %v1058_v53  ;;  %v1864_v4 = vcombine.low %v1060_v54, %v16395_v38  ;;  %v1865_v20 = vcombine.low %v16408_v17, %v16416_v44  ;;  %v13428_v38 = vpop.f32.mrb[23].mxu0 }
 0x20a   :  { %v4063_v6 = vsel %vm4062_vm8, %v3364_v16, -inf  ;;  %v16583_v62 = vcombine.low %v5315_v46, %v5316_v51  ;;  %v5447_v30 = vcombine.low %v5310_v28, %v5311_v12  ;;  %v1866_v29 = vcombine.low %v1061_v41, %v16390_v13 }
 0x20b   :  { %v4064_v49 = vmax.f32 %v4061_v39, %v4063_v6  ;;  %v5463_v1 = vcombine.low %v5312_v9, %v5313_v42  ;;  %v16589_v15 = vrot.slane %v1863_v47, %v14310_v11  ;;  %v16592_v21 = vrot.slane %v1864_v4, %v14310_v11 }
 0x20c   :  { %v5454_v17 = vrot.slane %v5446_v14, %v14327_v27  ;;  %v5461_v44 = vrot.slane %v5447_v30, %v14327_v27  ;;  %v16597_v46 = vrot.slane %v1865_v20, %v14310_v11  ;;  %v16600_v13 = vrot.slane %v1866_v29, %v14310_v11  ;;  %v16622_v14 = vpop.f32.mrb[24].mxu0 }
 0x20d   :  { %v4065_v51 = vrot.slane %v4064_v49, 4  ;;  %v5470_v42 = vrot.slane %v5463_v1, %v14327_v27  ;;  %v1895_v53 = vcombine.low %v16589_v15, %v16592_v21  ;;  %v16607_v0 = vcombine.low %v16405_v26, %v16426_v25  ;;  %18428 = vst [vmem:[#allocation24_spill] sm:$0xff] %v16622_v14 }
 0x20e   :  { %v5462_v35 = vcombine.low %v5454_v17, %v5461_v44  ;;  %v1896_v39 = vcombine.low %v16597_v46, %v16600_v13  ;;  %v1912_v24 = vcombine.low %v16597_v46, %v16436_v60  ;;  %v16615_v12 = vcombine.low %v16423_v33, %v16402_v59  ;;  %v13431_v33 = vpop.f32.mrb[25].mxu0 }
 0x20f   :  { %18427 = vst [vmem:[#allocation23_spill] sm:$0xff] %v16607_v0  ;;  %v4066_v54 = vmax.f32 %v4064_v49, %v4065_v51  ;;  %v5478_v16 = vcombine.low %v5470_v42, %v5477_v2  ;;  %v16618_v28 = vrot.slane %v1895_v53, %v14310_v11  ;;  %v4950_v26 = vadd.f32 %v16238_v32, %v16607_v0 }
 0x210   :  { %v5703_v41 = vsel %vm4060_vm7, %v5462_v35, -inf  ;;  %v16626_v9 = vrot.slane %v1896_v39, %v14310_v11  ;;  %v16629_v47 = vrot.slane %v1912_v24, %v14310_v11  ;;  %v4945_v59 = vadd.f32 %v16246_v63, %v16615_v12 }
 0x211   :  { %v4067_v2 = vrot.slane %v4066_v54, 2  ;;  %v5704_v4 = vsel %vm5694_vm6, %v5478_v16, -inf  ;;  %v5092_v20 = vcombine.high %v4950_v26, %v4950_v26  ;;  %v5099_v32 = vrot.slane %v4950_v26, %v14327_v27 }
 0x212   :  { %18429 = vst [vmem:[#allocation25_spill] sm:$0xff] %v16629_v47  ;;  %v5705_v30 = vmax.f32 %v5703_v41, %v5704_v4  ;;  %v1911_v29 = vcombine.low %v16618_v28, %v16626_v9  ;;  %v1920_v49 = vcombine.low %v16618_v28, %v16629_v47  ;;  %v3043_v63 = vmax.f32 %v2270_v5, 0.0 }
 0x213   :  { %v5106_v1 = vrot.slane %v5092_v20, %v14327_v27  ;;  %v5107_v38 = vcombine.high %v5099_v32, %v5099_v32  ;;  %v5321_v17 = vmax.f32 %v5099_v32, 0.0  ;;  %v5075_v53 = vcombine.high %v4945_v59, %v4945_v59 }
 0x214   :  { %v5706_v44 = vrot.slane %v5705_v30, 4  ;;  %v2095_v51 = vadd.f32 %v16176_v61, %v1911_v29  ;;  %v2100_v42 = vadd.f32 %v16227_v8, %v1920_v49  ;;  %v16647_v35 = vmax.f32 %v4066_v54, %v4067_v2 }
 0x215   :  { %v5108_v39 = vcombine.high %v5106_v1, %v5106_v1  ;;  %v5322_v24 = vmax.f32 %v5107_v38, 0.0  ;;  %v5323_v16 = vmax.f32 %v5106_v1, 0.0  ;;  %v16652_v4 = vrot.slane %v5321_v17, %v14327_v27 }
 0x216   :  { %18430 = vst [vmem:[#allocation26_spill] sm:$0xff] %v16647_v35  ;;  %v5707_v26 = vmax.f32 %v5705_v30, %v5706_v44  ;;  %v2271_v41 = vcombine.high %v2095_v51, %v2095_v51  ;;  %v2278_v19 = vrot.slane %v2095_v51, %v14310_v11  ;;  %v2320_v5 = vcombine.high %v2100_v42, %v2100_v42 }
 0x217   :  { %v2327_v33 = vrot.slane %v2100_v42, %v14310_v11  ;;  %v16654_v20 = vcombine.low %v5322_v24, %v5323_v16  ;;  %v16657_v61 = vrot.slane %v4945_v59, %v14327_v27  ;;  %v16661_v32 = vmax.f32 %v5108_v39, 0.0  ;;  %v16678_v16 = vpop.f32.mrb[12].mxu1 }
 0x218   :  { %v2285_v8 = vrot.slane %v2271_v41, %v14310_v11  ;;  %v2286_v54 = vcombine.high %v2278_v19, %v2278_v19  ;;  %v2294_v2 = vrot.slane %v2278_v19, %v14310_v11  ;;  %v5708_v30 = vrot.slane %v5707_v26, 2  ;;  %v16670_v51 = vpop.f32.mrb[26].mxu0  ;;  %18432 = vst [vmem:[#allocation28_spill] sm:$0xff] %v16678_v16 }
 0x219   :  { %v2334_v29 = vrot.slane %v2320_v5, %v14310_v11  ;;  %v2335_v49 = vcombine.high %v2327_v33, %v2327_v33  ;;  %v16665_v1 = vrot.slane %v5075_v53, %v14327_v27  ;;  %v2343_v44 = vrot.slane %v2327_v33, %v14310_v11  ;;  %18431 = vst [vmem:[#allocation27_spill] sm:$0xff] %v16670_v51  ;;  %v13434_v41 = vpop.f32.mrb[27].mxu0 }
 0x21a   :  { %v2287_v38 = vcombine.high %v2285_v8, %v2285_v8  ;;  %v2301_v17 = vrot.slane %v2285_v8, %v14310_v11  ;;  %v2308_v59 = vrot.slane %v2286_v54, %v14310_v11  ;;  %v2316_v42 = vcombine.high %v2294_v2, %v2294_v2 }
 0x21b   :  { %v3044_v24 = vmax.f32 %v2294_v2, 0.0  ;;  %v2336_v39 = vcombine.high %v2334_v29, %v2334_v29  ;;  %v2350_v6 = vrot.slane %v2334_v29, %v14310_v11  ;;  %v5709_v8 = vmax.f32 %v5707_v26, %v5708_v30 }
 0x21c   :  { %v2315_v19 = vrot.slane %v2287_v38, %v14310_v11  ;;  %v2317_v53 = vcombine.high %v2301_v17, %v2301_v17  ;;  %v2318_v5 = vcombine.high %v2308_v59, %v2308_v59  ;;  %v3045_v35 = vmax.f32 %v2308_v59, 0.0 }
 0x21d   :  { %v3046_v54 = vmax.f32 %v2316_v42, 0.0  ;;  %v3365_v37 = vcombine.low %v3043_v63, %v3044_v24  ;;  %v3048_v51 = vmax.f32 %v2301_v17, 0.0  ;;  %v2357_v41 = vrot.slane %v2335_v49, %v14310_v11 }
 0x21e   :  { %v2319_v33 = vcombine.high %v2315_v19, %v2315_v19  ;;  %v3047_v0 = vmax.f32 %v2318_v5, 0.0  ;;  %v3049_v14 = vmax.f32 %v2315_v19, 0.0  ;;  %v3050_v2 = vmax.f32 %v2317_v53, 0.0 }
 0x21f   :  { %v3366_v45 = vcombine.low %v3045_v35, %v3046_v54  ;;  %v3375_v47 = vrot.slane %v3365_v37, %v14310_v11  ;;  %v2364_v36 = vrot.slane %v2336_v39, %v14310_v11  ;;  %v2365_v29 = vcombine.high %v2343_v44, %v2343_v44 }
 0x220   :  { %v3367_v38 = vcombine.low %v3047_v0, %v3048_v51  ;;  %v2366_v26 = vcombine.high %v2350_v6, %v2350_v6  ;;  %v3368_v30 = vcombine.low %v3049_v14, %v3050_v2  ;;  %v2367_v59 = vcombine.high %v2357_v41, %v2357_v41 }
 0x221   :  { %v3382_v63 = vrot.slane %v3366_v45, %v14310_v11  ;;  %v3051_v42 = vmax.f32 %v2319_v33, 0.0  ;;  %v2368_v24 = vcombine.high %v2364_v36, %v2364_v36  ;;  %v3052_v35 = vmax.f32 %v2343_v44, 0.0 }
 0x222   :  { %v3389_v17 = vrot.slane %v3367_v38, %v14310_v11  ;;  %v3053_v19 = vmax.f32 %v2357_v41, 0.0  ;;  %v3396_v37 = vrot.slane %v3368_v30, %v14310_v11  ;;  %v3054_v53 = vmax.f32 %v2365_v29, 0.0 }
 0x223   :  { %v3397_v49 = vcombine.low %v3375_v47, %v3382_v63  ;;  %v3055_v5 = vmax.f32 %v2367_v59, 0.0  ;;  %v5710_v0 = vrot.slane %v5709_v8, 1  ;;  %v3056_v51 = vmax.f32 %v2350_v6, 0.0  ;;  %v16695_v59 = vpop.f32.mrb[13].mxu1 }
 0x224   :  { %v3057_v39 = vmax.f32 %v2364_v36, 0.0  ;;  %v3059_v54 = vmax.f32 %v2368_v24, 0.0  ;;  %v3398_v16 = vcombine.low %v3389_v17, %v3396_v37  ;;  %v3058_v14 = vmax.f32 %v2366_v26, 0.0 }
 0x225   :  { %v3414_v2 = vcombine.low %v3051_v42, %v3052_v35  ;;  %v3415_v45 = vcombine.low %v3053_v19, %v3054_v53  ;;  %v3405_v33 = vrot.slane %v3397_v49, %v14310_v11  ;;  %v3416_v48 = vcombine.low %v3055_v5, %v3056_v51 }
 0x226   :  { %v3444_v38 = vrot.slane %v3057_v39, %v14310_v11  ;;  %v5090_v44 = vcombine.high %v16657_v61, %v16657_v61  ;;  %v3412_v47 = vrot.slane %v3398_v16, %v14310_v11  ;;  %v5091_v36 = vcombine.high %v16665_v1, %v16665_v1 }
 0x227   :  { %v3423_v41 = vrot.slane %v3414_v2, %v14310_v11  ;;  %v3430_v6 = vrot.slane %v3415_v45, %v14310_v11  ;;  %v3437_v29 = vrot.slane %v3416_v48, %v14310_v11  ;;  %v3462_v26 = vcombine.low %v3058_v14, %v3059_v54 }
 0x228   :  { %v5317_v30 = vmax.f32 %v16657_v61, 0.0  ;;  %v5318_v63 = vmax.f32 %v5090_v44, 0.0  ;;  %v3413_v42 = vcombine.low %v3405_v33, %v3412_v47  ;;  %v5319_v24 = vmax.f32 %v16665_v1, 0.0 }
 0x229   :  { %v3445_v17 = vcombine.low %v3423_v41, %v3430_v6  ;;  %v5320_v16 = vmax.f32 %v5091_v36, 0.0  ;;  %v3446_v35 = vcombine.low %v3437_v29, %v3444_v38  ;;  %v1921_v37 = vcombine.low %v16439_v7, %v16454_v50 }
 0x22a   :  { %v5480_v19 = vcombine.low %v5317_v30, %v5318_v63  ;;  %v1922_v49 = vcombine.low %v16457_v31, %v16436_v60  ;;  %v16702_v48 = vmax.f32 %v5709_v8, %v5710_v0  ;;  %v1938_v5 = vcombine.low %v16465_v18, %v16589_v15  ;;  %v16751_v30 = vpop.f32.mrb[28].mxu0 }
 0x22b   :  { %v3453_v61 = vrot.slane %v3445_v17, %v14310_v11  ;;  %v5496_v53 = vcombine.low %v5319_v24, %v5320_v16  ;;  %v3460_v51 = vrot.slane %v3446_v35, %v14310_v11  ;;  %v16710_v39 = vrot.slane %v1921_v37, %v14310_v11 }
 0x22c   :  { %v5494_v1 = vrot.slane %v5480_v19, %v14327_v27  ;;  %v16713_v7 = vrot.slane %v1922_v49, %v14310_v11  ;;  %v16716_v60 = vrot.slane %v3462_v26, %v14310_v11  ;;  %v16720_v31 = vrot.slane %v1938_v5, %v14310_v11 }
 0x22d   :  { %v5503_v50 = vrot.slane %v5496_v53, %v14327_v27  ;;  %v4960_v18 = vadd.f32 %v16314_v52, %v16445_v22  ;;  %v4071_v8 = vsel %vm4060_vm7, %v3413_v42, -inf  ;;  %v3461_v0 = vcombine.low %v3453_v61, %v3460_v51 }
 0x22e   :  { %v18433_v54 = vrot.slane %v16583_v62, %v14327_v27  ;;  %v1937_v2 = vcombine.low %v16710_v39, %v16713_v7  ;;  %v1946_v33 = vcombine.low %v16710_v39, %v16720_v31  ;;  %v16735_v44 = vcombine.low %v16429_v56, %v16426_v25 }
 0x22f   :  { %v5511_v45 = vcombine.low %v5503_v50, %v16652_v4  ;;  %v5126_v38 = vcombine.high %v4960_v18, %v4960_v18  ;;  %v4072_v52 = vsel %vm4062_vm8, %v3461_v0, -inf  ;;  %v16741_v47 = vrot.slane %v4960_v18, %v14327_v27 }
 0x230   :  { %v5495_v14 = vcombine.low %v18433_v54, %v5494_v1  ;;  %v2105_v62 = vadd.f32 %v16297_v58, %v1937_v2  ;;  %v4073_v41 = vmax.f32 %v4071_v8, %v4072_v52  ;;  %v2110_v6 = vadd.f32 %v16323_v10, %v1946_v33  ;;  %v13437_v10 = vpop.f32.mrb[29].mxu0 }
 0x231   :  { %v5713_v4 = vsel %vm5694_vm6, %v5511_v45, -inf  ;;  %v16746_v36 = vrot.slane %v5126_v38, %v14327_v27  ;;  %v1947_v26 = vcombine.low %v16592_v21, %v16597_v46  ;;  %v16756_v17 = vadd.f32 %v16325_v43, %v16735_v44 }
 0x232   :  { %v5712_v22 = vsel %vm4060_vm7, %v5495_v14, -inf  ;;  %v2369_v25 = vcombine.high %v2105_v62, %v2105_v62  ;;  %v2376_v56 = vrot.slane %v2105_v62, %v14310_v11  ;;  %v4074_v58 = vrot.slane %v4073_v41, 4 }
 0x233   :  { %v5714_v29 = vmax.f32 %v5712_v22, %v5713_v4  ;;  %v2418_v63 = vcombine.high %v2110_v6, %v2110_v6  ;;  %v2425_v42 = vrot.slane %v2110_v6, %v14310_v11  ;;  %v5141_v61 = vcombine.high %v16741_v47, %v16741_v47 }
 0x234   :  { %v2383_v16 = vrot.slane %v2369_v25, %v14310_v11  ;;  %v2384_v35 = vcombine.high %v2376_v56, %v2376_v56  ;;  %v2392_v19 = vrot.slane %v2376_v56, %v14310_v11  ;;  %v4075_v37 = vmax.f32 %v4073_v41, %v4074_v58 }
 0x235   :  { %v5715_v24 = vrot.slane %v5714_v29, 4  ;;  %v2432_v49 = vrot.slane %v2418_v63, %v14310_v11  ;;  %v5142_v53 = vcombine.high %v16746_v36, %v16746_v36  ;;  %v2433_v8 = vcombine.high %v2425_v42, %v2425_v42 }
 0x236   :  { %v2385_v51 = vcombine.high %v2383_v16, %v2383_v16  ;;  %v2399_v43 = vrot.slane %v2383_v16, %v14310_v11  ;;  %v2406_v1 = vrot.slane %v2384_v35, %v14310_v11  ;;  %v4076_v50 = vrot.slane %v4075_v37, 2 }
 0x237   :  { %v5716_v5 = vmax.f32 %v5714_v29, %v5715_v24  ;;  %v2414_v18 = vcombine.high %v2392_v19, %v2392_v19  ;;  %v2441_v0 = vrot.slane %v2425_v42, %v14310_v11  ;;  %v3060_v45 = vmax.f32 %v2392_v19, 0.0 }
 0x238   :  { %v2413_v54 = vrot.slane %v2385_v51, %v14310_v11  ;;  %v2415_v14 = vcombine.high %v2399_v43, %v2399_v43  ;;  %v2416_v2 = vcombine.high %v2406_v1, %v2406_v1  ;;  %v3061_v38 = vmax.f32 %v2406_v1, 0.0 }
 0x239   :  { %v5717_v33 = vrot.slane %v5716_v5, 2  ;;  %v3062_v52 = vmax.f32 %v2414_v18, 0.0  ;;  %v2434_v22 = vcombine.high %v2432_v49, %v2432_v49  ;;  %v3064_v4 = vmax.f32 %v2399_v43, 0.0 }
 0x23a   :  { %v2417_v62 = vcombine.high %v2413_v54, %v2413_v54  ;;  %v3063_v41 = vmax.f32 %v2416_v2, 0.0  ;;  %v3065_v6 = vmax.f32 %v2413_v54, 0.0  ;;  %v16769_v29 = vmax.f32 %v4075_v37, %v4076_v50 }
 0x23b   :  { %v3463_v25 = vcombine.low %v3060_v45, %v3061_v38  ;;  %v2448_v56 = vrot.slane %v2432_v49, %v14310_v11  ;;  %v2455_v58 = vrot.slane %v2433_v8, %v14310_v11  ;;  %v3066_v63 = vmax.f32 %v2415_v14, 0.0 }
 0x23c   :  { %18434 = vst [vmem:[#allocation29_spill] sm:$0xff] %v16769_v29  ;;  %v3067_v42 = vmax.f32 %v2417_v62, 0.0  ;;  %v3464_v10 = vcombine.low %v3062_v52, %v3063_v41  ;;  %v3465_v24 = vcombine.low %v3064_v4, %v3065_v6  ;;  %v16775_v35 = vrot.slane %v2434_v22, %v14310_v11 }
 0x23d   :  { %v3479_v16 = vrot.slane %v3463_v25, %v14310_v11  ;;  %v2463_v19 = vcombine.high %v2441_v0, %v2441_v0  ;;  %v2465_v51 = vcombine.high %v2455_v58, %v2455_v58  ;;  %v2464_v50 = vcombine.high %v2448_v56, %v2448_v56 }
 0x23e   :  { %v3486_v43 = vrot.slane %v3464_v10, %v14310_v11  ;;  %v3493_v37 = vrot.slane %v3465_v24, %v14310_v11  ;;  %v3511_v1 = vcombine.low %v3066_v63, %v3067_v42  ;;  %v16779_v49 = vmax.f32 %v5716_v5, %v5717_v33 }
 0x23f   :  { %v3494_v18 = vcombine.low %v16716_v60, %v3479_v16  ;;  %v3068_v8 = vmax.f32 %v2441_v0, 0.0  ;;  %v3069_v54 = vmax.f32 %v2455_v58, 0.0  ;;  %v3070_v2 = vmax.f32 %v2463_v19, 0.0 }
 0x240   :  { %v3495_v14 = vcombine.low %v3486_v43, %v3493_v37  ;;  %v3071_v45 = vmax.f32 %v2465_v51, 0.0  ;;  %v3072_v38 = vmax.f32 %v2448_v56, 0.0  ;;  %v3520_v22 = vrot.slane %v3511_v1, %v14310_v11 }
 0x241   :  { %v3502_v52 = vrot.slane %v3494_v18, %v14310_v11  ;;  %v3073_v62 = vmax.f32 %v16775_v35, 0.0  ;;  %v3512_v41 = vcombine.low %v3068_v8, %v3069_v54  ;;  %v3074_v6 = vmax.f32 %v2464_v50, 0.0 }
 0x242   :  { %v3509_v4 = vrot.slane %v3495_v14, %v14310_v11  ;;  %v3513_v5 = vcombine.low %v3070_v2, %v3071_v45  ;;  %v3541_v33 = vrot.slane %v3072_v38, %v14310_v11  ;;  %v5329_v0 = vmax.f32 %v16741_v47, 0.0 }
 0x243   :  { %v3527_v60 = vrot.slane %v3512_v41, %v14310_v11  ;;  %v5330_v25 = vmax.f32 %v5141_v61, 0.0  ;;  %v5331_v56 = vmax.f32 %v16746_v36, 0.0  ;;  %v5332_v42 = vmax.f32 %v5142_v53, 0.0  ;;  %v16815_v41 = vpop.f32.mrb[14].mxu1 }
 0x244   :  { %v3510_v58 = vcombine.low %v3502_v52, %v3509_v4  ;;  %v3534_v63 = vrot.slane %v3513_v5, %v14310_v11  ;;  %v5109_v10 = vcombine.high %v16756_v17, %v16756_v17  ;;  %v2466_v24 = vcombine.high %v16775_v35, %v16775_v35  ;;  %v13501_v21 = vpop.f32.mrb[15].mxu1 }
 0x245   :  { %v3542_v16 = vcombine.low %v3520_v22, %v3527_v60  ;;  %v5545_v19 = vcombine.low %v5329_v0, %v5330_v25  ;;  %v5116_v51 = vrot.slane %v16756_v17, %v14327_v27  ;;  %v16797_v47 = vcombine.low %v3073_v62, %v3074_v6 }
 0x246   :  { %v3543_v43 = vcombine.low %v3534_v63, %v3541_v33  ;;  %v5546_v61 = vcombine.low %v5331_v56, %v5332_v42  ;;  %v5123_v36 = vrot.slane %v5109_v10, %v14327_v27  ;;  %v1948_v2 = vcombine.low %v16600_v13, %v16589_v15 }
 0x247   :  { %v3550_v37 = vrot.slane %v3542_v16, %v14310_v11  ;;  %v5553_v53 = vrot.slane %v5545_v19, %v14327_v27  ;;  %v5124_v1 = vcombine.high %v5116_v51, %v5116_v51  ;;  %v5325_v50 = vmax.f32 %v5116_v51, 0.0  ;;  %v18437_v19 = vld [vmem:[#allocation12_spill] sm:$0xff] }
 0x248   :  { %v3557_v18 = vrot.slane %v3543_v43, %v14310_v11  ;;  %v5560_v35 = vrot.slane %v5546_v61, %v14327_v27  ;;  %v5125_v8 = vcombine.high %v5123_v36, %v5123_v36  ;;  %v5327_v54 = vmax.f32 %v5123_v36, 0.0 }
 0x249   :  { %v5326_v14 = vmax.f32 %v5124_v1, 0.0  ;;  %v5513_v17 = vcombine.low %v16661_v32, %v5325_v50  ;;  %v16811_v45 = vrot.slane %v1947_v26, %v14310_v11  ;;  %v3569_v52 = vrot.slane %v16797_v47, %v14310_v11 }
 0x24a   :  { %v3558_v38 = vcombine.low %v3550_v37, %v3557_v18  ;;  %v5561_v22 = vcombine.low %v5553_v53, %v5560_v35  ;;  %v5328_v62 = vmax.f32 %v5125_v8, 0.0  ;;  %v16819_v6 = vrot.slane %v1948_v2, %v14310_v11  ;;  %v18438_v37 = vld [vmem:[#allocation18_spill] sm:$0xff] }
 0x24b   :  { %v5527_v4 = vrot.slane %v5513_v17, %v14327_v27  ;;  %v5529_v32 = vcombine.low %v5326_v14, %v5327_v54  ;;  %v1964_v15 = vcombine.low %v16811_v45, %v16470_v55  ;;  %v4080_v46 = vsel %vm4060_vm7, %v3510_v58, -inf }
 0x24c   :  { %v4081_v13 = vsel %vm4062_vm8, %v3558_v38, -inf  ;;  %v5543_v26 = vrot.slane %v5328_v62, %v14327_v27  ;;  %v1965_v5 = vcombine.low %v16482_v40, %v16470_v55  ;;  %v18435_v60 = vrot.slane %v16654_v20, %v14327_v27  ;;  %v18436_v20 = vld [vmem:[#allocation13_spill] sm:$0xff] }
 0x24d   :  { %v4082_v33 = vmax.f32 %v4080_v46, %v4081_v13  ;;  %v5536_v25 = vrot.slane %v5529_v32, %v14327_v27  ;;  %v1963_v56 = vcombine.low %v16811_v45, %v16819_v6  ;;  %v16835_v63 = vsel %vm4060_vm7, %v5561_v22, -inf }
 0x24e   :  { %v5528_v0 = vcombine.low %v18435_v60, %v5527_v4  ;;  %v3075_v58 = vmax.f32 %v2466_v24, 0.0  ;;  %v2120_v42 = vadd.f32 %v16392_v57, %v1964_v15  ;;  %v16839_v10 = vadd.f32 %v16487_v23, %v1965_v5  ;;  %v18439_v24 = vld [vmem:[#allocation14_spill] sm:$0xff]  ;;  %v16852_v57 = vpop.f32.mrb[16].mxu1 }
 0x24f   :  { %v4083_v55 = vrot.slane %v4082_v33, 4  ;;  %v5544_v40 = vcombine.low %v5536_v25, %v5543_v26  ;;  %v2115_v16 = vadd.f32 %v16380_v3, %v1963_v56  ;;  %v16844_v51 = vadd.f32 %v18437_v19, %v18436_v20  ;;  %v13504_v18 = vpop.f32.mrb[17].mxu1 }
 0x250   :  { %v5721_v43 = vsel %vm4060_vm7, %v5528_v0, -inf  ;;  %v2516_v61 = vcombine.high %v2120_v42, %v2120_v42  ;;  %v2523_v36 = vrot.slane %v2120_v42, %v14310_v11  ;;  %v16850_v53 = vadd.f32 %v18439_v24, %v18438_v37  ;;  %v16874_v5 = vpop.f32.mrb[18].mxu1 }
 0x251   :  { %v16854_v23 = vmax.f32 %v4082_v33, %v4083_v55  ;;  %v5722_v1 = vsel %vm5694_vm6, %v5544_v40, -inf  ;;  %v2467_v3 = vcombine.high %v2115_v16, %v2115_v16  ;;  %v2474_v50 = vrot.slane %v2115_v16, %v14310_v11  ;;  %v13507_v56 = vpop.f32.mrb[19].mxu1 }
 0x252   :  { %v16858_v35 = vmax.f32 %v5721_v43, %v5722_v1  ;;  %v2530_v8 = vrot.slane %v2516_v61, %v14310_v11  ;;  %v2531_v54 = vcombine.high %v2523_v36, %v2523_v36  ;;  %v2565_v14 = vcombine.high %v16839_v10, %v16839_v10 }
 0x253   :  { %18440 = vst [vmem:[#allocation13_spill] sm:$0xff] %v16854_v23  ;;  %v2481_v17 = vrot.slane %v2467_v3, %v14310_v11  ;;  %v2482_v2 = vcombine.high %v2474_v50, %v2474_v50  ;;  %v2490_v38 = vrot.slane %v2474_v50, %v14310_v11  ;;  %v16867_v22 = vrot.slane %v16839_v10, %v14310_v11 }
 0x254   :  { %v5724_v4 = vrot.slane %v16858_v35, 4  ;;  %v2532_v32 = vcombine.high %v2530_v8, %v2530_v8  ;;  %v2539_v15 = vrot.slane %v2523_v36, %v14310_v11  ;;  %v2546_v60 = vrot.slane %v2530_v8, %v14310_v11 }
 0x255   :  { %v2483_v21 = vcombine.high %v2481_v17, %v2481_v17  ;;  %v2497_v46 = vrot.slane %v2481_v17, %v14310_v11  ;;  %v2504_v13 = vrot.slane %v2482_v2, %v14310_v11  ;;  %v2512_v26 = vcombine.high %v2490_v38, %v2490_v38 }
 0x256   :  { %v3076_v33 = vmax.f32 %v2490_v38, 0.0  ;;  %v2553_v0 = vrot.slane %v2531_v54, %v14310_v11  ;;  %v2560_v25 = vrot.slane %v2532_v32, %v14310_v11  ;;  %v2561_v43 = vcombine.high %v2539_v15, %v2539_v15 }
 0x257   :  { %v2511_v42 = vrot.slane %v2483_v21, %v14310_v11  ;;  %v2513_v10 = vcombine.high %v2497_v46, %v2497_v46  ;;  %v2514_v55 = vcombine.high %v2504_v13, %v2504_v13  ;;  %v3077_v40 = vmax.f32 %v2504_v13, 0.0 }
 0x258   :  { %v3078_v16 = vmax.f32 %v2512_v26, 0.0  ;;  %v3080_v20 = vmax.f32 %v2497_v46, 0.0  ;;  %v3560_v19 = vcombine.low %v3075_v58, %v3076_v33  ;;  %v2562_v50 = vcombine.high %v2546_v60, %v2546_v60 }
 0x259   :  { %v2515_v61 = vcombine.high %v2511_v42, %v2511_v42  ;;  %v3079_v36 = vmax.f32 %v2514_v55, 0.0  ;;  %v3081_v37 = vmax.f32 %v2511_v42, 0.0  ;;  %v3082_v24 = vmax.f32 %v2513_v10, 0.0 }
 0x25a   :  { %v3561_v1 = vcombine.low %v3077_v40, %v3078_v16  ;;  %v3576_v3 = vrot.slane %v3560_v19, %v14310_v11  ;;  %v2563_v18 = vcombine.high %v2553_v0, %v2553_v0  ;;  %v2564_v17 = vcombine.high %v2560_v25, %v2560_v25 }
 0x25b   :  { %v3562_v8 = vcombine.low %v3079_v36, %v3080_v20  ;;  %v3608_v54 = vcombine.low %v3081_v37, %v3082_v24  ;;  %v3083_v2 = vmax.f32 %v2515_v61, 0.0  ;;  %v3084_v32 = vmax.f32 %v2539_v15, 0.0  ;;  %v16888_v61 = vpop.f32.mrb[20].mxu1 }
 0x25c   :  { %v3583_v38 = vrot.slane %v3561_v1, %v14310_v11  ;;  %v3591_v58 = vcombine.low %v3569_v52, %v3576_v3  ;;  %v3085_v21 = vmax.f32 %v2553_v0, 0.0  ;;  %v3086_v26 = vmax.f32 %v2561_v43, 0.0  ;;  %v13510_v43 = vpop.f32.mrb[21].mxu1 }
 0x25d   :  { %v3590_v46 = vrot.slane %v3562_v8, %v14310_v11  ;;  %v3617_v13 = vrot.slane %v3608_v54, %v14310_v11  ;;  %v3087_v33 = vmax.f32 %v2563_v18, 0.0  ;;  %v3088_v42 = vmax.f32 %v2546_v60, 0.0 }
 0x25e   :  { %v3599_v56 = vrot.slane %v3591_v58, %v14310_v11  ;;  %v3089_v10 = vmax.f32 %v2560_v25, 0.0  ;;  %v3090_v55 = vmax.f32 %v2562_v50, 0.0  ;;  %v3091_v16 = vmax.f32 %v2564_v17, 0.0 }
 0x25f   :  { %v3592_v40 = vcombine.low %v3583_v38, %v3590_v46  ;;  %v3609_v20 = vcombine.low %v3083_v2, %v3084_v32  ;;  %v3610_v19 = vcombine.low %v3085_v21, %v3086_v26  ;;  %v3638_v47 = vrot.slane %v3087_v33, %v14310_v11 }
 0x260   :  { %v3656_v52 = vcombine.low %v3088_v42, %v3089_v10  ;;  %v2579_v15 = vrot.slane %v2565_v14, %v14310_v11  ;;  %v2580_v0 = vcombine.high %v16867_v22, %v16867_v22  ;;  %v3657_v37 = vcombine.low %v3090_v55, %v3091_v16 }
 0x261   :  { %v3606_v36 = vrot.slane %v3592_v40, %v14310_v11  ;;  %v3624_v60 = vrot.slane %v3609_v20, %v14310_v11  ;;  %v3631_v25 = vrot.slane %v3610_v19, %v14310_v11  ;;  %v2588_v3 = vrot.slane %v16867_v22, %v14310_v11 }
 0x262   :  { %v3666_v24 = vrot.slane %v3656_v52, %v14310_v11  ;;  %v2581_v1 = vcombine.high %v2579_v15, %v2579_v15  ;;  %v2595_v50 = vrot.slane %v2579_v15, %v14310_v11  ;;  %v3673_v54 = vrot.slane %v3657_v37, %v14310_v11 }
 0x263   :  { %v3607_v14 = vcombine.low %v3599_v56, %v3606_v36  ;;  %v3639_v18 = vcombine.low %v3617_v13, %v3624_v60  ;;  %v3640_v8 = vcombine.low %v3631_v25, %v3638_v47  ;;  %v2602_v17 = vrot.slane %v2580_v0, %v14310_v11  ;;  %v16919_v25 = vpop.f32.mrb[22].mxu1 }
 0x264   :  { %v2609_v2 = vrot.slane %v2581_v1, %v14310_v11  ;;  %v2610_v38 = vcombine.high %v2588_v3, %v2588_v3  ;;  %v2611_v58 = vcombine.high %v2595_v50, %v2595_v50  ;;  %v16907_v32 = vmax.f32 %v16858_v35, %v5724_v4 }
 0x265   :  { %v4089_v22 = vsel %vm4060_vm7, %v3607_v14, -inf  ;;  %v3647_v21 = vrot.slane %v3639_v18, %v14310_v11  ;;  %v3654_v46 = vrot.slane %v3640_v8, %v14310_v11  ;;  %v3688_v13 = vcombine.low %v3666_v24, %v3673_v54 }
 0x266   :  { %v2612_v26 = vcombine.high %v2602_v17, %v2602_v17  ;;  %v2613_v33 = vcombine.high %v2609_v2, %v2609_v2  ;;  %v3093_v56 = vmax.f32 %v2602_v17, 0.0  ;;  %v3092_v10 = vmax.f32 %v2588_v3, 0.0 }
 0x267   :  { %v3655_v42 = vcombine.low %v3647_v21, %v3654_v46  ;;  %v3094_v55 = vmax.f32 %v2610_v38, 0.0  ;;  %v3096_v40 = vmax.f32 %v2595_v50, 0.0  ;;  %v3097_v20 = vmax.f32 %v2609_v2, 0.0  ;;  %v13513_v50 = vpop.f32.mrb[23].mxu1  ;;  %v18442_v46 = vld [vmem:[#allocation17_spill] sm:$0xff] }
 0x268   :  { %v3095_v16 = vmax.f32 %v2612_v26, 0.0  ;;  %v3098_v19 = vmax.f32 %v2611_v58, 0.0  ;;  %v3099_v47 = vmax.f32 %v2613_v33, 0.0  ;;  %v3658_v4 = vcombine.low %v3092_v10, %v3093_v56 }
 0x269   :  { %v4090_v35 = vsel %vm4062_vm8, %v3655_v42, -inf  ;;  %v5160_v52 = vcombine.high %v16844_v51, %v16844_v51  ;;  %v5167_v15 = vrot.slane %v16844_v51, %v14327_v27  ;;  %v3705_v36 = vcombine.low %v3096_v40, %v3097_v20 }
 0x26a   :  { %v16917_v0 = vmax.f32 %v4089_v22, %v4090_v35  ;;  %v3659_v43 = vcombine.low %v3094_v55, %v3095_v16  ;;  %v3706_v60 = vcombine.low %v3098_v19, %v3099_v47  ;;  %v5726_v37 = vrot.slane %v16907_v32, 2  ;;  %v18443_v47 = vld [vmem:[#allocation15_spill] sm:$0xff] }
 0x26b   :  { %v3696_v24 = vrot.slane %v3688_v13, %v14310_v11  ;;  %v5174_v1 = vrot.slane %v5160_v52, %v14327_v27  ;;  %v5175_v3 = vcombine.high %v5167_v15, %v5167_v15  ;;  %v3680_v14 = vrot.slane %v3658_v4, %v14310_v11 }
 0x26c   :  { %18441 = vst [vmem:[#allocation12_spill] sm:$0xff] %v16917_v0  ;;  %v3687_v18 = vrot.slane %v3659_v43, %v14310_v11  ;;  %v3714_v51 = vrot.slane %v3705_v36, %v14310_v11  ;;  %v3721_v8 = vrot.slane %v3706_v60, %v14310_v11  ;;  %v5143_v38 = vcombine.high %v16850_v53, %v16850_v53 }
 0x26d   :  { %v5176_v54 = vcombine.high %v5174_v1, %v5174_v1  ;;  %v5338_v17 = vmax.f32 %v5175_v3, 0.0  ;;  %v5339_v2 = vmax.f32 %v5174_v1, 0.0  ;;  %v5150_v21 = vrot.slane %v16850_v53, %v14327_v27  ;;  %v16949_v1 = vpop.f32.mrb[24].mxu1 }
 0x26e   :  { %v3689_v58 = vcombine.low %v3680_v14, %v3687_v18  ;;  %v16930_v22 = vcombine.low %v3714_v51, %v3721_v8  ;;  %v1966_v13 = vcombine.low %v18442_v46, %v16618_v28  ;;  %v5337_v26 = vmax.f32 %v5167_v15, 0.0  ;;  %v18444_v18 = vld [vmem:[#allocation19_spill] sm:$0xff] }
 0x26f   :  { %v5579_v33 = vcombine.low %v5338_v17, %v5339_v2  ;;  %v5157_v56 = vrot.slane %v5143_v38, %v14327_v27  ;;  %v1967_v42 = vcombine.low %v16626_v9, %v16618_v28  ;;  %v16941_v40 = vmax.f32 %v5176_v54, 0.0 }
 0x270   :  { %v3703_v55 = vrot.slane %v3689_v58, %v14310_v11  ;;  %v5158_v16 = vcombine.high %v5150_v21, %v5150_v21  ;;  %v3744_v53 = vrot.slane %v16930_v22, %v14310_v11  ;;  %v5333_v19 = vmax.f32 %v5150_v21, 0.0 }
 0x271   :  { %v5159_v20 = vcombine.high %v5157_v56, %v5157_v56  ;;  %v2130_v35 = vadd.f32 %v18443_v47, %v1966_v13  ;;  %v5335_v15 = vmax.f32 %v5157_v56, 0.0  ;;  %v2135_v43 = vadd.f32 %v16542_v34, %v1967_v42 }
 0x272   :  { %v3704_v4 = vcombine.low %v3696_v24, %v3703_v55  ;;  %v5334_v52 = vmax.f32 %v5158_v16, 0.0  ;;  %v5593_v28 = vrot.slane %v5579_v33, %v14327_v27  ;;  %v16954_v51 = vadd.f32 %v18444_v18, %v16615_v12  ;;  %v13516_v24 = vpop.f32.mrb[25].mxu1 }
 0x273   :  { %v5336_v9 = vmax.f32 %v5159_v20, 0.0  ;;  %v2614_v36 = vcombine.high %v2130_v35, %v2130_v35  ;;  %v2621_v60 = vrot.slane %v2130_v35, %v14310_v11  ;;  %v2663_v50 = vcombine.high %v2135_v43, %v2135_v43 }
 0x274   :  { %v5562_v3 = vcombine.low %v5333_v19, %v5334_v52  ;;  %v2670_v14 = vrot.slane %v2135_v43, %v14310_v11  ;;  %v5576_v38 = vrot.slane %v5335_v15, %v14327_v27 }
 0x275   :  { %v5578_v8 = vcombine.low %v5336_v9, %v5337_v26  ;;  %v2628_v34 = vrot.slane %v2614_v36, %v14310_v11  ;;  %v2629_v54 = vcombine.high %v2621_v60, %v2621_v60  ;;  %v2637_v17 = vrot.slane %v2621_v60, %v14310_v11 }
 0x276   :  { %v5569_v2 = vrot.slane %v5562_v3, %v14327_v27  ;;  %v2677_v58 = vrot.slane %v2663_v50, %v14310_v11  ;;  %v2678_v21 = vcombine.high %v2670_v14, %v2670_v14  ;;  %v2686_v55 = vrot.slane %v2670_v14, %v14310_v11  ;;  %v16971_v14 = vpop.f32.mrb[26].mxu1 }
 0x277   :  { %v5586_v46 = vrot.slane %v5578_v8, %v14327_v27  ;;  %v2630_v13 = vcombine.high %v2628_v34, %v2628_v34  ;;  %v2644_v12 = vrot.slane %v2628_v34, %v14310_v11  ;;  %v2651_v33 = vrot.slane %v2629_v54, %v14310_v11 }
 0x278   :  { %v5577_v26 = vcombine.low %v5569_v2, %v5576_v38  ;;  %v2659_v56 = vcombine.high %v2637_v17, %v2637_v17  ;;  %v2679_v42 = vcombine.high %v2677_v58, %v2677_v58  ;;  %v3100_v52 = vmax.f32 %v2637_v17, 0.0  ;;  %v13519_v2 = vpop.f32.mrb[27].mxu1 }
 0x279   :  { %v16965_v16 = vcombine.low %v5586_v46, %v5593_v28  ;;  %v2658_v20 = vrot.slane %v2630_v13, %v14310_v11  ;;  %v2660_v19 = vcombine.high %v2644_v12, %v2644_v12  ;;  %v2661_v47 = vcombine.high %v2651_v33, %v2651_v33 }
 0x27a   :  { %v5731_v35 = vsel %vm5694_vm6, %v5577_v26, -inf  ;;  %v3101_v15 = vmax.f32 %v2651_v33, 0.0  ;;  %v3102_v43 = vmax.f32 %v2659_v56, 0.0  ;;  %v3104_v60 = vmax.f32 %v2644_v12, 0.0 }
 0x27b   :  { %v5732_v9 = vmax.f32 %v16835_v63, %v5731_v35  ;;  %v3103_v36 = vmax.f32 %v2661_v47, 0.0  ;;  %v3105_v3 = vmax.f32 %v2658_v20, 0.0  ;;  %v2662_v50 = vcombine.high %v2658_v20, %v2658_v20 }
 0x27c   :  { %v3106_v18 = vmax.f32 %v2660_v19, 0.0  ;;  %v3707_v24 = vcombine.low %v3100_v52, %v3101_v15  ;;  %v2693_v28 = vrot.slane %v2677_v58, %v14310_v11  ;;  %v3735_v8 = vrot.slane %v3102_v43, %v14310_v11 }
 0x27d   :  { %v3753_v34 = vcombine.low %v3103_v36, %v3104_v60  ;;  %v2700_v54 = vrot.slane %v2678_v21, %v14310_v11  ;;  %v2707_v17 = vrot.slane %v2679_v42, %v14310_v11  ;;  %v2708_v46 = vcombine.high %v2686_v55, %v2686_v55 }
 0x27e   :  { %v3728_v63 = vrot.slane %v3707_v24, %v14310_v11  ;;  %v3754_v38 = vcombine.low %v3105_v3, %v3106_v18  ;;  %v2709_v13 = vcombine.high %v2693_v28, %v2693_v28  ;;  %v4098_v12 = vsel %vm4060_vm7, %v3704_v4, -inf }
 0x27f   :  { %v5733_v33 = vrot.slane %v5732_v9, 4  ;;  %v3763_v58 = vrot.slane %v3753_v34, %v14310_v11  ;;  %v2710_v26 = vcombine.high %v2700_v54, %v2700_v54  ;;  %v3107_v19 = vmax.f32 %v2662_v50, 0.0 }
 0x280   :  { %v3737_v56 = vcombine.low %v3728_v63, %v3735_v8  ;;  %v3770_v20 = vrot.slane %v3754_v38, %v14310_v11  ;;  %v3108_v47 = vmax.f32 %v2686_v55, 0.0  ;;  %v3109_v21 = vmax.f32 %v2700_v54, 0.0 }
 0x281   :  { %v3110_v35 = vmax.f32 %v2708_v46, 0.0  ;;  %v3111_v42 = vmax.f32 %v2710_v26, 0.0  ;;  %v3112_v52 = vmax.f32 %v2693_v28, 0.0  ;;  %v3113_v36 = vmax.f32 %v2707_v17, 0.0 }
 0x282   :  { %v3751_v15 = vrot.slane %v3737_v56, %v14310_v11  ;;  %v3785_v43 = vcombine.low %v3763_v58, %v3770_v20  ;;  %v3114_v60 = vmax.f32 %v2709_v13, 0.0  ;;  %v3755_v3 = vcombine.low %v3107_v19, %v3108_v47  ;;  %v18446_v20 = vld [vmem:[#allocation16_spill] sm:$0xff] }
 0x283   :  { %v3756_v4 = vcombine.low %v3109_v21, %v3110_v35  ;;  %v3802_v18 = vcombine.low %v3111_v42, %v3112_v52  ;;  %v5194_v24 = vcombine.high %v16954_v51, %v16954_v51  ;;  %v16983_v8 = vmax.f32 %v5732_v9, %v5733_v33  ;;  %v18447_v19 = vld [vmem:[#allocation20_spill] sm:$0xff] }
 0x284   :  { %v3752_v55 = vcombine.low %v3744_v53, %v3751_v15  ;;  %v3803_v50 = vcombine.low %v3113_v36, %v3114_v60  ;;  %v5201_v28 = vrot.slane %v16954_v51, %v14327_v27  ;;  %v3777_v34 = vrot.slane %v3755_v3, %v14310_v11 }
 0x285   :  { %v3784_v54 = vrot.slane %v3756_v4, %v14310_v11  ;;  %v3811_v2 = vrot.slane %v3802_v18, %v14310_v11  ;;  %v16994_v63 = vrot.slane %v5194_v24, %v14327_v27  ;;  %v2711_v38 = vcombine.high %v2707_v17, %v2707_v17  ;;  %v18449_v18 = vld [vmem:[#allocation22_spill] sm:$0xff] }
 0x286   :  { %v4099_v9 = vsel %vm4062_vm8, %v3752_v55, -inf  ;;  %v3818_v46 = vrot.slane %v3803_v50, %v14310_v11  ;;  %v5209_v22 = vcombine.high %v5201_v28, %v5201_v28  ;;  %v3793_v53 = vrot.slane %v3785_v43, %v14310_v11 }
 0x287   :  { %v16999_v13 = vmax.f32 %v4098_v12, %v4099_v9  ;;  %v3786_v51 = vcombine.low %v3777_v34, %v3784_v54  ;;  %v5210_v33 = vcombine.high %v16994_v63, %v16994_v63  ;;  %v5345_v26 = vmax.f32 %v5201_v28, 0.0  ;;  %v18448_v12 = vld [vmem:[#allocation25_spill] sm:$0xff] }
 0x288   :  { %v17003_v58 = vcombine.low %v3811_v2, %v3818_v46  ;;  %v5346_v56 = vmax.f32 %v5209_v22, 0.0  ;;  %v4975_v47 = vadd.f32 %v18447_v19, %v18446_v20  ;;  %v5347_v21 = vmax.f32 %v16994_v63, 0.0  ;;  %v17029_v20 = vpop.f32.mrb[28].mxu1 }
 0x289   :  { %18445 = vst [vmem:[#allocation18_spill] sm:$0xff] %v16999_v13  ;;  %v3800_v17 = vrot.slane %v3786_v51, %v14310_v11  ;;  %v5739_v35 = vsel %vm4060_vm7, %v16965_v16, -inf  ;;  %v1968_v42 = vcombine.low %v18448_v12, %v16710_v39  ;;  %v5348_v4 = vmax.f32 %v5210_v33, 0.0 }
 0x28a   :  { %v5612_v15 = vcombine.low %v5345_v26, %v5346_v56  ;;  %v5177_v43 = vcombine.high %v4975_v47, %v4975_v47  ;;  %v5184_v36 = vrot.slane %v4975_v47, %v14327_v27  ;;  %v3841_v3 = vrot.slane %v17003_v58, %v14310_v11  ;;  %v18450_v56 = vld [vmem:[#allocation24_spill] sm:$0xff] }
 0x28b   :  { %v17015_v60 = vcombine.low %v3793_v53, %v3800_v17  ;;  %v2140_v24 = vadd.f32 %v18449_v18, %v1968_v42  ;;  %v3115_v28 = vmax.f32 %v2711_v38, 0.0  ;;  %v1969_v63 = vcombine.low %v16713_v7, %v16710_v39  ;;  %v13522_v7 = vpop.f32.mrb[29].mxu1 }
 0x28c   :  { %v5191_v55 = vrot.slane %v5177_v43, %v14327_v27  ;;  %v5192_v16 = vcombine.high %v5184_v36, %v5184_v36  ;;  %v5341_v50 = vmax.f32 %v5184_v36, 0.0  ;;  %v5626_v34 = vrot.slane %v5612_v15, %v14327_v27 }
 0x28d   :  { %v2712_v54 = vcombine.high %v2140_v24, %v2140_v24  ;;  %v2719_v2 = vrot.slane %v2140_v24, %v14310_v11  ;;  %v2145_v38 = vadd.f32 %v18450_v56, %v1969_v63  ;;  %v1970_v39 = vcombine.low %v16720_v31, %v16811_v45 }
 0x28e   :  { %v5193_v9 = vcombine.high %v5191_v55, %v5191_v55  ;;  %v5342_v46 = vmax.f32 %v5192_v16, 0.0  ;;  %v5343_v22 = vmax.f32 %v5191_v55, 0.0  ;;  %v5595_v53 = vcombine.low %v16941_v40, %v5341_v50 }
 0x28f   :  { %v2726_v51 = vrot.slane %v2712_v54, %v14310_v11  ;;  %v2727_v33 = vcombine.high %v2719_v2, %v2719_v2  ;;  %v2735_v26 = vrot.slane %v2719_v2, %v14310_v11  ;;  %v2761_v24 = vcombine.high %v2145_v38, %v2145_v38 }
 0x290   :  { %v5344_v19 = vmax.f32 %v5193_v9, 0.0  ;;  %v5602_v47 = vrot.slane %v5595_v53, %v14327_v27  ;;  %v5609_v17 = vrot.slane %v5342_v46, %v14327_v27  ;;  %v17040_v56 = vcombine.low %v5347_v21, %v5348_v4 }
 0x291   :  { %v2728_v12 = vcombine.high %v2726_v51, %v2726_v51  ;;  %v2742_v40 = vrot.slane %v2726_v51, %v14310_v11  ;;  %v2749_v42 = vrot.slane %v2727_v33, %v14310_v11  ;;  %v2757_v15 = vcombine.high %v2735_v26, %v2735_v26 }
 0x292   :  { %v5610_v43 = vcombine.low %v5602_v47, %v5609_v17  ;;  %v5611_v36 = vcombine.low %v5343_v22, %v5344_v19  ;;  %v3116_v18 = vmax.f32 %v2735_v26, 0.0 }
 0x293   :  { %v2756_v55 = vrot.slane %v2728_v12, %v14310_v11  ;;  %v2758_v16 = vcombine.high %v2742_v40, %v2742_v40  ;;  %v2759_v50 = vcombine.high %v2749_v42, %v2749_v42  ;;  %v3117_v54 = vmax.f32 %v2749_v42, 0.0 }
 0x294   :  { %v5619_v2 = vrot.slane %v5611_v36, %v14327_v27  ;;  %v5740_v31 = vsel %vm5694_vm6, %v5610_v43, -inf  ;;  %v3118_v63 = vmax.f32 %v2757_v15, 0.0  ;;  %v3120_v9 = vmax.f32 %v2742_v40, 0.0 }
 0x295   :  { %v5741_v46 = vmax.f32 %v5739_v35, %v5740_v31  ;;  %v2760_v53 = vcombine.high %v2756_v55, %v2756_v55  ;;  %v3119_v51 = vmax.f32 %v2759_v50, 0.0  ;;  %v3121_v33 = vmax.f32 %v2756_v55, 0.0 }
 0x296   :  { %v17042_v22 = vcombine.low %v5619_v2, %v5626_v34  ;;  %v3122_v26 = vmax.f32 %v2758_v16, 0.0  ;;  %v3804_v19 = vcombine.low %v3115_v28, %v3116_v18  ;;  %v3832_v43 = vrot.slane %v3117_v54, %v14310_v11  ;;  %v18451_v34 = vld [vmem:[#allocation27_spill] sm:$0xff] }
 0x297   :  { %v5742_v47 = vrot.slane %v5741_v46, 4  ;;  %v3123_v17 = vmax.f32 %v2760_v53, 0.0  ;;  %v3850_v7 = vcombine.low %v3118_v63, %v3119_v51  ;;  %v3851_v12 = vcombine.low %v3120_v9, %v3121_v33 }
 0x298   :  { %v3825_v42 = vrot.slane %v3804_v19, %v14310_v11  ;;  %v2768_v40 = vrot.slane %v2145_v38, %v14310_v11  ;;  %v2775_v35 = vrot.slane %v2761_v24, %v14310_v11  ;;  %v2150_v36 = vadd.f32 %v18451_v34, %v1970_v39 }
 0x299   :  { %v3852_v15 = vcombine.low %v3122_v26, %v3123_v17  ;;  %v3860_v21 = vrot.slane %v3850_v7, %v14310_v11  ;;  %v3867_v4 = vrot.slane %v3851_v12, %v14310_v11  ;;  %v17054_v50 = vsel %vm4060_vm7, %v17015_v60, -inf }
 0x29a   :  { %v3834_v28 = vcombine.low %v3825_v42, %v3832_v43  ;;  %v2776_v18 = vcombine.high %v2768_v40, %v2768_v40  ;;  %v2777_v55 = vcombine.high %v2775_v35, %v2775_v35  ;;  %v2784_v16 = vrot.slane %v2768_v40, %v14310_v11  ;;  %18452 = vst [vmem:[#allocation14_spill] sm:$0xff] %v17054_v50 }
 0x29b   :  { %v17056_v54 = vmax.f32 %v5741_v46, %v5742_v47  ;;  %v3874_v38 = vrot.slane %v3852_v15, %v14310_v11  ;;  %v2791_v24 = vrot.slane %v2775_v35, %v14310_v11  ;;  %v3882_v9 = vcombine.low %v3860_v21, %v3867_v4 }
 0x29c   :  { %v3848_v2 = vrot.slane %v3834_v28, %v14310_v11  ;;  %v2798_v31 = vrot.slane %v2776_v18, %v14310_v11  ;;  %v2805_v39 = vrot.slane %v2777_v55, %v14310_v11  ;;  %v2806_v63 = vcombine.high %v2784_v16, %v2784_v16  ;;  %v18453_v18 = vld [vmem:[#allocation28_spill] sm:$0xff] }
 0x29d   :  { %v2807_v53 = vcombine.high %v2791_v24, %v2791_v24  ;;  %v3124_v51 = vmax.f32 %v2784_v16, 0.0  ;;  %v2810_v33 = vcombine.high %v2150_v36, %v2150_v36  ;;  %v3128_v17 = vmax.f32 %v2791_v24, 0.0 }
 0x29e   :  { %v3849_v60 = vcombine.low %v3841_v3, %v3848_v2  ;;  %v2808_v46 = vcombine.high %v2798_v31, %v2798_v31  ;;  %v2809_v26 = vcombine.high %v2805_v39, %v2805_v39  ;;  %v3125_v19 = vmax.f32 %v2798_v31, 0.0 }
 0x29f   :  { %v3126_v47 = vmax.f32 %v2806_v63, 0.0  ;;  %v3129_v7 = vmax.f32 %v2805_v39, 0.0  ;;  %v2817_v12 = vrot.slane %v2150_v36, %v14310_v11  ;;  %v3130_v43 = vmax.f32 %v2807_v53, 0.0 }
 0x2a0   :  { %v3127_v42 = vmax.f32 %v2808_v46, 0.0  ;;  %v3131_v40 = vmax.f32 %v2809_v26, 0.0  ;;  %v3853_v35 = vcombine.low %v3124_v51, %v3125_v19  ;;  %v2824_v21 = vrot.slane %v2810_v33, %v14310_v11 }
 0x2a1   :  { %v3900_v15 = vcombine.low %v3128_v17, %v3129_v7  ;;  %v2825_v4 = vcombine.high %v2817_v12, %v2817_v12  ;;  %v2833_v34 = vrot.slane %v2817_v12, %v14310_v11  ;;  %v4990_v55 = vadd.f32 %v18453_v18, %v16735_v44 }
 0x2a2   :  { %v3881_v58 = vrot.slane %v3853_v35, %v14310_v11  ;;  %v3899_v3 = vcombine.low %v3126_v47, %v3127_v42  ;;  %v3901_v28 = vcombine.low %v3130_v43, %v3131_v40  ;;  %v2826_v36 = vcombine.high %v2824_v21, %v2824_v21  ;;  %v17082_v43 = vpop.f32.mrb[30].mxu1 }
 0x2a3   :  { %v3915_v16 = vrot.slane %v3900_v15, %v14310_v11  ;;  %v2840_v24 = vrot.slane %v2824_v21, %v14310_v11  ;;  %v2847_v2 = vrot.slane %v2825_v4, %v14310_v11  ;;  %v2855_v63 = vcombine.high %v2833_v34, %v2833_v34  ;;  %v13525_v21 = vpop.f32.mrb[31].mxu1 }
 0x2a4   :  { %v3883_v31 = vcombine.low %v3874_v38, %v3881_v58  ;;  %v3908_v39 = vrot.slane %v3899_v3, %v14310_v11  ;;  %v3132_v53 = vmax.f32 %v2833_v34, 0.0  ;;  %v17077_v51 = vrot.slane %v2826_v36, %v14310_v11 }
 0x2a5   :  { %v2856_v33 = vcombine.high %v2840_v24, %v2840_v24  ;;  %v2857_v46 = vcombine.high %v2847_v2, %v2847_v2  ;;  %v3133_v26 = vmax.f32 %v2847_v2, 0.0  ;;  %v3890_v44 = vrot.slane %v3882_v9, %v14310_v11 }
 0x2a6   :  { %v3897_v19 = vrot.slane %v3883_v31, %v14310_v11  ;;  %v3930_v47 = vcombine.low %v3908_v39, %v3915_v16  ;;  %v3134_v17 = vmax.f32 %v2855_v63, 0.0  ;;  %v3136_v12 = vmax.f32 %v2840_v24, 0.0 }
 0x2a7   :  { %v3135_v7 = vmax.f32 %v2857_v46, 0.0  ;;  %v3137_v38 = vmax.f32 %v17077_v51, 0.0  ;;  %v3138_v42 = vmax.f32 %v2856_v33, 0.0  ;;  %v17085_v40 = vsel %vm4062_vm8, %v3849_v60, -inf  ;;  %v18456_v60 = vld [vmem:[#allocation23_spill] sm:$0xff] }
 0x2a8   :  { %18454 = vst [vmem:[#allocation17_spill] sm:$0xff] %v17085_v40  ;;  %v17087_v35 = vcombine.low %v3890_v44, %v3897_v19  ;;  %v3922_v15 = vrot.slane %v3901_v28, %v14310_v11  ;;  %v3929_v9 = vrot.slane %v3132_v53, %v14310_v11  ;;  %v3947_v4 = vcombine.low %v3133_v26, %v3134_v17 }
 0x2a9   :  { %v3948_v34 = vcombine.low %v3135_v7, %v3136_v12  ;;  %v17091_v58 = vcombine.low %v3137_v38, %v3138_v42  ;;  %v5228_v3 = vcombine.high %v4990_v55, %v4990_v55  ;;  %v2858_v18 = vcombine.high %v17077_v51, %v17077_v51 }
 0x2aa   :  { %18455 = vst [vmem:[#allocation15_spill] sm:$0xff] %v17087_v35  ;;  %v3931_v16 = vcombine.low %v3922_v15, %v3929_v9  ;;  %v5235_v36 = vrot.slane %v4990_v55, %v14327_v27  ;;  %v4985_v24 = vadd.f32 %v16695_v59, %v18456_v60  ;;  %v3938_v2 = vrot.slane %v3930_v47, %v14310_v11 }
 0x2ab   :  { %v3964_v28 = vrot.slane %v3948_v34, %v14310_v11  ;;  %v5242_v31 = vrot.slane %v5228_v3, %v14327_v27  ;;  %v5635_v39 = vrot.slane %v17040_v56, %v14327_v27  ;;  %v3957_v53 = vrot.slane %v3947_v4, %v14310_v11 }
 0x2ac   :  { %v3945_v63 = vrot.slane %v3931_v16, %v14310_v11  ;;  %v5243_v51 = vcombine.high %v5235_v36, %v5235_v36  ;;  %v5211_v33 = vcombine.high %v4985_v24, %v4985_v24  ;;  %v3971_v55 = vrot.slane %v17091_v58, %v14310_v11 }
 0x2ad   :  { %v5244_v46 = vcombine.high %v5242_v31, %v5242_v31  ;;  %v5355_v59 = vmax.f32 %v5242_v31, 0.0  ;;  %v5218_v26 = vrot.slane %v4985_v24, %v14327_v27  ;;  %v17108_v19 = vcombine.low %v3957_v53, %v3964_v28 }
 0x2ae   :  { %v3946_v44 = vcombine.low %v3938_v2, %v3945_v63  ;;  %v5354_v47 = vmax.f32 %v5243_v51, 0.0  ;;  %v5225_v17 = vrot.slane %v5211_v33, %v14327_v27  ;;  %v5353_v56 = vmax.f32 %v5235_v36, 0.0  ;;  %v18457_v2 = vld [vmem:[#allocation11_spill] sm:$0xff] }
 0x2af   :  { %v5356_v7 = vmax.f32 %v5244_v46, 0.0  ;;  %v5226_v12 = vcombine.high %v5218_v26, %v5218_v26  ;;  %v5349_v38 = vmax.f32 %v5218_v26, 0.0  ;;  %v5748_v21 = vsel %vm4060_vm7, %v17042_v22, -inf }
 0x2b0   :  { %v5661_v42 = vcombine.low %v5354_v47, %v5355_v59  ;;  %v5227_v15 = vcombine.high %v5225_v17, %v5225_v17  ;;  %v5351_v9 = vmax.f32 %v5225_v17, 0.0  ;;  %v1971_v16 = vcombine.low %v16819_v6, %v16811_v45  ;;  %v17128_v45 = vld [vmem:[%s18316_s6] sm:$0xf]  ;;  %s13872_s6 = smov 80  }
 0x2b1   :  { %v5675_v4 = vrot.slane %v5356_v7, %v14327_v27  ;;  %v5350_v34 = vmax.f32 %v5226_v12, 0.0  ;;  %v5642_v3 = vrot.slane %v5349_v38, %v14327_v27  ;;  %v3987_v36 = vrot.slane %v17108_v19, %v14310_v11 }
 0x2b2   :  { %v5668_v60 = vrot.slane %v5661_v42, %v14327_v27  ;;  %v5352_v24 = vmax.f32 %v5227_v15, 0.0  ;;  %v5936_v28 = vsub.s32 2, %v18457_v2  ;;  %v17122_v31 = vsel %vm4062_vm8, %v3946_v44, -inf }
 0x2b3   :  { %18458 = vst [vmem:[#allocation19_spill] sm:$0xff] %v17122_v31  ;;  %v5643_v22 = vcombine.low %v5635_v39, %v5642_v3  ;;  %v5644_v63 = vcombine.low %v5350_v34, %v5351_v9  ;;  %v2155_v53 = vadd.f32 %v16751_v30, %v1971_v16  ;;  %v3139_v46 = vmax.f32 %v2858_v18, 0.0 }
 0x2b4   :  { %v5676_v51 = vcombine.low %v5668_v60, %v5675_v4  ;;  %v5645_v33 = vcombine.low %v5352_v24, %v5353_v56  ;;  %v5937_v6 = vrot.slane %v17128_v45, %v5936_v28  ;;  %v5719_v39 = vrot.slane %v16779_v49, 1  ;;  %v17148_v60 = vpop.f32.mrb[30].mxu0 }
 0x2b5   :  { %v5749_v59 = vsel %vm5694_vm6, %v5643_v22, -inf  ;;  %v2859_v26 = vcombine.high %v2155_v53, %v2155_v53  ;;  %v2866_v44 = vrot.slane %v2155_v53, %v14310_v11  ;;  %v5652_v47 = vrot.slane %v5644_v63, %v14327_v27 }
 0x2b6   :  { %v5659_v30 = vrot.slane %v5645_v33, %v14327_v27  ;;  %v17136_v17 = vmax.f32 %v5748_v21, %v5749_v59  ;;  %v6931_v18 = vcombine.high %v5937_v6, %v5937_v6  ;;  %v6938_v38 = vrot.slane %v5937_v6, %v14310_v11 }
 0x2b7   :  { %v2873_v56 = vrot.slane %v2859_v26, %v14310_v11  ;;  %v2874_v7 = vcombine.high %v2866_v44, %v2866_v44  ;;  %v2882_v12 = vrot.slane %v2866_v44, %v14310_v11  ;;  %v17142_v42 = vsel %vm5694_vm6, %v5676_v51, -inf }
 0x2b8   :  { %v5660_v15 = vcombine.low %v5652_v47, %v5659_v30  ;;  %v6945_v4 = vrot.slane %v6931_v18, %v14310_v11  ;;  %v6946_v28 = vcombine.high %v6938_v38, %v6938_v38  ;;  %v17151_v63 = vmax.f32 %v16779_v49, %v5719_v39 }
 0x2b9   :  { %v2875_v34 = vcombine.high %v2873_v56, %v2873_v56  ;;  %v2889_v21 = vrot.slane %v2873_v56, %v14310_v11  ;;  %v2896_v3 = vrot.slane %v2874_v7, %v14310_v11  ;;  %v2904_v16 = vcombine.high %v2882_v12, %v2882_v12 }
 0x2ba   :  { %v3140_v24 = vmax.f32 %v2882_v12, 0.0  ;;  %v6947_v22 = vcombine.high %v6945_v4, %v6945_v4  ;;  %v6954_v47 = vrot.slane %v6938_v38, %v14310_v11  ;;  %v6961_v49 = vrot.slane %v6945_v4, %v14310_v11 }
 0x2bb   :  { %v2903_v53 = vrot.slane %v2875_v34, %v14310_v11  ;;  %v2905_v51 = vcombine.high %v2889_v21, %v2889_v21  ;;  %v2906_v33 = vcombine.high %v2896_v3, %v2896_v3  ;;  %v3141_v6 = vmax.f32 %v2896_v3, 0.0 }
 0x2bc   :  { %v3142_v59 = vmax.f32 %v2904_v16, 0.0  ;;  %v3144_v26 = vmax.f32 %v2889_v21, 0.0  ;;  %v3950_v44 = vcombine.low %v3139_v46, %v3140_v24  ;;  %v6968_v39 = vrot.slane %v6946_v28, %v14310_v11  ;;  %v17159_v21 = vpop.f32.mrb[31].mxu0 }
 0x2bd   :  { %v2907_v30 = vcombine.high %v2903_v53, %v2903_v53  ;;  %v3143_v18 = vmax.f32 %v2906_v33, 0.0  ;;  %v3145_v56 = vmax.f32 %v2903_v53, 0.0  ;;  %v3146_v7 = vmax.f32 %v2905_v51, 0.0  ;;  %18459 = vst [vmem:[#allocation16_spill] sm:$0xff] %v17159_v21  ;;  %v17165_v53 = vpop.f32.mrb[32].mxu1 }
 0x2be   :  { %v3978_v12 = vrot.slane %v3950_v44, %v14310_v11  ;;  %v3996_v52 = vcombine.low %v3141_v6, %v3142_v59  ;;  %v6975_v3 = vrot.slane %v6947_v22, %v14310_v11  ;;  %v7911_v16 = vcombine.low %v6954_v47, %v6968_v39  ;;  %v13528_v22 = vpop.f32.mrb[33].mxu1 }
 0x2bf   :  { %v3147_v34 = vmax.f32 %v2907_v30, 0.0  ;;  %v3997_v10 = vcombine.low %v3143_v18, %v3144_v26  ;;  %v3998_v62 = vcombine.low %v3145_v56, %v3146_v7  ;;  %v13186_v24 = vcombine.high %v6954_v47, %v6968_v39 }
 0x2c0   :  { %v3980_v46 = vcombine.low %v3971_v55, %v3978_v12  ;;  %v4005_v38 = vrot.slane %v3996_v52, %v14310_v11  ;;  %v7913_v33 = vcombine.low %v6961_v49, %v6975_v3  ;;  %v13187_v59 = vcombine.high %v6961_v49, %v6975_v3 }
 0x2c1   :  { %v4012_v4 = vrot.slane %v3997_v10, %v14310_v11  ;;  %v4019_v28 = vrot.slane %v3998_v62, %v14310_v11  ;;  %v4026_v51 = vrot.slane %v3147_v34, %v14310_v11  ;;  %v7921_v58 = vrot.slane %v7911_v16, %v14310_v11 }
 0x2c2   :  { %v3994_v6 = vrot.slane %v3980_v46, %v14310_v11  ;;  %v7928_v55 = vrot.slane %v13186_v24, %v14310_v11  ;;  %v7935_v44 = vrot.slane %v7913_v33, %v14310_v11  ;;  %v6976_v30 = vcombine.high %v6954_v47, %v6954_v47 }
 0x2c3   :  { %v4027_v52 = vcombine.low %v4005_v38, %v4012_v4  ;;  %v4028_v26 = vcombine.low %v4019_v28, %v4026_v51  ;;  %v7942_v10 = vrot.slane %v13187_v59, %v14310_v11  ;;  %v6978_v56 = vcombine.high %v6968_v39, %v6968_v39 }
 0x2c4   :  { %v17177_v62 = vcombine.low %v3987_v36, %v3994_v6  ;;  %v7943_v18 = vcombine.low %v7921_v58, %v7928_v55  ;;  %v17181_v7 = vsel %vm4060_vm7, %v5660_v15, -inf  ;;  %v7960_v34 = vcombine.low %v6976_v30, %v6954_v47 }
 0x2c5   :  { %v4035_v12 = vrot.slane %v4027_v52, %v14310_v11  ;;  %v7961_v46 = vcombine.low %v6968_v39, %v6976_v30  ;;  %v7944_v38 = vcombine.low %v7935_v44, %v7942_v10  ;;  %v7962_v24 = vcombine.low %v6978_v56, %v6961_v49 }
 0x2c6   :  { %18460 = vst [vmem:[#allocation20_spill] sm:$0xff] %v17177_v62  ;;  %v17185_v16 = vrot.slane %v7943_v18, %v14310_v11  ;;  %v6977_v4 = vcombine.high %v6961_v49, %v6961_v49  ;;  %v4042_v19 = vrot.slane %v4028_v26, %v14310_v11  ;;  %v17189_v36 = vrot.slane %v7960_v34, %v14310_v11 }
 0x2c7   :  { %v17192_v28 = vrot.slane %v7961_v46, %v14310_v11  ;;  %v6979_v15 = vcombine.high %v6975_v3, %v6975_v3  ;;  %v17195_v51 = vrot.slane %v7944_v38, %v14310_v11  ;;  %v17198_v39 = vrot.slane %v7962_v24, %v14310_v11 }
 0x2c8   :  { %v8001_v33 = vcombine.low %v6975_v3, %v6977_v4  ;;  %v8035_v22 = vcombine.low %v7928_v55, %v7935_v44  ;;  %v7984_v6 = vcombine.low %v7921_v58, %v17189_v36  ;;  %v8036_v52 = vcombine.low %v7942_v10, %v7921_v58 }
 0x2c9   :  { %v8002_v49 = vcombine.low %v6979_v15, %v6954_v47  ;;  %v8026_v59 = vcombine.low %v17192_v28, %v7921_v58  ;;  %v7959_v26 = vcombine.low %v17185_v16, %v17195_v51  ;;  %v7985_v30 = vcombine.low %v17192_v28, %v17198_v39 }
 0x2ca   :  { %v17207_v18 = vrot.slane %v8001_v33, %v14310_v11  ;;  %v17210_v56 = vrot.slane %v8035_v22, %v14310_v11  ;;  %v17212_v3 = vcombine.low %v4035_v12, %v4042_v19  ;;  %v17215_v55 = vrot.slane %v7984_v6, %v14310_v11  ;;  %v17243_v33 = vpop.f32.mrb[34].mxu1 }
 0x2cb   :  { %v17218_v47 = vrot.slane %v8002_v49, %v14310_v11  ;;  %v17221_v58 = vrot.slane %v8036_v52, %v14310_v11  ;;  %v8206_v44 = vadd.f32 %v16815_v41, %v7959_v26  ;;  %v8211_v10 = vadd.f32 %v16852_v57, %v7959_v26  ;;  %v13531_v52 = vpop.f32.mrb[35].mxu1 }
 0x2cc   :  { %18461 = vst [vmem:[#allocation25_spill] sm:$0xff] %v17210_v56  ;;  %18462 = vst [vmem:[#allocation22_spill] sm:$0xff] %v17212_v3  ;;  %v17226_v34 = vrot.slane %v7985_v30, %v14310_v11  ;;  %v17229_v46 = vrot.slane %v8026_v59, %v14310_v11  ;;  %v17257_v59 = vmax.f32 %v16907_v32, %v5726_v37 }
 0x2cd   :  { %18463 = vst [vmem:[#allocation24_spill] sm:$0xff] %v17215_v55  ;;  %18464 = vst [vmem:[#allocation27_spill] sm:$0xff] %v17221_v58  ;;  %v8017_v12 = vcombine.low %v17207_v18, %v17218_v47  ;;  %v17235_v38 = vcombine.low %v17210_v56, %v17221_v58  ;;  %v8318_v57 = vcombine.high %v8206_v44, %v8206_v44 }
 0x2ce   :  { %18465 = vst [vmem:[#allocation28_spill] sm:$0xff] %v17229_v46  ;;  %v8325_v4 = vrot.slane %v8206_v44, %v14310_v11  ;;  %v8367_v19 = vcombine.high %v8211_v10, %v8211_v10  ;;  %v8374_v15 = vrot.slane %v8211_v10, %v14310_v11  ;;  %v8000_v22 = vcombine.low %v17215_v55, %v17226_v34 }
 0x2cf   :  { %v17248_v6 = vrot.slane %v8017_v12, %v14310_v11  ;;  %v17252_v49 = vadd.f32 %v16949_v1, %v17235_v38  ;;  %v8332_v26 = vrot.slane %v8318_v57, %v14310_v11  ;;  %v17268_v57 = vpop.f32.mrb[32].mxu0 }
 0x2d0   :  { %v8333_v30 = vcombine.high %v8325_v4, %v8325_v4  ;;  %v8341_v44 = vrot.slane %v8325_v4, %v14310_v11  ;;  %v8381_v10 = vrot.slane %v8367_v19, %v14310_v11  ;;  %v8382_v9 = vcombine.high %v8374_v15, %v8374_v15  ;;  %18466 = vst [vmem:[#allocation23_spill] sm:$0xff] %v17268_v57  ;;  %v17275_v55 = vpop.f32.mrb[33].mxu0 }
 0x2d1   :  { %v8390_v12 = vrot.slane %v8374_v15, %v14310_v11  ;;  %v8216_v41 = vadd.f32 %v16874_v5, %v8000_v22  ;;  %v8334_v24 = vcombine.high %v8332_v26, %v8332_v26  ;;  %v8348_v32 = vrot.slane %v8332_v26, %v14310_v11 }
 0x2d2   :  { %v8355_v37 = vrot.slane %v8333_v30, %v14310_v11  ;;  %v8363_v52 = vcombine.high %v8341_v44, %v8341_v44  ;;  %v9401_v3 = vmax.f32 %v8341_v44, 0.0  ;;  %v8383_v4 = vcombine.high %v8381_v10, %v8381_v10 }
 0x2d3   :  { %v8397_v19 = vrot.slane %v8381_v10, %v14310_v11  ;;  %v8404_v31 = vrot.slane %v8382_v9, %v14310_v11  ;;  %v8362_v15 = vrot.slane %v8334_v24, %v14310_v11  ;;  %v8364_v5 = vcombine.high %v8348_v32, %v8348_v32 }
 0x2d4   :  { %v8365_v22 = vcombine.high %v8355_v37, %v8355_v37  ;;  %v9402_v62 = vmax.f32 %v8355_v37, 0.0  ;;  %v9403_v1 = vmax.f32 %v8363_v52, 0.0  ;;  %v9405_v35 = vmax.f32 %v8348_v32, 0.0 }
 0x2d5   :  { %v8411_v26 = vrot.slane %v8383_v4, %v14310_v11  ;;  %v8412_v50 = vcombine.high %v8390_v12, %v8390_v12  ;;  %v8366_v30 = vcombine.high %v8362_v15, %v8362_v15  ;;  %v9406_v13 = vmax.f32 %v8362_v15, 0.0 }
 0x2d6   :  { %v9404_v40 = vmax.f32 %v8365_v22, 0.0  ;;  %v9407_v0 = vmax.f32 %v8364_v5, 0.0  ;;  %v9705_v44 = vcombine.low %v9401_v3, %v9402_v62  ;;  %v8413_v23 = vcombine.high %v8397_v19, %v8397_v19 }
 0x2d7   :  { %v8414_v29 = vcombine.high %v8404_v31, %v8404_v31  ;;  %v8415_v10 = vcombine.high %v8411_v26, %v8411_v26  ;;  %v9408_v58 = vmax.f32 %v8366_v30, 0.0  ;;  %v9707_v56 = vcombine.low %v9405_v35, %v9406_v13 }
 0x2d8   :  { %v9706_v9 = vcombine.low %v9403_v1, %v9404_v40  ;;  %v9409_v24 = vmax.f32 %v8390_v12, 0.0  ;;  %v9715_v57 = vrot.slane %v9705_v44, %v14310_v11  ;;  %v9410_v37 = vmax.f32 %v8404_v31, 0.0 }
 0x2d9   :  { %v9411_v52 = vmax.f32 %v8412_v50, 0.0  ;;  %v9412_v32 = vmax.f32 %v8414_v29, 0.0  ;;  %v9708_v4 = vcombine.low %v9407_v0, %v9408_v58  ;;  %v9729_v15 = vrot.slane %v9707_v56, %v14310_v11 }
 0x2da   :  { %v9722_v22 = vrot.slane %v9706_v9, %v14310_v11  ;;  %v9413_v62 = vmax.f32 %v8397_v19, 0.0  ;;  %v9414_v3 = vmax.f32 %v8411_v26, 0.0  ;;  %v9415_v5 = vmax.f32 %v8413_v23, 0.0 }
 0x2db   :  { %v9416_v21 = vmax.f32 %v8415_v10, 0.0  ;;  %v9754_v30 = vcombine.low %v9409_v24, %v9410_v37  ;;  %v9736_v13 = vrot.slane %v9708_v4, %v14310_v11  ;;  %v9755_v35 = vcombine.low %v9411_v52, %v9412_v32  ;;  %v17288_v10 = vpop.f32.mrb[36].mxu1 }
 0x2dc   :  { %v9737_v40 = vcombine.low %v9715_v57, %v9722_v22  ;;  %v8416_v12 = vcombine.high %v8216_v41, %v8216_v41  ;;  %v9756_v31 = vcombine.low %v9413_v62, %v9414_v3  ;;  %v8423_v0 = vrot.slane %v8216_v41, %v14310_v11  ;;  %v13534_v37 = vpop.f32.mrb[37].mxu1 }
 0x2dd   :  { %v9757_v50 = vcombine.low %v9415_v5, %v9416_v21  ;;  %v9764_v29 = vrot.slane %v9754_v30, %v14310_v11  ;;  %v9738_v58 = vcombine.low %v9729_v15, %v9736_v13  ;;  %v9771_v56 = vrot.slane %v9755_v35, %v14310_v11 }
 0x2de   :  { %v9745_v1 = vrot.slane %v9737_v40, %v14310_v11  ;;  %v8430_v23 = vrot.slane %v8416_v12, %v14310_v11  ;;  %v9778_v19 = vrot.slane %v9756_v31, %v14310_v11  ;;  %v8431_v57 = vcombine.high %v8423_v0, %v8423_v0  ;;  %v17296_v12 = vpop.f32.mrb[38].mxu1  ;;  %v17298_v31 = vpop.f32.mrb[34].mxu0 }
 0x2df   :  { %v9785_v26 = vrot.slane %v9757_v50, %v14310_v11  ;;  %v8439_v44 = vrot.slane %v8423_v0, %v14310_v11  ;;  %v9752_v21 = vrot.slane %v9738_v58, %v14310_v11  ;;  %v9786_v9 = vcombine.low %v9764_v29, %v9771_v56 }
 0x2e0   :  { %v8432_v41 = vcombine.high %v8430_v23, %v8430_v23  ;;  %v8446_v24 = vrot.slane %v8430_v23, %v14310_v11  ;;  %v8453_v32 = vrot.slane %v8431_v57, %v14310_v11  ;;  %v17302_v58 = vadd.f32 %v16971_v14, %v17235_v38 }
 0x2e1   :  { %v9787_v52 = vcombine.low %v9778_v19, %v9785_v26  ;;  %v8461_v4 = vcombine.high %v8439_v44, %v8439_v44  ;;  %v9417_v22 = vmax.f32 %v8439_v44, 0.0  ;;  %v9753_v15 = vcombine.low %v9745_v1, %v9752_v21  ;;  %v13537_v1 = vpop.f32.mrb[39].mxu1 }
 0x2e2   :  { %v9794_v62 = vrot.slane %v9786_v9, %v14310_v11  ;;  %v8460_v3 = vrot.slane %v8432_v41, %v14310_v11  ;;  %v8462_v5 = vcombine.high %v8446_v24, %v8446_v24  ;;  %v8463_v13 = vcombine.high %v8453_v32, %v8453_v32 }
 0x2e3   :  { %v9801_v30 = vrot.slane %v9787_v52, %v14310_v11  ;;  %v9418_v40 = vmax.f32 %v8453_v32, 0.0  ;;  %v9419_v35 = vmax.f32 %v8461_v4, 0.0  ;;  %v9421_v29 = vmax.f32 %v8446_v24, 0.0  ;;  %v17312_v24 = vpop.f32.mrb[35].mxu0 }
 0x2e4   :  { %v8464_v50 = vcombine.high %v8460_v3, %v8460_v3  ;;  %v9422_v0 = vmax.f32 %v8460_v3, 0.0  ;;  %v9420_v23 = vmax.f32 %v8463_v13, 0.0  ;;  %v9423_v19 = vmax.f32 %v8462_v5, 0.0  ;;  %18468 = vst [vmem:[#allocation11_spill] sm:$0xff] %v17312_v24 }
 0x2e5   :  { %v9802_v56 = vcombine.low %v9794_v62, %v9801_v30  ;;  %v9803_v26 = vcombine.low %v9417_v22, %v9418_v40  ;;  %v10697_v57 = vsel %vm4060_vm7, %v9753_v15, -inf  ;;  %v9817_v44 = vrot.slane %v9419_v35, %v14310_v11 }
 0x2e6   :  { %v18467_v21 = vcombine.low %v17248_v6, %v17226_v34  ;;  %v8034_v41 = vcombine.low %v17248_v6, %v17229_v46  ;;  %v9826_v37 = vcombine.low %v9420_v23, %v9421_v29  ;;  %v9827_v52 = vcombine.low %v9422_v0, %v9423_v19 }
 0x2e7   :  { %v10698_v14 = vsel %vm4060_vm7, %v9802_v56, -inf  ;;  %v9810_v38 = vrot.slane %v9803_v26, %v14310_v11  ;;  %v9424_v5 = vmax.f32 %v8464_v50, 0.0 }
 0x2e8   :  { %v8221_v9 = vadd.f32 %v16888_v61, %v18467_v21  ;;  %v10699_v32 = vmax.f32 %v10697_v57, %v10698_v14  ;;  %v8226_v15 = vadd.f32 %v16919_v25, %v8034_v41  ;;  %v9836_v61 = vrot.slane %v9826_v37, %v14310_v11  ;;  %v17335_v37 = vpop.f32.mrb[40].mxu1 }
 0x2e9   :  { %v9818_v62 = vcombine.low %v9810_v38, %v9817_v44  ;;  %v9843_v3 = vrot.slane %v9827_v52, %v14310_v11  ;;  %v8563_v25 = vcombine.high %v17252_v49, %v17252_v49  ;;  %v17332_v21 = vrot.slane %v17252_v49, %v14310_v11  ;;  %18469 = vst [vmem:[#allocation30_spill] sm:$0xff] %v17335_v37 }
 0x2ea   :  { %v8465_v4 = vcombine.high %v8221_v9, %v8221_v9  ;;  %v8472_v22 = vrot.slane %v8221_v9, %v14310_v11  ;;  %v8514_v35 = vcombine.high %v8226_v15, %v8226_v15  ;;  %v8521_v1 = vrot.slane %v8226_v15, %v14310_v11 }
 0x2eb   :  { %v9825_v29 = vrot.slane %v9818_v62, %v14310_v11  ;;  %v9858_v0 = vcombine.low %v9836_v61, %v9843_v3  ;;  %v13540_v62 = vpop.f32.mrb[41].mxu1 }
 0x2ec   :  { %v8479_v30 = vrot.slane %v8465_v4, %v14310_v11  ;;  %v8480_v13 = vcombine.high %v8472_v22, %v8472_v22  ;;  %v8488_v40 = vrot.slane %v8472_v22, %v14310_v11  ;;  %v8528_v44 = vrot.slane %v8514_v35, %v14310_v11 }
 0x2ed   :  { %v10701_v26 = vsel %vm10700_vm9, %v9825_v29, -inf  ;;  %v8537_v46 = vrot.slane %v8521_v1, %v14310_v11 }
 0x2ee   :  { %v8481_v56 = vcombine.high %v8479_v30, %v8479_v30  ;;  %v8495_v23 = vrot.slane %v8479_v30, %v14310_v11  ;;  %v8502_v19 = vrot.slane %v8480_v13, %v14310_v11  ;;  %v8510_v50 = vcombine.high %v8488_v40, %v8488_v40 }
 0x2ef   :  { %v9425_v57 = vmax.f32 %v8488_v40, 0.0  ;;  %v10702_v9 = vmax.f32 %v10699_v32, %v10701_v26  ;;  %v8529_v32 = vcombine.high %v8521_v1, %v8521_v1  ;;  %v8530_v26 = vcombine.high %v8528_v44, %v8528_v44 }
 0x2f0   :  { %v8509_v41 = vrot.slane %v8481_v56, %v14310_v11  ;;  %v8511_v14 = vcombine.high %v8495_v23, %v8495_v23  ;;  %v8512_v38 = vcombine.high %v8502_v19, %v8502_v19  ;;  %v9426_v52 = vmax.f32 %v8502_v19, 0.0 }
 0x2f1   :  { %v9427_v4 = vmax.f32 %v8510_v50, 0.0  ;;  %v9429_v22 = vmax.f32 %v8495_v23, 0.0  ;;  %v9828_v15 = vcombine.low %v9424_v5, %v9425_v57  ;;  %v10703_v61 = vrot.slane %v10702_v9, 4 }
 0x2f2   :  { %v8513_v3 = vcombine.high %v8509_v41, %v8509_v41  ;;  %v9428_v30 = vmax.f32 %v8512_v38, 0.0  ;;  %v9430_v13 = vmax.f32 %v8509_v41, 0.0  ;;  %v9431_v40 = vmax.f32 %v8511_v14, 0.0 }
 0x2f3   :  { %v9829_v35 = vcombine.low %v9426_v52, %v9427_v4  ;;  %v9850_v49 = vrot.slane %v9828_v15, %v14310_v11  ;;  %v17338_v29 = vmax.f32 %v10702_v9, %v10703_v61  ;;  %v8544_v5 = vrot.slane %v8528_v44, %v14310_v11 }
 0x2f4   :  { %v9875_v56 = vcombine.low %v9428_v30, %v9429_v22  ;;  %v9876_v23 = vcombine.low %v9430_v13, %v9431_v40  ;;  %v8551_v50 = vrot.slane %v8529_v32, %v14310_v11  ;;  %v9866_v57 = vrot.slane %v9858_v0, %v14310_v11 }
 0x2f5   :  { %v9857_v19 = vrot.slane %v9829_v35, %v14310_v11  ;;  %v8558_v14 = vrot.slane %v8530_v26, %v14310_v11  ;;  %v8559_v38 = vcombine.high %v8537_v46, %v8537_v46  ;;  %v8560_v4 = vcombine.high %v8544_v5, %v8544_v5 }
 0x2f6   :  { %v9885_v41 = vrot.slane %v9875_v56, %v14310_v11  ;;  %v9892_v52 = vrot.slane %v9876_v23, %v14310_v11  ;;  %v8561_v22 = vcombine.high %v8551_v50, %v8551_v50  ;;  %v9432_v62 = vmax.f32 %v8513_v3, 0.0 }
 0x2f7   :  { %v9859_v9 = vcombine.low %v9850_v49, %v9857_v19  ;;  %v8562_v15 = vcombine.high %v8558_v14, %v8558_v14  ;;  %v9433_v61 = vmax.f32 %v8537_v46, 0.0  ;;  %v9434_v13 = vmax.f32 %v8551_v50, 0.0 }
 0x2f8   :  { %v9907_v30 = vcombine.low %v9885_v41, %v9892_v52  ;;  %v9435_v0 = vmax.f32 %v8559_v38, 0.0  ;;  %v9436_v40 = vmax.f32 %v8561_v22, 0.0  ;;  %v9437_v35 = vmax.f32 %v8544_v5, 0.0 }
 0x2f9   :  { %v9873_v44 = vrot.slane %v9859_v9, %v14310_v11  ;;  %v9438_v32 = vmax.f32 %v8558_v14, 0.0  ;;  %v9439_v56 = vmax.f32 %v8560_v4, 0.0  ;;  %v9440_v19 = vmax.f32 %v8562_v15, 0.0  ;;  %v17357_v14 = vpop.f32.mrb[42].mxu1 }
 0x2fa   :  { %v9915_v49 = vrot.slane %v9907_v30, %v14310_v11  ;;  %v9877_v23 = vcombine.low %v9432_v62, %v9433_v61  ;;  %v9878_v37 = vcombine.low %v9434_v13, %v9435_v0  ;;  %v9924_v24 = vcombine.low %v9436_v40, %v9437_v35  ;;  %v13543_v4 = vpop.f32.mrb[43].mxu1 }
 0x2fb   :  { %v9874_v26 = vcombine.low %v9866_v57, %v9873_v44  ;;  %v9938_v1 = vrot.slane %v9438_v32, %v14310_v11  ;;  %v8577_v46 = vrot.slane %v8563_v25, %v14310_v11  ;;  %v9947_v41 = vcombine.low %v9439_v56, %v9440_v19 }
 0x2fc   :  { %v9899_v50 = vrot.slane %v9877_v23, %v14310_v11  ;;  %v8578_v5 = vcombine.high %v17332_v21, %v17332_v21  ;;  %v9906_v57 = vrot.slane %v9878_v37, %v14310_v11  ;;  %v9931_v38 = vrot.slane %v9924_v24, %v14310_v11  ;;  %v17369_v24 = vpop.f32.mrb[36].mxu0 }
 0x2fd   :  { %v10709_v3 = vsel %vm4060_vm7, %v9874_v26, -inf  ;;  %v8579_v9 = vcombine.high %v8577_v46, %v8577_v46  ;;  %v8586_v52 = vrot.slane %v17332_v21, %v14310_v11  ;;  %v9957_v25 = vrot.slane %v9947_v41, %v14310_v11 }
 0x2fe   :  { %v8593_v22 = vrot.slane %v8577_v46, %v14310_v11  ;;  %v8600_v15 = vrot.slane %v8578_v5, %v14310_v11  ;;  %v8612_v62 = vcombine.high %v17302_v58, %v17302_v58  ;;  %v9908_v61 = vcombine.low %v9899_v50, %v9906_v57 }
 0x2ff   :  { %v9939_v44 = vcombine.low %v9931_v38, %v9938_v1  ;;  %v8607_v37 = vrot.slane %v8579_v9, %v14310_v11  ;;  %v8608_v30 = vcombine.high %v8586_v52, %v8586_v52  ;;  %v9441_v21 = vmax.f32 %v8586_v52, 0.0 }
 0x300   :  { %v8609_v13 = vcombine.high %v8593_v22, %v8593_v22  ;;  %v8610_v0 = vcombine.high %v8600_v15, %v8600_v15  ;;  %v9442_v40 = vmax.f32 %v8600_v15, 0.0  ;;  %v9922_v35 = vrot.slane %v9908_v61, %v14310_v11  ;;  %v17377_v15 = vpop.f32.mrb[37].mxu0 }
 0x301   :  { %v9946_v32 = vrot.slane %v9939_v44, %v14310_v11  ;;  %v8611_v56 = vcombine.high %v8607_v37, %v8607_v37  ;;  %v9443_v26 = vmax.f32 %v8608_v30, 0.0  ;;  %v9445_v23 = vmax.f32 %v8593_v22, 0.0 }
 0x302   :  { %v9444_v19 = vmax.f32 %v8610_v0, 0.0  ;;  %v9446_v46 = vmax.f32 %v8607_v37, 0.0  ;;  %v9447_v50 = vmax.f32 %v8609_v13, 0.0  ;;  %v9923_v1 = vcombine.low %v9915_v49, %v9922_v35 }
 0x303   :  { %v10712_v41 = vsel %vm10700_vm9, %v9946_v32, -inf  ;;  %v9448_v5 = vmax.f32 %v8611_v56, 0.0  ;;  %v9948_v57 = vcombine.low %v9441_v21, %v9442_v40  ;;  %v8619_v52 = vrot.slane %v17302_v58, %v14310_v11 }
 0x304   :  { %v9949_v38 = vcombine.low %v9443_v26, %v9444_v19  ;;  %v9950_v9 = vcombine.low %v9445_v23, %v9446_v46  ;;  %v8626_v4 = vrot.slane %v8612_v62, %v14310_v11  ;;  %v10710_v61 = vsel %vm4060_vm7, %v9923_v1, -inf }
 0x305   :  { %v9964_v22 = vrot.slane %v9948_v57, %v14310_v11  ;;  %v9996_v44 = vcombine.low %v9447_v50, %v9448_v5  ;;  %v18470_v49 = vcombine.low %v17189_v36, %v17192_v28  ;;  %v10711_v30 = vmax.f32 %v10709_v3, %v10710_v61 }
 0x306   :  { %v9971_v13 = vrot.slane %v9949_v38, %v14310_v11  ;;  %v9978_v58 = vrot.slane %v9950_v9, %v14310_v11  ;;  %v8627_v0 = vcombine.high %v8619_v52, %v8619_v52  ;;  %v8628_v40 = vcombine.high %v8626_v4, %v8626_v4 }
 0x307   :  { %v17385_v37 = vrot.slane %v18470_v49, %v14310_v11  ;;  %v9979_v62 = vcombine.low %v9957_v25, %v9964_v22  ;;  %v10006_v21 = vrot.slane %v9996_v44, %v14310_v11  ;;  %v8635_v35 = vrot.slane %v8619_v52, %v14310_v11 }
 0x308   :  { %v10713_v32 = vmax.f32 %v10711_v30, %v10712_v41  ;;  %v9980_v56 = vcombine.low %v9971_v13, %v9978_v58  ;;  %v8642_v26 = vrot.slane %v8626_v4, %v14310_v11  ;;  %v8649_v36 = vrot.slane %v8627_v0, %v14310_v11  ;;  %v17404_v0 = vpop.f32.mrb[44].mxu1 }
 0x309   :  { %v9987_v19 = vrot.slane %v9979_v62, %v14310_v11  ;;  %v8656_v3 = vrot.slane %v8628_v40, %v14310_v11  ;;  %v8657_v23 = vcombine.high %v8635_v35, %v8635_v35  ;;  %v9449_v46 = vmax.f32 %v8635_v35, 0.0 }
 0x30a   :  { %v10714_v50 = vrot.slane %v10713_v32, 4  ;;  %v9994_v25 = vrot.slane %v9980_v56, %v14310_v11  ;;  %v8658_v1 = vcombine.high %v8642_v26, %v8642_v26  ;;  %v8659_v5 = vcombine.high %v8649_v36, %v8649_v36 }
 0x30b   :  { %v8660_v57 = vcombine.high %v8656_v3, %v8656_v3  ;;  %v9450_v38 = vmax.f32 %v8649_v36, 0.0  ;;  %v9451_v9 = vmax.f32 %v8657_v23, 0.0  ;;  %v9453_v41 = vmax.f32 %v8642_v26, 0.0  ;;  %v13546_v26 = vpop.f32.mrb[45].mxu1 }
 0x30c   :  { %v17396_v52 = vmax.f32 %v10713_v32, %v10714_v50  ;;  %v9995_v4 = vcombine.low %v9987_v19, %v9994_v25  ;;  %v9452_v61 = vmax.f32 %v8659_v5, 0.0  ;;  %v9454_v22 = vmax.f32 %v8656_v3, 0.0 }
 0x30d   :  { %v9455_v44 = vmax.f32 %v8658_v1, 0.0  ;;  %v9456_v49 = vmax.f32 %v8660_v57, 0.0  ;;  %v9997_v30 = vcombine.low %v9449_v46, %v9450_v38  ;;  %v18472_v13 = vcombine.low %v17198_v39, %v17207_v18 }
 0x30e   :  { %18471 = vst [vmem:[#allocation31_spill] sm:$0xff] %v17396_v52  ;;  %v18473_v62 = vrot.slane %v17338_v29, 2  ;;  %v9998_v32 = vcombine.low %v9451_v9, %v9452_v61  ;;  %v9999_v56 = vcombine.low %v9453_v41, %v9454_v22  ;;  %v5728_v18 = vrot.slane %v17257_v59, 1  ;;  %v17430_v22 = vpop.f32.mrb[38].mxu0 }
 0x30f   :  { %v17402_v58 = vrot.slane %v18472_v13, %v14310_v11  ;;  %v10013_v36 = vrot.slane %v9997_v30, %v14310_v11  ;;  %v10045_v19 = vcombine.low %v9455_v44, %v9456_v49  ;;  %v5744_v46 = vrot.slane %v17056_v54, 2  ;;  %v17440_v13 = vpop.f32.mrb[46].mxu1 }
 0x310   :  { %v17409_v40 = vmax.f32 %v17338_v29, %v18473_v62  ;;  %v10020_v3 = vrot.slane %v9998_v32, %v14310_v11  ;;  %v10027_v23 = vrot.slane %v9999_v56, %v14310_v11  ;;  %v5735_v29 = vrot.slane %v16983_v8, 2  ;;  %v13549_v26 = vpop.f32.mrb[47].mxu1 }
 0x311   :  { %v8068_v39 = vcombine.low %v17385_v37, %v17402_v58  ;;  %v10028_v50 = vcombine.low %v10006_v21, %v10013_v36  ;;  %v10052_v1 = vrot.slane %v10045_v19, %v14310_v11  ;;  %v17423_v5 = vsel %vm4060_vm7, %v9995_v4, -inf }
 0x312   :  { %18474 = vst [vmem:[#allocation32_spill] sm:$0xff] %v17409_v40  ;;  %v10029_v57 = vcombine.low %v10020_v3, %v10027_v23  ;;  %v5736_v38 = vmax.f32 %v16983_v8, %v5735_v29  ;;  %v5745_v9 = vmax.f32 %v17056_v54, %v5744_v46  ;;  %v18475_v41 = vrot.slane %v17136_v17, 4 }
 0x313   :  { %v8241_v25 = vadd.f32 %v17029_v20, %v8068_v39  ;;  %v17434_v20 = vmax.f32 %v17257_v59, %v5728_v18  ;;  %v5759_v4 = vmax.f32 %v17181_v7, %v17142_v42  ;;  %v10036_v49 = vrot.slane %v10028_v50, %v14310_v11 }
 0x314   :  { %v5752_v61 = vmax.f32 %v17136_v17, %v18475_v41  ;;  %v10043_v8 = vrot.slane %v10029_v57, %v14310_v11  ;;  %v5737_v54 = vrot.slane %v5736_v38, 1  ;;  %v5746_v19 = vrot.slane %v5745_v9, 1 }
 0x315   :  { %v8661_v44 = vcombine.high %v8241_v25, %v8241_v25  ;;  %v8668_v21 = vrot.slane %v8241_v25, %v14310_v11  ;;  %v5760_v56 = vrot.slane %v5759_v4, 4 }
 0x316   :  { %v5753_v30 = vrot.slane %v5752_v61, 2  ;;  %v10044_v59 = vcombine.low %v10036_v49, %v10043_v8  ;;  %v5738_v36 = vmax.f32 %v5736_v38, %v5737_v54  ;;  %v5747_v49 = vmax.f32 %v5745_v9, %v5746_v19 }
 0x317   :  { %v8675_v17 = vrot.slane %v8661_v44, %v14310_v11  ;;  %v8676_v62 = vcombine.high %v8668_v21, %v8668_v21  ;;  %v8684_v32 = vrot.slane %v8668_v21, %v14310_v11  ;;  %v5761_v50 = vmax.f32 %v5759_v4, %v5760_v56  ;;  %v17450_v4 = vpop.f32.mrb[39].mxu0 }
 0x318   :  { %v5754_v39 = vmax.f32 %v5752_v61, %v5753_v30  ;;  %v10721_v29 = vsel %vm4060_vm7, %v10044_v59, -inf }
 0x319   :  { %v8677_v42 = vcombine.high %v8675_v17, %v8675_v17  ;;  %v8691_v7 = vrot.slane %v8675_v17, %v14310_v11  ;;  %v8698_v18 = vrot.slane %v8676_v62, %v14310_v11  ;;  %v8706_v3 = vcombine.high %v8684_v32, %v8684_v32 }
 0x31a   :  { %v9457_v23 = vmax.f32 %v8684_v32, 0.0  ;;  %v5755_v46 = vrot.slane %v5754_v39, 1  ;;  %v10722_v61 = vmax.f32 %v17423_v5, %v10721_v29  ;;  %v5762_v59 = vrot.slane %v5761_v50, 2 }
 0x31b   :  { %v8705_v25 = vrot.slane %v8677_v42, %v14310_v11  ;;  %v8707_v57 = vcombine.high %v8691_v7, %v8691_v7  ;;  %v8708_v41 = vcombine.high %v8698_v18, %v8698_v18  ;;  %v9458_v44 = vmax.f32 %v8698_v18, 0.0 }
 0x31c   :  { %v9459_v21 = vmax.f32 %v8706_v3, 0.0  ;;  %v10059_v38 = vrot.slane %v9457_v23, %v14310_v11  ;;  %v9461_v54 = vmax.f32 %v8691_v7, 0.0  ;;  %v5756_v18 = vmax.f32 %v5754_v39, %v5755_v46  ;;  %v18476_v46 = vld [vmem:[#allocation21_spill] sm:$0xff] }
 0x31d   :  { %v9460_v8 = vmax.f32 %v8708_v41, 0.0  ;;  %v9462_v30 = vmax.f32 %v8705_v25, 0.0  ;;  %v9463_v17 = vmax.f32 %v8707_v57, 0.0  ;;  %v8709_v62 = vcombine.high %v8705_v25, %v8705_v25 }
 0x31e   :  { %v10060_v32 = vcombine.low %v10052_v1, %v10059_v38  ;;  %v10068_v26 = vcombine.low %v9458_v44, %v9459_v21  ;;  %v5763_v9 = vmax.f32 %v5761_v50, %v5762_v59  ;;  %v12871_v50 = vsel %vm12848_vm10, %v16702_v48, %v18476_v46 }
 0x31f   :  { %v10069_v56 = vcombine.low %v9460_v8, %v9461_v54  ;;  %v17452_v42 = vcombine.low %v9462_v30, %v9463_v17  ;;  %v8069_v25 = vcombine.low %v17218_v47, %v17192_v28  ;;  %v12872_v41 = vsel %vm12850_vm11, %v17151_v63, %v12871_v50 }
 0x320   :  { %v10067_v3 = vrot.slane %v10060_v32, %v14310_v11  ;;  %v10078_v5 = vrot.slane %v10068_v26, %v14310_v11  ;;  %v5764_v23 = vrot.slane %v5763_v9, 1  ;;  %v10936_v44 = vsub.s32 3, %v18457_v2  ;;  %v18478_v32 = vld [vmem:[#allocation16_spill] sm:$0xff] }
 0x321   :  { %v10085_v19 = vrot.slane %v10069_v56, %v14310_v11  ;;  %v10092_v1 = vrot.slane %v17452_v42, %v14310_v11  ;;  %v12873_v38 = vsel %vm12852_vm12, %v17434_v20, %v12872_v41  ;;  %v9464_v8 = vmax.f32 %v8709_v62, 0.0 }
 0x322   :  { %v10723_v7 = vsel %vm10700_vm9, %v10067_v3, -inf  ;;  %v5765_v57 = vmax.f32 %v5763_v9, %v5764_v23  ;;  %v12874_v28 = vsel %vm12854_vm13, %v5738_v36, %v12873_v38  ;;  %v10937_v47 = vrot.slane %v17128_v45, %v10936_v44  ;;  %v17531_v38 = vpop.f32.mrb[48].mxu1 }
 0x323   :  { %v17460_v39 = vcombine.low %v10078_v5, %v10085_v19  ;;  %v10724_v29 = vmax.f32 %v10722_v61, %v10723_v7  ;;  %v17473_v61 = vrot.slane %v8069_v25, %v14310_v11  ;;  %v8079_v63 = vcombine.low %v17195_v51, %v17185_v16 }
 0x324   :  { %v12875_v2 = vsel %vm12856_vm14, %v5747_v49, %v12874_v28  ;;  %v11291_v62 = vcombine.high %v10937_v47, %v10937_v47  ;;  %v17490_v36 = vrot.slane %v10937_v47, %v14327_v27 }
 0x325   :  { %v10725_v21 = vrot.slane %v10724_v29, 4  ;;  %v10108_v48 = vrot.slane %v17460_v39, %v14310_v11  ;;  %v8077_v20 = vcombine.low %v17473_v61, %v17402_v58  ;;  %v8078_v30 = vcombine.low %v17473_v61, %v17185_v16 }
 0x326   :  { %v12876_v17 = vsel %vm12858_vm15, %v5756_v18, %v12875_v2  ;;  %v8256_v45 = vadd.f32 %v17243_v33, %v8079_v63  ;;  %v17498_v16 = vrot.slane %v11291_v62, %v14327_v27  ;;  %v17502_v56 = vcombine.high %v17490_v36, %v17490_v36 }
 0x327   :  { %v17481_v54 = vmax.f32 %v10724_v29, %v10725_v21  ;;  %v12877_v26 = vsel %vm12860_vm0, %v5765_v57, %v12876_v17  ;;  %v8246_v49 = vadd.f32 %v17082_v43, %v8077_v20  ;;  %v8251_v59 = vadd.f32 %v17165_v53, %v8078_v30  ;;  %v13552_v20 = vpop.f32.mrb[49].mxu1 }
 0x328   :  { %12878 = vrot.lane.b32.xlu0 %v12877_v26, %s13872_s6  ;;  %v8808_v18 = vcombine.high %v8256_v45, %v8256_v45  ;;  %v17505_v33 = vrot.slane %v8256_v45, %v14310_v11  ;;  %v17511_v53 = vcombine.high %v17498_v16, %v17498_v16  ;;  %v11614_v19 = vcombine.low %v17490_v36, %v17502_v56  ;;  %v17541_v26 = vpop.f32.mrb[40].mxu0  ;;  %s13874_s6 = smov [#allocation7]  }
 0x329   :  { %18477 = vst [vmem:[#allocation21_spill] sm:$0xff] %v17481_v54  ;;  %v8710_v3 = vcombine.high %v8246_v49, %v8246_v49  ;;  %v8717_v5 = vrot.slane %v8246_v49, %v14310_v11  ;;  %v8759_v9 = vcombine.high %v8251_v59, %v8251_v59  ;;  %v8766_v43 = vrot.slane %v8251_v59, %v14310_v11  ;;  %v17557_v35 = vpop.f32.mrb[41].mxu0 }
 0x32a   :  { %v17516_v7 = vrot.slane %v8808_v18, %v14310_v11  ;;  %v11615_v57 = vcombine.low %v17498_v16, %v17511_v53  ;;  %v17526_v41 = vrot.slane %v11614_v19, %v14327_v27 }
 0x32b   :  { %v8724_v29 = vrot.slane %v8710_v3, %v14310_v11  ;;  %v8725_v46 = vcombine.high %v8717_v5, %v8717_v5  ;;  %v8733_v50 = vrot.slane %v8717_v5, %v14310_v11  ;;  %v8773_v25 = vrot.slane %v8759_v9, %v14310_v11 }
 0x32c   :  { %v8774_v44 = vcombine.high %v8766_v43, %v8766_v43  ;;  %v17529_v21 = vrot.slane %v8766_v43, %v14310_v11  ;;  %v17536_v17 = vrot.slane %v11615_v57, %v14327_v27 }
 0x32d   :  { %v8726_v28 = vcombine.high %v8724_v29, %v8724_v29  ;;  %v8740_v47 = vrot.slane %v8724_v29, %v14310_v11  ;;  %v8747_v63 = vrot.slane %v8725_v46, %v14310_v11  ;;  %v8755_v2 = vcombine.high %v8733_v50, %v8733_v50 }
 0x32e   :  { %v9465_v30 = vmax.f32 %v8733_v50, 0.0  ;;  %v8775_v62 = vcombine.high %v8773_v25, %v8773_v25  ;;  %v17539_v45 = vrot.slane %v8773_v25, %v14310_v11  ;;  %v17546_v19 = vcombine.low %v17526_v41, %v17536_v17 }
 0x32f   :  { %v8754_v49 = vrot.slane %v8726_v28, %v14310_v11  ;;  %v8756_v59 = vcombine.high %v8740_v47, %v8740_v47  ;;  %v8757_v18 = vcombine.high %v8747_v63, %v8747_v63  ;;  %v9466_v3 = vmax.f32 %v8747_v63, 0.0 }
 0x330   :  { %v9467_v5 = vmax.f32 %v8755_v2, 0.0  ;;  %v9469_v9 = vmax.f32 %v8740_v47, 0.0  ;;  %v10071_v43 = vcombine.low %v9464_v8, %v9465_v30  ;;  %v11776_v28 = vadd.f32 %v17148_v60, %v17546_v19 }
 0x331   :  { %v8758_v29 = vcombine.high %v8754_v49, %v8754_v49  ;;  %v9468_v46 = vmax.f32 %v8757_v18, 0.0  ;;  %v9470_v50 = vmax.f32 %v8754_v49, 0.0  ;;  %v9471_v57 = vmax.f32 %v8756_v59, 0.0 }
 0x332   :  { %v10099_v25 = vrot.slane %v10071_v43, %v14310_v11  ;;  %v10117_v20 = vcombine.low %v9466_v3, %v9467_v5  ;;  %v11771_v63 = vadd.f32 %v18478_v32, %v17546_v19  ;;  %v8796_v8 = vrot.slane %v8774_v44, %v14310_v11 }
 0x333   :  { %v10118_v2 = vcombine.low %v9468_v46, %v9469_v9  ;;  %v17553_v47 = vcombine.low %v9470_v50, %v9471_v57  ;;  %v8803_v30 = vrot.slane %v8775_v62, %v14310_v11  ;;  %v11894_v18 = vcombine.high %v11776_v28, %v11776_v28 }
 0x334   :  { %v10101_v49 = vcombine.low %v10092_v1, %v10099_v25  ;;  %v10127_v59 = vrot.slane %v10117_v20, %v14310_v11  ;;  %v11901_v60 = vrot.slane %v11776_v28, %v14327_v27  ;;  %v11877_v5 = vcombine.high %v11771_v63, %v11771_v63  ;;  %v17573_v25 = vpop.f32.mrb[50].mxu1 }
 0x335   :  { %v10134_v32 = vrot.slane %v10118_v2, %v14310_v11  ;;  %v11884_v44 = vrot.slane %v11771_v63, %v14327_v27  ;;  %v11908_v9 = vrot.slane %v11894_v18, %v14327_v27  ;;  %v8804_v23 = vcombine.high %v17529_v21, %v17529_v21 }
 0x336   :  { %v10115_v62 = vrot.slane %v10101_v49, %v14310_v11  ;;  %v11909_v43 = vcombine.high %v11901_v60, %v11901_v60  ;;  %v12259_v42 = vmax.f32 %v11901_v60, 0.0  ;;  %v11891_v46 = vrot.slane %v11877_v5, %v14327_v27  ;;  %v13555_v49 = vpop.f32.mrb[51].mxu1 }
 0x337   :  { %v17570_v1 = vcombine.low %v10127_v59, %v10134_v32  ;;  %v11892_v50 = vcombine.high %v11884_v44, %v11884_v44  ;;  %v12255_v57 = vmax.f32 %v11884_v44, 0.0  ;;  %v11910_v28 = vcombine.high %v11908_v9, %v11908_v9 }
 0x338   :  { %v10116_v20 = vcombine.low %v10108_v48, %v10115_v62  ;;  %v12260_v63 = vmax.f32 %v11909_v43, 0.0  ;;  %v12261_v2 = vmax.f32 %v11908_v9, 0.0  ;;  %v11893_v60 = vcombine.high %v11891_v46, %v11891_v46 }
 0x339   :  { %v10157_v18 = vrot.slane %v17570_v1, %v14310_v11  ;;  %v12256_v59 = vmax.f32 %v11892_v50, 0.0  ;;  %v12257_v32 = vmax.f32 %v11891_v46, 0.0  ;;  %v12262_v44 = vmax.f32 %v11910_v28, 0.0 }
 0x33a   :  { %v17581_v5 = vsel %vm4060_vm7, %v10116_v20, -inf  ;;  %v12416_v3 = vcombine.low %v12259_v42, %v12260_v63  ;;  %v12258_v39 = vmax.f32 %v11893_v60, 0.0  ;;  %v8805_v62 = vcombine.high %v17539_v45, %v17539_v45 }
 0x33b   :  { %v12399_v48 = vcombine.low %v12255_v57, %v12256_v59  ;;  %v8806_v9 = vcombine.high %v8796_v8, %v8796_v8  ;;  %v12417_v43 = vcombine.low %v12261_v2, %v12262_v44  ;;  %v8807_v49 = vcombine.high %v8803_v30, %v8803_v30 }
 0x33c   :  { %v12424_v1 = vrot.slane %v12416_v3, %v14327_v27  ;;  %v9472_v50 = vmax.f32 %v8758_v29, 0.0  ;;  %v12400_v46 = vcombine.low %v12257_v32, %v12258_v39  ;;  %v9473_v28 = vmax.f32 %v17529_v21, 0.0 }
 0x33d   :  { %v12407_v20 = vrot.slane %v12399_v48, %v14327_v27  ;;  %v9474_v42 = vmax.f32 %v8796_v8, 0.0  ;;  %v12431_v63 = vrot.slane %v12417_v43, %v14327_v27  ;;  %v9475_v54 = vmax.f32 %v8804_v23, 0.0  ;;  %v17596_v23 = vpop.f32.mrb[42].mxu0 }
 0x33e   :  { %v9476_v60 = vmax.f32 %v8806_v9, 0.0  ;;  %v9477_v57 = vmax.f32 %v17539_v45, 0.0  ;;  %v12414_v59 = vrot.slane %v12400_v46, %v14327_v27  ;;  %v9478_v52 = vmax.f32 %v8803_v30, 0.0 }
 0x33f   :  { %v9479_v2 = vmax.f32 %v8805_v62, 0.0  ;;  %v9480_v44 = vmax.f32 %v8807_v49, 0.0  ;;  %v12432_v3 = vcombine.low %v12424_v1, %v12431_v63  ;;  %v10120_v40 = vcombine.low %v9472_v50, %v9473_v28  ;;  %v17604_v62 = vpop.f32.mrb[43].mxu0 }
 0x340   :  { %v10166_v29 = vcombine.low %v9474_v42, %v9475_v54  ;;  %v10180_v32 = vrot.slane %v9476_v60, %v14310_v11  ;;  %v12415_v39 = vcombine.low %v12407_v20, %v12414_v59  ;;  %v10189_v48 = vcombine.low %v9477_v57, %v9478_v52 }
 0x341   :  { %v10190_v21 = vcombine.low %v9479_v2, %v9480_v44  ;;  %v8824_v8 = vcombine.high %v17516_v7, %v17516_v7  ;;  %v10148_v45 = vrot.slane %v10120_v40, %v14310_v11  ;;  %v8831_v30 = vrot.slane %v17505_v33, %v14310_v11 }
 0x342   :  { %v10173_v9 = vrot.slane %v10166_v29, %v14310_v11  ;;  %v8838_v54 = vrot.slane %v17516_v7, %v14310_v11  ;;  %v10199_v52 = vrot.slane %v10189_v48, %v14310_v11  ;;  %v18479_v1 = vcombine.high %v17505_v33, %v17505_v33 }
 0x343   :  { %v10206_v43 = vrot.slane %v10190_v21, %v14310_v11  ;;  %v8852_v40 = vrot.slane %v8824_v8, %v14310_v11  ;;  %v18480_v50 = vrot.slane %v17553_v47, %v14310_v11  ;;  %v8853_v28 = vcombine.high %v8831_v30, %v8831_v30 }
 0x344   :  { %v8845_v49 = vrot.slane %v18479_v1, %v14310_v11  ;;  %v10181_v20 = vcombine.low %v10173_v9, %v10180_v32  ;;  %v8854_v7 = vcombine.high %v8838_v54, %v8838_v54  ;;  %v9481_v57 = vmax.f32 %v8831_v30, 0.0 }
 0x345   :  { %v10150_v46 = vcombine.low %v18480_v50, %v10148_v45  ;;  %v10221_v42 = vcombine.low %v10199_v52, %v10206_v43  ;;  %v8856_v60 = vcombine.high %v8852_v40, %v8852_v40  ;;  %v9483_v33 = vmax.f32 %v8853_v28, 0.0 }
 0x346   :  { %v8855_v63 = vcombine.high %v8845_v49, %v8845_v49  ;;  %v10188_v2 = vrot.slane %v10181_v20, %v14310_v11  ;;  %v9482_v44 = vmax.f32 %v8845_v49, 0.0  ;;  %v9485_v21 = vmax.f32 %v8838_v54, 0.0 }
 0x347   :  { %v10164_v59 = vrot.slane %v10150_v46, %v14310_v11  ;;  %v10229_v29 = vrot.slane %v10221_v42, %v14310_v11  ;;  %v9486_v8 = vmax.f32 %v8852_v40, 0.0  ;;  %v9487_v45 = vmax.f32 %v8854_v7, 0.0 }
 0x348   :  { %v9484_v48 = vmax.f32 %v8855_v63, 0.0  ;;  %v10734_v32 = vsel %vm10700_vm9, %v10188_v2, -inf  ;;  %v9488_v9 = vmax.f32 %v8856_v60, 0.0  ;;  %v10191_v52 = vcombine.low %v9481_v57, %v9482_v44  ;;  %v17645_v60 = vpop.f32.mrb[44].mxu0 }
 0x349   :  { %v10165_v47 = vcombine.low %v10157_v18, %v10164_v59  ;;  %v10238_v1 = vcombine.low %v9485_v21, %v9486_v8  ;;  %v11632_v30 = vcombine.low %v17502_v56, %v17498_v16  ;;  %v11648_v46 = vcombine.low %v17511_v53, %v17490_v36 }
 0x34a   :  { %v10192_v43 = vcombine.low %v9483_v33, %v9484_v48  ;;  %v10239_v49 = vcombine.low %v9487_v45, %v9488_v9  ;;  %v11631_v54 = vcombine.low %v17490_v36, %v17490_v36  ;;  %v10213_v40 = vrot.slane %v10191_v52, %v14310_v11  ;;  %v17657_v33 = vpop.f32.mrb[45].mxu0  ;;  %v18483_v48 = vld [vmem:[#allocation24_spill] sm:$0xff] }
 0x34b   :  { %v10732_v50 = vsel %vm4060_vm7, %v10165_v47, -inf  ;;  %v10248_v28 = vrot.slane %v10238_v1, %v14310_v11  ;;  %v17633_v16 = vrot.slane %v11632_v30, %v14327_v27  ;;  %v17636_v56 = vrot.slane %v11648_v46, %v14327_v27  ;;  %18482 = vst [vmem:[#allocation33_spill] sm:$0xff] %v17657_v33 }
 0x34c   :  { %v10733_v18 = vmax.f32 %v17581_v5, %v10732_v50  ;;  %v10220_v20 = vrot.slane %v10192_v43, %v14310_v11  ;;  %v10255_v7 = vrot.slane %v10239_v49, %v14310_v11  ;;  %v17639_v53 = vrot.slane %v11631_v54, %v14327_v27 }
 0x34d   :  { %v12751_v42 = vsel %vm4060_vm7, %v12415_v39, -inf  ;;  %v12752_v63 = vsel %vm4060_vm7, %v12432_v3, -inf  ;;  %v17651_v59 = vcombine.low %v17636_v56, %v17633_v16  ;;  %v8080_v21 = vcombine.low %v17195_v51, %v18483_v48 }
 0x34e   :  { %v17641_v36 = vmax.f32 %v10733_v18, %v10734_v32  ;;  %v10222_v5 = vcombine.low %v10213_v40, %v10220_v20  ;;  %v17647_v57 = vcombine.low %v10248_v28, %v10255_v7  ;;  %v17655_v2 = vcombine.low %v17639_v53, %v17633_v16  ;;  %v18484_v32 = vld [vmem:[#allocation23_spill] sm:$0xff] }
 0x34f   :  { %v12753_v44 = vmax.f32 %v12751_v42, %v12752_v63  ;;  %v17665_v8 = vcombine.low %v17226_v34, %v17248_v6  ;;  %v11786_v45 = vadd.f32 %v18484_v32, %v17651_v59  ;;  %v17675_v52 = vcombine.low %v17536_v17, %v17526_v41 }
 0x350   :  { %18481 = vst [vmem:[#allocation16_spill] sm:$0xff] %v17641_v36  ;;  %v10236_v3 = vrot.slane %v10222_v5, %v14310_v11  ;;  %v11781_v9 = vadd.f32 %v17275_v55, %v17655_v2  ;;  %v8261_v51 = vadd.f32 %v17288_v10, %v8080_v21  ;;  %v17682_v6 = vcombine.low %v17636_v56, %v17526_v41 }
 0x351   :  { %v8266_v34 = vadd.f32 %v17296_v12, %v17665_v8  ;;  %v11928_v1 = vcombine.high %v11786_v45, %v11786_v45  ;;  %v11935_v30 = vrot.slane %v11786_v45, %v14327_v27 }
 0x352   :  { %v10237_v43 = vcombine.low %v10229_v29, %v10236_v3  ;;  %v11911_v50 = vcombine.high %v11781_v9, %v11781_v9  ;;  %v11918_v55 = vrot.slane %v11781_v9, %v14327_v27  ;;  %v8857_v46 = vcombine.high %v8261_v51, %v8261_v51 }
 0x353   :  { %v8864_v29 = vrot.slane %v8261_v51, %v14310_v11  ;;  %v8906_v10 = vcombine.high %v8266_v34, %v8266_v34  ;;  %v11942_v54 = vrot.slane %v11928_v1, %v14327_v27  ;;  %v11943_v12 = vcombine.high %v11935_v30, %v11935_v30 }
 0x354   :  { %v17687_v49 = vsel %vm4060_vm7, %v10237_v43, -inf  ;;  %v12267_v18 = vmax.f32 %v11935_v30, 0.0  ;;  %v11925_v41 = vrot.slane %v11911_v50, %v14327_v27  ;;  %v11926_v40 = vcombine.high %v11918_v55, %v11918_v55  ;;  %v17699_v30 = vpop.f32.mrb[46].mxu0 }
 0x355   :  { %v12263_v20 = vmax.f32 %v11918_v55, 0.0  ;;  %v8871_v28 = vrot.slane %v8857_v46, %v14310_v11  ;;  %v8872_v7 = vcombine.high %v8864_v29, %v8864_v29  ;;  %v11944_v5 = vcombine.high %v11942_v54, %v11942_v54  ;;  %18485 = vst [vmem:[#allocation24_spill] sm:$0xff] %v17699_v30 }
 0x356   :  { %v12268_v42 = vmax.f32 %v11943_v12, 0.0  ;;  %v12269_v63 = vmax.f32 %v11942_v54, 0.0  ;;  %v11927_v3 = vcombine.high %v11925_v41, %v11925_v41  ;;  %v12264_v48 = vmax.f32 %v11926_v40, 0.0  ;;  %v17704_v12 = vpop.f32.mrb[47].mxu0 }
 0x357   :  { %v12265_v21 = vmax.f32 %v11925_v41, 0.0  ;;  %v12439_v32 = vrot.slane %v12263_v20, %v14327_v27  ;;  %v8873_v45 = vcombine.high %v8871_v28, %v8871_v28  ;;  %v17694_v9 = vmax.f32 %v11944_v5, 0.0  ;;  %18486 = vst [vmem:[#allocation23_spill] sm:$0xff] %v17704_v12 }
 0x358   :  { %v17696_v43 = vcombine.low %v12268_v42, %v12269_v63  ;;  %v12266_v51 = vmax.f32 %v11927_v3, 0.0  ;;  %v8880_v1 = vrot.slane %v8864_v29, %v14310_v11  ;;  %v8887_v46 = vrot.slane %v8871_v28, %v14310_v11 }
 0x359   :  { %v12440_v50 = vcombine.low %v12264_v48, %v12265_v21  ;;  %v12755_v55 = vsel %vm12754_vm1, %v12439_v32, -inf  ;;  %v8894_v54 = vrot.slane %v8872_v7, %v14310_v11  ;;  %v8901_v5 = vrot.slane %v8873_v45, %v14310_v11 }
 0x35a   :  { %v12441_v40 = vcombine.low %v12266_v51, %v12267_v18  ;;  %v12756_v20 = vmax.f32 %v12753_v44, %v12755_v55  ;;  %v8902_v42 = vcombine.high %v8880_v1, %v8880_v1  ;;  %v8903_v63 = vcombine.high %v8887_v46, %v8887_v46 }
 0x35b   :  { %v12448_v29 = vrot.slane %v12440_v50, %v14327_v27  ;;  %v8904_v3 = vcombine.high %v8894_v54, %v8894_v54  ;;  %v8905_v28 = vcombine.high %v8901_v5, %v8901_v5  ;;  %v9489_v32 = vmax.f32 %v8880_v1, 0.0 }
 0x35c   :  { %v12455_v48 = vrot.slane %v12441_v40, %v14327_v27  ;;  %v12757_v21 = vrot.slane %v12756_v20, 4  ;;  %v9490_v7 = vmax.f32 %v8894_v54, 0.0  ;;  %v9491_v39 = vmax.f32 %v8902_v42, 0.0 }
 0x35d   :  { %v9492_v47 = vmax.f32 %v8904_v3, 0.0  ;;  %v9493_v36 = vmax.f32 %v8887_v46, 0.0  ;;  %v9494_v44 = vmax.f32 %v8901_v5, 0.0  ;;  %v9495_v51 = vmax.f32 %v8903_v63, 0.0 }
 0x35e   :  { %v17711_v12 = vcombine.low %v12448_v29, %v12455_v48  ;;  %v12758_v18 = vmax.f32 %v12756_v20, %v12757_v21  ;;  %v10240_v45 = vcombine.low %v9489_v32, %v9490_v7  ;;  %v8913_v50 = vrot.slane %v8266_v34, %v14310_v11 }
 0x35f   :  { %v10241_v55 = vcombine.low %v9491_v39, %v9492_v47  ;;  %v8920_v41 = vrot.slane %v8906_v10, %v14310_v11  ;;  %v10287_v40 = vcombine.low %v9493_v36, %v9494_v44  ;;  %v10301_v33 = vrot.slane %v9495_v51, %v14310_v11 }
 0x360   :  { %v12759_v30 = vrot.slane %v12758_v18, 2  ;;  %v9496_v1 = vmax.f32 %v8905_v28, 0.0  ;;  %v10262_v54 = vrot.slane %v10240_v45, %v14310_v11  ;;  %v8921_v29 = vcombine.high %v8913_v50, %v8913_v50 }
 0x361   :  { %v10269_v46 = vrot.slane %v10241_v55, %v14310_v11  ;;  %v8922_v42 = vcombine.high %v8920_v41, %v8920_v41  ;;  %v10294_v5 = vrot.slane %v10287_v40, %v14310_v11  ;;  %v8929_v39 = vrot.slane %v8913_v50, %v14310_v11 }
 0x362   :  { %v12760_v20 = vmax.f32 %v12758_v18, %v12759_v30  ;;  %v8936_v47 = vrot.slane %v8920_v41, %v14310_v11  ;;  %v8943_v10 = vrot.slane %v8921_v29, %v14310_v11  ;;  %v11796_v63 = vadd.f32 %v17298_v31, %v17675_v52 }
 0x363   :  { %v10271_v34 = vcombine.low %v10262_v54, %v10269_v46  ;;  %v8950_v36 = vrot.slane %v8922_v42, %v14310_v11  ;;  %v10302_v48 = vcombine.low %v10294_v5, %v10301_v33  ;;  %v8951_v21 = vcombine.high %v8929_v39, %v8929_v39 }
 0x364   :  { %v12761_v3 = vrot.slane %v12760_v20, 1  ;;  %v8952_v28 = vcombine.high %v8936_v47, %v8936_v47  ;;  %v8953_v32 = vcombine.high %v8943_v10, %v8943_v10  ;;  %v9497_v18 = vmax.f32 %v8929_v39, 0.0 }
 0x365   :  { %v10285_v30 = vrot.slane %v10271_v34, %v14310_v11  ;;  %v8954_v7 = vcombine.high %v8950_v36, %v8950_v36  ;;  %v10309_v41 = vrot.slane %v10302_v48, %v14310_v11  ;;  %v9498_v51 = vmax.f32 %v8943_v10, 0.0 }
 0x366   :  { %v17726_v44 = vmax.f32 %v12760_v20, %v12761_v3  ;;  %v9499_v45 = vmax.f32 %v8951_v21, 0.0  ;;  %v18487_v55 = vrot.slane %v17647_v57, %v14310_v11  ;;  %v9500_v31 = vmax.f32 %v8953_v32, 0.0 }
 0x367   :  { %v9501_v40 = vmax.f32 %v8936_v47, 0.0  ;;  %v9502_v33 = vmax.f32 %v8950_v36, 0.0  ;;  %v10745_v54 = vsel %vm10700_vm9, %v10309_v41, -inf  ;;  %v9503_v46 = vmax.f32 %v8952_v28, 0.0 }
 0x368   :  { %v10286_v50 = vcombine.low %v18487_v55, %v10285_v30  ;;  %v10310_v29 = vcombine.low %v9496_v1, %v9497_v18  ;;  %v10311_v42 = vcombine.low %v9498_v51, %v9499_v45  ;;  %v11962_v39 = vcombine.high %v11796_v63, %v11796_v63 }
 0x369   :  { %v10312_v20 = vcombine.low %v9500_v31, %v9501_v40  ;;  %v11969_v34 = vrot.slane %v11796_v63, %v14327_v27  ;;  %v10313_v3 = vcombine.low %v9502_v33, %v9503_v46  ;;  %v18488_v63 = vld [vmem:[#allocation11_spill] sm:$0xff]  ;;  %v12763_v45 = vsel %vm4060_vm7, %v17711_v12, -inf  ;;  %v18489_v46 = vld [vmem:[#allocation30_spill] sm:$0xff] }
 0x36a   :  { %v10743_v5 = vsel %vm4060_vm7, %v10286_v50, -inf  ;;  %v10320_v57 = vrot.slane %v10310_v29, %v14310_v11  ;;  %v10327_v48 = vrot.slane %v10311_v42, %v14310_v11  ;;  %v11976_v36 = vrot.slane %v11962_v39, %v14327_v27 }
 0x36b   :  { %v10744_v10 = vmax.f32 %v17687_v49, %v10743_v5  ;;  %v10334_v47 = vrot.slane %v10312_v20, %v14310_v11  ;;  %v11977_v21 = vcombine.high %v11969_v34, %v11969_v34  ;;  %v12275_v1 = vmax.f32 %v11969_v34, 0.0 }
 0x36c   :  { %v10341_v30 = vrot.slane %v10313_v3, %v14310_v11  ;;  %v10342_v32 = vcombine.low %v10320_v57, %v10327_v48  ;;  %v11791_v18 = vadd.f32 %v18488_v63, %v17682_v6  ;;  %v11978_v49 = vcombine.high %v11976_v36, %v11976_v36 }
 0x36d   :  { %v17740_v28 = vmax.f32 %v10744_v10, %v10745_v54  ;;  %v12276_v41 = vmax.f32 %v11977_v21, 0.0  ;;  %v12277_v51 = vmax.f32 %v11976_v36, 0.0  ;;  %v8271_v29 = vadd.f32 %v18489_v46, %v17665_v8 }
 0x36e   :  { %v10343_v55 = vcombine.low %v10334_v47, %v10341_v30  ;;  %v10350_v50 = vrot.slane %v10342_v32, %v14310_v11  ;;  %v11945_v31 = vcombine.high %v11791_v18, %v11791_v18  ;;  %v11952_v40 = vrot.slane %v11791_v18, %v14327_v27 }
 0x36f   :  { %v12278_v33 = vmax.f32 %v11978_v49, 0.0  ;;  %v12482_v54 = vcombine.low %v12275_v1, %v12276_v41  ;;  %v9504_v42 = vmax.f32 %v8954_v7, 0.0  ;;  %v8955_v3 = vcombine.high %v8271_v29, %v8271_v29 }
 0x370   :  { %v10357_v5 = vrot.slane %v10343_v55, %v14310_v11  ;;  %v11959_v20 = vrot.slane %v11945_v31, %v14327_v27  ;;  %v11960_v39 = vcombine.high %v11952_v40, %v11952_v40  ;;  %v12271_v34 = vmax.f32 %v11952_v40, 0.0 }
 0x371   :  { %v12496_v12 = vrot.slane %v12482_v54, %v14327_v27  ;;  %v17754_v10 = vcombine.low %v12277_v51, %v12278_v33  ;;  %v8962_v57 = vrot.slane %v8271_v29, %v14310_v11  ;;  %v8969_v1 = vrot.slane %v8955_v3, %v14310_v11 }
 0x372   :  { %v10358_v48 = vcombine.low %v10350_v50, %v10357_v5  ;;  %v11961_v47 = vcombine.high %v11959_v20, %v11959_v20  ;;  %v12272_v36 = vmax.f32 %v11960_v39, 0.0  ;;  %v12273_v21 = vmax.f32 %v11959_v20, 0.0 }
 0x373   :  { %v12458_v7 = vcombine.low %v17694_v9, %v12271_v34  ;;  %v8970_v30 = vcombine.high %v8962_v57, %v8962_v57  ;;  %v8978_v49 = vrot.slane %v8962_v57, %v14310_v11  ;;  %v8971_v51 = vcombine.high %v8969_v1, %v8969_v1 }
 0x374   :  { %v17762_v32 = vsel %vm4060_vm7, %v10358_v48, -inf  ;;  %v12274_v63 = vmax.f32 %v11961_v47, 0.0  ;;  %v12480_v18 = vrot.slane %v12272_v36, %v14327_v27  ;;  %v8985_v55 = vrot.slane %v8969_v1, %v14310_v11 }
 0x375   :  { %v12472_v41 = vrot.slane %v12458_v7, %v14327_v27  ;;  %v8992_v50 = vrot.slane %v8970_v30, %v14310_v11  ;;  %v9000_v40 = vcombine.high %v8978_v49, %v8978_v49  ;;  %v9505_v33 = vmax.f32 %v8978_v49, 0.0  ;;  %v18491_v49 = vld [vmem:[#allocation25_spill] sm:$0xff] }
 0x376   :  { %v12481_v31 = vcombine.low %v12273_v21, %v12274_v63  ;;  %v12766_v9 = vsel %vm12754_vm1, %v12480_v18, -inf  ;;  %v18490_v54 = vrot.slane %v17696_v43, %v14327_v27  ;;  %v8999_v29 = vrot.slane %v8971_v51, %v14310_v11 }
 0x377   :  { %v9001_v5 = vcombine.high %v8985_v55, %v8985_v55  ;;  %v9002_v20 = vcombine.high %v8992_v50, %v8992_v50  ;;  %v9506_v34 = vmax.f32 %v8992_v50, 0.0  ;;  %v9507_v3 = vmax.f32 %v9000_v40, 0.0 }
 0x378   :  { %v12473_v46 = vcombine.low %v18490_v54, %v12472_v41  ;;  %v12489_v39 = vrot.slane %v12481_v31, %v14327_v27  ;;  %v9509_v57 = vmax.f32 %v8985_v55, 0.0  ;;  %v9003_v47 = vcombine.high %v8999_v29, %v8999_v29  ;;  %v18492_v41 = vld [vmem:[#allocation28_spill] sm:$0xff] }
 0x379   :  { %v9508_v36 = vmax.f32 %v9002_v20, 0.0  ;;  %v9510_v21 = vmax.f32 %v8999_v29, 0.0  ;;  %v9511_v30 = vmax.f32 %v9001_v5, 0.0  ;;  %v10359_v63 = vcombine.low %v9504_v42, %v9505_v33 }
 0x37a   :  { %v12764_v48 = vsel %vm4060_vm7, %v12473_v46, -inf  ;;  %v12497_v7 = vcombine.low %v12489_v39, %v12496_v12  ;;  %v10360_v43 = vcombine.low %v9506_v34, %v9507_v3  ;;  %v8082_v51 = vcombine.low %v18492_v41, %v18491_v49 }
 0x37b   :  { %v12765_v1 = vmax.f32 %v12763_v45, %v12764_v48  ;;  %v10361_v18 = vcombine.low %v9508_v36, %v9509_v57  ;;  %v9512_v54 = vmax.f32 %v9003_v47, 0.0  ;;  %v10362_v31 = vcombine.low %v9510_v21, %v9511_v30 }
 0x37c   :  { %v10369_v50 = vrot.slane %v10359_v63, %v14310_v11  ;;  %v17781_v55 = vcombine.low %v17633_v16, %v17636_v56  ;;  %v10376_v40 = vrot.slane %v10360_v43, %v14310_v11  ;;  %v8276_v42 = vadd.f32 %v17357_v14, %v8082_v51 }
 0x37d   :  { %v12767_v8 = vmax.f32 %v12765_v1, %v12766_v9  ;;  %v10383_v45 = vrot.slane %v10361_v18, %v14310_v11  ;;  %v17788_v12 = vcombine.low %v17536_v17, %v17639_v53  ;;  %v10390_v9 = vrot.slane %v10362_v31, %v14310_v11 }
 0x37e   :  { %v11806_v46 = vadd.f32 %v17369_v24, %v17781_v55  ;;  %v17794_v29 = vsel %vm4060_vm7, %v12497_v7, -inf  ;;  %v10391_v16 = vcombine.low %v10369_v50, %v10376_v40  ;;  %v9004_v56 = vcombine.high %v8276_v42, %v8276_v42 }
 0x37f   :  { %v12768_v33 = vrot.slane %v12767_v8, 4  ;;  %v9011_v5 = vrot.slane %v8276_v42, %v14310_v11  ;;  %v11801_v14 = vadd.f32 %v17377_v15, %v17788_v12  ;;  %v10392_v39 = vcombine.low %v10383_v45, %v10390_v9 }
 0x380   :  { %v11996_v17 = vcombine.high %v11806_v46, %v11806_v46  ;;  %v17800_v53 = vrot.slane %v11806_v46, %v14327_v27  ;;  %v10399_v34 = vrot.slane %v10391_v16, %v14310_v11  ;;  %v9018_v24 = vrot.slane %v9004_v56, %v14310_v11 }
 0x381   :  { %v12769_v20 = vmax.f32 %v12767_v8, %v12768_v33  ;;  %v9019_v3 = vcombine.high %v9011_v5, %v9011_v5  ;;  %v9027_v57 = vrot.slane %v9011_v5, %v14310_v11  ;;  %v10406_v47 = vrot.slane %v10392_v39, %v14310_v11 }
 0x382   :  { %v12010_v36 = vrot.slane %v11996_v17, %v14327_v27  ;;  %v12011_v15 = vcombine.high %v17800_v53, %v17800_v53  ;;  %v9020_v8 = vcombine.high %v9018_v24, %v9018_v24  ;;  %v9034_v21 = vrot.slane %v9018_v24, %v14310_v11 }
 0x383   :  { %v12770_v48 = vrot.slane %v12769_v20, 2  ;;  %v9041_v7 = vrot.slane %v9019_v3, %v14310_v11  ;;  %v9049_v1 = vcombine.high %v9027_v57, %v9027_v57  ;;  %v10407_v63 = vcombine.low %v10399_v34, %v10406_v47 }
 0x384   :  { %v9513_v43 = vmax.f32 %v9027_v57, 0.0  ;;  %v12012_v18 = vcombine.high %v12010_v36, %v12010_v36  ;;  %v9048_v41 = vrot.slane %v9020_v8, %v14310_v11  ;;  %v9050_v51 = vcombine.high %v9034_v21, %v9034_v21 }
 0x385   :  { %v12771_v30 = vmax.f32 %v12769_v20, %v12770_v48  ;;  %v9051_v31 = vcombine.high %v9041_v7, %v9041_v7  ;;  %v9514_v50 = vmax.f32 %v9041_v7, 0.0  ;;  %v17813_v45 = vsel %vm4060_vm7, %v10407_v63, -inf }
 0x386   :  { %v9515_v42 = vmax.f32 %v9049_v1, 0.0  ;;  %v9517_v33 = vmax.f32 %v9034_v21, 0.0  ;;  %v9052_v9 = vcombine.high %v9048_v41, %v9048_v41  ;;  %v9518_v16 = vmax.f32 %v9048_v41, 0.0  ;;  %v18493_v41 = vld [vmem:[#allocation27_spill] sm:$0xff] }
 0x387   :  { %v12772_v40 = vrot.slane %v12771_v30, 1  ;;  %v9516_v46 = vmax.f32 %v9051_v31, 0.0  ;;  %v9519_v56 = vmax.f32 %v9050_v51, 0.0  ;;  %v10408_v20 = vcombine.low %v9512_v54, %v9513_v43 }
 0x388   :  { %v10422_v39 = vrot.slane %v9514_v50, %v14310_v11  ;;  %v12283_v17 = vmax.f32 %v17800_v53, 0.0  ;;  %v9520_v34 = vmax.f32 %v9052_v9, 0.0  ;;  %v10432_v3 = vcombine.low %v9517_v33, %v9518_v16 }
 0x389   :  { %v17815_v5 = vmax.f32 %v12771_v30, %v12772_v40  ;;  %v10431_v24 = vcombine.low %v9515_v42, %v9516_v46  ;;  %v12284_v57 = vmax.f32 %v12011_v15, 0.0  ;;  %v10415_v48 = vrot.slane %v10408_v20, %v14310_v11 }
 0x38a   :  { %v12285_v47 = vmax.f32 %v12010_v36, 0.0  ;;  %v17820_v8 = vmax.f32 %v12012_v18, 0.0  ;;  %v11979_v21 = vcombine.high %v11801_v14, %v11801_v14  ;;  %v10433_v7 = vcombine.low %v9519_v56, %v9520_v34 }
 0x38b   :  { %v10441_v1 = vrot.slane %v10431_v24, %v14310_v11  ;;  %v10448_v30 = vrot.slane %v10432_v3, %v14310_v11  ;;  %v11986_v54 = vrot.slane %v11801_v14, %v14327_v27  ;;  %v10423_v63 = vcombine.low %v10415_v48, %v10422_v39 }
 0x38c   :  { %v12523_v43 = vcombine.low %v12284_v57, %v12285_v47  ;;  %v11993_v53 = vrot.slane %v11979_v21, %v14327_v27  ;;  %v8083_v15 = vcombine.low %v18493_v41, %v18491_v49  ;;  %v17829_v51 = vrot.slane %v10433_v7, %v14310_v11 }
 0x38d   :  { %v17831_v36 = vcombine.low %v10441_v1, %v10448_v30  ;;  %v11994_v18 = vcombine.high %v11986_v54, %v11986_v54  ;;  %v12279_v31 = vmax.f32 %v11986_v54, 0.0  ;;  %v10430_v50 = vrot.slane %v10423_v63, %v14310_v11 }
 0x38e   :  { %v12537_v40 = vrot.slane %v12523_v43, %v14327_v27  ;;  %v11995_v42 = vcombine.high %v11993_v53, %v11993_v53  ;;  %v12281_v14 = vmax.f32 %v11993_v53, 0.0  ;;  %v8281_v46 = vadd.f32 %v17404_v0, %v8083_v15 }
 0x38f   :  { %v10471_v33 = vrot.slane %v17831_v36, %v14310_v11  ;;  %v12280_v9 = vmax.f32 %v11994_v18, 0.0  ;;  %v11816_v49 = vadd.f32 %v17430_v22, %v17546_v19  ;;  %v17841_v16 = vsel %vm10700_vm9, %v10430_v50, -inf }
 0x390   :  { %v12282_v56 = vmax.f32 %v11995_v42, 0.0  ;;  %v12521_v20 = vrot.slane %v12281_v14, %v14327_v27  ;;  %v8084_v39 = vcombine.low %v18493_v41, %v17385_v37  ;;  %v9053_v24 = vcombine.high %v8281_v46, %v8281_v46 }
 0x391   :  { %v12499_v34 = vcombine.low %v12279_v31, %v12280_v9  ;;  %v9060_v3 = vrot.slane %v8281_v46, %v14310_v11  ;;  %v12030_v57 = vcombine.high %v11816_v49, %v11816_v49  ;;  %v12037_v47 = vrot.slane %v11816_v49, %v14327_v27 }
 0x392   :  { %v12522_v48 = vcombine.low %v12282_v56, %v12283_v17  ;;  %v12777_v0 = vsel %vm12754_vm1, %v12521_v20, -inf  ;;  %v8286_v22 = vadd.f32 %v17440_v13, %v8084_v39  ;;  %v9067_v7 = vrot.slane %v9053_v24, %v14310_v11 }
 0x393   :  { %v12513_v21 = vrot.slane %v12499_v34, %v14327_v27  ;;  %v9068_v1 = vcombine.high %v9060_v3, %v9060_v3  ;;  %v9076_v30 = vrot.slane %v9060_v3, %v14310_v11  ;;  %v12044_v54 = vrot.slane %v12030_v57, %v14327_v27 }
 0x394   :  { %v12530_v37 = vrot.slane %v12522_v48, %v14327_v27  ;;  %v12045_v63 = vcombine.high %v12037_v47, %v12037_v47  ;;  %v12291_v43 = vmax.f32 %v12037_v47, 0.0  ;;  %v18494_v17 = vrot.slane %v17754_v10, %v14327_v27 }
 0x395   :  { %v9069_v41 = vcombine.high %v9067_v7, %v9067_v7  ;;  %v9083_v13 = vrot.slane %v9067_v7, %v14310_v11  ;;  %v9090_v15 = vrot.slane %v9068_v1, %v14310_v11  ;;  %v9098_v31 = vcombine.high %v9076_v30, %v9076_v30 }
 0x396   :  { %v12514_v53 = vcombine.low %v18494_v17, %v12513_v21  ;;  %v17860_v18 = vcombine.low %v12530_v37, %v12537_v40  ;;  %v9521_v50 = vmax.f32 %v9076_v30, 0.0  ;;  %v12046_v42 = vcombine.high %v12044_v54, %v12044_v54 }
 0x397   :  { %v9097_v9 = vrot.slane %v9069_v41, %v14310_v11  ;;  %v9099_v46 = vcombine.high %v9083_v13, %v9083_v13  ;;  %v9100_v49 = vcombine.high %v9090_v15, %v9090_v15  ;;  %v9522_v10 = vmax.f32 %v9090_v15, 0.0 }
 0x398   :  { %v12775_v14 = vsel %vm4060_vm7, %v12514_v53, -inf  ;;  %v9523_v20 = vmax.f32 %v9098_v31, 0.0  ;;  %v9525_v39 = vmax.f32 %v9083_v13, 0.0  ;;  %v12292_v47 = vmax.f32 %v12045_v63, 0.0 }
 0x399   :  { %v12776_v56 = vmax.f32 %v17794_v29, %v12775_v14  ;;  %v9101_v34 = vcombine.high %v9097_v9, %v9097_v9  ;;  %v9524_v24 = vmax.f32 %v9100_v49, 0.0  ;;  %v9526_v3 = vmax.f32 %v9097_v9, 0.0 }
 0x39a   :  { %v9527_v57 = vmax.f32 %v9099_v46, 0.0  ;;  %v10434_v48 = vcombine.low %v9521_v50, %v9522_v10  ;;  %v12293_v21 = vmax.f32 %v12044_v54, 0.0  ;;  %v12294_v37 = vmax.f32 %v12046_v42, 0.0 }
 0x39b   :  { %v12778_v40 = vmax.f32 %v12776_v56, %v12777_v0  ;;  %v9528_v7 = vmax.f32 %v9101_v34, 0.0  ;;  %v10480_v1 = vcombine.low %v9523_v20, %v9524_v24  ;;  %v10481_v30 = vcombine.low %v9525_v39, %v9526_v3 }
 0x39c   :  { %v10462_v53 = vrot.slane %v10434_v48, %v14310_v11  ;;  %v12563_v41 = vcombine.low %v12291_v43, %v12292_v47  ;;  %v9102_v29 = vcombine.high %v8286_v22, %v8286_v22  ;;  %v12564_v14 = vcombine.low %v12293_v21, %v12294_v37 }
 0x39d   :  { %v12779_v17 = vrot.slane %v12778_v40, 4  ;;  %v10482_v15 = vcombine.low %v9527_v57, %v9528_v7  ;;  %v10490_v13 = vrot.slane %v10480_v1, %v14310_v11  ;;  %v10497_v31 = vrot.slane %v10481_v30, %v14310_v11 }
 0x39e   :  { %v10464_v0 = vcombine.low %v17829_v51, %v10462_v53  ;;  %v12571_v54 = vrot.slane %v12563_v41, %v14327_v27  ;;  %v9109_v63 = vrot.slane %v8286_v22, %v14310_v11  ;;  %v12578_v46 = vrot.slane %v12564_v14, %v14327_v27 }
 0x39f   :  { %v12780_v9 = vmax.f32 %v12778_v40, %v12779_v17  ;;  %v10504_v50 = vrot.slane %v10482_v15, %v14310_v11  ;;  %v10512_v42 = vcombine.low %v10490_v13, %v10497_v31  ;;  %v9116_v43 = vrot.slane %v9102_v29, %v14310_v11 }
 0x3a0   :  { %v10478_v56 = vrot.slane %v10464_v0, %v14310_v11  ;;  %v9117_v10 = vcombine.high %v9109_v63, %v9109_v63  ;;  %v9125_v20 = vrot.slane %v9109_v63, %v14310_v11  ;;  %v12579_v51 = vcombine.low %v12571_v54, %v12578_v46 }
 0x3a1   :  { %v12781_v49 = vrot.slane %v12780_v9, 2  ;;  %v10520_v39 = vrot.slane %v10512_v42, %v14310_v11  ;;  %v9118_v34 = vcombine.high %v9116_v43, %v9116_v43  ;;  %v9132_v24 = vrot.slane %v9116_v43, %v14310_v11 }
 0x3a2   :  { %v17883_v3 = vcombine.low %v10471_v33, %v10478_v56  ;;  %v9139_v57 = vrot.slane %v9117_v10, %v14310_v11  ;;  %v9147_v40 = vcombine.high %v9125_v20, %v9125_v20  ;;  %v17887_v48 = vsel %vm4060_vm7, %v12579_v51, -inf }
 0x3a3   :  { %v17878_v22 = vmax.f32 %v12780_v9, %v12781_v49  ;;  %v9146_v47 = vrot.slane %v9118_v34, %v14310_v11  ;;  %v9148_v21 = vcombine.high %v9132_v24, %v9132_v24  ;;  %v9529_v7 = vmax.f32 %v9125_v20, 0.0 }
 0x3a4   :  { %v9149_v30 = vcombine.high %v9139_v57, %v9139_v57  ;;  %v9530_v37 = vmax.f32 %v9139_v57, 0.0  ;;  %v9531_v17 = vmax.f32 %v9147_v40, 0.0  ;;  %v9533_v41 = vmax.f32 %v9132_v24, 0.0 }
 0x3a5   :  { %v12783_v1 = vrot.slane %v17878_v22, 1  ;;  %v9150_v53 = vcombine.high %v9146_v47, %v9146_v47  ;;  %v9534_v36 = vmax.f32 %v9146_v47, 0.0  ;;  %v9535_v33 = vmax.f32 %v9148_v21, 0.0 }
 0x3a6   :  { %v9532_v29 = vmax.f32 %v9149_v30, 0.0  ;;  %v10483_v15 = vcombine.low %v9529_v7, %v9530_v37  ;;  %v11811_v13 = vadd.f32 %v17450_v4, %v17781_v55  ;;  %v17895_v31 = vsel %vm4060_vm7, %v17860_v18, -inf }
 0x3a7   :  { %v10543_v14 = vrot.slane %v9533_v41, %v14310_v11  ;;  %v17898_v9 = vcombine.low %v9534_v36, %v9535_v33  ;;  %v17902_v0 = vcombine.low %v17402_v58, %v17473_v61  ;;  %v9536_v54 = vmax.f32 %v9150_v53, 0.0 }
 0x3a8   :  { %v10511_v63 = vrot.slane %v10483_v15, %v14310_v11  ;;  %v10529_v42 = vcombine.low %v9531_v17, %v9532_v29  ;;  %v12013_v46 = vcombine.high %v11811_v13, %v11811_v13  ;;  %v12020_v43 = vrot.slane %v11811_v13, %v14327_v27 }
 0x3a9   :  { %v10562_v4 = vrot.slane %v17898_v9, %v14310_v11  ;;  %v8291_v18 = vadd.f32 %v17531_v38, %v17902_v0  ;;  %v11826_v49 = vadd.f32 %v17541_v26, %v17655_v2  ;;  %v17914_v58 = vadd.f32 %v17557_v35, %v17546_v19 }
 0x3aa   :  { %v10513_v61 = vcombine.low %v10504_v50, %v10511_v63  ;;  %v10536_v56 = vrot.slane %v10529_v42, %v14310_v11  ;;  %v12027_v10 = vrot.slane %v12013_v46, %v14327_v27  ;;  %v12028_v20 = vcombine.high %v12020_v43, %v12020_v43 }
 0x3ab   :  { %v12287_v51 = vmax.f32 %v12020_v43, 0.0  ;;  %v9151_v34 = vcombine.high %v8291_v18, %v8291_v18  ;;  %v9158_v24 = vrot.slane %v8291_v18, %v14310_v11  ;;  %v12064_v57 = vcombine.high %v11826_v49, %v11826_v49 }
 0x3ac   :  { %v10527_v38 = vrot.slane %v10513_v61, %v14310_v11  ;;  %v10544_v40 = vcombine.low %v10536_v56, %v10543_v14  ;;  %v12029_v47 = vcombine.high %v12027_v10, %v12027_v10  ;;  %v12288_v26 = vmax.f32 %v12028_v20, 0.0 }
 0x3ad   :  { %v12289_v2 = vmax.f32 %v12027_v10, 0.0  ;;  %v12539_v35 = vcombine.low %v17820_v8, %v12287_v51  ;;  %v9165_v19 = vrot.slane %v9151_v34, %v14310_v11  ;;  %v9166_v50 = vcombine.high %v9158_v24, %v9158_v24 }
 0x3ae   :  { %v17922_v21 = vcombine.low %v10520_v39, %v10527_v38  ;;  %v17925_v7 = vrot.slane %v10544_v40, %v14310_v11  ;;  %v12290_v30 = vmax.f32 %v12029_v47, 0.0  ;;  %v9174_v37 = vrot.slane %v9158_v24, %v14310_v11 }
 0x3af   :  { %v12540_v17 = vcombine.low %v12288_v26, %v12289_v2  ;;  %v12547_v53 = vrot.slane %v12539_v35, %v14327_v27  ;;  %v9167_v41 = vcombine.high %v9165_v19, %v9165_v19  ;;  %v9181_v36 = vrot.slane %v9165_v19, %v14310_v11 }
 0x3b0   :  { %v12562_v33 = vrot.slane %v12290_v30, %v14327_v27  ;;  %v9188_v8 = vrot.slane %v9166_v50, %v14310_v11  ;;  %v9196_v29 = vcombine.high %v9174_v37, %v9174_v37  ;;  %v9537_v15 = vmax.f32 %v9174_v37, 0.0 }
 0x3b1   :  { %v12554_v39 = vrot.slane %v12540_v17, %v14327_v27  ;;  %v9195_v13 = vrot.slane %v9167_v41, %v14310_v11  ;;  %v9197_v14 = vcombine.high %v9181_v36, %v9181_v36  ;;  %v9541_v9 = vmax.f32 %v9181_v36, 0.0 }
 0x3b2   :  { %v12788_v63 = vsel %vm12754_vm1, %v12562_v33, -inf  ;;  %v9198_v42 = vcombine.high %v9188_v8, %v9188_v8  ;;  %v9538_v46 = vmax.f32 %v9188_v8, 0.0  ;;  %v9539_v43 = vmax.f32 %v9196_v29, 0.0 }
 0x3b3   :  { %v12555_v18 = vcombine.low %v12547_v53, %v12554_v39  ;;  %v9199_v61 = vcombine.high %v9195_v13, %v9195_v13  ;;  %v9542_v56 = vmax.f32 %v9195_v13, 0.0  ;;  %v9543_v10 = vmax.f32 %v9197_v14, 0.0 }
 0x3b4   :  { %v9540_v20 = vmax.f32 %v9198_v42, 0.0  ;;  %v10553_v51 = vcombine.low %v9536_v54, %v9537_v15  ;;  %v10554_v34 = vcombine.low %v9538_v46, %v9539_v43  ;;  %v12071_v24 = vrot.slane %v11826_v49, %v14327_v27 }
 0x3b5   :  { %v12786_v38 = vsel %vm4060_vm7, %v12555_v18, -inf  ;;  %v17937_v40 = vcombine.low %v9542_v56, %v9543_v10  ;;  %v12078_v47 = vrot.slane %v12064_v57, %v14327_v27  ;;  %v12047_v26 = vcombine.high %v17914_v58, %v17914_v58 }
 0x3b6   :  { %v12787_v2 = vmax.f32 %v17895_v31, %v12786_v38  ;;  %v10555_v35 = vcombine.low %v9540_v20, %v9541_v9  ;;  %v10569_v19 = vrot.slane %v10553_v51, %v14310_v11  ;;  %v10576_v50 = vrot.slane %v10554_v34, %v14310_v11 }
 0x3b7   :  { %v10611_v54 = vrot.slane %v17937_v40, %v14310_v11  ;;  %v12079_v49 = vcombine.high %v12071_v24, %v12071_v24  ;;  %v12080_v30 = vcombine.high %v12078_v47, %v12078_v47  ;;  %v12299_v37 = vmax.f32 %v12071_v24, 0.0 }
 0x3b8   :  { %v12789_v17 = vmax.f32 %v12787_v2, %v12788_v63  ;;  %v10583_v53 = vrot.slane %v10555_v35, %v14310_v11  ;;  %v10584_v57 = vcombine.low %v10562_v4, %v10569_v19  ;;  %v12301_v41 = vmax.f32 %v12078_v47, 0.0 }
 0x3b9   :  { %v12300_v36 = vmax.f32 %v12079_v49, 0.0  ;;  %v17948_v33 = vmax.f32 %v12080_v30, 0.0  ;;  %v12603_v31 = vrot.slane %v12299_v37, %v14327_v27  ;;  %v12054_v8 = vrot.slane %v17914_v58, %v14327_v27 }
 0x3ba   :  { %v12790_v29 = vrot.slane %v12789_v17, 4  ;;  %v10585_v15 = vcombine.low %v10576_v50, %v10583_v53  ;;  %v10592_v39 = vrot.slane %v10584_v57, %v14310_v11  ;;  %v12061_v13 = vrot.slane %v12047_v26, %v14327_v27 }
 0x3bb   :  { %v17955_v14 = vcombine.low %v12300_v36, %v12301_v41  ;;  %v12799_v9 = vsel %vm12754_vm1, %v12603_v31, -inf  ;;  %v12062_v4 = vcombine.high %v12054_v8, %v12054_v8  ;;  %v12295_v63 = vmax.f32 %v12054_v8, 0.0 }
 0x3bc   :  { %v12791_v42 = vmax.f32 %v12789_v17, %v12790_v29  ;;  %v10599_v46 = vrot.slane %v10585_v15, %v14310_v11  ;;  %v12063_v43 = vcombine.high %v12061_v13, %v12061_v13  ;;  %v12297_v18 = vmax.f32 %v12061_v13, 0.0 }
 0x3bd   :  { %v12612_v58 = vrot.slane %v17955_v14, %v14327_v27  ;;  %v12296_v56 = vmax.f32 %v12062_v4, 0.0  ;;  %v8296_v10 = vadd.f32 %v17573_v25, %v17902_v0  ;;  %v9544_v20 = vmax.f32 %v9199_v61, 0.0 }
 0x3be   :  { %v12792_v51 = vrot.slane %v12791_v42, 2  ;;  %v17963_v34 = vcombine.low %v10592_v39, %v10599_v46  ;;  %v12298_v24 = vmax.f32 %v12063_v43, 0.0  ;;  %v11836_v38 = vadd.f32 %v17596_v23, %v17682_v6 }
 0x3bf   :  { %v12580_v47 = vcombine.low %v12295_v63, %v12296_v56  ;;  %v9200_v26 = vcombine.high %v8296_v10, %v8296_v10  ;;  %v9207_v2 = vrot.slane %v8296_v10, %v14310_v11  ;;  %v11831_v35 = vadd.f32 %v17604_v62, %v17651_v59 }
 0x3c0   :  { %v17970_v19 = vmax.f32 %v12791_v42, %v12792_v51  ;;  %v12581_v50 = vcombine.low %v12297_v18, %v12298_v24  ;;  %v12098_v49 = vcombine.high %v11836_v38, %v11836_v38  ;;  %v17973_v25 = vrot.slane %v11836_v38, %v14327_v27 }
 0x3c1   :  { %v12588_v0 = vrot.slane %v12580_v47, %v14327_v27  ;;  %v9214_v61 = vrot.slane %v9200_v26, %v14310_v11  ;;  %v9215_v30 = vcombine.high %v9207_v2, %v9207_v2  ;;  %v9223_v23 = vrot.slane %v9207_v2, %v14310_v11 }
 0x3c2   :  { %v12595_v6 = vrot.slane %v12581_v50, %v14327_v27  ;;  %v12112_v37 = vrot.slane %v12098_v49, %v14327_v27  ;;  %v12113_v62 = vcombine.high %v17973_v25, %v17973_v25  ;;  %v12307_v59 = vmax.f32 %v17973_v25, 0.0 }
 0x3c3   :  { %v9216_v17 = vcombine.high %v9214_v61, %v9214_v61  ;;  %v9230_v53 = vrot.slane %v9214_v61, %v14310_v11  ;;  %v9237_v57 = vrot.slane %v9215_v30, %v14310_v11  ;;  %v9245_v41 = vcombine.high %v9223_v23, %v9223_v23 }
 0x3c4   :  { %v12596_v36 = vcombine.low %v12588_v0, %v12595_v6  ;;  %v9545_v31 = vmax.f32 %v9223_v23, 0.0  ;;  %v12114_v8 = vcombine.high %v12112_v37, %v12112_v37  ;;  %v12308_v29 = vmax.f32 %v12113_v62, 0.0 }
 0x3c5   :  { %v9244_v15 = vrot.slane %v9216_v17, %v14310_v11  ;;  %v9246_v39 = vcombine.high %v9230_v53, %v9230_v53  ;;  %v9247_v13 = vcombine.high %v9237_v57, %v9237_v57  ;;  %v9546_v4 = vmax.f32 %v9237_v57, 0.0 }
 0x3c6   :  { %v12797_v63 = vsel %vm4060_vm7, %v12596_v36, -inf  ;;  %v9547_v42 = vmax.f32 %v9245_v41, 0.0  ;;  %v9549_v46 = vmax.f32 %v9230_v53, 0.0  ;;  %v10602_v43 = vcombine.low %v9544_v20, %v9545_v31 }
 0x3c7   :  { %v12798_v18 = vmax.f32 %v17887_v48, %v12797_v63  ;;  %v9248_v56 = vcombine.high %v9244_v15, %v9244_v15  ;;  %v9548_v10 = vmax.f32 %v9247_v13, 0.0  ;;  %v9550_v51 = vmax.f32 %v9244_v15, 0.0 }
 0x3c8   :  { %v9551_v24 = vmax.f32 %v9246_v39, 0.0  ;;  %v10603_v38 = vcombine.low %v9546_v4, %v9547_v42  ;;  %v10618_v47 = vrot.slane %v10602_v43, %v14310_v11  ;;  %v12309_v26 = vmax.f32 %v12112_v37, 0.0  ;;  %v18496_v39 = vld [vmem:[#allocation24_spill] sm:$0xff] }
 0x3c9   :  { %v17989_v2 = vmax.f32 %v12798_v18, %v12799_v9  ;;  %v9552_v50 = vmax.f32 %v9248_v56, 0.0  ;;  %v10604_v49 = vcombine.low %v9548_v10, %v9549_v46  ;;  %v12310_v0 = vmax.f32 %v12114_v8, 0.0 }
 0x3ca   :  { %v10625_v61 = vrot.slane %v10603_v38, %v14310_v11  ;;  %v10633_v20 = vcombine.low %v10611_v54, %v10618_v47  ;;  %v10650_v48 = vcombine.low %v9550_v51, %v9551_v24  ;;  %v12644_v30 = vrot.slane %v12308_v29, %v14327_v27  ;;  %v18495_v29 = vld [vmem:[#allocation33_spill] sm:$0xff] }
 0x3cb   :  { %v12801_v23 = vrot.slane %v17989_v2, 4  ;;  %v10632_v6 = vrot.slane %v10604_v49, %v14310_v11  ;;  %v10664_v37 = vrot.slane %v9552_v50, %v14310_v11  ;;  %v17999_v9 = vcombine.low %v12309_v26, %v12310_v0 }
 0x3cc   :  { %v10641_v62 = vrot.slane %v10633_v20, %v14310_v11  ;;  %v10657_v17 = vrot.slane %v10650_v48, %v14310_v11  ;;  %v18004_v53 = vsel %vm12754_vm1, %v12644_v30, -inf  ;;  %v12081_v40 = vcombine.high %v11831_v35, %v11831_v35 }
 0x3cd   :  { %v10634_v54 = vcombine.low %v10625_v61, %v10632_v6  ;;  %v12653_v57 = vrot.slane %v17999_v9, %v14327_v27  ;;  %v12088_v41 = vrot.slane %v11831_v35, %v14327_v27  ;;  %v11846_v36 = vadd.f32 %v17645_v60, %v17788_v12 }
 0x3ce   :  { %v18011_v31 = vcombine.low %v10657_v17, %v10664_v37  ;;  %v12095_v8 = vrot.slane %v12081_v40, %v14327_v27  ;;  %v11841_v15 = vadd.f32 %v18495_v29, %v17675_v52  ;;  %v11856_v13 = vadd.f32 %v18496_v39, %v17781_v55 }
 0x3cf   :  { %v10648_v4 = vrot.slane %v10634_v54, %v14310_v11  ;;  %v12096_v63 = vcombine.high %v12088_v41, %v12088_v41  ;;  %v12303_v42 = vmax.f32 %v12088_v41, 0.0  ;;  %v12132_v46 = vcombine.high %v11846_v36, %v11846_v36 }
 0x3d0   :  { %v12097_v43 = vcombine.high %v12095_v8, %v12095_v8  ;;  %v12305_v35 = vmax.f32 %v12095_v8, 0.0  ;;  %v12139_v18 = vrot.slane %v11846_v36, %v14327_v27  ;;  %v12115_v60 = vcombine.high %v11841_v15, %v11841_v15 }
 0x3d1   :  { %v18020_v12 = vcombine.low %v10641_v62, %v10648_v4  ;;  %v12304_v56 = vmax.f32 %v12096_v63, 0.0  ;;  %v12605_v10 = vcombine.low %v17948_v33, %v12303_v42  ;;  %v12146_v52 = vrot.slane %v12132_v46, %v14327_v27  ;;  %v18497_v63 = vld [vmem:[#allocation23_spill] sm:$0xff] }
 0x3d2   :  { %v12306_v51 = vmax.f32 %v12097_v43, 0.0  ;;  %v12147_v24 = vcombine.high %v12139_v18, %v12139_v18  ;;  %v12315_v38 = vmax.f32 %v12139_v18, 0.0  ;;  %v12122_v47 = vrot.slane %v11841_v15, %v14327_v27 }
 0x3d3   :  { %v12619_v26 = vrot.slane %v12605_v10, %v14327_v27  ;;  %v12621_v50 = vcombine.low %v12304_v56, %v12305_v35  ;;  %v12148_v49 = vcombine.high %v12146_v52, %v12146_v52  ;;  %v12317_v0 = vmax.f32 %v12146_v52, 0.0 }
 0x3d4   :  { %v12622_v61 = vcombine.low %v12306_v51, %v12307_v59  ;;  %v12316_v20 = vmax.f32 %v12147_v24, 0.0  ;;  %v12129_v48 = vrot.slane %v12115_v60, %v14327_v27  ;;  %v12130_v30 = vcombine.high %v12122_v47, %v12122_v47  ;;  %v18498_v60 = vld [vmem:[#allocation32_spill] sm:$0xff] }
 0x3d5   :  { %v12620_v33 = vcombine.low %v12612_v58, %v12619_v26  ;;  %v12629_v6 = vrot.slane %v12621_v50, %v14327_v27  ;;  %v12318_v37 = vmax.f32 %v12148_v49, 0.0  ;;  %v12685_v62 = vrot.slane %v12317_v0, %v14327_v27 }
 0x3d6   :  { %v12636_v17 = vrot.slane %v12622_v61, %v14327_v27  ;;  %v12663_v40 = vcombine.low %v12315_v38, %v12316_v20  ;;  %v12131_v54 = vcombine.high %v12129_v48, %v12129_v48  ;;  %v12311_v41 = vmax.f32 %v12122_v47, 0.0 }
 0x3d7   :  { %v12807_v25 = vsel %vm4060_vm7, %v12620_v33, -inf  ;;  %v18037_v59 = vsel %vm12754_vm1, %v12685_v62, -inf  ;;  %v12312_v36 = vmax.f32 %v12130_v30, 0.0  ;;  %v12313_v8 = vmax.f32 %v12129_v48, 0.0 }
 0x3d8   :  { %v12637_v29 = vcombine.low %v12629_v6, %v12636_v17  ;;  %v12677_v14 = vrot.slane %v12663_v40, %v14327_v27  ;;  %v12314_v58 = vmax.f32 %v12131_v54, 0.0  ;;  %v12166_v15 = vcombine.high %v11856_v13, %v11856_v13 }
 0x3d9   :  { %v12646_v39 = vcombine.low %v12311_v41, %v12312_v36  ;;  %v12173_v4 = vrot.slane %v11856_v13, %v14327_v27  ;;  %v11851_v42 = vadd.f32 %v18497_v63, %v17781_v55  ;;  %v10672_v46 = vrot.slane %v18011_v31, %v14310_v11 }
 0x3da   :  { %v12808_v43 = vsel %vm4060_vm7, %v12637_v29, -inf  ;;  %v12662_v35 = vcombine.low %v12313_v8, %v12314_v58  ;;  %v12180_v18 = vrot.slane %v12166_v15, %v14327_v27  ;;  %v10707_v56 = vrot.slane %v18498_v60, 1 }
 0x3db   :  { %v12809_v10 = vmax.f32 %v12807_v25, %v12808_v43  ;;  %v12660_v52 = vrot.slane %v12646_v39, %v14327_v27  ;;  %v12181_v51 = vcombine.high %v12173_v4, %v12173_v4  ;;  %v12323_v24 = vmax.f32 %v12173_v4, 0.0  ;;  %v18501_v39 = vld [vmem:[#allocation21_spill] sm:$0xff] }
 0x3dc   :  { %v12670_v13 = vrot.slane %v12662_v35, %v14327_v27  ;;  %v12182_v38 = vcombine.high %v12180_v18, %v12180_v18  ;;  %v12325_v47 = vmax.f32 %v12180_v18, 0.0  ;;  %v12149_v55 = vcombine.high %v11851_v42, %v11851_v42  ;;  %v18503_v35 = vld [vmem:[#allocation16_spill] sm:$0xff] }
 0x3dd   :  { %v18051_v26 = vmax.f32 %v12809_v10, %v18004_v53  ;;  %v12661_v50 = vcombine.low %v12653_v57, %v12660_v52  ;;  %v12324_v49 = vmax.f32 %v12181_v51, 0.0  ;;  %v12156_v0 = vrot.slane %v11851_v42, %v14327_v27 }
 0x3de   :  { %v12678_v61 = vcombine.low %v12670_v13, %v12677_v14  ;;  %v12326_v20 = vmax.f32 %v12182_v38, 0.0  ;;  %v12163_v48 = vrot.slane %v12149_v55, %v14327_v27  ;;  %v10708_v30 = vmax.f32 %v18498_v60, %v10707_v56  ;;  %v18499_v14 = vld [vmem:[#allocation31_spill] sm:$0xff] }
 0x3df   :  { %v18060_v33 = vsel %vm4060_vm7, %v12661_v50, -inf  ;;  %v12704_v6 = vcombine.low %v12324_v49, %v12325_v47  ;;  %v12164_v62 = vcombine.high %v12156_v0, %v12156_v0  ;;  %v12319_v53 = vmax.f32 %v12156_v0, 0.0 }
 0x3e0   :  { %v18063_v17 = vsel %vm4060_vm7, %v12678_v61, -inf  ;;  %v12726_v9 = vrot.slane %v12326_v20, %v14327_v27  ;;  %v12165_v57 = vcombine.high %v12163_v48, %v12163_v48  ;;  %v12321_v40 = vmax.f32 %v12163_v48, 0.0 }
 0x3e1   :  { %v12820_v54 = vmax.f32 %v18060_v33, %v18063_v17  ;;  %v12718_v41 = vrot.slane %v12704_v6, %v14327_v27  ;;  %v12320_v25 = vmax.f32 %v12164_v62, 0.0  ;;  %v12686_v36 = vcombine.low %v12318_v37, %v12319_v53 }
 0x3e2   :  { %v18070_v8 = vsel %vm12754_vm1, %v12726_v9, -inf  ;;  %v12322_v29 = vmax.f32 %v12165_v57, 0.0  ;;  %v18500_v58 = vrot.slane %v18499_v14, 2  ;;  %v18502_v4 = vrot.slane %v18501_v39, 2 }
 0x3e3   :  { %v12687_v42 = vcombine.low %v12320_v25, %v12321_v40  ;;  %v12694_v43 = vrot.slane %v12686_v36, %v14327_v27  ;;  %v18504_v18 = vrot.slane %v18503_v35, 4  ;;  %v10747_v37 = vrot.slane %v17740_v28, 4 }
 0x3e4   :  { %v10717_v15 = vmax.f32 %v18499_v14, %v18500_v58  ;;  %v10728_v63 = vmax.f32 %v18501_v39, %v18502_v4  ;;  %v12703_v56 = vcombine.low %v12322_v29, %v12323_v24  ;;  %v10755_v51 = vmax.f32 %v17762_v32, %v17813_v45 }
 0x3e5   :  { %v10737_v60 = vmax.f32 %v18503_v35, %v18504_v18  ;;  %v12701_v13 = vrot.slane %v12687_v42, %v14327_v27  ;;  %v10748_v47 = vmax.f32 %v17740_v28, %v10747_v37  ;;  %v10764_v55 = vsel %vm4060_vm7, %v17883_v3, -inf }
 0x3e6   :  { %v10718_v10 = vrot.slane %v10717_v15, 1  ;;  %v10729_v52 = vrot.slane %v10728_v63, 1  ;;  %v12711_v50 = vrot.slane %v12703_v56, %v14327_v27  ;;  %v10757_v61 = vmax.f32 %v10755_v51, %v17841_v16 }
 0x3e7   :  { %v10738_v38 = vrot.slane %v10737_v60, 2  ;;  %v12702_v24 = vcombine.low %v12694_v43, %v12701_v13  ;;  %v10749_v48 = vrot.slane %v10748_v47, 2  ;;  %v10765_v32 = vsel %vm4060_vm7, %v17922_v21, -inf }
 0x3e8   :  { %v10719_v49 = vmax.f32 %v10717_v15, %v10718_v10  ;;  %v10730_v0 = vmax.f32 %v10728_v63, %v10729_v52  ;;  %v12719_v45 = vcombine.low %v12711_v50, %v12718_v41  ;;  %v10758_v6 = vrot.slane %v10757_v61, 4 }
 0x3e9   :  { %v10739_v20 = vmax.f32 %v10737_v60, %v10738_v38  ;;  %v10766_v62 = vmax.f32 %v10764_v55, %v10765_v32  ;;  %v10767_v28 = vsel %vm10700_vm9, %v17925_v7, -inf  ;;  %v12829_v3 = vsel %vm4060_vm7, %v12702_v24, -inf }
 0x3ea   :  { %v10750_v27 = vmax.f32 %v10748_v47, %v10749_v48  ;;  %v10775_v9 = vsel %vm4060_vm7, %v17963_v34, -inf  ;;  %v12830_v16 = vsel %vm4060_vm7, %v12719_v45, -inf  ;;  %v10759_v57 = vmax.f32 %v10757_v61, %v10758_v6 }
 0x3eb   :  { %v10740_v53 = vrot.slane %v10739_v20, 1  ;;  %v10768_v40 = vmax.f32 %v10766_v62, %v10767_v28  ;;  %v10776_v21 = vsel %vm4060_vm7, %v18020_v12, -inf  ;;  %v12831_v41 = vmax.f32 %v12829_v3, %v12830_v16  ;;  %v18506_v3 = vld [vmem:[#allocation29_spill] sm:$0xff] }
 0x3ec   :  { %v10751_v36 = vrot.slane %v10750_v27, 1  ;;  %v10777_v29 = vmax.f32 %v10775_v9, %v10776_v21  ;;  %v10760_v14 = vrot.slane %v10759_v57, 2  ;;  %v10778_v58 = vsel %vm10700_vm9, %v10672_v46, -inf }
 0x3ed   :  { %v10741_v25 = vmax.f32 %v10739_v20, %v10740_v53  ;;  %v10769_v7 = vrot.slane %v10768_v40, 4  ;;  %v12889_v34 = vsel %vm12848_vm10, %v10719_v49, %v10708_v30  ;;  %v12784_v12 = vmax.f32 %v17878_v22, %v12783_v1  ;;  %v18505_v20 = vld [vmem:[#allocation26_spill] sm:$0xff] }
 0x3ee   :  { %v10752_v15 = vmax.f32 %v10750_v27, %v10751_v36  ;;  %v10779_v39 = vmax.f32 %v10777_v29, %v10778_v58  ;;  %v12890_v4 = vsel %vm12850_vm11, %v10730_v0, %v12889_v34  ;;  %v10761_v63 = vmax.f32 %v10759_v57, %v10760_v14  ;;  %v18509_v29 = vld [vmem:[#allocation12_spill] sm:$0xff] }
 0x3ef   :  { %v10770_v42 = vmax.f32 %v10768_v40, %v10769_v7  ;;  %v12891_v43 = vsel %vm12852_vm12, %v10741_v25, %v12890_v4  ;;  %v12794_v35 = vrot.slane %v17970_v19, 1  ;;  %v12802_v31 = vmax.f32 %v17989_v2, %v12801_v23 }
 0x3f0   :  { %v10780_v18 = vrot.slane %v10779_v39, 4  ;;  %v12892_v11 = vsel %vm12854_vm13, %v10752_v15, %v12891_v43  ;;  %v12812_v46 = vrot.slane %v18051_v26, 4  ;;  %v10762_v30 = vrot.slane %v10761_v63, 1 }
 0x3f1   :  { %v10771_v60 = vrot.slane %v10770_v42, 2  ;;  %v12795_v37 = vmax.f32 %v17970_v19, %v12794_v35  ;;  %v12822_v22 = vmax.f32 %v12820_v54, %v18037_v59  ;;  %v12803_v56 = vrot.slane %v12802_v31, 2  ;;  %v18513_v35 = vld [vmem:[#allocation17_spill] sm:$0xff] }
 0x3f2   :  { %v10781_v1 = vmax.f32 %v10779_v39, %v10780_v18  ;;  %v12813_v10 = vmax.f32 %v18051_v26, %v12812_v46  ;;  %v12833_v52 = vmax.f32 %v12831_v41, %v18070_v8  ;;  %v10763_v51 = vmax.f32 %v10761_v63, %v10762_v30  ;;  %v18507_v41 = vld [vmem:[#allocation13_spill] sm:$0xff]  ;;  %v18511_v39 = vld [vmem:[#allocation18_spill] sm:$0xff]  ;;  %v18515_v30 = vld [vmem:[#allocation15_spill] sm:$0xff] }
 0x3f3   :  { %v10772_v13 = vmax.f32 %v10770_v42, %v10771_v60  ;;  %v12823_v2 = vrot.slane %v12822_v22, 4  ;;  %v12907_v23 = vsel %vm12848_vm10, %v17815_v5, %v17726_v44  ;;  %v12804_v19 = vmax.f32 %v12802_v31, %v12803_v56  ;;  %v18514_v18 = vld [vmem:[#allocation14_spill] sm:$0xff] }
 0x3f4   :  { %v10782_v38 = vrot.slane %v10781_v1, 2  ;;  %v12814_v47 = vrot.slane %v12813_v10, 2  ;;  %v12834_v55 = vrot.slane %v12833_v52, 4  ;;  %v12893_v59 = vsel %vm12856_vm14, %v10763_v51, %v12892_v11  ;;  %v12937_v51 = vld [vmem:[%s18317_s7 + $0x80] sm:$0xff] }
 0x3f5   :  { %v10773_v50 = vrot.slane %v10772_v13, 1  ;;  %v12824_v33 = vmax.f32 %v12822_v22, %v12823_v2  ;;  %v12908_v17 = vsel %vm12850_vm11, %v12784_v12, %v12907_v23  ;;  %v12805_v54 = vrot.slane %v12804_v19, 1 }
 0x3f6   :  { %v10783_v26 = vmax.f32 %v10781_v1, %v10782_v38  ;;  %v12815_v8 = vmax.f32 %v12813_v10, %v12814_v47  ;;  %v12835_v49 = vmax.f32 %v12833_v52, %v12834_v55  ;;  %v12909_v24 = vsel %vm12852_vm12, %v12795_v37, %v12908_v17  ;;  %v18516_v37 = vld [vmem:[#allocation20_spill] sm:$0xff]  ;;  %v18517_v38 = vld [vmem:[#allocation19_spill] sm:$0xff]  ;;  %v18518_v47 = vld [vmem:[#allocation22_spill] sm:$0xff] }
 0x3f7   :  { %v10774_v0 = vmax.f32 %v10772_v13, %v10773_v50  ;;  %v12825_v61 = vrot.slane %v12824_v33, 2  ;;  %v4069_v44 = vrot.slane %v18505_v20, 1  ;;  %v12806_v48 = vmax.f32 %v12804_v19, %v12805_v54  ;;  %v12938_v13 = vld [vmem:[%s18317_s7 + $0x88] sm:$0xff]  ;;  %v12921_v50 = vld [vmem:[%s18317_s7] sm:$0xff] }
 0x3f8   :  { %v10784_v5 = vrot.slane %v10783_v26, 1  ;;  %v12816_v32 = vrot.slane %v12815_v8, 1  ;;  %v12836_v45 = vrot.slane %v12835_v49, 2  ;;  %v4078_v53 = vrot.slane %v18506_v3, 1 }
 0x3f9   :  { %v12894_v6 = vsel %vm12858_vm15, %v10774_v0, %v12893_v59  ;;  %v12826_v62 = vmax.f32 %v12824_v33, %v12825_v61  ;;  %v4070_v28 = vmax.f32 %v18505_v20, %v4069_v44  ;;  %v12910_v57 = vsel %vm12854_vm13, %v12806_v48, %v12909_v24  ;;  %v12922_v59 = vld [vmem:[%s18317_s7 + $0x8] sm:$0xff]  ;;  %v12923_v44 = vld [vmem:[%s18317_s7 + $0x10] sm:$0xff] }
 0x3fa   :  { %v10785_v27 = vmax.f32 %v10783_v26, %v10784_v5  ;;  %v12817_v9 = vmax.f32 %v12815_v8, %v12816_v32  ;;  %v12837_v16 = vmax.f32 %v12835_v49, %v12836_v45  ;;  %v4079_v21 = vmax.f32 %v18506_v3, %v4078_v53  ;;  %v12939_v8 = vld [vmem:[%s18317_s7 + $0x90] sm:$0xff]  ;;  %v12940_v49 = vld [vmem:[%s18317_s7 + $0x98] sm:$0xff] }
 0x3fb   :  { %v12827_v40 = vrot.slane %v12826_v62, 1  ;;  %v18508_v25 = vrot.slane %v18507_v41, 2  ;;  %v18510_v14 = vrot.slane %v18509_v29, 4  ;;  %v18512_v4 = vrot.slane %v18511_v39, 4  ;;  %v12924_v5 = vld [vmem:[%s18317_s7 + $0x18] sm:$0xff] }
 0x3fc   :  { %v12895_v58 = vsel %vm12860_vm0, %v10785_v27, %v12894_v6  ;;  %v12838_v34 = vrot.slane %v12837_v16, 1  ;;  %v12911_v15 = vsel %vm12856_vm14, %v12817_v9, %v12910_v57  ;;  %v4109_v11 = vmax.f32 %v18514_v18, %v18513_v35  ;;  %v12928_v35 = vld [vmem:[%s18317_s7 + $0x38] sm:$0xff] }
 0x3fd   :  { %v4086_v36 = vmax.f32 %v18507_v41, %v18508_v25  ;;  %v4093_v7 = vmax.f32 %v18509_v29, %v18510_v14  ;;  %v4102_v12 = vmax.f32 %v18511_v39, %v18512_v4  ;;  %12896 = vrot.lane.b32.xlu1 %v12895_v58, %s13866_s21  ;;  %v12828_v63 = vmax.f32 %v12826_v62, %v12827_v40  ;;  %v12941_v62 = vld [vmem:[%s18317_s7 + $0xa0] sm:$0xff]  ;;  %v12926_v29 = vld [vmem:[%s18317_s7 + $0x28] sm:$0xff]  ;;  %v12943_v58 = vld [vmem:[%s18317_s7 + $0xb0] sm:$0xff]  ;;  %s13117_s21 = sshll.u32 %s13874_s6, 4  ;;  %s13118_s21 = int_to_ptr.vmem [resolvable:$true] %s13117_s21 }
 0x3fe   :  { %v12839_v31 = vmax.f32 %v12837_v16, %v12838_v34  ;;  %v4116_v60 = vsel %vm4060_vm7, %v18515_v30, -inf  ;;  %v4125_v22 = vsel %vm4060_vm7, %v18516_v37, -inf  ;;  %v4110_v52 = vrot.slane %v4109_v11, 4  ;;  %v12944_v34 = vld [vmem:[%s18317_s7 + $0xb8] sm:$0xff]  ;;  %p13838_p3 = scmp.lt.s32.totalorder %s13118_s21, %s13118_s21 }
 0x3ff   :  { %v4087_v42 = vrot.slane %v4086_v36, 1  ;;  %v4094_v43 = vrot.slane %v4093_v7, 2  ;;  %v4103_v46 = vrot.slane %v4102_v12, 2  ;;  %v12912_v1 = vsel %vm12858_vm15, %v12828_v63, %v12911_v15 }
 0x400   :  { %v12913_v2 = vsel %vm12860_vm0, %v12839_v31, %v12912_v1  ;;  %v4118_v19 = vmax.f32 %v4116_v60, %v18517_v38  ;;  %v4126_v55 = vsel %vm4062_vm8, %v18518_v47, -inf  ;;  %v4111_v17 = vmax.f32 %v4109_v11, %v4110_v52  ;;  %v12945_v31 = vld [vmem:[%s18317_s7 + $0xc0] sm:$0xff]  ;;  %v12931_v38 = vld [vmem:[%s18317_s7 + $0x50] sm:$0xff] }
 0x401   :  { %v4088_v56 = vmax.f32 %v4086_v36, %v4087_v42  ;;  %v4095_v10 = vmax.f32 %v4093_v7, %v4094_v43  ;;  %v4104_v23 = vmax.f32 %v4102_v12, %v4103_v46  ;;  %12914 = vrot.lane.b32.xlu0 %v12913_v2, %s13873_s11  ;;  %v4127_v26 = vmax.f32 %v4125_v22, %v4126_v55  ;;  %v12925_v36 = vld [vmem:[%s18317_s7 + $0x20] sm:$0xff]  ;;  %v12927_v43 = vld [vmem:[%s18317_s7 + $0x30] sm:$0xff]  ;;  %v12946_v46 = vld [vmem:[%s18317_s7 + $0xc8] sm:$0xff] }
 0x402   :  { %v12849_v54 = vsel %vm12848_vm10, %v4079_v21, %v4070_v28  ;;  %v4119_v61 = vrot.slane %v4118_v19, 4  ;;  %v13698_v20 = vpack.c.bf16 %v12938_v13, %v12937_v51  ;;  %v4112_v32 = vrot.slane %v4111_v17, 2  ;;  %v12942_v28 = vld [vmem:[%s18317_s7 + $0xa8] sm:$0xff]  ;;  %v12947_v51 = vld [vmem:[%s18317_s7 + $0xd0] sm:$0xff]  ;;  %v12948_v13 = vld [vmem:[%s18317_s7 + $0xd8] sm:$0xff] }
 0x403   :  { %v4096_v33 = vrot.slane %v4095_v10, 1  ;;  %v4105_v0 = vrot.slane %v4104_v23, 1  ;;  %v12851_v24 = vsel %vm12850_vm11, %v4088_v56, %v12849_v54  ;;  %v4128_v45 = vrot.slane %v4127_v26, 4  ;;  %v12929_v56 = vld [vmem:[%s18317_s7 + $0x40] sm:$0xff]  ;;  %v12950_v55 = vld [vmem:[%s18317_s7 + $0xe8] sm:$0xff]  ;;  %v12952_v54 = vld [vmem:[%s18317_s7 + $0xf8] sm:$0xff] }
 0x404   :  { %v13700_v6 = vpack.c.bf16 %v12922_v59, %v12921_v50  ;;  %v4120_v53 = vmax.f32 %v4118_v19, %v4119_v61  ;;  %13699 = vmatprep.subr.bf16.mxu0 %v13698_v20  ;;  %v13702_v27 = vpack.c.bf16 %v12940_v49, %v12939_v8  ;;  %v4113_v9 = vmax.f32 %v4111_v17, %v4112_v32  ;;  %v12932_v19 = vld [vmem:[%s18317_s7 + $0x58] sm:$0xff]  ;;  %v12949_v47 = vld [vmem:[%s18317_s7 + $0xe0] sm:$0xff]  ;;  %v12934_v17 = vld [vmem:[%s18317_s7 + $0x68] sm:$0xff] }
 0x405   :  { %v4097_v48 = vmax.f32 %v4095_v10, %v4096_v33  ;;  %v4106_v3 = vmax.f32 %v4104_v23, %v4105_v0  ;;  %v4129_v16 = vmax.f32 %v4127_v26, %v4128_v45  ;;  %v13704_v40 = vpack.c.bf16 %v12924_v5, %v12923_v44  ;;  %v12930_v10 = vld [vmem:[%s18317_s7 + $0x48] sm:$0xff]  ;;  %v12933_v33 = vld [vmem:[%s18317_s7 + $0x60] sm:$0xff]  ;;  %v12951_v26 = vld [vmem:[%s18317_s7 + $0xf0] sm:$0xff]  ;;  %v12879_v44 = vpop.permute.xlu0 %12878 }
 0x406   :  { %13701 = vmatpush3.bf16.msra.mxu0 %v13700_v6  ;;  %v4121_v21 = vrot.slane %v4120_v53, 2  ;;  %v13706_v25 = vpack.c.bf16 %v12942_v28, %v12941_v62  ;;  %v4114_v14 = vrot.slane %v4113_v9, 1  ;;  %v13708_v12 = vpack.c.bf16 %v12926_v29, %v12925_v36  ;;  %v12935_v0 = vld [vmem:[%s18317_s7 + $0x70] sm:$0xff]  ;;  %v12936_v61 = vld [vmem:[%s18317_s7 + $0x78] sm:$0xff]  ;;  %v12954_v32 = vld [vmem:[%s18317_s7 + $0x108] sm:$0xff] }
 0x407   :  { %v12853_v57 = vsel %vm12852_vm12, %v4097_v48, %v12851_v24  ;;  %13703 = vmatprep.subr.bf16.mxu0 %v13702_v27  ;;  %v4130_v7 = vrot.slane %v4129_v16, 2  ;;  %v13710_v42 = vpack.c.bf16 %v12944_v34, %v12943_v58  ;;  %v13712_v37 = vpack.c.bf16 %v12928_v35, %v12927_v43  ;;  %v12953_v48 = vld [vmem:[%s18317_s7 + $0x100] sm:$0xff] }
 0x408   :  { %v12855_v41 = vsel %vm12854_vm13, %v4106_v3, %v12853_v57  ;;  %v4122_v15 = vmax.f32 %v4120_v53, %v4121_v21  ;;  %v4115_v39 = vmax.f32 %v4113_v9, %v4114_v14  ;;  %v13714_v1 = vpack.c.bf16 %v12946_v46, %v12945_v31  ;;  %v12955_v3 = vld [vmem:[%s18317_s7 + $0x110] sm:$0xff]  ;;  %v12956_v53 = vld [vmem:[%s18317_s7 + $0x118] sm:$0xff]  ;;  %v12957_v57 = vld [vmem:[%s18317_s7 + $0x120] sm:$0xff] }
 0x409   :  { %v4131_v4 = vmax.f32 %v4129_v16, %v4130_v7  ;;  %v13716_v2 = vpack.c.bf16 %v12930_v10, %v12929_v56  ;;  %v13718_v23 = vpack.c.bf16 %v12948_v13, %v12947_v51  ;;  %v13720_v50 = vpack.c.bf16 %v12932_v19, %v12931_v38  ;;  %v13225_v58 = vld [vmem:[%s18318_s8] ss:$0 sm:$0xff] }
 0x40a   :  { %13705 = vmatpush3.bf16.msra.mxu0 %v13704_v40  ;;  %v4123_v63 = vrot.slane %v4122_v15, 1  ;;  %v12857_v11 = vsel %vm12856_vm14, %v4115_v39, %v12855_v41  ;;  %v13722_v59 = vpack.c.bf16 %v12950_v55, %v12949_v47  ;;  %v13724_v8 = vpack.c.bf16 %v12934_v17, %v12933_v33  ;;  %v12958_v40 = vld [vmem:[%s18317_s7 + $0x128] sm:$0xff]  ;;  %v12959_v41 = vld [vmem:[%s18317_s7 + $0x130] sm:$0xff] }
 0x40b   :  { %13707 = vmatprep.subr.bf16.mxu0 %v13706_v25  ;;  %v4132_v18 = vrot.slane %v4131_v4, 1  ;;  %v13726_v49 = vpack.c.bf16 %v12952_v54, %v12951_v26  ;;  %v13728_v24 = vpack.c.bf16 %v12936_v61, %v12935_v0  ;;  %v18519_v20 = vmov 0.0|0.0   ;;  %v12960_v25 = vld [vmem:[%s18317_s7 + $0x138] sm:$0xff]  ;;  %s13833_s7 = scalar_lea.vmem %s13118_s21, 128 }
 0x40c   :  { %v4124_v30 = vmax.f32 %v4122_v15, %v4123_v63  ;;  %v13731_v62 = vpack.c.bf16 %v12954_v32, %v12953_v48  ;;  %v13734_v9 = vpack.c.bf16 %v12956_v53, %v12955_v3  ;;  %v18520_v16 = vmov 0.0   ;;  %p13834_p2 = scmp.ne.s32.totalorder %s13118_s21, %s13833_s7  ;;  %p13839_p4 = scmp.lt.s32.totalorder %s13833_s7, %s13833_s7 }
 0x40d   :  { %v4133_v60 = vmax.f32 %v4131_v4, %v4132_v18  ;;  %v13737_v21 = vpack.c.bf16 %v12958_v40, %v12957_v57  ;;  %v13740_v36 = vpack.c.bf16 %v12960_v25, %v12959_v41 }
 0x40e   :  { %13709 = vmatpush3.bf16.msra.mxu0 %v13708_v12  ;;  %v12859_v22 = vsel %vm12858_vm15, %v4124_v30, %v12857_v11  ;;  %p13840_p5 = por %p13839_p4, %p13838_p3 }
 0x40f   :  { %13711 = vmatprep.subr.bf16.mxu0 %v13710_v42  ;;  %v12861_v52 = vsel %vm12860_vm0, %v4133_v60, %v12859_v22 }
 0x410   :  { %v12917_v27 = vsel %vm4060_vm7, %v12861_v52, %v12879_v44  ;;  %p13841_p6 = pnand %p13840_p5, %p13834_p2 }
 0x412   :  { %13713 = vmatpush3.bf16.msra.mxu0 %v13712_v37 }
 0x413   :  { %13715 = vmatprep.subr.bf16.mxu0 %v13714_v1 }
 0x416   :  { %13717 = vmatpush3.bf16.msra.mxu0 %v13716_v2 }
 0x417   :  { %13719 = vmatprep.subr.bf16.mxu0 %v13718_v23 }
 0x41a   :  { %13721 = vmatpush3.bf16.msra.mxu0 %v13720_v50 }
 0x41b   :  { %13723 = vmatprep.subr.bf16.mxu0 %v13722_v59 }
 0x41e   :  { %13725 = vmatpush3.bf16.msra.mxu0 %v13724_v8 }
 0x41f   :  { %13727 = vmatprep.subr.bf16.mxu0 %v13726_v49 }
 0x422   :  { %13729 = vmatpush3.bf16.msra.mxu0 %v13728_v24 }
 0x423   :  { %13730 = vmatprep.subr.bf16.mxu0 %v18519_v20 }
 0x46f   :  { %v12897_v5 = vpop.permute.xlu1 %12896 }
 0x470   :  { %v12918_v45 = vsel %vm199_vm3, %v12879_v44, %v12897_v5 }
 0x473   :  { %v12915_v6 = vpop.permute.xlu0 %12914 }
 0x474   :  { %v12920_v28 = vsel %vm12919_vm5, %v12918_v45, %v12915_v6 }
 0x475   :  { %13034 = vmatprep.mubr.f32.mxu0 %v12920_v28 }
 0x476   :  { %13035 = vmatmul.mubr.f32.vlgmr.msra.gmra.mrb[48].mxu0 %v12917_v27 }
 0x477   :  { %13732 = vmatpush3.bf16.msra.mxu0 %v13731_v62  ;;  %13623 = vmatprep.mubr.msk.f32.mxu0 %vm13868_vm2, %v18520_v16 }
 0x478   :  { %13733 = vmatprep.subr.bf16.mxu0 %v18519_v20 }
 0x47b   :  { %13735 = vmatpush3.bf16.msra.mxu0 %v13734_v9 }
 0x47c   :  { %13736 = vmatprep.subr.bf16.mxu0 %v18519_v20 }
 0x47f   :  { %13738 = vmatpush3.bf16.msra.mxu0 %v13737_v21 }
 0x480   :  { %13739 = vmatprep.subr.bf16.mxu0 %v18519_v20 }
 0x483   :  { %13741 = vmatpush3.bf16.msra.mxu0 %v13740_v36 }
 0x486   :  { %13624 = vmatmul.mubr.msk.f32.vlgmr.msra.gmra.mrb[50].mxu0 %vm1987_vm4, %v12915_v6 }
 0x549   :  { %v13365_v29 = vpop.f32.mrb[48].mxu0 }
 0x54a   :  { %v13366_v14 = vpop.f32.mrb[49].mxu0 }
 0x54b   :  { %v13367_v7 = vadd.f32 %v13366_v14, %v13365_v29 }
 0x54d   :  { %v13037_v34 = vadd.f32 %v13367_v7, %v13225_v58 }
 0x559   :  { %v13106_v15 = vpop.f32.mrb[50].mxu0 }
 0x55a   :  { %v13107_v39 = vadd.f32 %v13106_v15, %v13037_v34  ;;  %v13625_v4 = vpop.f32.mrb[51].mxu0 }
 0x55c   :  { %13110 = vst [vmem:[#allocation7] sm:$0xff] %v13107_v39 }
 0x55d   :  { %13844 = shalt.err (!%p13841_p6)
}
 0x55e   :  { %s13845_s27 = scalar_lea.hbm %s18319_s9, 128 }
 0x55f   :  { %p13846_p7 = scmp.ne.s32.totalorder %s18319_s9, %s13845_s27  ;;  %p13849_p8 = scmp.lt.u32.totalorder %s13845_s27, %s18319_s9 }
 0x561   :  { %p13851_p9 = pnand %p13849_p8, %p13846_p7 }
 0x563   :  { %13854 = shalt.err (!%p13851_p9)
}
 0x564   :  { %13120 = dma.vmem_to_hbm [thread:$0]  %s13118_s21, 128, %s18319_s9, [#allocation4]  }
 0x565   :  { %13859 = dma.done.wait [#allocation4], 128  }
 0x566   :  { %13860 = vsyncadd [#allocation4], 4294967168 }
 0x567   :  { %13124 = vsyncpa [#allocation3], 1 }
 0x568   :  { %13125 = vsyncpa [#allocation6], 1 }
 0x569   :  { %13126 = vsyncpa [#allocation4], 1 }

</bundles_post_ra>
